<compile_context>
chip_gen: v7x
topology: tpu7x:2x2x1
jax: 0.10.0
libtpu: 0.0.40
codegen_flags: <defaults>
</compile_context>

<pallas_src>
import functools

import numpy as np

import jax
import jax.numpy as jnp
from jax import lax
from jax.experimental import pallas as pl
from jax.experimental.pallas import tpu as pltpu


# ------------------------- 1-D bilinear operators ---------------------------

def _interp_matrix(in_size, out_size):
    """Dense 1-D bilinear interpolation matrix, PyTorch align_corners=True."""
    m = np.zeros((out_size, in_size), np.float32)
    if out_size == 1:
        src = np.zeros((1,), np.float64)
    else:
        src = np.arange(out_size, dtype=np.float64) * (in_size - 1) / (out_size - 1)
    i0 = np.clip(np.floor(src).astype(np.int64), 0, in_size - 1)
    i1 = np.minimum(i0 + 1, in_size - 1)
    frac = (src - i0).astype(np.float32)
    rows = np.arange(out_size)
    np.add.at(m, (rows, i0), 1.0 - frac)
    np.add.at(m, (rows, i1), frac)
    return m


# ------------------------------ fused kernel --------------------------------

def _upsample_conv_bn_relu_kernel(
        x_ref,       # (1, Cin, H, W)       f32   input block (per batch, resident)
        whp_ref,     # (Ho+2, H)            f32   row interp op incl. conv zero-pad rows
        wwpT_ref,    # (W, Wo+2)            f32   col interp op (transposed) incl. pad cols
        w_ref,       # (kh*kw, Cout, Cin)   bf16  conv taps
        scale_ref,   # (Cout, 1)            f32   folded BN scale
        shift_ref,   # (Cout, 1)            f32   folded BN shift
        o_ref,       # (1, Cout, tr, Wo)    f32   output row strip
        up_ref,      # (Cin, tr+kh-1, Wo+kw-1) bf16 VMEM scratch (upsampled+padded strip)
        *, rows_per_strip, kh, kw):
    cin = x_ref.shape[1]
    cout = o_ref.shape[1]
    wo = o_ref.shape[3]
    tr = rows_per_strip
    halo = kh - 1

    # First padded output row handled by this grid step.
    r0 = pl.multiple_of(pl.program_id(1) * tr, tr)

    # ---- separable bilinear upsample of just this strip (+conv halo) ----
    # wh_rows already contains the conv's zero-pad rows (rows 0 / Ho+1 of whp),
    # wwpT already contains the zero-pad columns, so `up_ref` is directly the
    # zero-padded conv input for output rows [r0, r0+tr).
    wh_rows = whp_ref[pl.ds(r0, tr + halo), :]          # (tr+2, H)
    wwpT = wwpT_ref[...]                                # (W, Wo+2)

    def _upsample_channel(c, carry):
        x2d = x_ref[0, c]                               # (H, W) f32
        t = jnp.dot(wh_rows, x2d,
                    preferred_element_type=jnp.float32,
                    precision=lax.Precision.HIGHEST)    # (tr+2, W)
        u = jnp.dot(t, wwpT,
                    preferred_element_type=jnp.float32,
                    precision=lax.Precision.HIGHEST)    # (tr+2, Wo+2)
        up_ref[c] = u.astype(up_ref.dtype)
        return carry

    lax.fori_loop(0, cin, _upsample_channel, 0, unroll=cin <= 16)

    # ---- direct 3x3 conv + folded BN + ReLU, one output row at a time ----
    # (static unroll: every scratch index / output index is a compile-time
    # constant; the only dynamic indices in the kernel are the leading-dim
    # channel index above and the Whp row window.)
    bn_scale = scale_ref[...]                           # (Cout, 1)
    bn_shift = shift_ref[...]                           # (Cout, 1)
    for s in range(tr):
        acc = jnp.zeros((cout, wo), jnp.float32)
        for dy in range(kh):
            for dx in range(kw):
                xs = up_ref[:, s + dy, pl.ds(dx, wo)]   # (Cin, Wo) bf16
                acc = acc + jnp.dot(w_ref[dy * kw + dx], xs,
                                    preferred_element_type=jnp.float32)
        y = jnp.maximum(acc * bn_scale + bn_shift, 0.0)
        o_ref[0, :, s, :] = y.astype(o_ref.dtype)


# ------------------------ Upsample_Interpolate.forward ----------------------

def upsample_interpolate_forward(params, x, *, scale=2, row_block=None):
    """x (NCHW) -> bilinear x`scale` (align_corners=True) -> conv3x3(pad=1)+BN+ReLU.

    Default reduce_dim=False path of the PyTorch module; NCHW in / NCHW out.
    Everything runs inside one fused Pallas kernel; the upsampled intermediate
    never touches HBM.
    """
    N, Cin, H, W = x.shape
    w_hwio = params["conv_w"]                     # (kh, kw, Cin, Cout)
    kh, kw, _, Cout = w_hwio.shape
    assert kh == 3 and kw == 3, "module default kernel_size=3/padding=1 path"

    Ho, Wo = H * scale, W * scale
    Hp, Wp = Ho + (kh - 1), Wo + (kw - 1)         # conv zero-pad baked in

    # 1-D interpolation operators with the conv zero border folded in.
    whp = np.zeros((Hp, H), np.float32)
    whp[1:Ho + 1, :] = _interp_matrix(H, Ho)
    wwpT = np.zeros((W, Wp), np.float32)
    wwpT[:, 1:Wo + 1] = _interp_matrix(W, Wo).T

    # Conv taps as kh*kw MXU-ready (Cout, Cin) bf16 matrices.
    w_taps = jnp.transpose(w_hwio, (0, 1, 3, 2)).reshape(kh * kw, Cout, Cin)
    w_taps = w_taps.astype(jnp.bfloat16)
    bn_scale = params["bn_scale"].astype(jnp.float32).reshape(Cout, 1)
    bn_shift = params["bn_shift"].astype(jnp.float32).reshape(Cout, 1)

    # Output row-strip size: multiple of 8 (sublane rule) or the full height.
    if row_block is None:
        if Ho % 16 == 0 and Ho >= 32:
            row_block = 16
        elif Ho % 8 == 0:
            row_block = 8
        else:
            row_block = Ho
    tr = row_block
    num_strips = Ho // tr
    grid = (N, num_strips)

    flops = int(2 * N * Cin * num_strips * ((tr + 2) * H * W + (tr + 2) * W * Wp)
                + 2 * N * Ho * Wo * kh * kw * Cin * Cout)
    bytes_accessed = int(N * Cin * H * W * 4 + kh * kw * Cin * Cout * 2
                         + 2 * Cout * 4 + N * Cout * Ho * Wo * 4)

    kernel = functools.partial(_upsample_conv_bn_relu_kernel,
                               rows_per_strip=tr, kh=kh, kw=kw)

    out = pl.pallas_call(
        kernel,
        out_shape=jax.ShapeDtypeStruct((N, Cout, Ho, Wo), jnp.float32),
        grid_spec=pltpu.PrefetchScalarGridSpec(
            num_scalar_prefetch=0,
            grid=grid,
            in_specs=[
                pl.BlockSpec((1, Cin, H, W), lambda n, r: (n, 0, 0, 0)),
                pl.BlockSpec((Hp, H), lambda n, r: (0, 0)),
                pl.BlockSpec((W, Wp), lambda n, r: (0, 0)),
                pl.BlockSpec((kh * kw, Cout, Cin), lambda n, r: (0, 0, 0)),
                pl.BlockSpec((Cout, 1), lambda n, r: (0, 0)),
                pl.BlockSpec((Cout, 1), lambda n, r: (0, 0)),
            ],
            out_specs=pl.BlockSpec((1, Cout, tr, Wo), lambda n, r: (n, 0, r, 0)),
            scratch_shapes=[
                pltpu.VMEM((Cin, tr + kh - 1, Wp), jnp.bfloat16),
            ],
        ),
        compiler_params=pltpu.CompilerParams(
            dimension_semantics=("parallel", "parallel")),
        cost_estimate=pl.CostEstimate(flops=flops, transcendentals=0,
                                      bytes_accessed=bytes_accessed),
    )(x.astype(jnp.float32), jnp.asarray(whp), jnp.asarray(wwpT),
      w_taps, bn_scale, bn_shift)
    return out


# ------------------------------- parameters ---------------------------------

def make_params(key, dim_in, dim_out, eps=1e-5):
    kw_, kg, kb, km, kv = jax.random.split(key, 5)
    fan_in = 3 * 3 * dim_in
    w = jax.random.normal(kw_, (3, 3, dim_in, dim_out), jnp.float32) / fan_in ** 0.5
    gamma = 1.0 + 0.1 * jax.random.normal(kg, (dim_out,), jnp.float32)
    beta = 0.1 * jax.random.normal(kb, (dim_out,), jnp.float32)
    mean = 0.1 * jax.random.normal(km, (dim_out,), jnp.float32)
    var = 1.0 + 0.1 * jnp.abs(jax.random.normal(kv, (dim_out,), jnp.float32))
    # TODO(synk): eval-mode BatchNorm only (running stats folded into an
    # affine); training-mode batch statistics are not implemented.
    scale = gamma / jnp.sqrt(var + eps)
    shift = beta - mean * scale
    return {"conv_w": w, "bn_scale": scale, "bn_shift": shift}


# --------------------------- pure-JAX reference -----------------------------

def upsample_interpolate_reference(params, x, *, scale=2):
    N, Cin, H, W = x.shape
    w_hwio = params["conv_w"]
    Ho, Wo = H * scale, W * scale
    wh = jnp.asarray(_interp_matrix(H, Ho))
    ww = jnp.asarray(_interp_matrix(W, Wo))
    up = jnp.einsum('oh,nchw,pw->ncop', wh, x, ww)
    w_oihw = jnp.transpose(w_hwio, (3, 2, 0, 1))
    y = lax.conv_general_dilated(up, w_oihw, window_strides=(1, 1),
                                 padding=((1, 1), (1, 1)),
                                 dimension_numbers=('NCHW', 'OIHW', 'NCHW'))
    y = (y * params["bn_scale"][None, :, None, None]
         + params["bn_shift"][None, :, None, None])
    return jnp.maximum(y, 0.0)


if __name__ == "__main__":
    key = jax.random.PRNGKey(0)
    kp, kx = jax.random.split(key)
    dim_in, dim_out = 4, 8
    params = make_params(kp, dim_in, dim_out)

    x = jax.random.normal(kx, (2, dim_in, 16, 16), jnp.float32)

    y = jax.jit(upsample_interpolate_forward)(params, x)
    y = jax.block_until_ready(y)
    assert y.shape == (2, dim_out, 32, 32)
    assert bool(jnp.isfinite(y).all())

    # Correctness check against plain-XLA reference (bf16 conv operands ->
    # loose tolerance).
    y_ref = upsample_interpolate_reference(params, x)
    err = float(jnp.max(jnp.abs(y - y_ref)))
    assert err < 1e-1, f"mismatch vs reference: max abs err {err}"

    print("KERNEL_OK")
</pallas_src>

<mosaic_0001>
module attributes {stable_mosaic.version = 11 : i64} {
  func.func @_upsample_conv_bn_relu_kernel(%arg0: i32, %arg1: i32, %arg2: memref<1x4x16x16xf32, #tpu.memory_space<vmem>>, %arg3: memref<34x16xf32, #tpu.memory_space<vmem>>, %arg4: memref<16x34xf32, #tpu.memory_space<vmem>>, %arg5: memref<9x8x4xbf16, #tpu.memory_space<vmem>>, %arg6: memref<8x1xf32, #tpu.memory_space<vmem>>, %arg7: memref<8x1xf32, #tpu.memory_space<vmem>>, %arg8: memref<1x8x16x32xf32, #tpu.memory_space<vmem>>, %arg9: memref<4x18x34xbf16, #tpu.memory_space<vmem>>) attributes {dimension_semantics = [#tpu.dimension_semantics<parallel>, #tpu.dimension_semantics<parallel>], iteration_bounds = array<i64: 2, 2>, scalar_prefetch = 0 : i64, scratch_operands = 1 : i64, tpu.core_type = #tpu.core_type<tc>, window_params = [{transform_indices = @transform_0, window_bounds = array<i64: 1, 4, 16, 16>}, {pipeline_mode = #tpu.pipeline_mode<synchronous>, transform_indices = @transform_1, window_bounds = array<i64: 34, 16>}, {pipeline_mode = #tpu.pipeline_mode<synchronous>, transform_indices = @transform_2, window_bounds = array<i64: 16, 34>}, {pipeline_mode = #tpu.pipeline_mode<synchronous>, transform_indices = @transform_3, window_bounds = array<i64: 9, 8, 4>}, {pipeline_mode = #tpu.pipeline_mode<synchronous>, transform_indices = @transform_4, window_bounds = array<i64: 8, 1>}, {pipeline_mode = #tpu.pipeline_mode<synchronous>, transform_indices = @transform_5, window_bounds = array<i64: 8, 1>}, {transform_indices = @transform_6, window_bounds = array<i64: 1, 8, 16, 32>}]} {
    %c16_i32 = arith.constant 16 : i32
    %0 = arith.muli %arg1, %c16_i32 : i32
    %1 = tpu.assume_multiple %0, 16 : i32
    %2 = arith.index_cast %1 : i32 to index
    %c0 = arith.constant 0 : index
    %3 = vector.load %arg3[%2, %c0] : memref<34x16xf32, #tpu.memory_space<vmem>>, vector<18x16xf32>
    %c0_0 = arith.constant 0 : index
    %c0_1 = arith.constant 0 : index
    %4 = vector.load %arg4[%c0_0, %c0_1] : memref<16x34xf32, #tpu.memory_space<vmem>>, vector<16x34xf32>
    %c0_i32 = arith.constant 0 : i32
    %c0_2 = arith.constant 0 : index
    %5 = arith.index_cast %c0_i32 : i32 to index
    %c0_3 = arith.constant 0 : index
    %c0_4 = arith.constant 0 : index
    %6 = vector.load %arg2[%c0_2, %5, %c0_3, %c0_4] : memref<1x4x16x16xf32, #tpu.memory_space<vmem>>, vector<1x1x16x16xf32>
    %7 = vector.shape_cast %6 : vector<1x1x16x16xf32> to vector<16x16xf32>
    %cst = arith.constant dense<0.000000e+00> : vector<18x16xf32>
    %8 = tpu.matmul %3, %7, %cst {dimension_numbers = #tpu.dot_dimension_numbers<[1], [0], [0], [1], [0, 0, 1, 1], [], []>, precision = #tpu.contract_precision<fp32>} : vector<18x16xf32>, vector<16x16xf32>, vector<18x16xf32> -> vector<18x16xf32>
    %cst_5 = arith.constant dense<0.000000e+00> : vector<18x34xf32>
    %9 = tpu.matmul %8, %4, %cst_5 {dimension_numbers = #tpu.dot_dimension_numbers<[1], [0], [0], [1], [0, 0, 1, 1], [], []>, precision = #tpu.contract_precision<fp32>} : vector<18x16xf32>, vector<16x34xf32>, vector<18x34xf32> -> vector<18x34xf32>
    %10 = arith.truncf %9 : vector<18x34xf32> to vector<18x34xbf16>
    %11 = arith.index_cast %c0_i32 : i32 to index
    %c0_6 = arith.constant 0 : index
    %c0_7 = arith.constant 0 : index
    %12 = vector.load %arg9[%11, %c0_6, %c0_7] : memref<4x18x34xbf16, #tpu.memory_space<vmem>>, vector<1x18x34xbf16>
    %13 = vector.shape_cast %12 : vector<1x18x34xbf16> to vector<18x34xbf16>
    %14 = vector.shape_cast %10 : vector<18x34xbf16> to vector<1x18x34xbf16>
    tpu.vector_store %arg9[%11, %c0_6, %c0_7], %14 {strides = array<i32>} : memref<4x18x34xbf16, #tpu.memory_space<vmem>>, vector<1x18x34xbf16>,
    %c1_i32 = arith.constant 1 : i32
    %c0_8 = arith.constant 0 : index
    %15 = arith.index_cast %c1_i32 : i32 to index
    %c0_9 = arith.constant 0 : index
    %c0_10 = arith.constant 0 : index
    %16 = vector.load %arg2[%c0_8, %15, %c0_9, %c0_10] : memref<1x4x16x16xf32, #tpu.memory_space<vmem>>, vector<1x1x16x16xf32>
    %17 = vector.shape_cast %16 : vector<1x1x16x16xf32> to vector<16x16xf32>
    %cst_11 = arith.constant dense<0.000000e+00> : vector<18x16xf32>
    %18 = tpu.matmul %3, %17, %cst_11 {dimension_numbers = #tpu.dot_dimension_numbers<[1], [0], [0], [1], [0, 0, 1, 1], [], []>, precision = #tpu.contract_precision<fp32>} : vector<18x16xf32>, vector<16x16xf32>, vector<18x16xf32> -> vector<18x16xf32>
    %cst_12 = arith.constant dense<0.000000e+00> : vector<18x34xf32>
    %19 = tpu.matmul %18, %4, %cst_12 {dimension_numbers = #tpu.dot_dimension_numbers<[1], [0], [0], [1], [0, 0, 1, 1], [], []>, precision = #tpu.contract_precision<fp32>} : vector<18x16xf32>, vector<16x34xf32>, vector<18x34xf32> -> vector<18x34xf32>
    %20 = arith.truncf %19 : vector<18x34xf32> to vector<18x34xbf16>
    %21 = arith.index_cast %c1_i32 : i32 to index
    %c0_13 = arith.constant 0 : index
    %c0_14 = arith.constant 0 : index
    %22 = vector.load %arg9[%21, %c0_13, %c0_14] : memref<4x18x34xbf16, #tpu.memory_space<vmem>>, vector<1x18x34xbf16>
    %23 = vector.shape_cast %22 : vector<1x18x34xbf16> to vector<18x34xbf16>
    %24 = vector.shape_cast %20 : vector<18x34xbf16> to vector<1x18x34xbf16>
    tpu.vector_store %arg9[%21, %c0_13, %c0_14], %24 {strides = array<i32>} : memref<4x18x34xbf16, #tpu.memory_space<vmem>>, vector<1x18x34xbf16>,
    %c2_i32 = arith.constant 2 : i32
    %c0_15 = arith.constant 0 : index
    %25 = arith.index_cast %c2_i32 : i32 to index
    %c0_16 = arith.constant 0 : index
    %c0_17 = arith.constant 0 : index
    %26 = vector.load %arg2[%c0_15, %25, %c0_16, %c0_17] : memref<1x4x16x16xf32, #tpu.memory_space<vmem>>, vector<1x1x16x16xf32>
    %27 = vector.shape_cast %26 : vector<1x1x16x16xf32> to vector<16x16xf32>
    %cst_18 = arith.constant dense<0.000000e+00> : vector<18x16xf32>
    %28 = tpu.matmul %3, %27, %cst_18 {dimension_numbers = #tpu.dot_dimension_numbers<[1], [0], [0], [1], [0, 0, 1, 1], [], []>, precision = #tpu.contract_precision<fp32>} : vector<18x16xf32>, vector<16x16xf32>, vector<18x16xf32> -> vector<18x16xf32>
    %cst_19 = arith.constant dense<0.000000e+00> : vector<18x34xf32>
    %29 = tpu.matmul %28, %4, %cst_19 {dimension_numbers = #tpu.dot_dimension_numbers<[1], [0], [0], [1], [0, 0, 1, 1], [], []>, precision = #tpu.contract_precision<fp32>} : vector<18x16xf32>, vector<16x34xf32>, vector<18x34xf32> -> vector<18x34xf32>
    %30 = arith.truncf %29 : vector<18x34xf32> to vector<18x34xbf16>
    %31 = arith.index_cast %c2_i32 : i32 to index
    %c0_20 = arith.constant 0 : index
    %c0_21 = arith.constant 0 : index
    %32 = vector.load %arg9[%31, %c0_20, %c0_21] : memref<4x18x34xbf16, #tpu.memory_space<vmem>>, vector<1x18x34xbf16>
    %33 = vector.shape_cast %32 : vector<1x18x34xbf16> to vector<18x34xbf16>
    %34 = vector.shape_cast %30 : vector<18x34xbf16> to vector<1x18x34xbf16>
    tpu.vector_store %arg9[%31, %c0_20, %c0_21], %34 {strides = array<i32>} : memref<4x18x34xbf16, #tpu.memory_space<vmem>>, vector<1x18x34xbf16>,
    %c3_i32 = arith.constant 3 : i32
    %c0_22 = arith.constant 0 : index
    %35 = arith.index_cast %c3_i32 : i32 to index
    %c0_23 = arith.constant 0 : index
    %c0_24 = arith.constant 0 : index
    %36 = vector.load %arg2[%c0_22, %35, %c0_23, %c0_24] : memref<1x4x16x16xf32, #tpu.memory_space<vmem>>, vector<1x1x16x16xf32>
    %37 = vector.shape_cast %36 : vector<1x1x16x16xf32> to vector<16x16xf32>
    %cst_25 = arith.constant dense<0.000000e+00> : vector<18x16xf32>
    %38 = tpu.matmul %3, %37, %cst_25 {dimension_numbers = #tpu.dot_dimension_numbers<[1], [0], [0], [1], [0, 0, 1, 1], [], []>, precision = #tpu.contract_precision<fp32>} : vector<18x16xf32>, vector<16x16xf32>, vector<18x16xf32> -> vector<18x16xf32>
    %cst_26 = arith.constant dense<0.000000e+00> : vector<18x34xf32>
    %39 = tpu.matmul %38, %4, %cst_26 {dimension_numbers = #tpu.dot_dimension_numbers<[1], [0], [0], [1], [0, 0, 1, 1], [], []>, precision = #tpu.contract_precision<fp32>} : vector<18x16xf32>, vector<16x34xf32>, vector<18x34xf32> -> vector<18x34xf32>
    %40 = arith.truncf %39 : vector<18x34xf32> to vector<18x34xbf16>
    %41 = arith.index_cast %c3_i32 : i32 to index
    %c0_27 = arith.constant 0 : index
    %c0_28 = arith.constant 0 : index
    %42 = vector.load %arg9[%41, %c0_27, %c0_28] : memref<4x18x34xbf16, #tpu.memory_space<vmem>>, vector<1x18x34xbf16>
    %43 = vector.shape_cast %42 : vector<1x18x34xbf16> to vector<18x34xbf16>
    %44 = vector.shape_cast %40 : vector<18x34xbf16> to vector<1x18x34xbf16>
    tpu.vector_store %arg9[%41, %c0_27, %c0_28], %44 {strides = array<i32>} : memref<4x18x34xbf16, #tpu.memory_space<vmem>>, vector<1x18x34xbf16>,
    %c4_i32 = arith.constant 4 : i32
    %c0_29 = arith.constant 0 : index
    %c0_30 = arith.constant 0 : index
    %45 = vector.load %arg6[%c0_29, %c0_30] : memref<8x1xf32, #tpu.memory_space<vmem>>, vector<8x1xf32>
    %c0_31 = arith.constant 0 : index
    %c0_32 = arith.constant 0 : index
    %46 = vector.load %arg7[%c0_31, %c0_32] : memref<8x1xf32, #tpu.memory_space<vmem>>, vector<8x1xf32>
    %cst_33 = arith.constant 0.000000e+00 : f32
    %47 = vector.broadcast %cst_33 : f32 to vector<8x32xf32>
    %c0_34 = arith.constant 0 : index
    %c0_35 = arith.constant 0 : index
    %c0_36 = arith.constant 0 : index
    %48 = vector.load %arg9[%c0_34, %c0_35, %c0_36] : memref<4x18x34xbf16, #tpu.memory_space<vmem>>, vector<4x1x32xbf16>
    %49 = vector.shape_cast %48 : vector<4x1x32xbf16> to vector<4x32xbf16>
    %c0_37 = arith.constant 0 : index
    %c0_38 = arith.constant 0 : index
    %c0_39 = arith.constant 0 : index
    %50 = vector.load %arg5[%c0_37, %c0_38, %c0_39] : memref<9x8x4xbf16, #tpu.memory_space<vmem>>, vector<1x8x4xbf16>
    %51 = vector.shape_cast %50 : vector<1x8x4xbf16> to vector<8x4xbf16>
    %cst_40 = arith.constant dense<0.000000e+00> : vector<8x32xf32>
    %52 = tpu.matmul %51, %49, %cst_40 {dimension_numbers = #tpu.dot_dimension_numbers<[1], [0], [0], [1], [0, 0, 1, 1], [], []>} : vector<8x4xbf16>, vector<4x32xbf16>, vector<8x32xf32> -> vector<8x32xf32>
    %53 = arith.addf %47, %52 : vector<8x32xf32>
    %c0_41 = arith.constant 0 : index
    %c0_42 = arith.constant 0 : index
    %c1 = arith.constant 1 : index
    %54 = vector.load %arg9[%c0_41, %c0_42, %c1] : memref<4x18x34xbf16, #tpu.memory_space<vmem>>, vector<4x1x32xbf16>
    %55 = vector.shape_cast %54 : vector<4x1x32xbf16> to vector<4x32xbf16>
    %c1_43 = arith.constant 1 : index
    %c0_44 = arith.constant 0 : index
    %c0_45 = arith.constant 0 : index
    %56 = vector.load %arg5[%c1_43, %c0_44, %c0_45] : memref<9x8x4xbf16, #tpu.memory_space<vmem>>, vector<1x8x4xbf16>
    %57 = vector.shape_cast %56 : vector<1x8x4xbf16> to vector<8x4xbf16>
    %cst_46 = arith.constant dense<0.000000e+00> : vector<8x32xf32>
    %58 = tpu.matmul %57, %55, %cst_46 {dimension_numbers = #tpu.dot_dimension_numbers<[1], [0], [0], [1], [0, 0, 1, 1], [], []>} : vector<8x4xbf16>, vector<4x32xbf16>, vector<8x32xf32> -> vector<8x32xf32>
    %59 = arith.addf %53, %58 : vector<8x32xf32>
    %c0_47 = arith.constant 0 : index
    %c0_48 = arith.constant 0 : index
    %c2 = arith.constant 2 : index
    %60 = vector.load %arg9[%c0_47, %c0_48, %c2] : memref<4x18x34xbf16, #tpu.memory_space<vmem>>, vector<4x1x32xbf16>
    %61 = vector.shape_cast %60 : vector<4x1x32xbf16> to vector<4x32xbf16>
    %c2_49 = arith.constant 2 : index
    %c0_50 = arith.constant 0 : index
    %c0_51 = arith.constant 0 : index
    %62 = vector.load %arg5[%c2_49, %c0_50, %c0_51] : memref<9x8x4xbf16, #tpu.memory_space<vmem>>, vector<1x8x4xbf16>
    %63 = vector.shape_cast %62 : vector<1x8x4xbf16> to vector<8x4xbf16>
    %cst_52 = arith.constant dense<0.000000e+00> : vector<8x32xf32>
    %64 = tpu.matmul %63, %61, %cst_52 {dimension_numbers = #tpu.dot_dimension_numbers<[1], [0], [0], [1], [0, 0, 1, 1], [], []>} : vector<8x4xbf16>, vector<4x32xbf16>, vector<8x32xf32> -> vector<8x32xf32>
    %65 = arith.addf %59, %64 : vector<8x32xf32>
    %c0_53 = arith.constant 0 : index
    %c1_54 = arith.constant 1 : index
    %c0_55 = arith.constant 0 : index
    %66 = vector.load %arg9[%c0_53, %c1_54, %c0_55] : memref<4x18x34xbf16, #tpu.memory_space<vmem>>, vector<4x1x32xbf16>
    %67 = vector.shape_cast %66 : vector<4x1x32xbf16> to vector<4x32xbf16>
    %c3 = arith.constant 3 : index
    %c0_56 = arith.constant 0 : index
    %c0_57 = arith.constant 0 : index
    %68 = vector.load %arg5[%c3, %c0_56, %c0_57] : memref<9x8x4xbf16, #tpu.memory_space<vmem>>, vector<1x8x4xbf16>
    %69 = vector.shape_cast %68 : vector<1x8x4xbf16> to vector<8x4xbf16>
    %cst_58 = arith.constant dense<0.000000e+00> : vector<8x32xf32>
    %70 = tpu.matmul %69, %67, %cst_58 {dimension_numbers = #tpu.dot_dimension_numbers<[1], [0], [0], [1], [0, 0, 1, 1], [], []>} : vector<8x4xbf16>, vector<4x32xbf16>, vector<8x32xf32> -> vector<8x32xf32>
    %71 = arith.addf %65, %70 : vector<8x32xf32>
    %c0_59 = arith.constant 0 : index
    %c1_60 = arith.constant 1 : index
    %c1_61 = arith.constant 1 : index
    %72 = vector.load %arg9[%c0_59, %c1_60, %c1_61] : memref<4x18x34xbf16, #tpu.memory_space<vmem>>, vector<4x1x32xbf16>
    %73 = vector.shape_cast %72 : vector<4x1x32xbf16> to vector<4x32xbf16>
    %c4 = arith.constant 4 : index
    %c0_62 = arith.constant 0 : index
    %c0_63 = arith.constant 0 : index
    %74 = vector.load %arg5[%c4, %c0_62, %c0_63] : memref<9x8x4xbf16, #tpu.memory_space<vmem>>, vector<1x8x4xbf16>
    %75 = vector.shape_cast %74 : vector<1x8x4xbf16> to vector<8x4xbf16>
    %cst_64 = arith.constant dense<0.000000e+00> : vector<8x32xf32>
    %76 = tpu.matmul %75, %73, %cst_64 {dimension_numbers = #tpu.dot_dimension_numbers<[1], [0], [0], [1], [0, 0, 1, 1], [], []>} : vector<8x4xbf16>, vector<4x32xbf16>, vector<8x32xf32> -> vector<8x32xf32>
    %77 = arith.addf %71, %76 : vector<8x32xf32>
    %c0_65 = arith.constant 0 : index
    %c1_66 = arith.constant 1 : index
    %c2_67 = arith.constant 2 : index
    %78 = vector.load %arg9[%c0_65, %c1_66, %c2_67] : memref<4x18x34xbf16, #tpu.memory_space<vmem>>, vector<4x1x32xbf16>
    %79 = vector.shape_cast %78 : vector<4x1x32xbf16> to vector<4x32xbf16>
    %c5 = arith.constant 5 : index
    %c0_68 = arith.constant 0 : index
    %c0_69 = arith.constant 0 : index
    %80 = vector.load %arg5[%c5, %c0_68, %c0_69] : memref<9x8x4xbf16, #tpu.memory_space<vmem>>, vector<1x8x4xbf16>
    %81 = vector.shape_cast %80 : vector<1x8x4xbf16> to vector<8x4xbf16>
    %cst_70 = arith.constant dense<0.000000e+00> : vector<8x32xf32>
    %82 = tpu.matmul %81, %79, %cst_70 {dimension_numbers = #tpu.dot_dimension_numbers<[1], [0], [0], [1], [0, 0, 1, 1], [], []>} : vector<8x4xbf16>, vector<4x32xbf16>, vector<8x32xf32> -> vector<8x32xf32>
    %83 = arith.addf %77, %82 : vector<8x32xf32>
    %c0_71 = arith.constant 0 : index
    %c2_72 = arith.constant 2 : index
    %c0_73 = arith.constant 0 : index
    %84 = vector.load %arg9[%c0_71, %c2_72, %c0_73] : memref<4x18x34xbf16, #tpu.memory_space<vmem>>, vector<4x1x32xbf16>
    %85 = vector.shape_cast %84 : vector<4x1x32xbf16> to vector<4x32xbf16>
    %c6 = arith.constant 6 : index
    %c0_74 = arith.constant 0 : index
    %c0_75 = arith.constant 0 : index
    %86 = vector.load %arg5[%c6, %c0_74, %c0_75] : memref<9x8x4xbf16, #tpu.memory_space<vmem>>, vector<1x8x4xbf16>
    %87 = vector.shape_cast %86 : vector<1x8x4xbf16> to vector<8x4xbf16>
    %cst_76 = arith.constant dense<0.000000e+00> : vector<8x32xf32>
    %88 = tpu.matmul %87, %85, %cst_76 {dimension_numbers = #tpu.dot_dimension_numbers<[1], [0], [0], [1], [0, 0, 1, 1], [], []>} : vector<8x4xbf16>, vector<4x32xbf16>, vector<8x32xf32> -> vector<8x32xf32>
    %89 = arith.addf %83, %88 : vector<8x32xf32>
    %c0_77 = arith.constant 0 : index
    %c2_78 = arith.constant 2 : index
    %c1_79 = arith.constant 1 : index
    %90 = vector.load %arg9[%c0_77, %c2_78, %c1_79] : memref<4x18x34xbf16, #tpu.memory_space<vmem>>, vector<4x1x32xbf16>
    %91 = vector.shape_cast %90 : vector<4x1x32xbf16> to vector<4x32xbf16>
    %c7 = arith.constant 7 : index
    %c0_80 = arith.constant 0 : index
    %c0_81 = arith.constant 0 : index
    %92 = vector.load %arg5[%c7, %c0_80, %c0_81] : memref<9x8x4xbf16, #tpu.memory_space<vmem>>, vector<1x8x4xbf16>
    %93 = vector.shape_cast %92 : vector<1x8x4xbf16> to vector<8x4xbf16>
    %cst_82 = arith.constant dense<0.000000e+00> : vector<8x32xf32>
    %94 = tpu.matmul %93, %91, %cst_82 {dimension_numbers = #tpu.dot_dimension_numbers<[1], [0], [0], [1], [0, 0, 1, 1], [], []>} : vector<8x4xbf16>, vector<4x32xbf16>, vector<8x32xf32> -> vector<8x32xf32>
    %95 = arith.addf %89, %94 : vector<8x32xf32>
    %c0_83 = arith.constant 0 : index
    %c2_84 = arith.constant 2 : index
    %c2_85 = arith.constant 2 : index
    %96 = vector.load %arg9[%c0_83, %c2_84, %c2_85] : memref<4x18x34xbf16, #tpu.memory_space<vmem>>, vector<4x1x32xbf16>
    %97 = vector.shape_cast %96 : vector<4x1x32xbf16> to vector<4x32xbf16>
    %c8 = arith.constant 8 : index
    %c0_86 = arith.constant 0 : index
    %c0_87 = arith.constant 0 : index
    %98 = vector.load %arg5[%c8, %c0_86, %c0_87] : memref<9x8x4xbf16, #tpu.memory_space<vmem>>, vector<1x8x4xbf16>
    %99 = vector.shape_cast %98 : vector<1x8x4xbf16> to vector<8x4xbf16>
    %cst_88 = arith.constant dense<0.000000e+00> : vector<8x32xf32>
    %100 = tpu.matmul %99, %97, %cst_88 {dimension_numbers = #tpu.dot_dimension_numbers<[1], [0], [0], [1], [0, 0, 1, 1], [], []>} : vector<8x4xbf16>, vector<4x32xbf16>, vector<8x32xf32> -> vector<8x32xf32>
    %101 = arith.addf %95, %100 : vector<8x32xf32>
    %102 = vector.broadcast %45 : vector<8x1xf32> to vector<8x32xf32>
    %103 = arith.mulf %101, %102 : vector<8x32xf32>
    %104 = vector.broadcast %46 : vector<8x1xf32> to vector<8x32xf32>
    %105 = arith.addf %103, %104 : vector<8x32xf32>
    %cst_89 = arith.constant 0.000000e+00 : f32
    %106 = vector.broadcast %cst_89 : f32 to vector<8x32xf32>
    %107 = arith.maximumf %105, %106 : vector<8x32xf32>
    %c0_90 = arith.constant 0 : index
    %c0_91 = arith.constant 0 : index
    %c0_92 = arith.constant 0 : index
    %c0_93 = arith.constant 0 : index
    %108 = vector.load %arg8[%c0_90, %c0_91, %c0_92, %c0_93] : memref<1x8x16x32xf32, #tpu.memory_space<vmem>>, vector<1x8x1x32xf32>
    %109 = vector.shape_cast %108 : vector<1x8x1x32xf32> to vector<8x32xf32>
    %110 = vector.shape_cast %107 : vector<8x32xf32> to vector<1x8x1x32xf32>
    tpu.vector_store %arg8[%c0_90, %c0_91, %c0_92, %c0_93], %110 {strides = array<i32>} : memref<1x8x16x32xf32, #tpu.memory_space<vmem>>, vector<1x8x1x32xf32>,
    %cst_94 = arith.constant 0.000000e+00 : f32
    %111 = vector.broadcast %cst_94 : f32 to vector<8x32xf32>
    %c0_95 = arith.constant 0 : index
    %c1_96 = arith.constant 1 : index
    %c0_97 = arith.constant 0 : index
    %112 = vector.load %arg9[%c0_95, %c1_96, %c0_97] : memref<4x18x34xbf16, #tpu.memory_space<vmem>>, vector<4x1x32xbf16>
    %113 = vector.shape_cast %112 : vector<4x1x32xbf16> to vector<4x32xbf16>
    %c0_98 = arith.constant 0 : index
    %c0_99 = arith.constant 0 : index
    %c0_100 = arith.constant 0 : index
    %114 = vector.load %arg5[%c0_98, %c0_99, %c0_100] : memref<9x8x4xbf16, #tpu.memory_space<vmem>>, vector<1x8x4xbf16>
    %115 = vector.shape_cast %114 : vector<1x8x4xbf16> to vector<8x4xbf16>
    %cst_101 = arith.constant dense<0.000000e+00> : vector<8x32xf32>
    %116 = tpu.matmul %115, %113, %cst_101 {dimension_numbers = #tpu.dot_dimension_numbers<[1], [0], [0], [1], [0, 0, 1, 1], [], []>} : vector<8x4xbf16>, vector<4x32xbf16>, vector<8x32xf32> -> vector<8x32xf32>
    %117 = arith.addf %111, %116 : vector<8x32xf32>
    %c0_102 = arith.constant 0 : index
    %c1_103 = arith.constant 1 : index
    %c1_104 = arith.constant 1 : index
    %118 = vector.load %arg9[%c0_102, %c1_103, %c1_104] : memref<4x18x34xbf16, #tpu.memory_space<vmem>>, vector<4x1x32xbf16>
    %119 = vector.shape_cast %118 : vector<4x1x32xbf16> to vector<4x32xbf16>
    %c1_105 = arith.constant 1 : index
    %c0_106 = arith.constant 0 : index
    %c0_107 = arith.constant 0 : index
    %120 = vector.load %arg5[%c1_105, %c0_106, %c0_107] : memref<9x8x4xbf16, #tpu.memory_space<vmem>>, vector<1x8x4xbf16>
    %121 = vector.shape_cast %120 : vector<1x8x4xbf16> to vector<8x4xbf16>
    %cst_108 = arith.constant dense<0.000000e+00> : vector<8x32xf32>
    %122 = tpu.matmul %121, %119, %cst_108 {dimension_numbers = #tpu.dot_dimension_numbers<[1], [0], [0], [1], [0, 0, 1, 1], [], []>} : vector<8x4xbf16>, vector<4x32xbf16>, vector<8x32xf32> -> vector<8x32xf32>
    %123 = arith.addf %117, %122 : vector<8x32xf32>
    %c0_109 = arith.constant 0 : index
    %c1_110 = arith.constant 1 : index
    %c2_111 = arith.constant 2 : index
    %124 = vector.load %arg9[%c0_109, %c1_110, %c2_111] : memref<4x18x34xbf16, #tpu.memory_space<vmem>>, vector<4x1x32xbf16>
    %125 = vector.shape_cast %124 : vector<4x1x32xbf16> to vector<4x32xbf16>
    %c2_112 = arith.constant 2 : index
    %c0_113 = arith.constant 0 : index
    %c0_114 = arith.constant 0 : index
    %126 = vector.load %arg5[%c2_112, %c0_113, %c0_114] : memref<9x8x4xbf16, #tpu.memory_space<vmem>>, vector<1x8x4xbf16>
    %127 = vector.shape_cast %126 : vector<1x8x4xbf16> to vector<8x4xbf16>
    %cst_115 = arith.constant dense<0.000000e+00> : vector<8x32xf32>
    %128 = tpu.matmul %127, %125, %cst_115 {dimension_numbers = #tpu.dot_dimension_numbers<[1], [0], [0], [1], [0, 0, 1, 1], [], []>} : vector<8x4xbf16>, vector<4x32xbf16>, vector<8x32xf32> -> vector<8x32xf32>
    %129 = arith.addf %123, %128 : vector<8x32xf32>
    %c0_116 = arith.constant 0 : index
    %c2_117 = arith.constant 2 : index
    %c0_118 = arith.constant 0 : index
    %130 = vector.load %arg9[%c0_116, %c2_117, %c0_118] : memref<4x18x34xbf16, #tpu.memory_space<vmem>>, vector<4x1x32xbf16>
    %131 = vector.shape_cast %130 : vector<4x1x32xbf16> to vector<4x32xbf16>
    %c3_119 = arith.constant 3 : index
    %c0_120 = arith.constant 0 : index
    %c0_121 = arith.constant 0 : index
    %132 = vector.load %arg5[%c3_119, %c0_120, %c0_121] : memref<9x8x4xbf16, #tpu.memory_space<vmem>>, vector<1x8x4xbf16>
    %133 = vector.shape_cast %132 : vector<1x8x4xbf16> to vector<8x4xbf16>
    %cst_122 = arith.constant dense<0.000000e+00> : vector<8x32xf32>
    %134 = tpu.matmul %133, %131, %cst_122 {dimension_numbers = #tpu.dot_dimension_numbers<[1], [0], [0], [1], [0, 0, 1, 1], [], []>} : vector<8x4xbf16>, vector<4x32xbf16>, vector<8x32xf32> -> vector<8x32xf32>
    %135 = arith.addf %129, %134 : vector<8x32xf32>
    %c0_123 = arith.constant 0 : index
    %c2_124 = arith.constant 2 : index
    %c1_125 = arith.constant 1 : index
    %136 = vector.load %arg9[%c0_123, %c2_124, %c1_125] : memref<4x18x34xbf16, #tpu.memory_space<vmem>>, vector<4x1x32xbf16>
    %137 = vector.shape_cast %136 : vector<4x1x32xbf16> to vector<4x32xbf16>
    %c4_126 = arith.constant 4 : index
    %c0_127 = arith.constant 0 : index
    %c0_128 = arith.constant 0 : index
    %138 = vector.load %arg5[%c4_126, %c0_127, %c0_128] : memref<9x8x4xbf16, #tpu.memory_space<vmem>>, vector<1x8x4xbf16>
    %139 = vector.shape_cast %138 : vector<1x8x4xbf16> to vector<8x4xbf16>
    %cst_129 = arith.constant dense<0.000000e+00> : vector<8x32xf32>
    %140 = tpu.matmul %139, %137, %cst_129 {dimension_numbers = #tpu.dot_dimension_numbers<[1], [0], [0], [1], [0, 0, 1, 1], [], []>} : vector<8x4xbf16>, vector<4x32xbf16>, vector<8x32xf32> -> vector<8x32xf32>
    %141 = arith.addf %135, %140 : vector<8x32xf32>
    %c0_130 = arith.constant 0 : index
    %c2_131 = arith.constant 2 : index
    %c2_132 = arith.constant 2 : index
    %142 = vector.load %arg9[%c0_130, %c2_131, %c2_132] : memref<4x18x34xbf16, #tpu.memory_space<vmem>>, vector<4x1x32xbf16>
    %143 = vector.shape_cast %142 : vector<4x1x32xbf16> to vector<4x32xbf16>
    %c5_133 = arith.constant 5 : index
    %c0_134 = arith.constant 0 : index
    %c0_135 = arith.constant 0 : index
    %144 = vector.load %arg5[%c5_133, %c0_134, %c0_135] : memref<9x8x4xbf16, #tpu.memory_space<vmem>>, vector<1x8x4xbf16>
    %145 = vector.shape_cast %144 : vector<1x8x4xbf16> to vector<8x4xbf16>
    %cst_136 = arith.constant dense<0.000000e+00> : vector<8x32xf32>
    %146 = tpu.matmul %145, %143, %cst_136 {dimension_numbers = #tpu.dot_dimension_numbers<[1], [0], [0], [1], [0, 0, 1, 1], [], []>} : vector<8x4xbf16>, vector<4x32xbf16>, vector<8x32xf32> -> vector<8x32xf32>
    %147 = arith.addf %141, %146 : vector<8x32xf32>
    %c0_137 = arith.constant 0 : index
    %c3_138 = arith.constant 3 : index
    %c0_139 = arith.constant 0 : index
    %148 = vector.load %arg9[%c0_137, %c3_138, %c0_139] : memref<4x18x34xbf16, #tpu.memory_space<vmem>>, vector<4x1x32xbf16>
    %149 = vector.shape_cast %148 : vector<4x1x32xbf16> to vector<4x32xbf16>
    %c6_140 = arith.constant 6 : index
    %c0_141 = arith.constant 0 : index
    %c0_142 = arith.constant 0 : index
    %150 = vector.load %arg5[%c6_140, %c0_141, %c0_142] : memref<9x8x4xbf16, #tpu.memory_space<vmem>>, vector<1x8x4xbf16>
    %151 = vector.shape_cast %150 : vector<1x8x4xbf16> to vector<8x4xbf16>
    %cst_143 = arith.constant dense<0.000000e+00> : vector<8x32xf32>
    %152 = tpu.matmul %151, %149, %cst_143 {dimension_numbers = #tpu.dot_dimension_numbers<[1], [0], [0], [1], [0, 0, 1, 1], [], []>} : vector<8x4xbf16>, vector<4x32xbf16>, vector<8x32xf32> -> vector<8x32xf32>
    %153 = arith.addf %147, %152 : vector<8x32xf32>
    %c0_144 = arith.constant 0 : index
    %c3_145 = arith.constant 3 : index
    %c1_146 = arith.constant 1 : index
    %154 = vector.load %arg9[%c0_144, %c3_145, %c1_146] : memref<4x18x34xbf16, #tpu.memory_space<vmem>>, vector<4x1x32xbf16>
    %155 = vector.shape_cast %154 : vector<4x1x32xbf16> to vector<4x32xbf16>
    %c7_147 = arith.constant 7 : index
    %c0_148 = arith.constant 0 : index
    %c0_149 = arith.constant 0 : index
    %156 = vector.load %arg5[%c7_147, %c0_148, %c0_149] : memref<9x8x4xbf16, #tpu.memory_space<vmem>>, vector<1x8x4xbf16>
    %157 = vector.shape_cast %156 : vector<1x8x4xbf16> to vector<8x4xbf16>
    %cst_150 = arith.constant dense<0.000000e+00> : vector<8x32xf32>
    %158 = tpu.matmul %157, %155, %cst_150 {dimension_numbers = #tpu.dot_dimension_numbers<[1], [0], [0], [1], [0, 0, 1, 1], [], []>} : vector<8x4xbf16>, vector<4x32xbf16>, vector<8x32xf32> -> vector<8x32xf32>
    %159 = arith.addf %153, %158 : vector<8x32xf32>
    %c0_151 = arith.constant 0 : index
    %c3_152 = arith.constant 3 : index
    %c2_153 = arith.constant 2 : index
    %160 = vector.load %arg9[%c0_151, %c3_152, %c2_153] : memref<4x18x34xbf16, #tpu.memory_space<vmem>>, vector<4x1x32xbf16>
    %161 = vector.shape_cast %160 : vector<4x1x32xbf16> to vector<4x32xbf16>
    %c8_154 = arith.constant 8 : index
    %c0_155 = arith.constant 0 : index
    %c0_156 = arith.constant 0 : index
    %162 = vector.load %arg5[%c8_154, %c0_155, %c0_156] : memref<9x8x4xbf16, #tpu.memory_space<vmem>>, vector<1x8x4xbf16>
    %163 = vector.shape_cast %162 : vector<1x8x4xbf16> to vector<8x4xbf16>
    %cst_157 = arith.constant dense<0.000000e+00> : vector<8x32xf32>
    %164 = tpu.matmul %163, %161, %cst_157 {dimension_numbers = #tpu.dot_dimension_numbers<[1], [0], [0], [1], [0, 0, 1, 1], [], []>} : vector<8x4xbf16>, vector<4x32xbf16>, vector<8x32xf32> -> vector<8x32xf32>
    %165 = arith.addf %159, %164 : vector<8x32xf32>
    %166 = vector.broadcast %45 : vector<8x1xf32> to vector<8x32xf32>
    %167 = arith.mulf %165, %166 : vector<8x32xf32>
    %168 = vector.broadcast %46 : vector<8x1xf32> to vector<8x32xf32>
    %169 = arith.addf %167, %168 : vector<8x32xf32>
    %cst_158 = arith.constant 0.000000e+00 : f32
    %170 = vector.broadcast %cst_158 : f32 to vector<8x32xf32>
    %171 = arith.maximumf %169, %170 : vector<8x32xf32>
    %c0_159 = arith.constant 0 : index
    %c0_160 = arith.constant 0 : index
    %c1_161 = arith.constant 1 : index
    %c0_162 = arith.constant 0 : index
    %172 = vector.load %arg8[%c0_159, %c0_160, %c1_161, %c0_162] : memref<1x8x16x32xf32, #tpu.memory_space<vmem>>, vector<1x8x1x32xf32>
    %173 = vector.shape_cast %172 : vector<1x8x1x32xf32> to vector<8x32xf32>
    %174 = vector.shape_cast %171 : vector<8x32xf32> to vector<1x8x1x32xf32>
    tpu.vector_store %arg8[%c0_159, %c0_160, %c1_161, %c0_162], %174 {strides = array<i32>} : memref<1x8x16x32xf32, #tpu.memory_space<vmem>>, vector<1x8x1x32xf32>,
    %cst_163 = arith.constant 0.000000e+00 : f32
    %175 = vector.broadcast %cst_163 : f32 to vector<8x32xf32>
    %c0_164 = arith.constant 0 : index
    %c2_165 = arith.constant 2 : index
    %c0_166 = arith.constant 0 : index
    %176 = vector.load %arg9[%c0_164, %c2_165, %c0_166] : memref<4x18x34xbf16, #tpu.memory_space<vmem>>, vector<4x1x32xbf16>
    %177 = vector.shape_cast %176 : vector<4x1x32xbf16> to vector<4x32xbf16>
    %c0_167 = arith.constant 0 : index
    %c0_168 = arith.constant 0 : index
    %c0_169 = arith.constant 0 : index
    %178 = vector.load %arg5[%c0_167, %c0_168, %c0_169] : memref<9x8x4xbf16, #tpu.memory_space<vmem>>, vector<1x8x4xbf16>
    %179 = vector.shape_cast %178 : vector<1x8x4xbf16> to vector<8x4xbf16>
    %cst_170 = arith.constant dense<0.000000e+00> : vector<8x32xf32>
    %180 = tpu.matmul %179, %177, %cst_170 {dimension_numbers = #tpu.dot_dimension_numbers<[1], [0], [0], [1], [0, 0, 1, 1], [], []>} : vector<8x4xbf16>, vector<4x32xbf16>, vector<8x32xf32> -> vector<8x32xf32>
    %181 = arith.addf %175, %180 : vector<8x32xf32>
    %c0_171 = arith.constant 0 : index
    %c2_172 = arith.constant 2 : index
    %c1_173 = arith.constant 1 : index
    %182 = vector.load %arg9[%c0_171, %c2_172, %c1_173] : memref<4x18x34xbf16, #tpu.memory_space<vmem>>, vector<4x1x32xbf16>
    %183 = vector.shape_cast %182 : vector<4x1x32xbf16> to vector<4x32xbf16>
    %c1_174 = arith.constant 1 : index
    %c0_175 = arith.constant 0 : index
    %c0_176 = arith.constant 0 : index
    %184 = vector.load %arg5[%c1_174, %c0_175, %c0_176] : memref<9x8x4xbf16, #tpu.memory_space<vmem>>, vector<1x8x4xbf16>
    %185 = vector.shape_cast %184 : vector<1x8x4xbf16> to vector<8x4xbf16>
    %cst_177 = arith.constant dense<0.000000e+00> : vector<8x32xf32>
    %186 = tpu.matmul %185, %183, %cst_177 {dimension_numbers = #tpu.dot_dimension_numbers<[1], [0], [0], [1], [0, 0, 1, 1], [], []>} : vector<8x4xbf16>, vector<4x32xbf16>, vector<8x32xf32> -> vector<8x32xf32>
    %187 = arith.addf %181, %186 : vector<8x32xf32>
    %c0_178 = arith.constant 0 : index
    %c2_179 = arith.constant 2 : index
    %c2_180 = arith.constant 2 : index
    %188 = vector.load %arg9[%c0_178, %c2_179, %c2_180] : memref<4x18x34xbf16, #tpu.memory_space<vmem>>, vector<4x1x32xbf16>
    %189 = vector.shape_cast %188 : vector<4x1x32xbf16> to vector<4x32xbf16>
    %c2_181 = arith.constant 2 : index
    %c0_182 = arith.constant 0 : index
    %c0_183 = arith.constant 0 : index
    %190 = vector.load %arg5[%c2_181, %c0_182, %c0_183] : memref<9x8x4xbf16, #tpu.memory_space<vmem>>, vector<1x8x4xbf16>
    %191 = vector.shape_cast %190 : vector<1x8x4xbf16> to vector<8x4xbf16>
    %cst_184 = arith.constant dense<0.000000e+00> : vector<8x32xf32>
    %192 = tpu.matmul %191, %189, %cst_184 {dimension_numbers = #tpu.dot_dimension_numbers<[1], [0], [0], [1], [0, 0, 1, 1], [], []>} : vector<8x4xbf16>, vector<4x32xbf16>, vector<8x32xf32> -> vector<8x32xf32>
    %193 = arith.addf %187, %192 : vector<8x32xf32>
    %c0_185 = arith.constant 0 : index
    %c3_186 = arith.constant 3 : index
    %c0_187 = arith.constant 0 : index
    %194 = vector.load %arg9[%c0_185, %c3_186, %c0_187] : memref<4x18x34xbf16, #tpu.memory_space<vmem>>, vector<4x1x32xbf16>
    %195 = vector.shape_cast %194 : vector<4x1x32xbf16> to vector<4x32xbf16>
    %c3_188 = arith.constant 3 : index
    %c0_189 = arith.constant 0 : index
    %c0_190 = arith.constant 0 : index
    %196 = vector.load %arg5[%c3_188, %c0_189, %c0_190] : memref<9x8x4xbf16, #tpu.memory_space<vmem>>, vector<1x8x4xbf16>
    %197 = vector.shape_cast %196 : vector<1x8x4xbf16> to vector<8x4xbf16>
    %cst_191 = arith.constant dense<0.000000e+00> : vector<8x32xf32>
    %198 = tpu.matmul %197, %195, %cst_191 {dimension_numbers = #tpu.dot_dimension_numbers<[1], [0], [0], [1], [0, 0, 1, 1], [], []>} : vector<8x4xbf16>, vector<4x32xbf16>, vector<8x32xf32> -> vector<8x32xf32>
    %199 = arith.addf %193, %198 : vector<8x32xf32>
    %c0_192 = arith.constant 0 : index
    %c3_193 = arith.constant 3 : index
    %c1_194 = arith.constant 1 : index
    %200 = vector.load %arg9[%c0_192, %c3_193, %c1_194] : memref<4x18x34xbf16, #tpu.memory_space<vmem>>, vector<4x1x32xbf16>
    %201 = vector.shape_cast %200 : vector<4x1x32xbf16> to vector<4x32xbf16>
    %c4_195 = arith.constant 4 : index
    %c0_196 = arith.constant 0 : index
    %c0_197 = arith.constant 0 : index
    %202 = vector.load %arg5[%c4_195, %c0_196, %c0_197] : memref<9x8x4xbf16, #tpu.memory_space<vmem>>, vector<1x8x4xbf16>
    %203 = vector.shape_cast %202 : vector<1x8x4xbf16> to vector<8x4xbf16>
    %cst_198 = arith.constant dense<0.000000e+00> : vector<8x32xf32>
    %204 = tpu.matmul %203, %201, %cst_198 {dimension_numbers = #tpu.dot_dimension_numbers<[1], [0], [0], [1], [0, 0, 1, 1], [], []>} : vector<8x4xbf16>, vector<4x32xbf16>, vector<8x32xf32> -> vector<8x32xf32>
    %205 = arith.addf %199, %204 : vector<8x32xf32>
    %c0_199 = arith.constant 0 : index
    %c3_200 = arith.constant 3 : index
    %c2_201 = arith.constant 2 : index
    %206 = vector.load %arg9[%c0_199, %c3_200, %c2_201] : memref<4x18x34xbf16, #tpu.memory_space<vmem>>, vector<4x1x32xbf16>
    %207 = vector.shape_cast %206 : vector<4x1x32xbf16> to vector<4x32xbf16>
    %c5_202 = arith.constant 5 : index
    %c0_203 = arith.constant 0 : index
    %c0_204 = arith.constant 0 : index
    %208 = vector.load %arg5[%c5_202, %c0_203, %c0_204] : memref<9x8x4xbf16, #tpu.memory_space<vmem>>, vector<1x8x4xbf16>
    %209 = vector.shape_cast %208 : vector<1x8x4xbf16> to vector<8x4xbf16>
    %cst_205 = arith.constant dense<0.000000e+00> : vector<8x32xf32>
    %210 = tpu.matmul %209, %207, %cst_205 {dimension_numbers = #tpu.dot_dimension_numbers<[1], [0], [0], [1], [0, 0, 1, 1], [], []>} : vector<8x4xbf16>, vector<4x32xbf16>, vector<8x32xf32> -> vector<8x32xf32>
    %211 = arith.addf %205, %210 : vector<8x32xf32>
    %c0_206 = arith.constant 0 : index
    %c4_207 = arith.constant 4 : index
    %c0_208 = arith.constant 0 : index
    %212 = vector.load %arg9[%c0_206, %c4_207, %c0_208] : memref<4x18x34xbf16, #tpu.memory_space<vmem>>, vector<4x1x32xbf16>
    %213 = vector.shape_cast %212 : vector<4x1x32xbf16> to vector<4x32xbf16>
    %c6_209 = arith.constant 6 : index
    %c0_210 = arith.constant 0 : index
    %c0_211 = arith.constant 0 : index
    %214 = vector.load %arg5[%c6_209, %c0_210, %c0_211] : memref<9x8x4xbf16, #tpu.memory_space<vmem>>, vector<1x8x4xbf16>
    %215 = vector.shape_cast %214 : vector<1x8x4xbf16> to vector<8x4xbf16>
    %cst_212 = arith.constant dense<0.000000e+00> : vector<8x32xf32>
    %216 = tpu.matmul %215, %213, %cst_212 {dimension_numbers = #tpu.dot_dimension_numbers<[1], [0], [0], [1], [0, 0, 1, 1], [], []>} : vector<8x4xbf16>, vector<4x32xbf16>, vector<8x32xf32> -> vector<8x32xf32>
    %217 = arith.addf %211, %216 : vector<8x32xf32>
    %c0_213 = arith.constant 0 : index
    %c4_214 = arith.constant 4 : index
    %c1_215 = arith.constant 1 : index
    %218 = vector.load %arg9[%c0_213, %c4_214, %c1_215] : memref<4x18x34xbf16, #tpu.memory_space<vmem>>, vector<4x1x32xbf16>
    %219 = vector.shape_cast %218 : vector<4x1x32xbf16> to vector<4x32xbf16>
    %c7_216 = arith.constant 7 : index
    %c0_217 = arith.constant 0 : index
    %c0_218 = arith.constant 0 : index
    %220 = vector.load %arg5[%c7_216, %c0_217, %c0_218] : memref<9x8x4xbf16, #tpu.memory_space<vmem>>, vector<1x8x4xbf16>
    %221 = vector.shape_cast %220 : vector<1x8x4xbf16> to vector<8x4xbf16>
    %cst_219 = arith.constant dense<0.000000e+00> : vector<8x32xf32>
    %222 = tpu.matmul %221, %219, %cst_219 {dimension_numbers = #tpu.dot_dimension_numbers<[1], [0], [0], [1], [0, 0, 1, 1], [], []>} : vector<8x4xbf16>, vector<4x32xbf16>, vector<8x32xf32> -> vector<8x32xf32>
    %223 = arith.addf %217, %222 : vector<8x32xf32>
    %c0_220 = arith.constant 0 : index
    %c4_221 = arith.constant 4 : index
    %c2_222 = arith.constant 2 : index
    %224 = vector.load %arg9[%c0_220, %c4_221, %c2_222] : memref<4x18x34xbf16, #tpu.memory_space<vmem>>, vector<4x1x32xbf16>
    %225 = vector.shape_cast %224 : vector<4x1x32xbf16> to vector<4x32xbf16>
    %c8_223 = arith.constant 8 : index
    %c0_224 = arith.constant 0 : index
    %c0_225 = arith.constant 0 : index
    %226 = vector.load %arg5[%c8_223, %c0_224, %c0_225] : memref<9x8x4xbf16, #tpu.memory_space<vmem>>, vector<1x8x4xbf16>
    %227 = vector.shape_cast %226 : vector<1x8x4xbf16> to vector<8x4xbf16>
    %cst_226 = arith.constant dense<0.000000e+00> : vector<8x32xf32>
    %228 = tpu.matmul %227, %225, %cst_226 {dimension_numbers = #tpu.dot_dimension_numbers<[1], [0], [0], [1], [0, 0, 1, 1], [], []>} : vector<8x4xbf16>, vector<4x32xbf16>, vector<8x32xf32> -> vector<8x32xf32>
    %229 = arith.addf %223, %228 : vector<8x32xf32>
    %230 = vector.broadcast %45 : vector<8x1xf32> to vector<8x32xf32>
    %231 = arith.mulf %229, %230 : vector<8x32xf32>
    %232 = vector.broadcast %46 : vector<8x1xf32> to vector<8x32xf32>
    %233 = arith.addf %231, %232 : vector<8x32xf32>
    %cst_227 = arith.constant 0.000000e+00 : f32
    %234 = vector.broadcast %cst_227 : f32 to vector<8x32xf32>
    %235 = arith.maximumf %233, %234 : vector<8x32xf32>
    %c0_228 = arith.constant 0 : index
    %c0_229 = arith.constant 0 : index
    %c2_230 = arith.constant 2 : index
    %c0_231 = arith.constant 0 : index
    %236 = vector.load %arg8[%c0_228, %c0_229, %c2_230, %c0_231] : memref<1x8x16x32xf32, #tpu.memory_space<vmem>>, vector<1x8x1x32xf32>
    %237 = vector.shape_cast %236 : vector<1x8x1x32xf32> to vector<8x32xf32>
    %238 = vector.shape_cast %235 : vector<8x32xf32> to vector<1x8x1x32xf32>
    tpu.vector_store %arg8[%c0_228, %c0_229, %c2_230, %c0_231], %238 {strides = array<i32>} : memref<1x8x16x32xf32, #tpu.memory_space<vmem>>, vector<1x8x1x32xf32>,
    %cst_232 = arith.constant 0.000000e+00 : f32
    %239 = vector.broadcast %cst_232 : f32 to vector<8x32xf32>
    %c0_233 = arith.constant 0 : index
    %c3_234 = arith.constant 3 : index
    %c0_235 = arith.constant 0 : index
    %240 = vector.load %arg9[%c0_233, %c3_234, %c0_235] : memref<4x18x34xbf16, #tpu.memory_space<vmem>>, vector<4x1x32xbf16>
    %241 = vector.shape_cast %240 : vector<4x1x32xbf16> to vector<4x32xbf16>
    %c0_236 = arith.constant 0 : index
    %c0_237 = arith.constant 0 : index
    %c0_238 = arith.constant 0 : index
    %242 = vector.load %arg5[%c0_236, %c0_237, %c0_238] : memref<9x8x4xbf16, #tpu.memory_space<vmem>>, vector<1x8x4xbf16>
    %243 = vector.shape_cast %242 : vector<1x8x4xbf16> to vector<8x4xbf16>
    %cst_239 = arith.constant dense<0.000000e+00> : vector<8x32xf32>
    %244 = tpu.matmul %243, %241, %cst_239 {dimension_numbers = #tpu.dot_dimension_numbers<[1], [0], [0], [1], [0, 0, 1, 1], [], []>} : vector<8x4xbf16>, vector<4x32xbf16>, vector<8x32xf32> -> vector<8x32xf32>
    %245 = arith.addf %239, %244 : vector<8x32xf32>
    %c0_240 = arith.constant 0 : index
    %c3_241 = arith.constant 3 : index
    %c1_242 = arith.constant 1 : index
    %246 = vector.load %arg9[%c0_240, %c3_241, %c1_242] : memref<4x18x34xbf16, #tpu.memory_space<vmem>>, vector<4x1x32xbf16>
    %247 = vector.shape_cast %246 : vector<4x1x32xbf16> to vector<4x32xbf16>
    %c1_243 = arith.constant 1 : index
    %c0_244 = arith.constant 0 : index
    %c0_245 = arith.constant 0 : index
    %248 = vector.load %arg5[%c1_243, %c0_244, %c0_245] : memref<9x8x4xbf16, #tpu.memory_space<vmem>>, vector<1x8x4xbf16>
    %249 = vector.shape_cast %248 : vector<1x8x4xbf16> to vector<8x4xbf16>
    %cst_246 = arith.constant dense<0.000000e+00> : vector<8x32xf32>
    %250 = tpu.matmul %249, %247, %cst_246 {dimension_numbers = #tpu.dot_dimension_numbers<[1], [0], [0], [1], [0, 0, 1, 1], [], []>} : vector<8x4xbf16>, vector<4x32xbf16>, vector<8x32xf32> -> vector<8x32xf32>
    %251 = arith.addf %245, %250 : vector<8x32xf32>
    %c0_247 = arith.constant 0 : index
    %c3_248 = arith.constant 3 : index
    %c2_249 = arith.constant 2 : index
    %252 = vector.load %arg9[%c0_247, %c3_248, %c2_249] : memref<4x18x34xbf16, #tpu.memory_space<vmem>>, vector<4x1x32xbf16>
    %253 = vector.shape_cast %252 : vector<4x1x32xbf16> to vector<4x32xbf16>
    %c2_250 = arith.constant 2 : index
    %c0_251 = arith.constant 0 : index
    %c0_252 = arith.constant 0 : index
    %254 = vector.load %arg5[%c2_250, %c0_251, %c0_252] : memref<9x8x4xbf16, #tpu.memory_space<vmem>>, vector<1x8x4xbf16>
    %255 = vector.shape_cast %254 : vector<1x8x4xbf16> to vector<8x4xbf16>
    %cst_253 = arith.constant dense<0.000000e+00> : vector<8x32xf32>
    %256 = tpu.matmul %255, %253, %cst_253 {dimension_numbers = #tpu.dot_dimension_numbers<[1], [0], [0], [1], [0, 0, 1, 1], [], []>} : vector<8x4xbf16>, vector<4x32xbf16>, vector<8x32xf32> -> vector<8x32xf32>
    %257 = arith.addf %251, %256 : vector<8x32xf32>
    %c0_254 = arith.constant 0 : index
    %c4_255 = arith.constant 4 : index
    %c0_256 = arith.constant 0 : index
    %258 = vector.load %arg9[%c0_254, %c4_255, %c0_256] : memref<4x18x34xbf16, #tpu.memory_space<vmem>>, vector<4x1x32xbf16>
    %259 = vector.shape_cast %258 : vector<4x1x32xbf16> to vector<4x32xbf16>
    %c3_257 = arith.constant 3 : index
    %c0_258 = arith.constant 0 : index
    %c0_259 = arith.constant 0 : index
    %260 = vector.load %arg5[%c3_257, %c0_258, %c0_259] : memref<9x8x4xbf16, #tpu.memory_space<vmem>>, vector<1x8x4xbf16>
    %261 = vector.shape_cast %260 : vector<1x8x4xbf16> to vector<8x4xbf16>
    %cst_260 = arith.constant dense<0.000000e+00> : vector<8x32xf32>
    %262 = tpu.matmul %261, %259, %cst_260 {dimension_numbers = #tpu.dot_dimension_numbers<[1], [0], [0], [1], [0, 0, 1, 1], [], []>} : vector<8x4xbf16>, vector<4x32xbf16>, vector<8x32xf32> -> vector<8x32xf32>
    %263 = arith.addf %257, %262 : vector<8x32xf32>
    %c0_261 = arith.constant 0 : index
    %c4_262 = arith.constant 4 : index
    %c1_263 = arith.constant 1 : index
    %264 = vector.load %arg9[%c0_261, %c4_262, %c1_263] : memref<4x18x34xbf16, #tpu.memory_space<vmem>>, vector<4x1x32xbf16>
    %265 = vector.shape_cast %264 : vector<4x1x32xbf16> to vector<4x32xbf16>
    %c4_264 = arith.constant 4 : index
    %c0_265 = arith.constant 0 : index
    %c0_266 = arith.constant 0 : index
    %266 = vector.load %arg5[%c4_264, %c0_265, %c0_266] : memref<9x8x4xbf16, #tpu.memory_space<vmem>>, vector<1x8x4xbf16>
    %267 = vector.shape_cast %266 : vector<1x8x4xbf16> to vector<8x4xbf16>
    %cst_267 = arith.constant dense<0.000000e+00> : vector<8x32xf32>
    %268 = tpu.matmul %267, %265, %cst_267 {dimension_numbers = #tpu.dot_dimension_numbers<[1], [0], [0], [1], [0, 0, 1, 1], [], []>} : vector<8x4xbf16>, vector<4x32xbf16>, vector<8x32xf32> -> vector<8x32xf32>
    %269 = arith.addf %263, %268 : vector<8x32xf32>
    %c0_268 = arith.constant 0 : index
    %c4_269 = arith.constant 4 : index
    %c2_270 = arith.constant 2 : index
    %270 = vector.load %arg9[%c0_268, %c4_269, %c2_270] : memref<4x18x34xbf16, #tpu.memory_space<vmem>>, vector<4x1x32xbf16>
    %271 = vector.shape_cast %270 : vector<4x1x32xbf16> to vector<4x32xbf16>
    %c5_271 = arith.constant 5 : index
    %c0_272 = arith.constant 0 : index
    %c0_273 = arith.constant 0 : index
    %272 = vector.load %arg5[%c5_271, %c0_272, %c0_273] : memref<9x8x4xbf16, #tpu.memory_space<vmem>>, vector<1x8x4xbf16>
    %273 = vector.shape_cast %272 : vector<1x8x4xbf16> to vector<8x4xbf16>
    %cst_274 = arith.constant dense<0.000000e+00> : vector<8x32xf32>
    %274 = tpu.matmul %273, %271, %cst_274 {dimension_numbers = #tpu.dot_dimension_numbers<[1], [0], [0], [1], [0, 0, 1, 1], [], []>} : vector<8x4xbf16>, vector<4x32xbf16>, vector<8x32xf32> -> vector<8x32xf32>
    %275 = arith.addf %269, %274 : vector<8x32xf32>
    %c0_275 = arith.constant 0 : index
    %c5_276 = arith.constant 5 : index
    %c0_277 = arith.constant 0 : index
    %276 = vector.load %arg9[%c0_275, %c5_276, %c0_277] : memref<4x18x34xbf16, #tpu.memory_space<vmem>>, vector<4x1x32xbf16>
    %277 = vector.shape_cast %276 : vector<4x1x32xbf16> to vector<4x32xbf16>
    %c6_278 = arith.constant 6 : index
    %c0_279 = arith.constant 0 : index
    %c0_280 = arith.constant 0 : index
    %278 = vector.load %arg5[%c6_278, %c0_279, %c0_280] : memref<9x8x4xbf16, #tpu.memory_space<vmem>>, vector<1x8x4xbf16>
    %279 = vector.shape_cast %278 : vector<1x8x4xbf16> to vector<8x4xbf16>
    %cst_281 = arith.constant dense<0.000000e+00> : vector<8x32xf32>
    %280 = tpu.matmul %279, %277, %cst_281 {dimension_numbers = #tpu.dot_dimension_numbers<[1], [0], [0], [1], [0, 0, 1, 1], [], []>} : vector<8x4xbf16>, vector<4x32xbf16>, vector<8x32xf32> -> vector<8x32xf32>
    %281 = arith.addf %275, %280 : vector<8x32xf32>
    %c0_282 = arith.constant 0 : index
    %c5_283 = arith.constant 5 : index
    %c1_284 = arith.constant 1 : index
    %282 = vector.load %arg9[%c0_282, %c5_283, %c1_284] : memref<4x18x34xbf16, #tpu.memory_space<vmem>>, vector<4x1x32xbf16>
    %283 = vector.shape_cast %282 : vector<4x1x32xbf16> to vector<4x32xbf16>
    %c7_285 = arith.constant 7 : index
    %c0_286 = arith.constant 0 : index
    %c0_287 = arith.constant 0 : index
    %284 = vector.load %arg5[%c7_285, %c0_286, %c0_287] : memref<9x8x4xbf16, #tpu.memory_space<vmem>>, vector<1x8x4xbf16>
    %285 = vector.shape_cast %284 : vector<1x8x4xbf16> to vector<8x4xbf16>
    %cst_288 = arith.constant dense<0.000000e+00> : vector<8x32xf32>
    %286 = tpu.matmul %285, %283, %cst_288 {dimension_numbers = #tpu.dot_dimension_numbers<[1], [0], [0], [1], [0, 0, 1, 1], [], []>} : vector<8x4xbf16>, vector<4x32xbf16>, vector<8x32xf32> -> vector<8x32xf32>
    %287 = arith.addf %281, %286 : vector<8x32xf32>
    %c0_289 = arith.constant 0 : index
    %c5_290 = arith.constant 5 : index
    %c2_291 = arith.constant 2 : index
    %288 = vector.load %arg9[%c0_289, %c5_290, %c2_291] : memref<4x18x34xbf16, #tpu.memory_space<vmem>>, vector<4x1x32xbf16>
    %289 = vector.shape_cast %288 : vector<4x1x32xbf16> to vector<4x32xbf16>
    %c8_292 = arith.constant 8 : index
    %c0_293 = arith.constant 0 : index
    %c0_294 = arith.constant 0 : index
    %290 = vector.load %arg5[%c8_292, %c0_293, %c0_294] : memref<9x8x4xbf16, #tpu.memory_space<vmem>>, vector<1x8x4xbf16>
    %291 = vector.shape_cast %290 : vector<1x8x4xbf16> to vector<8x4xbf16>
    %cst_295 = arith.constant dense<0.000000e+00> : vector<8x32xf32>
    %292 = tpu.matmul %291, %289, %cst_295 {dimension_numbers = #tpu.dot_dimension_numbers<[1], [0], [0], [1], [0, 0, 1, 1], [], []>} : vector<8x4xbf16>, vector<4x32xbf16>, vector<8x32xf32> -> vector<8x32xf32>
    %293 = arith.addf %287, %292 : vector<8x32xf32>
    %294 = vector.broadcast %45 : vector<8x1xf32> to vector<8x32xf32>
    %295 = arith.mulf %293, %294 : vector<8x32xf32>
    %296 = vector.broadcast %46 : vector<8x1xf32> to vector<8x32xf32>
    %297 = arith.addf %295, %296 : vector<8x32xf32>
    %cst_296 = arith.constant 0.000000e+00 : f32
    %298 = vector.broadcast %cst_296 : f32 to vector<8x32xf32>
    %299 = arith.maximumf %297, %298 : vector<8x32xf32>
    %c0_297 = arith.constant 0 : index
    %c0_298 = arith.constant 0 : index
    %c3_299 = arith.constant 3 : index
    %c0_300 = arith.constant 0 : index
    %300 = vector.load %arg8[%c0_297, %c0_298, %c3_299, %c0_300] : memref<1x8x16x32xf32, #tpu.memory_space<vmem>>, vector<1x8x1x32xf32>
    %301 = vector.shape_cast %300 : vector<1x8x1x32xf32> to vector<8x32xf32>
    %302 = vector.shape_cast %299 : vector<8x32xf32> to vector<1x8x1x32xf32>
    tpu.vector_store %arg8[%c0_297, %c0_298, %c3_299, %c0_300], %302 {strides = array<i32>} : memref<1x8x16x32xf32, #tpu.memory_space<vmem>>, vector<1x8x1x32xf32>,
    %cst_301 = arith.constant 0.000000e+00 : f32
    %303 = vector.broadcast %cst_301 : f32 to vector<8x32xf32>
    %c0_302 = arith.constant 0 : index
    %c4_303 = arith.constant 4 : index
    %c0_304 = arith.constant 0 : index
    %304 = vector.load %arg9[%c0_302, %c4_303, %c0_304] : memref<4x18x34xbf16, #tpu.memory_space<vmem>>, vector<4x1x32xbf16>
    %305 = vector.shape_cast %304 : vector<4x1x32xbf16> to vector<4x32xbf16>
    %c0_305 = arith.constant 0 : index
    %c0_306 = arith.constant 0 : index
    %c0_307 = arith.constant 0 : index
    %306 = vector.load %arg5[%c0_305, %c0_306, %c0_307] : memref<9x8x4xbf16, #tpu.memory_space<vmem>>, vector<1x8x4xbf16>
    %307 = vector.shape_cast %306 : vector<1x8x4xbf16> to vector<8x4xbf16>
    %cst_308 = arith.constant dense<0.000000e+00> : vector<8x32xf32>
    %308 = tpu.matmul %307, %305, %cst_308 {dimension_numbers = #tpu.dot_dimension_numbers<[1], [0], [0], [1], [0, 0, 1, 1], [], []>} : vector<8x4xbf16>, vector<4x32xbf16>, vector<8x32xf32> -> vector<8x32xf32>
    %309 = arith.addf %303, %308 : vector<8x32xf32>
    %c0_309 = arith.constant 0 : index
    %c4_310 = arith.constant 4 : index
    %c1_311 = arith.constant 1 : index
    %310 = vector.load %arg9[%c0_309, %c4_310, %c1_311] : memref<4x18x34xbf16, #tpu.memory_space<vmem>>, vector<4x1x32xbf16>
    %311 = vector.shape_cast %310 : vector<4x1x32xbf16> to vector<4x32xbf16>
    %c1_312 = arith.constant 1 : index
    %c0_313 = arith.constant 0 : index
    %c0_314 = arith.constant 0 : index
    %312 = vector.load %arg5[%c1_312, %c0_313, %c0_314] : memref<9x8x4xbf16, #tpu.memory_space<vmem>>, vector<1x8x4xbf16>
    %313 = vector.shape_cast %312 : vector<1x8x4xbf16> to vector<8x4xbf16>
    %cst_315 = arith.constant dense<0.000000e+00> : vector<8x32xf32>
    %314 = tpu.matmul %313, %311, %cst_315 {dimension_numbers = #tpu.dot_dimension_numbers<[1], [0], [0], [1], [0, 0, 1, 1], [], []>} : vector<8x4xbf16>, vector<4x32xbf16>, vector<8x32xf32> -> vector<8x32xf32>
    %315 = arith.addf %309, %314 : vector<8x32xf32>
    %c0_316 = arith.constant 0 : index
    %c4_317 = arith.constant 4 : index
    %c2_318 = arith.constant 2 : index
    %316 = vector.load %arg9[%c0_316, %c4_317, %c2_318] : memref<4x18x34xbf16, #tpu.memory_space<vmem>>, vector<4x1x32xbf16>
    %317 = vector.shape_cast %316 : vector<4x1x32xbf16> to vector<4x32xbf16>
    %c2_319 = arith.constant 2 : index
    %c0_320 = arith.constant 0 : index
    %c0_321 = arith.constant 0 : index
    %318 = vector.load %arg5[%c2_319, %c0_320, %c0_321] : memref<9x8x4xbf16, #tpu.memory_space<vmem>>, vector<1x8x4xbf16>
    %319 = vector.shape_cast %318 : vector<1x8x4xbf16> to vector<8x4xbf16>
    %cst_322 = arith.constant dense<0.000000e+00> : vector<8x32xf32>
    %320 = tpu.matmul %319, %317, %cst_322 {dimension_numbers = #tpu.dot_dimension_numbers<[1], [0], [0], [1], [0, 0, 1, 1], [], []>} : vector<8x4xbf16>, vector<4x32xbf16>, vector<8x32xf32> -> vector<8x32xf32>
    %321 = arith.addf %315, %320 : vector<8x32xf32>
    %c0_323 = arith.constant 0 : index
    %c5_324 = arith.constant 5 : index
    %c0_325 = arith.constant 0 : index
    %322 = vector.load %arg9[%c0_323, %c5_324, %c0_325] : memref<4x18x34xbf16, #tpu.memory_space<vmem>>, vector<4x1x32xbf16>
    %323 = vector.shape_cast %322 : vector<4x1x32xbf16> to vector<4x32xbf16>
    %c3_326 = arith.constant 3 : index
    %c0_327 = arith.constant 0 : index
    %c0_328 = arith.constant 0 : index
    %324 = vector.load %arg5[%c3_326, %c0_327, %c0_328] : memref<9x8x4xbf16, #tpu.memory_space<vmem>>, vector<1x8x4xbf16>
    %325 = vector.shape_cast %324 : vector<1x8x4xbf16> to vector<8x4xbf16>
    %cst_329 = arith.constant dense<0.000000e+00> : vector<8x32xf32>
    %326 = tpu.matmul %325, %323, %cst_329 {dimension_numbers = #tpu.dot_dimension_numbers<[1], [0], [0], [1], [0, 0, 1, 1], [], []>} : vector<8x4xbf16>, vector<4x32xbf16>, vector<8x32xf32> -> vector<8x32xf32>
    %327 = arith.addf %321, %326 : vector<8x32xf32>
    %c0_330 = arith.constant 0 : index
    %c5_331 = arith.constant 5 : index
    %c1_332 = arith.constant 1 : index
    %328 = vector.load %arg9[%c0_330, %c5_331, %c1_332] : memref<4x18x34xbf16, #tpu.memory_space<vmem>>, vector<4x1x32xbf16>
    %329 = vector.shape_cast %328 : vector<4x1x32xbf16> to vector<4x32xbf16>
    %c4_333 = arith.constant 4 : index
    %c0_334 = arith.constant 0 : index
    %c0_335 = arith.constant 0 : index
    %330 = vector.load %arg5[%c4_333, %c0_334, %c0_335] : memref<9x8x4xbf16, #tpu.memory_space<vmem>>, vector<1x8x4xbf16>
    %331 = vector.shape_cast %330 : vector<1x8x4xbf16> to vector<8x4xbf16>
    %cst_336 = arith.constant dense<0.000000e+00> : vector<8x32xf32>
    %332 = tpu.matmul %331, %329, %cst_336 {dimension_numbers = #tpu.dot_dimension_numbers<[1], [0], [0], [1], [0, 0, 1, 1], [], []>} : vector<8x4xbf16>, vector<4x32xbf16>, vector<8x32xf32> -> vector<8x32xf32>
    %333 = arith.addf %327, %332 : vector<8x32xf32>
    %c0_337 = arith.constant 0 : index
    %c5_338 = arith.constant 5 : index
    %c2_339 = arith.constant 2 : index
    %334 = vector.load %arg9[%c0_337, %c5_338, %c2_339] : memref<4x18x34xbf16, #tpu.memory_space<vmem>>, vector<4x1x32xbf16>
    %335 = vector.shape_cast %334 : vector<4x1x32xbf16> to vector<4x32xbf16>
    %c5_340 = arith.constant 5 : index
    %c0_341 = arith.constant 0 : index
    %c0_342 = arith.constant 0 : index
    %336 = vector.load %arg5[%c5_340, %c0_341, %c0_342] : memref<9x8x4xbf16, #tpu.memory_space<vmem>>, vector<1x8x4xbf16>
    %337 = vector.shape_cast %336 : vector<1x8x4xbf16> to vector<8x4xbf16>
    %cst_343 = arith.constant dense<0.000000e+00> : vector<8x32xf32>
    %338 = tpu.matmul %337, %335, %cst_343 {dimension_numbers = #tpu.dot_dimension_numbers<[1], [0], [0], [1], [0, 0, 1, 1], [], []>} : vector<8x4xbf16>, vector<4x32xbf16>, vector<8x32xf32> -> vector<8x32xf32>
    %339 = arith.addf %333, %338 : vector<8x32xf32>
    %c0_344 = arith.constant 0 : index
    %c6_345 = arith.constant 6 : index
    %c0_346 = arith.constant 0 : index
    %340 = vector.load %arg9[%c0_344, %c6_345, %c0_346] : memref<4x18x34xbf16, #tpu.memory_space<vmem>>, vector<4x1x32xbf16>
    %341 = vector.shape_cast %340 : vector<4x1x32xbf16> to vector<4x32xbf16>
    %c6_347 = arith.constant 6 : index
    %c0_348 = arith.constant 0 : index
    %c0_349 = arith.constant 0 : index
    %342 = vector.load %arg5[%c6_347, %c0_348, %c0_349] : memref<9x8x4xbf16, #tpu.memory_space<vmem>>, vector<1x8x4xbf16>
    %343 = vector.shape_cast %342 : vector<1x8x4xbf16> to vector<8x4xbf16>
    %cst_350 = arith.constant dense<0.000000e+00> : vector<8x32xf32>
    %344 = tpu.matmul %343, %341, %cst_350 {dimension_numbers = #tpu.dot_dimension_numbers<[1], [0], [0], [1], [0, 0, 1, 1], [], []>} : vector<8x4xbf16>, vector<4x32xbf16>, vector<8x32xf32> -> vector<8x32xf32>
    %345 = arith.addf %339, %344 : vector<8x32xf32>
    %c0_351 = arith.constant 0 : index
    %c6_352 = arith.constant 6 : index
    %c1_353 = arith.constant 1 : index
    %346 = vector.load %arg9[%c0_351, %c6_352, %c1_353] : memref<4x18x34xbf16, #tpu.memory_space<vmem>>, vector<4x1x32xbf16>
    %347 = vector.shape_cast %346 : vector<4x1x32xbf16> to vector<4x32xbf16>
    %c7_354 = arith.constant 7 : index
    %c0_355 = arith.constant 0 : index
    %c0_356 = arith.constant 0 : index
    %348 = vector.load %arg5[%c7_354, %c0_355, %c0_356] : memref<9x8x4xbf16, #tpu.memory_space<vmem>>, vector<1x8x4xbf16>
    %349 = vector.shape_cast %348 : vector<1x8x4xbf16> to vector<8x4xbf16>
    %cst_357 = arith.constant dense<0.000000e+00> : vector<8x32xf32>
    %350 = tpu.matmul %349, %347, %cst_357 {dimension_numbers = #tpu.dot_dimension_numbers<[1], [0], [0], [1], [0, 0, 1, 1], [], []>} : vector<8x4xbf16>, vector<4x32xbf16>, vector<8x32xf32> -> vector<8x32xf32>
    %351 = arith.addf %345, %350 : vector<8x32xf32>
    %c0_358 = arith.constant 0 : index
    %c6_359 = arith.constant 6 : index
    %c2_360 = arith.constant 2 : index
    %352 = vector.load %arg9[%c0_358, %c6_359, %c2_360] : memref<4x18x34xbf16, #tpu.memory_space<vmem>>, vector<4x1x32xbf16>
    %353 = vector.shape_cast %352 : vector<4x1x32xbf16> to vector<4x32xbf16>
    %c8_361 = arith.constant 8 : index
    %c0_362 = arith.constant 0 : index
    %c0_363 = arith.constant 0 : index
    %354 = vector.load %arg5[%c8_361, %c0_362, %c0_363] : memref<9x8x4xbf16, #tpu.memory_space<vmem>>, vector<1x8x4xbf16>
    %355 = vector.shape_cast %354 : vector<1x8x4xbf16> to vector<8x4xbf16>
    %cst_364 = arith.constant dense<0.000000e+00> : vector<8x32xf32>
    %356 = tpu.matmul %355, %353, %cst_364 {dimension_numbers = #tpu.dot_dimension_numbers<[1], [0], [0], [1], [0, 0, 1, 1], [], []>} : vector<8x4xbf16>, vector<4x32xbf16>, vector<8x32xf32> -> vector<8x32xf32>
    %357 = arith.addf %351, %356 : vector<8x32xf32>
    %358 = vector.broadcast %45 : vector<8x1xf32> to vector<8x32xf32>
    %359 = arith.mulf %357, %358 : vector<8x32xf32>
    %360 = vector.broadcast %46 : vector<8x1xf32> to vector<8x32xf32>
    %361 = arith.addf %359, %360 : vector<8x32xf32>
    %cst_365 = arith.constant 0.000000e+00 : f32
    %362 = vector.broadcast %cst_365 : f32 to vector<8x32xf32>
    %363 = arith.maximumf %361, %362 : vector<8x32xf32>
    %c0_366 = arith.constant 0 : index
    %c0_367 = arith.constant 0 : index
    %c4_368 = arith.constant 4 : index
    %c0_369 = arith.constant 0 : index
    %364 = vector.load %arg8[%c0_366, %c0_367, %c4_368, %c0_369] : memref<1x8x16x32xf32, #tpu.memory_space<vmem>>, vector<1x8x1x32xf32>
    %365 = vector.shape_cast %364 : vector<1x8x1x32xf32> to vector<8x32xf32>
    %366 = vector.shape_cast %363 : vector<8x32xf32> to vector<1x8x1x32xf32>
    tpu.vector_store %arg8[%c0_366, %c0_367, %c4_368, %c0_369], %366 {strides = array<i32>} : memref<1x8x16x32xf32, #tpu.memory_space<vmem>>, vector<1x8x1x32xf32>,
    %cst_370 = arith.constant 0.000000e+00 : f32
    %367 = vector.broadcast %cst_370 : f32 to vector<8x32xf32>
    %c0_371 = arith.constant 0 : index
    %c5_372 = arith.constant 5 : index
    %c0_373 = arith.constant 0 : index
    %368 = vector.load %arg9[%c0_371, %c5_372, %c0_373] : memref<4x18x34xbf16, #tpu.memory_space<vmem>>, vector<4x1x32xbf16>
    %369 = vector.shape_cast %368 : vector<4x1x32xbf16> to vector<4x32xbf16>
    %c0_374 = arith.constant 0 : index
    %c0_375 = arith.constant 0 : index
    %c0_376 = arith.constant 0 : index
    %370 = vector.load %arg5[%c0_374, %c0_375, %c0_376] : memref<9x8x4xbf16, #tpu.memory_space<vmem>>, vector<1x8x4xbf16>
    %371 = vector.shape_cast %370 : vector<1x8x4xbf16> to vector<8x4xbf16>
    %cst_377 = arith.constant dense<0.000000e+00> : vector<8x32xf32>
    %372 = tpu.matmul %371, %369, %cst_377 {dimension_numbers = #tpu.dot_dimension_numbers<[1], [0], [0], [1], [0, 0, 1, 1], [], []>} : vector<8x4xbf16>, vector<4x32xbf16>, vector<8x32xf32> -> vector<8x32xf32>
    %373 = arith.addf %367, %372 : vector<8x32xf32>
    %c0_378 = arith.constant 0 : index
    %c5_379 = arith.constant 5 : index
    %c1_380 = arith.constant 1 : index
    %374 = vector.load %arg9[%c0_378, %c5_379, %c1_380] : memref<4x18x34xbf16, #tpu.memory_space<vmem>>, vector<4x1x32xbf16>
    %375 = vector.shape_cast %374 : vector<4x1x32xbf16> to vector<4x32xbf16>
    %c1_381 = arith.constant 1 : index
    %c0_382 = arith.constant 0 : index
    %c0_383 = arith.constant 0 : index
    %376 = vector.load %arg5[%c1_381, %c0_382, %c0_383] : memref<9x8x4xbf16, #tpu.memory_space<vmem>>, vector<1x8x4xbf16>
    %377 = vector.shape_cast %376 : vector<1x8x4xbf16> to vector<8x4xbf16>
    %cst_384 = arith.constant dense<0.000000e+00> : vector<8x32xf32>
    %378 = tpu.matmul %377, %375, %cst_384 {dimension_numbers = #tpu.dot_dimension_numbers<[1], [0], [0], [1], [0, 0, 1, 1], [], []>} : vector<8x4xbf16>, vector<4x32xbf16>, vector<8x32xf32> -> vector<8x32xf32>
    %379 = arith.addf %373, %378 : vector<8x32xf32>
    %c0_385 = arith.constant 0 : index
    %c5_386 = arith.constant 5 : index
    %c2_387 = arith.constant 2 : index
    %380 = vector.load %arg9[%c0_385, %c5_386, %c2_387] : memref<4x18x34xbf16, #tpu.memory_space<vmem>>, vector<4x1x32xbf16>
    %381 = vector.shape_cast %380 : vector<4x1x32xbf16> to vector<4x32xbf16>
    %c2_388 = arith.constant 2 : index
    %c0_389 = arith.constant 0 : index
    %c0_390 = arith.constant 0 : index
    %382 = vector.load %arg5[%c2_388, %c0_389, %c0_390] : memref<9x8x4xbf16, #tpu.memory_space<vmem>>, vector<1x8x4xbf16>
    %383 = vector.shape_cast %382 : vector<1x8x4xbf16> to vector<8x4xbf16>
    %cst_391 = arith.constant dense<0.000000e+00> : vector<8x32xf32>
    %384 = tpu.matmul %383, %381, %cst_391 {dimension_numbers = #tpu.dot_dimension_numbers<[1], [0], [0], [1], [0, 0, 1, 1], [], []>} : vector<8x4xbf16>, vector<4x32xbf16>, vector<8x32xf32> -> vector<8x32xf32>
    %385 = arith.addf %379, %384 : vector<8x32xf32>
    %c0_392 = arith.constant 0 : index
    %c6_393 = arith.constant 6 : index
    %c0_394 = arith.constant 0 : index
    %386 = vector.load %arg9[%c0_392, %c6_393, %c0_394] : memref<4x18x34xbf16, #tpu.memory_space<vmem>>, vector<4x1x32xbf16>
    %387 = vector.shape_cast %386 : vector<4x1x32xbf16> to vector<4x32xbf16>
    %c3_395 = arith.constant 3 : index
    %c0_396 = arith.constant 0 : index
    %c0_397 = arith.constant 0 : index
    %388 = vector.load %arg5[%c3_395, %c0_396, %c0_397] : memref<9x8x4xbf16, #tpu.memory_space<vmem>>, vector<1x8x4xbf16>
    %389 = vector.shape_cast %388 : vector<1x8x4xbf16> to vector<8x4xbf16>
    %cst_398 = arith.constant dense<0.000000e+00> : vector<8x32xf32>
    %390 = tpu.matmul %389, %387, %cst_398 {dimension_numbers = #tpu.dot_dimension_numbers<[1], [0], [0], [1], [0, 0, 1, 1], [], []>} : vector<8x4xbf16>, vector<4x32xbf16>, vector<8x32xf32> -> vector<8x32xf32>
    %391 = arith.addf %385, %390 : vector<8x32xf32>
    %c0_399 = arith.constant 0 : index
    %c6_400 = arith.constant 6 : index
    %c1_401 = arith.constant 1 : index
    %392 = vector.load %arg9[%c0_399, %c6_400, %c1_401] : memref<4x18x34xbf16, #tpu.memory_space<vmem>>, vector<4x1x32xbf16>
    %393 = vector.shape_cast %392 : vector<4x1x32xbf16> to vector<4x32xbf16>
    %c4_402 = arith.constant 4 : index
    %c0_403 = arith.constant 0 : index
    %c0_404 = arith.constant 0 : index
    %394 = vector.load %arg5[%c4_402, %c0_403, %c0_404] : memref<9x8x4xbf16, #tpu.memory_space<vmem>>, vector<1x8x4xbf16>
    %395 = vector.shape_cast %394 : vector<1x8x4xbf16> to vector<8x4xbf16>
    %cst_405 = arith.constant dense<0.000000e+00> : vector<8x32xf32>
    %396 = tpu.matmul %395, %393, %cst_405 {dimension_numbers = #tpu.dot_dimension_numbers<[1], [0], [0], [1], [0, 0, 1, 1], [], []>} : vector<8x4xbf16>, vector<4x32xbf16>, vector<8x32xf32> -> vector<8x32xf32>
    %397 = arith.addf %391, %396 : vector<8x32xf32>
    %c0_406 = arith.constant 0 : index
    %c6_407 = arith.constant 6 : index
    %c2_408 = arith.constant 2 : index
    %398 = vector.load %arg9[%c0_406, %c6_407, %c2_408] : memref<4x18x34xbf16, #tpu.memory_space<vmem>>, vector<4x1x32xbf16>
    %399 = vector.shape_cast %398 : vector<4x1x32xbf16> to vector<4x32xbf16>
    %c5_409 = arith.constant 5 : index
    %c0_410 = arith.constant 0 : index
    %c0_411 = arith.constant 0 : index
    %400 = vector.load %arg5[%c5_409, %c0_410, %c0_411] : memref<9x8x4xbf16, #tpu.memory_space<vmem>>, vector<1x8x4xbf16>
    %401 = vector.shape_cast %400 : vector<1x8x4xbf16> to vector<8x4xbf16>
    %cst_412 = arith.constant dense<0.000000e+00> : vector<8x32xf32>
    %402 = tpu.matmul %401, %399, %cst_412 {dimension_numbers = #tpu.dot_dimension_numbers<[1], [0], [0], [1], [0, 0, 1, 1], [], []>} : vector<8x4xbf16>, vector<4x32xbf16>, vector<8x32xf32> -> vector<8x32xf32>
    %403 = arith.addf %397, %402 : vector<8x32xf32>
    %c0_413 = arith.constant 0 : index
    %c7_414 = arith.constant 7 : index
    %c0_415 = arith.constant 0 : index
    %404 = vector.load %arg9[%c0_413, %c7_414, %c0_415] : memref<4x18x34xbf16, #tpu.memory_space<vmem>>, vector<4x1x32xbf16>
    %405 = vector.shape_cast %404 : vector<4x1x32xbf16> to vector<4x32xbf16>
    %c6_416 = arith.constant 6 : index
    %c0_417 = arith.constant 0 : index
    %c0_418 = arith.constant 0 : index
    %406 = vector.load %arg5[%c6_416, %c0_417, %c0_418] : memref<9x8x4xbf16, #tpu.memory_space<vmem>>, vector<1x8x4xbf16>
    %407 = vector.shape_cast %406 : vector<1x8x4xbf16> to vector<8x4xbf16>
    %cst_419 = arith.constant dense<0.000000e+00> : vector<8x32xf32>
    %408 = tpu.matmul %407, %405, %cst_419 {dimension_numbers = #tpu.dot_dimension_numbers<[1], [0], [0], [1], [0, 0, 1, 1], [], []>} : vector<8x4xbf16>, vector<4x32xbf16>, vector<8x32xf32> -> vector<8x32xf32>
    %409 = arith.addf %403, %408 : vector<8x32xf32>
    %c0_420 = arith.constant 0 : index
    %c7_421 = arith.constant 7 : index
    %c1_422 = arith.constant 1 : index
    %410 = vector.load %arg9[%c0_420, %c7_421, %c1_422] : memref<4x18x34xbf16, #tpu.memory_space<vmem>>, vector<4x1x32xbf16>
    %411 = vector.shape_cast %410 : vector<4x1x32xbf16> to vector<4x32xbf16>
    %c7_423 = arith.constant 7 : index
    %c0_424 = arith.constant 0 : index
    %c0_425 = arith.constant 0 : index
    %412 = vector.load %arg5[%c7_423, %c0_424, %c0_425] : memref<9x8x4xbf16, #tpu.memory_space<vmem>>, vector<1x8x4xbf16>
    %413 = vector.shape_cast %412 : vector<1x8x4xbf16> to vector<8x4xbf16>
    %cst_426 = arith.constant dense<0.000000e+00> : vector<8x32xf32>
    %414 = tpu.matmul %413, %411, %cst_426 {dimension_numbers = #tpu.dot_dimension_numbers<[1], [0], [0], [1], [0, 0, 1, 1], [], []>} : vector<8x4xbf16>, vector<4x32xbf16>, vector<8x32xf32> -> vector<8x32xf32>
    %415 = arith.addf %409, %414 : vector<8x32xf32>
    %c0_427 = arith.constant 0 : index
    %c7_428 = arith.constant 7 : index
    %c2_429 = arith.constant 2 : index
    %416 = vector.load %arg9[%c0_427, %c7_428, %c2_429] : memref<4x18x34xbf16, #tpu.memory_space<vmem>>, vector<4x1x32xbf16>
    %417 = vector.shape_cast %416 : vector<4x1x32xbf16> to vector<4x32xbf16>
    %c8_430 = arith.constant 8 : index
    %c0_431 = arith.constant 0 : index
    %c0_432 = arith.constant 0 : index
    %418 = vector.load %arg5[%c8_430, %c0_431, %c0_432] : memref<9x8x4xbf16, #tpu.memory_space<vmem>>, vector<1x8x4xbf16>
    %419 = vector.shape_cast %418 : vector<1x8x4xbf16> to vector<8x4xbf16>
    %cst_433 = arith.constant dense<0.000000e+00> : vector<8x32xf32>
    %420 = tpu.matmul %419, %417, %cst_433 {dimension_numbers = #tpu.dot_dimension_numbers<[1], [0], [0], [1], [0, 0, 1, 1], [], []>} : vector<8x4xbf16>, vector<4x32xbf16>, vector<8x32xf32> -> vector<8x32xf32>
    %421 = arith.addf %415, %420 : vector<8x32xf32>
    %422 = vector.broadcast %45 : vector<8x1xf32> to vector<8x32xf32>
    %423 = arith.mulf %421, %422 : vector<8x32xf32>
    %424 = vector.broadcast %46 : vector<8x1xf32> to vector<8x32xf32>
    %425 = arith.addf %423, %424 : vector<8x32xf32>
    %cst_434 = arith.constant 0.000000e+00 : f32
    %426 = vector.broadcast %cst_434 : f32 to vector<8x32xf32>
    %427 = arith.maximumf %425, %426 : vector<8x32xf32>
    %c0_435 = arith.constant 0 : index
    %c0_436 = arith.constant 0 : index
    %c5_437 = arith.constant 5 : index
    %c0_438 = arith.constant 0 : index
    %428 = vector.load %arg8[%c0_435, %c0_436, %c5_437, %c0_438] : memref<1x8x16x32xf32, #tpu.memory_space<vmem>>, vector<1x8x1x32xf32>
    %429 = vector.shape_cast %428 : vector<1x8x1x32xf32> to vector<8x32xf32>
    %430 = vector.shape_cast %427 : vector<8x32xf32> to vector<1x8x1x32xf32>
    tpu.vector_store %arg8[%c0_435, %c0_436, %c5_437, %c0_438], %430 {strides = array<i32>} : memref<1x8x16x32xf32, #tpu.memory_space<vmem>>, vector<1x8x1x32xf32>,
    %cst_439 = arith.constant 0.000000e+00 : f32
    %431 = vector.broadcast %cst_439 : f32 to vector<8x32xf32>
    %c0_440 = arith.constant 0 : index
    %c6_441 = arith.constant 6 : index
    %c0_442 = arith.constant 0 : index
    %432 = vector.load %arg9[%c0_440, %c6_441, %c0_442] : memref<4x18x34xbf16, #tpu.memory_space<vmem>>, vector<4x1x32xbf16>
    %433 = vector.shape_cast %432 : vector<4x1x32xbf16> to vector<4x32xbf16>
    %c0_443 = arith.constant 0 : index
    %c0_444 = arith.constant 0 : index
    %c0_445 = arith.constant 0 : index
    %434 = vector.load %arg5[%c0_443, %c0_444, %c0_445] : memref<9x8x4xbf16, #tpu.memory_space<vmem>>, vector<1x8x4xbf16>
    %435 = vector.shape_cast %434 : vector<1x8x4xbf16> to vector<8x4xbf16>
    %cst_446 = arith.constant dense<0.000000e+00> : vector<8x32xf32>
    %436 = tpu.matmul %435, %433, %cst_446 {dimension_numbers = #tpu.dot_dimension_numbers<[1], [0], [0], [1], [0, 0, 1, 1], [], []>} : vector<8x4xbf16>, vector<4x32xbf16>, vector<8x32xf32> -> vector<8x32xf32>
    %437 = arith.addf %431, %436 : vector<8x32xf32>
    %c0_447 = arith.constant 0 : index
    %c6_448 = arith.constant 6 : index
    %c1_449 = arith.constant 1 : index
    %438 = vector.load %arg9[%c0_447, %c6_448, %c1_449] : memref<4x18x34xbf16, #tpu.memory_space<vmem>>, vector<4x1x32xbf16>
    %439 = vector.shape_cast %438 : vector<4x1x32xbf16> to vector<4x32xbf16>
    %c1_450 = arith.constant 1 : index
    %c0_451 = arith.constant 0 : index
    %c0_452 = arith.constant 0 : index
    %440 = vector.load %arg5[%c1_450, %c0_451, %c0_452] : memref<9x8x4xbf16, #tpu.memory_space<vmem>>, vector<1x8x4xbf16>
    %441 = vector.shape_cast %440 : vector<1x8x4xbf16> to vector<8x4xbf16>
    %cst_453 = arith.constant dense<0.000000e+00> : vector<8x32xf32>
    %442 = tpu.matmul %441, %439, %cst_453 {dimension_numbers = #tpu.dot_dimension_numbers<[1], [0], [0], [1], [0, 0, 1, 1], [], []>} : vector<8x4xbf16>, vector<4x32xbf16>, vector<8x32xf32> -> vector<8x32xf32>
    %443 = arith.addf %437, %442 : vector<8x32xf32>
    %c0_454 = arith.constant 0 : index
    %c6_455 = arith.constant 6 : index
    %c2_456 = arith.constant 2 : index
    %444 = vector.load %arg9[%c0_454, %c6_455, %c2_456] : memref<4x18x34xbf16, #tpu.memory_space<vmem>>, vector<4x1x32xbf16>
    %445 = vector.shape_cast %444 : vector<4x1x32xbf16> to vector<4x32xbf16>
    %c2_457 = arith.constant 2 : index
    %c0_458 = arith.constant 0 : index
    %c0_459 = arith.constant 0 : index
    %446 = vector.load %arg5[%c2_457, %c0_458, %c0_459] : memref<9x8x4xbf16, #tpu.memory_space<vmem>>, vector<1x8x4xbf16>
    %447 = vector.shape_cast %446 : vector<1x8x4xbf16> to vector<8x4xbf16>
    %cst_460 = arith.constant dense<0.000000e+00> : vector<8x32xf32>
    %448 = tpu.matmul %447, %445, %cst_460 {dimension_numbers = #tpu.dot_dimension_numbers<[1], [0], [0], [1], [0, 0, 1, 1], [], []>} : vector<8x4xbf16>, vector<4x32xbf16>, vector<8x32xf32> -> vector<8x32xf32>
    %449 = arith.addf %443, %448 : vector<8x32xf32>
    %c0_461 = arith.constant 0 : index
    %c7_462 = arith.constant 7 : index
    %c0_463 = arith.constant 0 : index
    %450 = vector.load %arg9[%c0_461, %c7_462, %c0_463] : memref<4x18x34xbf16, #tpu.memory_space<vmem>>, vector<4x1x32xbf16>
    %451 = vector.shape_cast %450 : vector<4x1x32xbf16> to vector<4x32xbf16>
    %c3_464 = arith.constant 3 : index
    %c0_465 = arith.constant 0 : index
    %c0_466 = arith.constant 0 : index
    %452 = vector.load %arg5[%c3_464, %c0_465, %c0_466] : memref<9x8x4xbf16, #tpu.memory_space<vmem>>, vector<1x8x4xbf16>
    %453 = vector.shape_cast %452 : vector<1x8x4xbf16> to vector<8x4xbf16>
    %cst_467 = arith.constant dense<0.000000e+00> : vector<8x32xf32>
    %454 = tpu.matmul %453, %451, %cst_467 {dimension_numbers = #tpu.dot_dimension_numbers<[1], [0], [0], [1], [0, 0, 1, 1], [], []>} : vector<8x4xbf16>, vector<4x32xbf16>, vector<8x32xf32> -> vector<8x32xf32>
    %455 = arith.addf %449, %454 : vector<8x32xf32>
    %c0_468 = arith.constant 0 : index
    %c7_469 = arith.constant 7 : index
    %c1_470 = arith.constant 1 : index
    %456 = vector.load %arg9[%c0_468, %c7_469, %c1_470] : memref<4x18x34xbf16, #tpu.memory_space<vmem>>, vector<4x1x32xbf16>
    %457 = vector.shape_cast %456 : vector<4x1x32xbf16> to vector<4x32xbf16>
    %c4_471 = arith.constant 4 : index
    %c0_472 = arith.constant 0 : index
    %c0_473 = arith.constant 0 : index
    %458 = vector.load %arg5[%c4_471, %c0_472, %c0_473] : memref<9x8x4xbf16, #tpu.memory_space<vmem>>, vector<1x8x4xbf16>
    %459 = vector.shape_cast %458 : vector<1x8x4xbf16> to vector<8x4xbf16>
    %cst_474 = arith.constant dense<0.000000e+00> : vector<8x32xf32>
    %460 = tpu.matmul %459, %457, %cst_474 {dimension_numbers = #tpu.dot_dimension_numbers<[1], [0], [0], [1], [0, 0, 1, 1], [], []>} : vector<8x4xbf16>, vector<4x32xbf16>, vector<8x32xf32> -> vector<8x32xf32>
    %461 = arith.addf %455, %460 : vector<8x32xf32>
    %c0_475 = arith.constant 0 : index
    %c7_476 = arith.constant 7 : index
    %c2_477 = arith.constant 2 : index
    %462 = vector.load %arg9[%c0_475, %c7_476, %c2_477] : memref<4x18x34xbf16, #tpu.memory_space<vmem>>, vector<4x1x32xbf16>
    %463 = vector.shape_cast %462 : vector<4x1x32xbf16> to vector<4x32xbf16>
    %c5_478 = arith.constant 5 : index
    %c0_479 = arith.constant 0 : index
    %c0_480 = arith.constant 0 : index
    %464 = vector.load %arg5[%c5_478, %c0_479, %c0_480] : memref<9x8x4xbf16, #tpu.memory_space<vmem>>, vector<1x8x4xbf16>
    %465 = vector.shape_cast %464 : vector<1x8x4xbf16> to vector<8x4xbf16>
    %cst_481 = arith.constant dense<0.000000e+00> : vector<8x32xf32>
    %466 = tpu.matmul %465, %463, %cst_481 {dimension_numbers = #tpu.dot_dimension_numbers<[1], [0], [0], [1], [0, 0, 1, 1], [], []>} : vector<8x4xbf16>, vector<4x32xbf16>, vector<8x32xf32> -> vector<8x32xf32>
    %467 = arith.addf %461, %466 : vector<8x32xf32>
    %c0_482 = arith.constant 0 : index
    %c8_483 = arith.constant 8 : index
    %c0_484 = arith.constant 0 : index
    %468 = vector.load %arg9[%c0_482, %c8_483, %c0_484] : memref<4x18x34xbf16, #tpu.memory_space<vmem>>, vector<4x1x32xbf16>
    %469 = vector.shape_cast %468 : vector<4x1x32xbf16> to vector<4x32xbf16>
    %c6_485 = arith.constant 6 : index
    %c0_486 = arith.constant 0 : index
    %c0_487 = arith.constant 0 : index
    %470 = vector.load %arg5[%c6_485, %c0_486, %c0_487] : memref<9x8x4xbf16, #tpu.memory_space<vmem>>, vector<1x8x4xbf16>
    %471 = vector.shape_cast %470 : vector<1x8x4xbf16> to vector<8x4xbf16>
    %cst_488 = arith.constant dense<0.000000e+00> : vector<8x32xf32>
    %472 = tpu.matmul %471, %469, %cst_488 {dimension_numbers = #tpu.dot_dimension_numbers<[1], [0], [0], [1], [0, 0, 1, 1], [], []>} : vector<8x4xbf16>, vector<4x32xbf16>, vector<8x32xf32> -> vector<8x32xf32>
    %473 = arith.addf %467, %472 : vector<8x32xf32>
    %c0_489 = arith.constant 0 : index
    %c8_490 = arith.constant 8 : index
    %c1_491 = arith.constant 1 : index
    %474 = vector.load %arg9[%c0_489, %c8_490, %c1_491] : memref<4x18x34xbf16, #tpu.memory_space<vmem>>, vector<4x1x32xbf16>
    %475 = vector.shape_cast %474 : vector<4x1x32xbf16> to vector<4x32xbf16>
    %c7_492 = arith.constant 7 : index
    %c0_493 = arith.constant 0 : index
    %c0_494 = arith.constant 0 : index
    %476 = vector.load %arg5[%c7_492, %c0_493, %c0_494] : memref<9x8x4xbf16, #tpu.memory_space<vmem>>, vector<1x8x4xbf16>
    %477 = vector.shape_cast %476 : vector<1x8x4xbf16> to vector<8x4xbf16>
    %cst_495 = arith.constant dense<0.000000e+00> : vector<8x32xf32>
    %478 = tpu.matmul %477, %475, %cst_495 {dimension_numbers = #tpu.dot_dimension_numbers<[1], [0], [0], [1], [0, 0, 1, 1], [], []>} : vector<8x4xbf16>, vector<4x32xbf16>, vector<8x32xf32> -> vector<8x32xf32>
    %479 = arith.addf %473, %478 : vector<8x32xf32>
    %c0_496 = arith.constant 0 : index
    %c8_497 = arith.constant 8 : index
    %c2_498 = arith.constant 2 : index
    %480 = vector.load %arg9[%c0_496, %c8_497, %c2_498] : memref<4x18x34xbf16, #tpu.memory_space<vmem>>, vector<4x1x32xbf16>
    %481 = vector.shape_cast %480 : vector<4x1x32xbf16> to vector<4x32xbf16>
    %c8_499 = arith.constant 8 : index
    %c0_500 = arith.constant 0 : index
    %c0_501 = arith.constant 0 : index
    %482 = vector.load %arg5[%c8_499, %c0_500, %c0_501] : memref<9x8x4xbf16, #tpu.memory_space<vmem>>, vector<1x8x4xbf16>
    %483 = vector.shape_cast %482 : vector<1x8x4xbf16> to vector<8x4xbf16>
    %cst_502 = arith.constant dense<0.000000e+00> : vector<8x32xf32>
    %484 = tpu.matmul %483, %481, %cst_502 {dimension_numbers = #tpu.dot_dimension_numbers<[1], [0], [0], [1], [0, 0, 1, 1], [], []>} : vector<8x4xbf16>, vector<4x32xbf16>, vector<8x32xf32> -> vector<8x32xf32>
    %485 = arith.addf %479, %484 : vector<8x32xf32>
    %486 = vector.broadcast %45 : vector<8x1xf32> to vector<8x32xf32>
    %487 = arith.mulf %485, %486 : vector<8x32xf32>
    %488 = vector.broadcast %46 : vector<8x1xf32> to vector<8x32xf32>
    %489 = arith.addf %487, %488 : vector<8x32xf32>
    %cst_503 = arith.constant 0.000000e+00 : f32
    %490 = vector.broadcast %cst_503 : f32 to vector<8x32xf32>
    %491 = arith.maximumf %489, %490 : vector<8x32xf32>
    %c0_504 = arith.constant 0 : index
    %c0_505 = arith.constant 0 : index
    %c6_506 = arith.constant 6 : index
    %c0_507 = arith.constant 0 : index
    %492 = vector.load %arg8[%c0_504, %c0_505, %c6_506, %c0_507] : memref<1x8x16x32xf32, #tpu.memory_space<vmem>>, vector<1x8x1x32xf32>
    %493 = vector.shape_cast %492 : vector<1x8x1x32xf32> to vector<8x32xf32>
    %494 = vector.shape_cast %491 : vector<8x32xf32> to vector<1x8x1x32xf32>
    tpu.vector_store %arg8[%c0_504, %c0_505, %c6_506, %c0_507], %494 {strides = array<i32>} : memref<1x8x16x32xf32, #tpu.memory_space<vmem>>, vector<1x8x1x32xf32>,
    %cst_508 = arith.constant 0.000000e+00 : f32
    %495 = vector.broadcast %cst_508 : f32 to vector<8x32xf32>
    %c0_509 = arith.constant 0 : index
    %c7_510 = arith.constant 7 : index
    %c0_511 = arith.constant 0 : index
    %496 = vector.load %arg9[%c0_509, %c7_510, %c0_511] : memref<4x18x34xbf16, #tpu.memory_space<vmem>>, vector<4x1x32xbf16>
    %497 = vector.shape_cast %496 : vector<4x1x32xbf16> to vector<4x32xbf16>
    %c0_512 = arith.constant 0 : index
    %c0_513 = arith.constant 0 : index
    %c0_514 = arith.constant 0 : index
    %498 = vector.load %arg5[%c0_512, %c0_513, %c0_514] : memref<9x8x4xbf16, #tpu.memory_space<vmem>>, vector<1x8x4xbf16>
    %499 = vector.shape_cast %498 : vector<1x8x4xbf16> to vector<8x4xbf16>
    %cst_515 = arith.constant dense<0.000000e+00> : vector<8x32xf32>
    %500 = tpu.matmul %499, %497, %cst_515 {dimension_numbers = #tpu.dot_dimension_numbers<[1], [0], [0], [1], [0, 0, 1, 1], [], []>} : vector<8x4xbf16>, vector<4x32xbf16>, vector<8x32xf32> -> vector<8x32xf32>
    %501 = arith.addf %495, %500 : vector<8x32xf32>
    %c0_516 = arith.constant 0 : index
    %c7_517 = arith.constant 7 : index
    %c1_518 = arith.constant 1 : index
    %502 = vector.load %arg9[%c0_516, %c7_517, %c1_518] : memref<4x18x34xbf16, #tpu.memory_space<vmem>>, vector<4x1x32xbf16>
    %503 = vector.shape_cast %502 : vector<4x1x32xbf16> to vector<4x32xbf16>
    %c1_519 = arith.constant 1 : index
    %c0_520 = arith.constant 0 : index
    %c0_521 = arith.constant 0 : index
    %504 = vector.load %arg5[%c1_519, %c0_520, %c0_521] : memref<9x8x4xbf16, #tpu.memory_space<vmem>>, vector<1x8x4xbf16>
    %505 = vector.shape_cast %504 : vector<1x8x4xbf16> to vector<8x4xbf16>
    %cst_522 = arith.constant dense<0.000000e+00> : vector<8x32xf32>
    %506 = tpu.matmul %505, %503, %cst_522 {dimension_numbers = #tpu.dot_dimension_numbers<[1], [0], [0], [1], [0, 0, 1, 1], [], []>} : vector<8x4xbf16>, vector<4x32xbf16>, vector<8x32xf32> -> vector<8x32xf32>
    %507 = arith.addf %501, %506 : vector<8x32xf32>
    %c0_523 = arith.constant 0 : index
    %c7_524 = arith.constant 7 : index
    %c2_525 = arith.constant 2 : index
    %508 = vector.load %arg9[%c0_523, %c7_524, %c2_525] : memref<4x18x34xbf16, #tpu.memory_space<vmem>>, vector<4x1x32xbf16>
    %509 = vector.shape_cast %508 : vector<4x1x32xbf16> to vector<4x32xbf16>
    %c2_526 = arith.constant 2 : index
    %c0_527 = arith.constant 0 : index
    %c0_528 = arith.constant 0 : index
    %510 = vector.load %arg5[%c2_526, %c0_527, %c0_528] : memref<9x8x4xbf16, #tpu.memory_space<vmem>>, vector<1x8x4xbf16>
    %511 = vector.shape_cast %510 : vector<1x8x4xbf16> to vector<8x4xbf16>
    %cst_529 = arith.constant dense<0.000000e+00> : vector<8x32xf32>
    %512 = tpu.matmul %511, %509, %cst_529 {dimension_numbers = #tpu.dot_dimension_numbers<[1], [0], [0], [1], [0, 0, 1, 1], [], []>} : vector<8x4xbf16>, vector<4x32xbf16>, vector<8x32xf32> -> vector<8x32xf32>
    %513 = arith.addf %507, %512 : vector<8x32xf32>
    %c0_530 = arith.constant 0 : index
    %c8_531 = arith.constant 8 : index
    %c0_532 = arith.constant 0 : index
    %514 = vector.load %arg9[%c0_530, %c8_531, %c0_532] : memref<4x18x34xbf16, #tpu.memory_space<vmem>>, vector<4x1x32xbf16>
    %515 = vector.shape_cast %514 : vector<4x1x32xbf16> to vector<4x32xbf16>
    %c3_533 = arith.constant 3 : index
    %c0_534 = arith.constant 0 : index
    %c0_535 = arith.constant 0 : index
    %516 = vector.load %arg5[%c3_533, %c0_534, %c0_535] : memref<9x8x4xbf16, #tpu.memory_space<vmem>>, vector<1x8x4xbf16>
    %517 = vector.shape_cast %516 : vector<1x8x4xbf16> to vector<8x4xbf16>
    %cst_536 = arith.constant dense<0.000000e+00> : vector<8x32xf32>
    %518 = tpu.matmul %517, %515, %cst_536 {dimension_numbers = #tpu.dot_dimension_numbers<[1], [0], [0], [1], [0, 0, 1, 1], [], []>} : vector<8x4xbf16>, vector<4x32xbf16>, vector<8x32xf32> -> vector<8x32xf32>
    %519 = arith.addf %513, %518 : vector<8x32xf32>
    %c0_537 = arith.constant 0 : index
    %c8_538 = arith.constant 8 : index
    %c1_539 = arith.constant 1 : index
    %520 = vector.load %arg9[%c0_537, %c8_538, %c1_539] : memref<4x18x34xbf16, #tpu.memory_space<vmem>>, vector<4x1x32xbf16>
    %521 = vector.shape_cast %520 : vector<4x1x32xbf16> to vector<4x32xbf16>
    %c4_540 = arith.constant 4 : index
    %c0_541 = arith.constant 0 : index
    %c0_542 = arith.constant 0 : index
    %522 = vector.load %arg5[%c4_540, %c0_541, %c0_542] : memref<9x8x4xbf16, #tpu.memory_space<vmem>>, vector<1x8x4xbf16>
    %523 = vector.shape_cast %522 : vector<1x8x4xbf16> to vector<8x4xbf16>
    %cst_543 = arith.constant dense<0.000000e+00> : vector<8x32xf32>
    %524 = tpu.matmul %523, %521, %cst_543 {dimension_numbers = #tpu.dot_dimension_numbers<[1], [0], [0], [1], [0, 0, 1, 1], [], []>} : vector<8x4xbf16>, vector<4x32xbf16>, vector<8x32xf32> -> vector<8x32xf32>
    %525 = arith.addf %519, %524 : vector<8x32xf32>
    %c0_544 = arith.constant 0 : index
    %c8_545 = arith.constant 8 : index
    %c2_546 = arith.constant 2 : index
    %526 = vector.load %arg9[%c0_544, %c8_545, %c2_546] : memref<4x18x34xbf16, #tpu.memory_space<vmem>>, vector<4x1x32xbf16>
    %527 = vector.shape_cast %526 : vector<4x1x32xbf16> to vector<4x32xbf16>
    %c5_547 = arith.constant 5 : index
    %c0_548 = arith.constant 0 : index
    %c0_549 = arith.constant 0 : index
    %528 = vector.load %arg5[%c5_547, %c0_548, %c0_549] : memref<9x8x4xbf16, #tpu.memory_space<vmem>>, vector<1x8x4xbf16>
    %529 = vector.shape_cast %528 : vector<1x8x4xbf16> to vector<8x4xbf16>
    %cst_550 = arith.constant dense<0.000000e+00> : vector<8x32xf32>
    %530 = tpu.matmul %529, %527, %cst_550 {dimension_numbers = #tpu.dot_dimension_numbers<[1], [0], [0], [1], [0, 0, 1, 1], [], []>} : vector<8x4xbf16>, vector<4x32xbf16>, vector<8x32xf32> -> vector<8x32xf32>
    %531 = arith.addf %525, %530 : vector<8x32xf32>
    %c0_551 = arith.constant 0 : index
    %c9 = arith.constant 9 : index
    %c0_552 = arith.constant 0 : index
    %532 = vector.load %arg9[%c0_551, %c9, %c0_552] : memref<4x18x34xbf16, #tpu.memory_space<vmem>>, vector<4x1x32xbf16>
    %533 = vector.shape_cast %532 : vector<4x1x32xbf16> to vector<4x32xbf16>
    %c6_553 = arith.constant 6 : index
    %c0_554 = arith.constant 0 : index
    %c0_555 = arith.constant 0 : index
    %534 = vector.load %arg5[%c6_553, %c0_554, %c0_555] : memref<9x8x4xbf16, #tpu.memory_space<vmem>>, vector<1x8x4xbf16>
    %535 = vector.shape_cast %534 : vector<1x8x4xbf16> to vector<8x4xbf16>
    %cst_556 = arith.constant dense<0.000000e+00> : vector<8x32xf32>
    %536 = tpu.matmul %535, %533, %cst_556 {dimension_numbers = #tpu.dot_dimension_numbers<[1], [0], [0], [1], [0, 0, 1, 1], [], []>} : vector<8x4xbf16>, vector<4x32xbf16>, vector<8x32xf32> -> vector<8x32xf32>
    %537 = arith.addf %531, %536 : vector<8x32xf32>
    %c0_557 = arith.constant 0 : index
    %c9_558 = arith.constant 9 : index
    %c1_559 = arith.constant 1 : index
    %538 = vector.load %arg9[%c0_557, %c9_558, %c1_559] : memref<4x18x34xbf16, #tpu.memory_space<vmem>>, vector<4x1x32xbf16>
    %539 = vector.shape_cast %538 : vector<4x1x32xbf16> to vector<4x32xbf16>
    %c7_560 = arith.constant 7 : index
    %c0_561 = arith.constant 0 : index
    %c0_562 = arith.constant 0 : index
    %540 = vector.load %arg5[%c7_560, %c0_561, %c0_562] : memref<9x8x4xbf16, #tpu.memory_space<vmem>>, vector<1x8x4xbf16>
    %541 = vector.shape_cast %540 : vector<1x8x4xbf16> to vector<8x4xbf16>
    %cst_563 = arith.constant dense<0.000000e+00> : vector<8x32xf32>
    %542 = tpu.matmul %541, %539, %cst_563 {dimension_numbers = #tpu.dot_dimension_numbers<[1], [0], [0], [1], [0, 0, 1, 1], [], []>} : vector<8x4xbf16>, vector<4x32xbf16>, vector<8x32xf32> -> vector<8x32xf32>
    %543 = arith.addf %537, %542 : vector<8x32xf32>
    %c0_564 = arith.constant 0 : index
    %c9_565 = arith.constant 9 : index
    %c2_566 = arith.constant 2 : index
    %544 = vector.load %arg9[%c0_564, %c9_565, %c2_566] : memref<4x18x34xbf16, #tpu.memory_space<vmem>>, vector<4x1x32xbf16>
    %545 = vector.shape_cast %544 : vector<4x1x32xbf16> to vector<4x32xbf16>
    %c8_567 = arith.constant 8 : index
    %c0_568 = arith.constant 0 : index
    %c0_569 = arith.constant 0 : index
    %546 = vector.load %arg5[%c8_567, %c0_568, %c0_569] : memref<9x8x4xbf16, #tpu.memory_space<vmem>>, vector<1x8x4xbf16>
    %547 = vector.shape_cast %546 : vector<1x8x4xbf16> to vector<8x4xbf16>
    %cst_570 = arith.constant dense<0.000000e+00> : vector<8x32xf32>
    %548 = tpu.matmul %547, %545, %cst_570 {dimension_numbers = #tpu.dot_dimension_numbers<[1], [0], [0], [1], [0, 0, 1, 1], [], []>} : vector<8x4xbf16>, vector<4x32xbf16>, vector<8x32xf32> -> vector<8x32xf32>
    %549 = arith.addf %543, %548 : vector<8x32xf32>
    %550 = vector.broadcast %45 : vector<8x1xf32> to vector<8x32xf32>
    %551 = arith.mulf %549, %550 : vector<8x32xf32>
    %552 = vector.broadcast %46 : vector<8x1xf32> to vector<8x32xf32>
    %553 = arith.addf %551, %552 : vector<8x32xf32>
    %cst_571 = arith.constant 0.000000e+00 : f32
    %554 = vector.broadcast %cst_571 : f32 to vector<8x32xf32>
    %555 = arith.maximumf %553, %554 : vector<8x32xf32>
    %c0_572 = arith.constant 0 : index
    %c0_573 = arith.constant 0 : index
    %c7_574 = arith.constant 7 : index
    %c0_575 = arith.constant 0 : index
    %556 = vector.load %arg8[%c0_572, %c0_573, %c7_574, %c0_575] : memref<1x8x16x32xf32, #tpu.memory_space<vmem>>, vector<1x8x1x32xf32>
    %557 = vector.shape_cast %556 : vector<1x8x1x32xf32> to vector<8x32xf32>
    %558 = vector.shape_cast %555 : vector<8x32xf32> to vector<1x8x1x32xf32>
    tpu.vector_store %arg8[%c0_572, %c0_573, %c7_574, %c0_575], %558 {strides = array<i32>} : memref<1x8x16x32xf32, #tpu.memory_space<vmem>>, vector<1x8x1x32xf32>,
    %cst_576 = arith.constant 0.000000e+00 : f32
    %559 = vector.broadcast %cst_576 : f32 to vector<8x32xf32>
    %c0_577 = arith.constant 0 : index
    %c8_578 = arith.constant 8 : index
    %c0_579 = arith.constant 0 : index
    %560 = vector.load %arg9[%c0_577, %c8_578, %c0_579] : memref<4x18x34xbf16, #tpu.memory_space<vmem>>, vector<4x1x32xbf16>
    %561 = vector.shape_cast %560 : vector<4x1x32xbf16> to vector<4x32xbf16>
    %c0_580 = arith.constant 0 : index
    %c0_581 = arith.constant 0 : index
    %c0_582 = arith.constant 0 : index
    %562 = vector.load %arg5[%c0_580, %c0_581, %c0_582] : memref<9x8x4xbf16, #tpu.memory_space<vmem>>, vector<1x8x4xbf16>
    %563 = vector.shape_cast %562 : vector<1x8x4xbf16> to vector<8x4xbf16>
    %cst_583 = arith.constant dense<0.000000e+00> : vector<8x32xf32>
    %564 = tpu.matmul %563, %561, %cst_583 {dimension_numbers = #tpu.dot_dimension_numbers<[1], [0], [0], [1], [0, 0, 1, 1], [], []>} : vector<8x4xbf16>, vector<4x32xbf16>, vector<8x32xf32> -> vector<8x32xf32>
    %565 = arith.addf %559, %564 : vector<8x32xf32>
    %c0_584 = arith.constant 0 : index
    %c8_585 = arith.constant 8 : index
    %c1_586 = arith.constant 1 : index
    %566 = vector.load %arg9[%c0_584, %c8_585, %c1_586] : memref<4x18x34xbf16, #tpu.memory_space<vmem>>, vector<4x1x32xbf16>
    %567 = vector.shape_cast %566 : vector<4x1x32xbf16> to vector<4x32xbf16>
    %c1_587 = arith.constant 1 : index
    %c0_588 = arith.constant 0 : index
    %c0_589 = arith.constant 0 : index
    %568 = vector.load %arg5[%c1_587, %c0_588, %c0_589] : memref<9x8x4xbf16, #tpu.memory_space<vmem>>, vector<1x8x4xbf16>
    %569 = vector.shape_cast %568 : vector<1x8x4xbf16> to vector<8x4xbf16>
    %cst_590 = arith.constant dense<0.000000e+00> : vector<8x32xf32>
    %570 = tpu.matmul %569, %567, %cst_590 {dimension_numbers = #tpu.dot_dimension_numbers<[1], [0], [0], [1], [0, 0, 1, 1], [], []>} : vector<8x4xbf16>, vector<4x32xbf16>, vector<8x32xf32> -> vector<8x32xf32>
    %571 = arith.addf %565, %570 : vector<8x32xf32>
    %c0_591 = arith.constant 0 : index
    %c8_592 = arith.constant 8 : index
    %c2_593 = arith.constant 2 : index
    %572 = vector.load %arg9[%c0_591, %c8_592, %c2_593] : memref<4x18x34xbf16, #tpu.memory_space<vmem>>, vector<4x1x32xbf16>
    %573 = vector.shape_cast %572 : vector<4x1x32xbf16> to vector<4x32xbf16>
    %c2_594 = arith.constant 2 : index
    %c0_595 = arith.constant 0 : index
    %c0_596 = arith.constant 0 : index
    %574 = vector.load %arg5[%c2_594, %c0_595, %c0_596] : memref<9x8x4xbf16, #tpu.memory_space<vmem>>, vector<1x8x4xbf16>
    %575 = vector.shape_cast %574 : vector<1x8x4xbf16> to vector<8x4xbf16>
    %cst_597 = arith.constant dense<0.000000e+00> : vector<8x32xf32>
    %576 = tpu.matmul %575, %573, %cst_597 {dimension_numbers = #tpu.dot_dimension_numbers<[1], [0], [0], [1], [0, 0, 1, 1], [], []>} : vector<8x4xbf16>, vector<4x32xbf16>, vector<8x32xf32> -> vector<8x32xf32>
    %577 = arith.addf %571, %576 : vector<8x32xf32>
    %c0_598 = arith.constant 0 : index
    %c9_599 = arith.constant 9 : index
    %c0_600 = arith.constant 0 : index
    %578 = vector.load %arg9[%c0_598, %c9_599, %c0_600] : memref<4x18x34xbf16, #tpu.memory_space<vmem>>, vector<4x1x32xbf16>
    %579 = vector.shape_cast %578 : vector<4x1x32xbf16> to vector<4x32xbf16>
    %c3_601 = arith.constant 3 : index
    %c0_602 = arith.constant 0 : index
    %c0_603 = arith.constant 0 : index
    %580 = vector.load %arg5[%c3_601, %c0_602, %c0_603] : memref<9x8x4xbf16, #tpu.memory_space<vmem>>, vector<1x8x4xbf16>
    %581 = vector.shape_cast %580 : vector<1x8x4xbf16> to vector<8x4xbf16>
    %cst_604 = arith.constant dense<0.000000e+00> : vector<8x32xf32>
    %582 = tpu.matmul %581, %579, %cst_604 {dimension_numbers = #tpu.dot_dimension_numbers<[1], [0], [0], [1], [0, 0, 1, 1], [], []>} : vector<8x4xbf16>, vector<4x32xbf16>, vector<8x32xf32> -> vector<8x32xf32>
    %583 = arith.addf %577, %582 : vector<8x32xf32>
    %c0_605 = arith.constant 0 : index
    %c9_606 = arith.constant 9 : index
    %c1_607 = arith.constant 1 : index
    %584 = vector.load %arg9[%c0_605, %c9_606, %c1_607] : memref<4x18x34xbf16, #tpu.memory_space<vmem>>, vector<4x1x32xbf16>
    %585 = vector.shape_cast %584 : vector<4x1x32xbf16> to vector<4x32xbf16>
    %c4_608 = arith.constant 4 : index
    %c0_609 = arith.constant 0 : index
    %c0_610 = arith.constant 0 : index
    %586 = vector.load %arg5[%c4_608, %c0_609, %c0_610] : memref<9x8x4xbf16, #tpu.memory_space<vmem>>, vector<1x8x4xbf16>
    %587 = vector.shape_cast %586 : vector<1x8x4xbf16> to vector<8x4xbf16>
    %cst_611 = arith.constant dense<0.000000e+00> : vector<8x32xf32>
    %588 = tpu.matmul %587, %585, %cst_611 {dimension_numbers = #tpu.dot_dimension_numbers<[1], [0], [0], [1], [0, 0, 1, 1], [], []>} : vector<8x4xbf16>, vector<4x32xbf16>, vector<8x32xf32> -> vector<8x32xf32>
    %589 = arith.addf %583, %588 : vector<8x32xf32>
    %c0_612 = arith.constant 0 : index
    %c9_613 = arith.constant 9 : index
    %c2_614 = arith.constant 2 : index
    %590 = vector.load %arg9[%c0_612, %c9_613, %c2_614] : memref<4x18x34xbf16, #tpu.memory_space<vmem>>, vector<4x1x32xbf16>
    %591 = vector.shape_cast %590 : vector<4x1x32xbf16> to vector<4x32xbf16>
    %c5_615 = arith.constant 5 : index
    %c0_616 = arith.constant 0 : index
    %c0_617 = arith.constant 0 : index
    %592 = vector.load %arg5[%c5_615, %c0_616, %c0_617] : memref<9x8x4xbf16, #tpu.memory_space<vmem>>, vector<1x8x4xbf16>
    %593 = vector.shape_cast %592 : vector<1x8x4xbf16> to vector<8x4xbf16>
    %cst_618 = arith.constant dense<0.000000e+00> : vector<8x32xf32>
    %594 = tpu.matmul %593, %591, %cst_618 {dimension_numbers = #tpu.dot_dimension_numbers<[1], [0], [0], [1], [0, 0, 1, 1], [], []>} : vector<8x4xbf16>, vector<4x32xbf16>, vector<8x32xf32> -> vector<8x32xf32>
    %595 = arith.addf %589, %594 : vector<8x32xf32>
    %c0_619 = arith.constant 0 : index
    %c10 = arith.constant 10 : index
    %c0_620 = arith.constant 0 : index
    %596 = vector.load %arg9[%c0_619, %c10, %c0_620] : memref<4x18x34xbf16, #tpu.memory_space<vmem>>, vector<4x1x32xbf16>
    %597 = vector.shape_cast %596 : vector<4x1x32xbf16> to vector<4x32xbf16>
    %c6_621 = arith.constant 6 : index
    %c0_622 = arith.constant 0 : index
    %c0_623 = arith.constant 0 : index
    %598 = vector.load %arg5[%c6_621, %c0_622, %c0_623] : memref<9x8x4xbf16, #tpu.memory_space<vmem>>, vector<1x8x4xbf16>
    %599 = vector.shape_cast %598 : vector<1x8x4xbf16> to vector<8x4xbf16>
    %cst_624 = arith.constant dense<0.000000e+00> : vector<8x32xf32>
    %600 = tpu.matmul %599, %597, %cst_624 {dimension_numbers = #tpu.dot_dimension_numbers<[1], [0], [0], [1], [0, 0, 1, 1], [], []>} : vector<8x4xbf16>, vector<4x32xbf16>, vector<8x32xf32> -> vector<8x32xf32>
    %601 = arith.addf %595, %600 : vector<8x32xf32>
    %c0_625 = arith.constant 0 : index
    %c10_626 = arith.constant 10 : index
    %c1_627 = arith.constant 1 : index
    %602 = vector.load %arg9[%c0_625, %c10_626, %c1_627] : memref<4x18x34xbf16, #tpu.memory_space<vmem>>, vector<4x1x32xbf16>
    %603 = vector.shape_cast %602 : vector<4x1x32xbf16> to vector<4x32xbf16>
    %c7_628 = arith.constant 7 : index
    %c0_629 = arith.constant 0 : index
    %c0_630 = arith.constant 0 : index
    %604 = vector.load %arg5[%c7_628, %c0_629, %c0_630] : memref<9x8x4xbf16, #tpu.memory_space<vmem>>, vector<1x8x4xbf16>
    %605 = vector.shape_cast %604 : vector<1x8x4xbf16> to vector<8x4xbf16>
    %cst_631 = arith.constant dense<0.000000e+00> : vector<8x32xf32>
    %606 = tpu.matmul %605, %603, %cst_631 {dimension_numbers = #tpu.dot_dimension_numbers<[1], [0], [0], [1], [0, 0, 1, 1], [], []>} : vector<8x4xbf16>, vector<4x32xbf16>, vector<8x32xf32> -> vector<8x32xf32>
    %607 = arith.addf %601, %606 : vector<8x32xf32>
    %c0_632 = arith.constant 0 : index
    %c10_633 = arith.constant 10 : index
    %c2_634 = arith.constant 2 : index
    %608 = vector.load %arg9[%c0_632, %c10_633, %c2_634] : memref<4x18x34xbf16, #tpu.memory_space<vmem>>, vector<4x1x32xbf16>
    %609 = vector.shape_cast %608 : vector<4x1x32xbf16> to vector<4x32xbf16>
    %c8_635 = arith.constant 8 : index
    %c0_636 = arith.constant 0 : index
    %c0_637 = arith.constant 0 : index
    %610 = vector.load %arg5[%c8_635, %c0_636, %c0_637] : memref<9x8x4xbf16, #tpu.memory_space<vmem>>, vector<1x8x4xbf16>
    %611 = vector.shape_cast %610 : vector<1x8x4xbf16> to vector<8x4xbf16>
    %cst_638 = arith.constant dense<0.000000e+00> : vector<8x32xf32>
    %612 = tpu.matmul %611, %609, %cst_638 {dimension_numbers = #tpu.dot_dimension_numbers<[1], [0], [0], [1], [0, 0, 1, 1], [], []>} : vector<8x4xbf16>, vector<4x32xbf16>, vector<8x32xf32> -> vector<8x32xf32>
    %613 = arith.addf %607, %612 : vector<8x32xf32>
    %614 = vector.broadcast %45 : vector<8x1xf32> to vector<8x32xf32>
    %615 = arith.mulf %613, %614 : vector<8x32xf32>
    %616 = vector.broadcast %46 : vector<8x1xf32> to vector<8x32xf32>
    %617 = arith.addf %615, %616 : vector<8x32xf32>
    %cst_639 = arith.constant 0.000000e+00 : f32
    %618 = vector.broadcast %cst_639 : f32 to vector<8x32xf32>
    %619 = arith.maximumf %617, %618 : vector<8x32xf32>
    %c0_640 = arith.constant 0 : index
    %c0_641 = arith.constant 0 : index
    %c8_642 = arith.constant 8 : index
    %c0_643 = arith.constant 0 : index
    %620 = vector.load %arg8[%c0_640, %c0_641, %c8_642, %c0_643] : memref<1x8x16x32xf32, #tpu.memory_space<vmem>>, vector<1x8x1x32xf32>
    %621 = vector.shape_cast %620 : vector<1x8x1x32xf32> to vector<8x32xf32>
    %622 = vector.shape_cast %619 : vector<8x32xf32> to vector<1x8x1x32xf32>
    tpu.vector_store %arg8[%c0_640, %c0_641, %c8_642, %c0_643], %622 {strides = array<i32>} : memref<1x8x16x32xf32, #tpu.memory_space<vmem>>, vector<1x8x1x32xf32>,
    %cst_644 = arith.constant 0.000000e+00 : f32
    %623 = vector.broadcast %cst_644 : f32 to vector<8x32xf32>
    %c0_645 = arith.constant 0 : index
    %c9_646 = arith.constant 9 : index
    %c0_647 = arith.constant 0 : index
    %624 = vector.load %arg9[%c0_645, %c9_646, %c0_647] : memref<4x18x34xbf16, #tpu.memory_space<vmem>>, vector<4x1x32xbf16>
    %625 = vector.shape_cast %624 : vector<4x1x32xbf16> to vector<4x32xbf16>
    %c0_648 = arith.constant 0 : index
    %c0_649 = arith.constant 0 : index
    %c0_650 = arith.constant 0 : index
    %626 = vector.load %arg5[%c0_648, %c0_649, %c0_650] : memref<9x8x4xbf16, #tpu.memory_space<vmem>>, vector<1x8x4xbf16>
    %627 = vector.shape_cast %626 : vector<1x8x4xbf16> to vector<8x4xbf16>
    %cst_651 = arith.constant dense<0.000000e+00> : vector<8x32xf32>
    %628 = tpu.matmul %627, %625, %cst_651 {dimension_numbers = #tpu.dot_dimension_numbers<[1], [0], [0], [1], [0, 0, 1, 1], [], []>} : vector<8x4xbf16>, vector<4x32xbf16>, vector<8x32xf32> -> vector<8x32xf32>
    %629 = arith.addf %623, %628 : vector<8x32xf32>
    %c0_652 = arith.constant 0 : index
    %c9_653 = arith.constant 9 : index
    %c1_654 = arith.constant 1 : index
    %630 = vector.load %arg9[%c0_652, %c9_653, %c1_654] : memref<4x18x34xbf16, #tpu.memory_space<vmem>>, vector<4x1x32xbf16>
    %631 = vector.shape_cast %630 : vector<4x1x32xbf16> to vector<4x32xbf16>
    %c1_655 = arith.constant 1 : index
    %c0_656 = arith.constant 0 : index
    %c0_657 = arith.constant 0 : index
    %632 = vector.load %arg5[%c1_655, %c0_656, %c0_657] : memref<9x8x4xbf16, #tpu.memory_space<vmem>>, vector<1x8x4xbf16>
    %633 = vector.shape_cast %632 : vector<1x8x4xbf16> to vector<8x4xbf16>
    %cst_658 = arith.constant dense<0.000000e+00> : vector<8x32xf32>
    %634 = tpu.matmul %633, %631, %cst_658 {dimension_numbers = #tpu.dot_dimension_numbers<[1], [0], [0], [1], [0, 0, 1, 1], [], []>} : vector<8x4xbf16>, vector<4x32xbf16>, vector<8x32xf32> -> vector<8x32xf32>
    %635 = arith.addf %629, %634 : vector<8x32xf32>
    %c0_659 = arith.constant 0 : index
    %c9_660 = arith.constant 9 : index
    %c2_661 = arith.constant 2 : index
    %636 = vector.load %arg9[%c0_659, %c9_660, %c2_661] : memref<4x18x34xbf16, #tpu.memory_space<vmem>>, vector<4x1x32xbf16>
    %637 = vector.shape_cast %636 : vector<4x1x32xbf16> to vector<4x32xbf16>
    %c2_662 = arith.constant 2 : index
    %c0_663 = arith.constant 0 : index
    %c0_664 = arith.constant 0 : index
    %638 = vector.load %arg5[%c2_662, %c0_663, %c0_664] : memref<9x8x4xbf16, #tpu.memory_space<vmem>>, vector<1x8x4xbf16>
    %639 = vector.shape_cast %638 : vector<1x8x4xbf16> to vector<8x4xbf16>
    %cst_665 = arith.constant dense<0.000000e+00> : vector<8x32xf32>
    %640 = tpu.matmul %639, %637, %cst_665 {dimension_numbers = #tpu.dot_dimension_numbers<[1], [0], [0], [1], [0, 0, 1, 1], [], []>} : vector<8x4xbf16>, vector<4x32xbf16>, vector<8x32xf32> -> vector<8x32xf32>
    %641 = arith.addf %635, %640 : vector<8x32xf32>
    %c0_666 = arith.constant 0 : index
    %c10_667 = arith.constant 10 : index
    %c0_668 = arith.constant 0 : index
    %642 = vector.load %arg9[%c0_666, %c10_667, %c0_668] : memref<4x18x34xbf16, #tpu.memory_space<vmem>>, vector<4x1x32xbf16>
    %643 = vector.shape_cast %642 : vector<4x1x32xbf16> to vector<4x32xbf16>
    %c3_669 = arith.constant 3 : index
    %c0_670 = arith.constant 0 : index
    %c0_671 = arith.constant 0 : index
    %644 = vector.load %arg5[%c3_669, %c0_670, %c0_671] : memref<9x8x4xbf16, #tpu.memory_space<vmem>>, vector<1x8x4xbf16>
    %645 = vector.shape_cast %644 : vector<1x8x4xbf16> to vector<8x4xbf16>
    %cst_672 = arith.constant dense<0.000000e+00> : vector<8x32xf32>
    %646 = tpu.matmul %645, %643, %cst_672 {dimension_numbers = #tpu.dot_dimension_numbers<[1], [0], [0], [1], [0, 0, 1, 1], [], []>} : vector<8x4xbf16>, vector<4x32xbf16>, vector<8x32xf32> -> vector<8x32xf32>
    %647 = arith.addf %641, %646 : vector<8x32xf32>
    %c0_673 = arith.constant 0 : index
    %c10_674 = arith.constant 10 : index
    %c1_675 = arith.constant 1 : index
    %648 = vector.load %arg9[%c0_673, %c10_674, %c1_675] : memref<4x18x34xbf16, #tpu.memory_space<vmem>>, vector<4x1x32xbf16>
    %649 = vector.shape_cast %648 : vector<4x1x32xbf16> to vector<4x32xbf16>
    %c4_676 = arith.constant 4 : index
    %c0_677 = arith.constant 0 : index
    %c0_678 = arith.constant 0 : index
    %650 = vector.load %arg5[%c4_676, %c0_677, %c0_678] : memref<9x8x4xbf16, #tpu.memory_space<vmem>>, vector<1x8x4xbf16>
    %651 = vector.shape_cast %650 : vector<1x8x4xbf16> to vector<8x4xbf16>
    %cst_679 = arith.constant dense<0.000000e+00> : vector<8x32xf32>
    %652 = tpu.matmul %651, %649, %cst_679 {dimension_numbers = #tpu.dot_dimension_numbers<[1], [0], [0], [1], [0, 0, 1, 1], [], []>} : vector<8x4xbf16>, vector<4x32xbf16>, vector<8x32xf32> -> vector<8x32xf32>
    %653 = arith.addf %647, %652 : vector<8x32xf32>
    %c0_680 = arith.constant 0 : index
    %c10_681 = arith.constant 10 : index
    %c2_682 = arith.constant 2 : index
    %654 = vector.load %arg9[%c0_680, %c10_681, %c2_682] : memref<4x18x34xbf16, #tpu.memory_space<vmem>>, vector<4x1x32xbf16>
    %655 = vector.shape_cast %654 : vector<4x1x32xbf16> to vector<4x32xbf16>
    %c5_683 = arith.constant 5 : index
    %c0_684 = arith.constant 0 : index
    %c0_685 = arith.constant 0 : index
    %656 = vector.load %arg5[%c5_683, %c0_684, %c0_685] : memref<9x8x4xbf16, #tpu.memory_space<vmem>>, vector<1x8x4xbf16>
    %657 = vector.shape_cast %656 : vector<1x8x4xbf16> to vector<8x4xbf16>
    %cst_686 = arith.constant dense<0.000000e+00> : vector<8x32xf32>
    %658 = tpu.matmul %657, %655, %cst_686 {dimension_numbers = #tpu.dot_dimension_numbers<[1], [0], [0], [1], [0, 0, 1, 1], [], []>} : vector<8x4xbf16>, vector<4x32xbf16>, vector<8x32xf32> -> vector<8x32xf32>
    %659 = arith.addf %653, %658 : vector<8x32xf32>
    %c0_687 = arith.constant 0 : index
    %c11 = arith.constant 11 : index
    %c0_688 = arith.constant 0 : index
    %660 = vector.load %arg9[%c0_687, %c11, %c0_688] : memref<4x18x34xbf16, #tpu.memory_space<vmem>>, vector<4x1x32xbf16>
    %661 = vector.shape_cast %660 : vector<4x1x32xbf16> to vector<4x32xbf16>
    %c6_689 = arith.constant 6 : index
    %c0_690 = arith.constant 0 : index
    %c0_691 = arith.constant 0 : index
    %662 = vector.load %arg5[%c6_689, %c0_690, %c0_691] : memref<9x8x4xbf16, #tpu.memory_space<vmem>>, vector<1x8x4xbf16>
    %663 = vector.shape_cast %662 : vector<1x8x4xbf16> to vector<8x4xbf16>
    %cst_692 = arith.constant dense<0.000000e+00> : vector<8x32xf32>
    %664 = tpu.matmul %663, %661, %cst_692 {dimension_numbers = #tpu.dot_dimension_numbers<[1], [0], [0], [1], [0, 0, 1, 1], [], []>} : vector<8x4xbf16>, vector<4x32xbf16>, vector<8x32xf32> -> vector<8x32xf32>
    %665 = arith.addf %659, %664 : vector<8x32xf32>
    %c0_693 = arith.constant 0 : index
    %c11_694 = arith.constant 11 : index
    %c1_695 = arith.constant 1 : index
    %666 = vector.load %arg9[%c0_693, %c11_694, %c1_695] : memref<4x18x34xbf16, #tpu.memory_space<vmem>>, vector<4x1x32xbf16>
    %667 = vector.shape_cast %666 : vector<4x1x32xbf16> to vector<4x32xbf16>
    %c7_696 = arith.constant 7 : index
    %c0_697 = arith.constant 0 : index
    %c0_698 = arith.constant 0 : index
    %668 = vector.load %arg5[%c7_696, %c0_697, %c0_698] : memref<9x8x4xbf16, #tpu.memory_space<vmem>>, vector<1x8x4xbf16>
    %669 = vector.shape_cast %668 : vector<1x8x4xbf16> to vector<8x4xbf16>
    %cst_699 = arith.constant dense<0.000000e+00> : vector<8x32xf32>
    %670 = tpu.matmul %669, %667, %cst_699 {dimension_numbers = #tpu.dot_dimension_numbers<[1], [0], [0], [1], [0, 0, 1, 1], [], []>} : vector<8x4xbf16>, vector<4x32xbf16>, vector<8x32xf32> -> vector<8x32xf32>
    %671 = arith.addf %665, %670 : vector<8x32xf32>
    %c0_700 = arith.constant 0 : index
    %c11_701 = arith.constant 11 : index
    %c2_702 = arith.constant 2 : index
    %672 = vector.load %arg9[%c0_700, %c11_701, %c2_702] : memref<4x18x34xbf16, #tpu.memory_space<vmem>>, vector<4x1x32xbf16>
    %673 = vector.shape_cast %672 : vector<4x1x32xbf16> to vector<4x32xbf16>
    %c8_703 = arith.constant 8 : index
    %c0_704 = arith.constant 0 : index
    %c0_705 = arith.constant 0 : index
    %674 = vector.load %arg5[%c8_703, %c0_704, %c0_705] : memref<9x8x4xbf16, #tpu.memory_space<vmem>>, vector<1x8x4xbf16>
    %675 = vector.shape_cast %674 : vector<1x8x4xbf16> to vector<8x4xbf16>
    %cst_706 = arith.constant dense<0.000000e+00> : vector<8x32xf32>
    %676 = tpu.matmul %675, %673, %cst_706 {dimension_numbers = #tpu.dot_dimension_numbers<[1], [0], [0], [1], [0, 0, 1, 1], [], []>} : vector<8x4xbf16>, vector<4x32xbf16>, vector<8x32xf32> -> vector<8x32xf32>
    %677 = arith.addf %671, %676 : vector<8x32xf32>
    %678 = vector.broadcast %45 : vector<8x1xf32> to vector<8x32xf32>
    %679 = arith.mulf %677, %678 : vector<8x32xf32>
    %680 = vector.broadcast %46 : vector<8x1xf32> to vector<8x32xf32>
    %681 = arith.addf %679, %680 : vector<8x32xf32>
    %cst_707 = arith.constant 0.000000e+00 : f32
    %682 = vector.broadcast %cst_707 : f32 to vector<8x32xf32>
    %683 = arith.maximumf %681, %682 : vector<8x32xf32>
    %c0_708 = arith.constant 0 : index
    %c0_709 = arith.constant 0 : index
    %c9_710 = arith.constant 9 : index
    %c0_711 = arith.constant 0 : index
    %684 = vector.load %arg8[%c0_708, %c0_709, %c9_710, %c0_711] : memref<1x8x16x32xf32, #tpu.memory_space<vmem>>, vector<1x8x1x32xf32>
    %685 = vector.shape_cast %684 : vector<1x8x1x32xf32> to vector<8x32xf32>
    %686 = vector.shape_cast %683 : vector<8x32xf32> to vector<1x8x1x32xf32>
    tpu.vector_store %arg8[%c0_708, %c0_709, %c9_710, %c0_711], %686 {strides = array<i32>} : memref<1x8x16x32xf32, #tpu.memory_space<vmem>>, vector<1x8x1x32xf32>,
    %cst_712 = arith.constant 0.000000e+00 : f32
    %687 = vector.broadcast %cst_712 : f32 to vector<8x32xf32>
    %c0_713 = arith.constant 0 : index
    %c10_714 = arith.constant 10 : index
    %c0_715 = arith.constant 0 : index
    %688 = vector.load %arg9[%c0_713, %c10_714, %c0_715] : memref<4x18x34xbf16, #tpu.memory_space<vmem>>, vector<4x1x32xbf16>
    %689 = vector.shape_cast %688 : vector<4x1x32xbf16> to vector<4x32xbf16>
    %c0_716 = arith.constant 0 : index
    %c0_717 = arith.constant 0 : index
    %c0_718 = arith.constant 0 : index
    %690 = vector.load %arg5[%c0_716, %c0_717, %c0_718] : memref<9x8x4xbf16, #tpu.memory_space<vmem>>, vector<1x8x4xbf16>
    %691 = vector.shape_cast %690 : vector<1x8x4xbf16> to vector<8x4xbf16>
    %cst_719 = arith.constant dense<0.000000e+00> : vector<8x32xf32>
    %692 = tpu.matmul %691, %689, %cst_719 {dimension_numbers = #tpu.dot_dimension_numbers<[1], [0], [0], [1], [0, 0, 1, 1], [], []>} : vector<8x4xbf16>, vector<4x32xbf16>, vector<8x32xf32> -> vector<8x32xf32>
    %693 = arith.addf %687, %692 : vector<8x32xf32>
    %c0_720 = arith.constant 0 : index
    %c10_721 = arith.constant 10 : index
    %c1_722 = arith.constant 1 : index
    %694 = vector.load %arg9[%c0_720, %c10_721, %c1_722] : memref<4x18x34xbf16, #tpu.memory_space<vmem>>, vector<4x1x32xbf16>
    %695 = vector.shape_cast %694 : vector<4x1x32xbf16> to vector<4x32xbf16>
    %c1_723 = arith.constant 1 : index
    %c0_724 = arith.constant 0 : index
    %c0_725 = arith.constant 0 : index
    %696 = vector.load %arg5[%c1_723, %c0_724, %c0_725] : memref<9x8x4xbf16, #tpu.memory_space<vmem>>, vector<1x8x4xbf16>
    %697 = vector.shape_cast %696 : vector<1x8x4xbf16> to vector<8x4xbf16>
    %cst_726 = arith.constant dense<0.000000e+00> : vector<8x32xf32>
    %698 = tpu.matmul %697, %695, %cst_726 {dimension_numbers = #tpu.dot_dimension_numbers<[1], [0], [0], [1], [0, 0, 1, 1], [], []>} : vector<8x4xbf16>, vector<4x32xbf16>, vector<8x32xf32> -> vector<8x32xf32>
    %699 = arith.addf %693, %698 : vector<8x32xf32>
    %c0_727 = arith.constant 0 : index
    %c10_728 = arith.constant 10 : index
    %c2_729 = arith.constant 2 : index
    %700 = vector.load %arg9[%c0_727, %c10_728, %c2_729] : memref<4x18x34xbf16, #tpu.memory_space<vmem>>, vector<4x1x32xbf16>
    %701 = vector.shape_cast %700 : vector<4x1x32xbf16> to vector<4x32xbf16>
    %c2_730 = arith.constant 2 : index
    %c0_731 = arith.constant 0 : index
    %c0_732 = arith.constant 0 : index
    %702 = vector.load %arg5[%c2_730, %c0_731, %c0_732] : memref<9x8x4xbf16, #tpu.memory_space<vmem>>, vector<1x8x4xbf16>
    %703 = vector.shape_cast %702 : vector<1x8x4xbf16> to vector<8x4xbf16>
    %cst_733 = arith.constant dense<0.000000e+00> : vector<8x32xf32>
    %704 = tpu.matmul %703, %701, %cst_733 {dimension_numbers = #tpu.dot_dimension_numbers<[1], [0], [0], [1], [0, 0, 1, 1], [], []>} : vector<8x4xbf16>, vector<4x32xbf16>, vector<8x32xf32> -> vector<8x32xf32>
    %705 = arith.addf %699, %704 : vector<8x32xf32>
    %c0_734 = arith.constant 0 : index
    %c11_735 = arith.constant 11 : index
    %c0_736 = arith.constant 0 : index
    %706 = vector.load %arg9[%c0_734, %c11_735, %c0_736] : memref<4x18x34xbf16, #tpu.memory_space<vmem>>, vector<4x1x32xbf16>
    %707 = vector.shape_cast %706 : vector<4x1x32xbf16> to vector<4x32xbf16>
    %c3_737 = arith.constant 3 : index
    %c0_738 = arith.constant 0 : index
    %c0_739 = arith.constant 0 : index
    %708 = vector.load %arg5[%c3_737, %c0_738, %c0_739] : memref<9x8x4xbf16, #tpu.memory_space<vmem>>, vector<1x8x4xbf16>
    %709 = vector.shape_cast %708 : vector<1x8x4xbf16> to vector<8x4xbf16>
    %cst_740 = arith.constant dense<0.000000e+00> : vector<8x32xf32>
    %710 = tpu.matmul %709, %707, %cst_740 {dimension_numbers = #tpu.dot_dimension_numbers<[1], [0], [0], [1], [0, 0, 1, 1], [], []>} : vector<8x4xbf16>, vector<4x32xbf16>, vector<8x32xf32> -> vector<8x32xf32>
    %711 = arith.addf %705, %710 : vector<8x32xf32>
    %c0_741 = arith.constant 0 : index
    %c11_742 = arith.constant 11 : index
    %c1_743 = arith.constant 1 : index
    %712 = vector.load %arg9[%c0_741, %c11_742, %c1_743] : memref<4x18x34xbf16, #tpu.memory_space<vmem>>, vector<4x1x32xbf16>
    %713 = vector.shape_cast %712 : vector<4x1x32xbf16> to vector<4x32xbf16>
    %c4_744 = arith.constant 4 : index
    %c0_745 = arith.constant 0 : index
    %c0_746 = arith.constant 0 : index
    %714 = vector.load %arg5[%c4_744, %c0_745, %c0_746] : memref<9x8x4xbf16, #tpu.memory_space<vmem>>, vector<1x8x4xbf16>
    %715 = vector.shape_cast %714 : vector<1x8x4xbf16> to vector<8x4xbf16>
    %cst_747 = arith.constant dense<0.000000e+00> : vector<8x32xf32>
    %716 = tpu.matmul %715, %713, %cst_747 {dimension_numbers = #tpu.dot_dimension_numbers<[1], [0], [0], [1], [0, 0, 1, 1], [], []>} : vector<8x4xbf16>, vector<4x32xbf16>, vector<8x32xf32> -> vector<8x32xf32>
    %717 = arith.addf %711, %716 : vector<8x32xf32>
    %c0_748 = arith.constant 0 : index
    %c11_749 = arith.constant 11 : index
    %c2_750 = arith.constant 2 : index
    %718 = vector.load %arg9[%c0_748, %c11_749, %c2_750] : memref<4x18x34xbf16, #tpu.memory_space<vmem>>, vector<4x1x32xbf16>
    %719 = vector.shape_cast %718 : vector<4x1x32xbf16> to vector<4x32xbf16>
    %c5_751 = arith.constant 5 : index
    %c0_752 = arith.constant 0 : index
    %c0_753 = arith.constant 0 : index
    %720 = vector.load %arg5[%c5_751, %c0_752, %c0_753] : memref<9x8x4xbf16, #tpu.memory_space<vmem>>, vector<1x8x4xbf16>
    %721 = vector.shape_cast %720 : vector<1x8x4xbf16> to vector<8x4xbf16>
    %cst_754 = arith.constant dense<0.000000e+00> : vector<8x32xf32>
    %722 = tpu.matmul %721, %719, %cst_754 {dimension_numbers = #tpu.dot_dimension_numbers<[1], [0], [0], [1], [0, 0, 1, 1], [], []>} : vector<8x4xbf16>, vector<4x32xbf16>, vector<8x32xf32> -> vector<8x32xf32>
    %723 = arith.addf %717, %722 : vector<8x32xf32>
    %c0_755 = arith.constant 0 : index
    %c12 = arith.constant 12 : index
    %c0_756 = arith.constant 0 : index
    %724 = vector.load %arg9[%c0_755, %c12, %c0_756] : memref<4x18x34xbf16, #tpu.memory_space<vmem>>, vector<4x1x32xbf16>
    %725 = vector.shape_cast %724 : vector<4x1x32xbf16> to vector<4x32xbf16>
    %c6_757 = arith.constant 6 : index
    %c0_758 = arith.constant 0 : index
    %c0_759 = arith.constant 0 : index
    %726 = vector.load %arg5[%c6_757, %c0_758, %c0_759] : memref<9x8x4xbf16, #tpu.memory_space<vmem>>, vector<1x8x4xbf16>
    %727 = vector.shape_cast %726 : vector<1x8x4xbf16> to vector<8x4xbf16>
    %cst_760 = arith.constant dense<0.000000e+00> : vector<8x32xf32>
    %728 = tpu.matmul %727, %725, %cst_760 {dimension_numbers = #tpu.dot_dimension_numbers<[1], [0], [0], [1], [0, 0, 1, 1], [], []>} : vector<8x4xbf16>, vector<4x32xbf16>, vector<8x32xf32> -> vector<8x32xf32>
    %729 = arith.addf %723, %728 : vector<8x32xf32>
    %c0_761 = arith.constant 0 : index
    %c12_762 = arith.constant 12 : index
    %c1_763 = arith.constant 1 : index
    %730 = vector.load %arg9[%c0_761, %c12_762, %c1_763] : memref<4x18x34xbf16, #tpu.memory_space<vmem>>, vector<4x1x32xbf16>
    %731 = vector.shape_cast %730 : vector<4x1x32xbf16> to vector<4x32xbf16>
    %c7_764 = arith.constant 7 : index
    %c0_765 = arith.constant 0 : index
    %c0_766 = arith.constant 0 : index
    %732 = vector.load %arg5[%c7_764, %c0_765, %c0_766] : memref<9x8x4xbf16, #tpu.memory_space<vmem>>, vector<1x8x4xbf16>
    %733 = vector.shape_cast %732 : vector<1x8x4xbf16> to vector<8x4xbf16>
    %cst_767 = arith.constant dense<0.000000e+00> : vector<8x32xf32>
    %734 = tpu.matmul %733, %731, %cst_767 {dimension_numbers = #tpu.dot_dimension_numbers<[1], [0], [0], [1], [0, 0, 1, 1], [], []>} : vector<8x4xbf16>, vector<4x32xbf16>, vector<8x32xf32> -> vector<8x32xf32>
    %735 = arith.addf %729, %734 : vector<8x32xf32>
    %c0_768 = arith.constant 0 : index
    %c12_769 = arith.constant 12 : index
    %c2_770 = arith.constant 2 : index
    %736 = vector.load %arg9[%c0_768, %c12_769, %c2_770] : memref<4x18x34xbf16, #tpu.memory_space<vmem>>, vector<4x1x32xbf16>
    %737 = vector.shape_cast %736 : vector<4x1x32xbf16> to vector<4x32xbf16>
    %c8_771 = arith.constant 8 : index
    %c0_772 = arith.constant 0 : index
    %c0_773 = arith.constant 0 : index
    %738 = vector.load %arg5[%c8_771, %c0_772, %c0_773] : memref<9x8x4xbf16, #tpu.memory_space<vmem>>, vector<1x8x4xbf16>
    %739 = vector.shape_cast %738 : vector<1x8x4xbf16> to vector<8x4xbf16>
    %cst_774 = arith.constant dense<0.000000e+00> : vector<8x32xf32>
    %740 = tpu.matmul %739, %737, %cst_774 {dimension_numbers = #tpu.dot_dimension_numbers<[1], [0], [0], [1], [0, 0, 1, 1], [], []>} : vector<8x4xbf16>, vector<4x32xbf16>, vector<8x32xf32> -> vector<8x32xf32>
    %741 = arith.addf %735, %740 : vector<8x32xf32>
    %742 = vector.broadcast %45 : vector<8x1xf32> to vector<8x32xf32>
    %743 = arith.mulf %741, %742 : vector<8x32xf32>
    %744 = vector.broadcast %46 : vector<8x1xf32> to vector<8x32xf32>
    %745 = arith.addf %743, %744 : vector<8x32xf32>
    %cst_775 = arith.constant 0.000000e+00 : f32
    %746 = vector.broadcast %cst_775 : f32 to vector<8x32xf32>
    %747 = arith.maximumf %745, %746 : vector<8x32xf32>
    %c0_776 = arith.constant 0 : index
    %c0_777 = arith.constant 0 : index
    %c10_778 = arith.constant 10 : index
    %c0_779 = arith.constant 0 : index
    %748 = vector.load %arg8[%c0_776, %c0_777, %c10_778, %c0_779] : memref<1x8x16x32xf32, #tpu.memory_space<vmem>>, vector<1x8x1x32xf32>
    %749 = vector.shape_cast %748 : vector<1x8x1x32xf32> to vector<8x32xf32>
    %750 = vector.shape_cast %747 : vector<8x32xf32> to vector<1x8x1x32xf32>
    tpu.vector_store %arg8[%c0_776, %c0_777, %c10_778, %c0_779], %750 {strides = array<i32>} : memref<1x8x16x32xf32, #tpu.memory_space<vmem>>, vector<1x8x1x32xf32>,
    %cst_780 = arith.constant 0.000000e+00 : f32
    %751 = vector.broadcast %cst_780 : f32 to vector<8x32xf32>
    %c0_781 = arith.constant 0 : index
    %c11_782 = arith.constant 11 : index
    %c0_783 = arith.constant 0 : index
    %752 = vector.load %arg9[%c0_781, %c11_782, %c0_783] : memref<4x18x34xbf16, #tpu.memory_space<vmem>>, vector<4x1x32xbf16>
    %753 = vector.shape_cast %752 : vector<4x1x32xbf16> to vector<4x32xbf16>
    %c0_784 = arith.constant 0 : index
    %c0_785 = arith.constant 0 : index
    %c0_786 = arith.constant 0 : index
    %754 = vector.load %arg5[%c0_784, %c0_785, %c0_786] : memref<9x8x4xbf16, #tpu.memory_space<vmem>>, vector<1x8x4xbf16>
    %755 = vector.shape_cast %754 : vector<1x8x4xbf16> to vector<8x4xbf16>
    %cst_787 = arith.constant dense<0.000000e+00> : vector<8x32xf32>
    %756 = tpu.matmul %755, %753, %cst_787 {dimension_numbers = #tpu.dot_dimension_numbers<[1], [0], [0], [1], [0, 0, 1, 1], [], []>} : vector<8x4xbf16>, vector<4x32xbf16>, vector<8x32xf32> -> vector<8x32xf32>
    %757 = arith.addf %751, %756 : vector<8x32xf32>
    %c0_788 = arith.constant 0 : index
    %c11_789 = arith.constant 11 : index
    %c1_790 = arith.constant 1 : index
    %758 = vector.load %arg9[%c0_788, %c11_789, %c1_790] : memref<4x18x34xbf16, #tpu.memory_space<vmem>>, vector<4x1x32xbf16>
    %759 = vector.shape_cast %758 : vector<4x1x32xbf16> to vector<4x32xbf16>
    %c1_791 = arith.constant 1 : index
    %c0_792 = arith.constant 0 : index
    %c0_793 = arith.constant 0 : index
    %760 = vector.load %arg5[%c1_791, %c0_792, %c0_793] : memref<9x8x4xbf16, #tpu.memory_space<vmem>>, vector<1x8x4xbf16>
    %761 = vector.shape_cast %760 : vector<1x8x4xbf16> to vector<8x4xbf16>
    %cst_794 = arith.constant dense<0.000000e+00> : vector<8x32xf32>
    %762 = tpu.matmul %761, %759, %cst_794 {dimension_numbers = #tpu.dot_dimension_numbers<[1], [0], [0], [1], [0, 0, 1, 1], [], []>} : vector<8x4xbf16>, vector<4x32xbf16>, vector<8x32xf32> -> vector<8x32xf32>
    %763 = arith.addf %757, %762 : vector<8x32xf32>
    %c0_795 = arith.constant 0 : index
    %c11_796 = arith.constant 11 : index
    %c2_797 = arith.constant 2 : index
    %764 = vector.load %arg9[%c0_795, %c11_796, %c2_797] : memref<4x18x34xbf16, #tpu.memory_space<vmem>>, vector<4x1x32xbf16>
    %765 = vector.shape_cast %764 : vector<4x1x32xbf16> to vector<4x32xbf16>
    %c2_798 = arith.constant 2 : index
    %c0_799 = arith.constant 0 : index
    %c0_800 = arith.constant 0 : index
    %766 = vector.load %arg5[%c2_798, %c0_799, %c0_800] : memref<9x8x4xbf16, #tpu.memory_space<vmem>>, vector<1x8x4xbf16>
    %767 = vector.shape_cast %766 : vector<1x8x4xbf16> to vector<8x4xbf16>
    %cst_801 = arith.constant dense<0.000000e+00> : vector<8x32xf32>
    %768 = tpu.matmul %767, %765, %cst_801 {dimension_numbers = #tpu.dot_dimension_numbers<[1], [0], [0], [1], [0, 0, 1, 1], [], []>} : vector<8x4xbf16>, vector<4x32xbf16>, vector<8x32xf32> -> vector<8x32xf32>
    %769 = arith.addf %763, %768 : vector<8x32xf32>
    %c0_802 = arith.constant 0 : index
    %c12_803 = arith.constant 12 : index
    %c0_804 = arith.constant 0 : index
    %770 = vector.load %arg9[%c0_802, %c12_803, %c0_804] : memref<4x18x34xbf16, #tpu.memory_space<vmem>>, vector<4x1x32xbf16>
    %771 = vector.shape_cast %770 : vector<4x1x32xbf16> to vector<4x32xbf16>
    %c3_805 = arith.constant 3 : index
    %c0_806 = arith.constant 0 : index
    %c0_807 = arith.constant 0 : index
    %772 = vector.load %arg5[%c3_805, %c0_806, %c0_807] : memref<9x8x4xbf16, #tpu.memory_space<vmem>>, vector<1x8x4xbf16>
    %773 = vector.shape_cast %772 : vector<1x8x4xbf16> to vector<8x4xbf16>
    %cst_808 = arith.constant dense<0.000000e+00> : vector<8x32xf32>
    %774 = tpu.matmul %773, %771, %cst_808 {dimension_numbers = #tpu.dot_dimension_numbers<[1], [0], [0], [1], [0, 0, 1, 1], [], []>} : vector<8x4xbf16>, vector<4x32xbf16>, vector<8x32xf32> -> vector<8x32xf32>
    %775 = arith.addf %769, %774 : vector<8x32xf32>
    %c0_809 = arith.constant 0 : index
    %c12_810 = arith.constant 12 : index
    %c1_811 = arith.constant 1 : index
    %776 = vector.load %arg9[%c0_809, %c12_810, %c1_811] : memref<4x18x34xbf16, #tpu.memory_space<vmem>>, vector<4x1x32xbf16>
    %777 = vector.shape_cast %776 : vector<4x1x32xbf16> to vector<4x32xbf16>
    %c4_812 = arith.constant 4 : index
    %c0_813 = arith.constant 0 : index
    %c0_814 = arith.constant 0 : index
    %778 = vector.load %arg5[%c4_812, %c0_813, %c0_814] : memref<9x8x4xbf16, #tpu.memory_space<vmem>>, vector<1x8x4xbf16>
    %779 = vector.shape_cast %778 : vector<1x8x4xbf16> to vector<8x4xbf16>
    %cst_815 = arith.constant dense<0.000000e+00> : vector<8x32xf32>
    %780 = tpu.matmul %779, %777, %cst_815 {dimension_numbers = #tpu.dot_dimension_numbers<[1], [0], [0], [1], [0, 0, 1, 1], [], []>} : vector<8x4xbf16>, vector<4x32xbf16>, vector<8x32xf32> -> vector<8x32xf32>
    %781 = arith.addf %775, %780 : vector<8x32xf32>
    %c0_816 = arith.constant 0 : index
    %c12_817 = arith.constant 12 : index
    %c2_818 = arith.constant 2 : index
    %782 = vector.load %arg9[%c0_816, %c12_817, %c2_818] : memref<4x18x34xbf16, #tpu.memory_space<vmem>>, vector<4x1x32xbf16>
    %783 = vector.shape_cast %782 : vector<4x1x32xbf16> to vector<4x32xbf16>
    %c5_819 = arith.constant 5 : index
    %c0_820 = arith.constant 0 : index
    %c0_821 = arith.constant 0 : index
    %784 = vector.load %arg5[%c5_819, %c0_820, %c0_821] : memref<9x8x4xbf16, #tpu.memory_space<vmem>>, vector<1x8x4xbf16>
    %785 = vector.shape_cast %784 : vector<1x8x4xbf16> to vector<8x4xbf16>
    %cst_822 = arith.constant dense<0.000000e+00> : vector<8x32xf32>
    %786 = tpu.matmul %785, %783, %cst_822 {dimension_numbers = #tpu.dot_dimension_numbers<[1], [0], [0], [1], [0, 0, 1, 1], [], []>} : vector<8x4xbf16>, vector<4x32xbf16>, vector<8x32xf32> -> vector<8x32xf32>
    %787 = arith.addf %781, %786 : vector<8x32xf32>
    %c0_823 = arith.constant 0 : index
    %c13 = arith.constant 13 : index
    %c0_824 = arith.constant 0 : index
    %788 = vector.load %arg9[%c0_823, %c13, %c0_824] : memref<4x18x34xbf16, #tpu.memory_space<vmem>>, vector<4x1x32xbf16>
    %789 = vector.shape_cast %788 : vector<4x1x32xbf16> to vector<4x32xbf16>
    %c6_825 = arith.constant 6 : index
    %c0_826 = arith.constant 0 : index
    %c0_827 = arith.constant 0 : index
    %790 = vector.load %arg5[%c6_825, %c0_826, %c0_827] : memref<9x8x4xbf16, #tpu.memory_space<vmem>>, vector<1x8x4xbf16>
    %791 = vector.shape_cast %790 : vector<1x8x4xbf16> to vector<8x4xbf16>
    %cst_828 = arith.constant dense<0.000000e+00> : vector<8x32xf32>
    %792 = tpu.matmul %791, %789, %cst_828 {dimension_numbers = #tpu.dot_dimension_numbers<[1], [0], [0], [1], [0, 0, 1, 1], [], []>} : vector<8x4xbf16>, vector<4x32xbf16>, vector<8x32xf32> -> vector<8x32xf32>
    %793 = arith.addf %787, %792 : vector<8x32xf32>
    %c0_829 = arith.constant 0 : index
    %c13_830 = arith.constant 13 : index
    %c1_831 = arith.constant 1 : index
    %794 = vector.load %arg9[%c0_829, %c13_830, %c1_831] : memref<4x18x34xbf16, #tpu.memory_space<vmem>>, vector<4x1x32xbf16>
    %795 = vector.shape_cast %794 : vector<4x1x32xbf16> to vector<4x32xbf16>
    %c7_832 = arith.constant 7 : index
    %c0_833 = arith.constant 0 : index
    %c0_834 = arith.constant 0 : index
    %796 = vector.load %arg5[%c7_832, %c0_833, %c0_834] : memref<9x8x4xbf16, #tpu.memory_space<vmem>>, vector<1x8x4xbf16>
    %797 = vector.shape_cast %796 : vector<1x8x4xbf16> to vector<8x4xbf16>
    %cst_835 = arith.constant dense<0.000000e+00> : vector<8x32xf32>
    %798 = tpu.matmul %797, %795, %cst_835 {dimension_numbers = #tpu.dot_dimension_numbers<[1], [0], [0], [1], [0, 0, 1, 1], [], []>} : vector<8x4xbf16>, vector<4x32xbf16>, vector<8x32xf32> -> vector<8x32xf32>
    %799 = arith.addf %793, %798 : vector<8x32xf32>
    %c0_836 = arith.constant 0 : index
    %c13_837 = arith.constant 13 : index
    %c2_838 = arith.constant 2 : index
    %800 = vector.load %arg9[%c0_836, %c13_837, %c2_838] : memref<4x18x34xbf16, #tpu.memory_space<vmem>>, vector<4x1x32xbf16>
    %801 = vector.shape_cast %800 : vector<4x1x32xbf16> to vector<4x32xbf16>
    %c8_839 = arith.constant 8 : index
    %c0_840 = arith.constant 0 : index
    %c0_841 = arith.constant 0 : index
    %802 = vector.load %arg5[%c8_839, %c0_840, %c0_841] : memref<9x8x4xbf16, #tpu.memory_space<vmem>>, vector<1x8x4xbf16>
    %803 = vector.shape_cast %802 : vector<1x8x4xbf16> to vector<8x4xbf16>
    %cst_842 = arith.constant dense<0.000000e+00> : vector<8x32xf32>
    %804 = tpu.matmul %803, %801, %cst_842 {dimension_numbers = #tpu.dot_dimension_numbers<[1], [0], [0], [1], [0, 0, 1, 1], [], []>} : vector<8x4xbf16>, vector<4x32xbf16>, vector<8x32xf32> -> vector<8x32xf32>
    %805 = arith.addf %799, %804 : vector<8x32xf32>
    %806 = vector.broadcast %45 : vector<8x1xf32> to vector<8x32xf32>
    %807 = arith.mulf %805, %806 : vector<8x32xf32>
    %808 = vector.broadcast %46 : vector<8x1xf32> to vector<8x32xf32>
    %809 = arith.addf %807, %808 : vector<8x32xf32>
    %cst_843 = arith.constant 0.000000e+00 : f32
    %810 = vector.broadcast %cst_843 : f32 to vector<8x32xf32>
    %811 = arith.maximumf %809, %810 : vector<8x32xf32>
    %c0_844 = arith.constant 0 : index
    %c0_845 = arith.constant 0 : index
    %c11_846 = arith.constant 11 : index
    %c0_847 = arith.constant 0 : index
    %812 = vector.load %arg8[%c0_844, %c0_845, %c11_846, %c0_847] : memref<1x8x16x32xf32, #tpu.memory_space<vmem>>, vector<1x8x1x32xf32>
    %813 = vector.shape_cast %812 : vector<1x8x1x32xf32> to vector<8x32xf32>
    %814 = vector.shape_cast %811 : vector<8x32xf32> to vector<1x8x1x32xf32>
    tpu.vector_store %arg8[%c0_844, %c0_845, %c11_846, %c0_847], %814 {strides = array<i32>} : memref<1x8x16x32xf32, #tpu.memory_space<vmem>>, vector<1x8x1x32xf32>,
    %cst_848 = arith.constant 0.000000e+00 : f32
    %815 = vector.broadcast %cst_848 : f32 to vector<8x32xf32>
    %c0_849 = arith.constant 0 : index
    %c12_850 = arith.constant 12 : index
    %c0_851 = arith.constant 0 : index
    %816 = vector.load %arg9[%c0_849, %c12_850, %c0_851] : memref<4x18x34xbf16, #tpu.memory_space<vmem>>, vector<4x1x32xbf16>
    %817 = vector.shape_cast %816 : vector<4x1x32xbf16> to vector<4x32xbf16>
    %c0_852 = arith.constant 0 : index
    %c0_853 = arith.constant 0 : index
    %c0_854 = arith.constant 0 : index
    %818 = vector.load %arg5[%c0_852, %c0_853, %c0_854] : memref<9x8x4xbf16, #tpu.memory_space<vmem>>, vector<1x8x4xbf16>
    %819 = vector.shape_cast %818 : vector<1x8x4xbf16> to vector<8x4xbf16>
    %cst_855 = arith.constant dense<0.000000e+00> : vector<8x32xf32>
    %820 = tpu.matmul %819, %817, %cst_855 {dimension_numbers = #tpu.dot_dimension_numbers<[1], [0], [0], [1], [0, 0, 1, 1], [], []>} : vector<8x4xbf16>, vector<4x32xbf16>, vector<8x32xf32> -> vector<8x32xf32>
    %821 = arith.addf %815, %820 : vector<8x32xf32>
    %c0_856 = arith.constant 0 : index
    %c12_857 = arith.constant 12 : index
    %c1_858 = arith.constant 1 : index
    %822 = vector.load %arg9[%c0_856, %c12_857, %c1_858] : memref<4x18x34xbf16, #tpu.memory_space<vmem>>, vector<4x1x32xbf16>
    %823 = vector.shape_cast %822 : vector<4x1x32xbf16> to vector<4x32xbf16>
    %c1_859 = arith.constant 1 : index
    %c0_860 = arith.constant 0 : index
    %c0_861 = arith.constant 0 : index
    %824 = vector.load %arg5[%c1_859, %c0_860, %c0_861] : memref<9x8x4xbf16, #tpu.memory_space<vmem>>, vector<1x8x4xbf16>
    %825 = vector.shape_cast %824 : vector<1x8x4xbf16> to vector<8x4xbf16>
    %cst_862 = arith.constant dense<0.000000e+00> : vector<8x32xf32>
    %826 = tpu.matmul %825, %823, %cst_862 {dimension_numbers = #tpu.dot_dimension_numbers<[1], [0], [0], [1], [0, 0, 1, 1], [], []>} : vector<8x4xbf16>, vector<4x32xbf16>, vector<8x32xf32> -> vector<8x32xf32>
    %827 = arith.addf %821, %826 : vector<8x32xf32>
    %c0_863 = arith.constant 0 : index
    %c12_864 = arith.constant 12 : index
    %c2_865 = arith.constant 2 : index
    %828 = vector.load %arg9[%c0_863, %c12_864, %c2_865] : memref<4x18x34xbf16, #tpu.memory_space<vmem>>, vector<4x1x32xbf16>
    %829 = vector.shape_cast %828 : vector<4x1x32xbf16> to vector<4x32xbf16>
    %c2_866 = arith.constant 2 : index
    %c0_867 = arith.constant 0 : index
    %c0_868 = arith.constant 0 : index
    %830 = vector.load %arg5[%c2_866, %c0_867, %c0_868] : memref<9x8x4xbf16, #tpu.memory_space<vmem>>, vector<1x8x4xbf16>
    %831 = vector.shape_cast %830 : vector<1x8x4xbf16> to vector<8x4xbf16>
    %cst_869 = arith.constant dense<0.000000e+00> : vector<8x32xf32>
    %832 = tpu.matmul %831, %829, %cst_869 {dimension_numbers = #tpu.dot_dimension_numbers<[1], [0], [0], [1], [0, 0, 1, 1], [], []>} : vector<8x4xbf16>, vector<4x32xbf16>, vector<8x32xf32> -> vector<8x32xf32>
    %833 = arith.addf %827, %832 : vector<8x32xf32>
    %c0_870 = arith.constant 0 : index
    %c13_871 = arith.constant 13 : index
    %c0_872 = arith.constant 0 : index
    %834 = vector.load %arg9[%c0_870, %c13_871, %c0_872] : memref<4x18x34xbf16, #tpu.memory_space<vmem>>, vector<4x1x32xbf16>
    %835 = vector.shape_cast %834 : vector<4x1x32xbf16> to vector<4x32xbf16>
    %c3_873 = arith.constant 3 : index
    %c0_874 = arith.constant 0 : index
    %c0_875 = arith.constant 0 : index
    %836 = vector.load %arg5[%c3_873, %c0_874, %c0_875] : memref<9x8x4xbf16, #tpu.memory_space<vmem>>, vector<1x8x4xbf16>
    %837 = vector.shape_cast %836 : vector<1x8x4xbf16> to vector<8x4xbf16>
    %cst_876 = arith.constant dense<0.000000e+00> : vector<8x32xf32>
    %838 = tpu.matmul %837, %835, %cst_876 {dimension_numbers = #tpu.dot_dimension_numbers<[1], [0], [0], [1], [0, 0, 1, 1], [], []>} : vector<8x4xbf16>, vector<4x32xbf16>, vector<8x32xf32> -> vector<8x32xf32>
    %839 = arith.addf %833, %838 : vector<8x32xf32>
    %c0_877 = arith.constant 0 : index
    %c13_878 = arith.constant 13 : index
    %c1_879 = arith.constant 1 : index
    %840 = vector.load %arg9[%c0_877, %c13_878, %c1_879] : memref<4x18x34xbf16, #tpu.memory_space<vmem>>, vector<4x1x32xbf16>
    %841 = vector.shape_cast %840 : vector<4x1x32xbf16> to vector<4x32xbf16>
    %c4_880 = arith.constant 4 : index
    %c0_881 = arith.constant 0 : index
    %c0_882 = arith.constant 0 : index
    %842 = vector.load %arg5[%c4_880, %c0_881, %c0_882] : memref<9x8x4xbf16, #tpu.memory_space<vmem>>, vector<1x8x4xbf16>
    %843 = vector.shape_cast %842 : vector<1x8x4xbf16> to vector<8x4xbf16>
    %cst_883 = arith.constant dense<0.000000e+00> : vector<8x32xf32>
    %844 = tpu.matmul %843, %841, %cst_883 {dimension_numbers = #tpu.dot_dimension_numbers<[1], [0], [0], [1], [0, 0, 1, 1], [], []>} : vector<8x4xbf16>, vector<4x32xbf16>, vector<8x32xf32> -> vector<8x32xf32>
    %845 = arith.addf %839, %844 : vector<8x32xf32>
    %c0_884 = arith.constant 0 : index
    %c13_885 = arith.constant 13 : index
    %c2_886 = arith.constant 2 : index
    %846 = vector.load %arg9[%c0_884, %c13_885, %c2_886] : memref<4x18x34xbf16, #tpu.memory_space<vmem>>, vector<4x1x32xbf16>
    %847 = vector.shape_cast %846 : vector<4x1x32xbf16> to vector<4x32xbf16>
    %c5_887 = arith.constant 5 : index
    %c0_888 = arith.constant 0 : index
    %c0_889 = arith.constant 0 : index
    %848 = vector.load %arg5[%c5_887, %c0_888, %c0_889] : memref<9x8x4xbf16, #tpu.memory_space<vmem>>, vector<1x8x4xbf16>
    %849 = vector.shape_cast %848 : vector<1x8x4xbf16> to vector<8x4xbf16>
    %cst_890 = arith.constant dense<0.000000e+00> : vector<8x32xf32>
    %850 = tpu.matmul %849, %847, %cst_890 {dimension_numbers = #tpu.dot_dimension_numbers<[1], [0], [0], [1], [0, 0, 1, 1], [], []>} : vector<8x4xbf16>, vector<4x32xbf16>, vector<8x32xf32> -> vector<8x32xf32>
    %851 = arith.addf %845, %850 : vector<8x32xf32>
    %c0_891 = arith.constant 0 : index
    %c14 = arith.constant 14 : index
    %c0_892 = arith.constant 0 : index
    %852 = vector.load %arg9[%c0_891, %c14, %c0_892] : memref<4x18x34xbf16, #tpu.memory_space<vmem>>, vector<4x1x32xbf16>
    %853 = vector.shape_cast %852 : vector<4x1x32xbf16> to vector<4x32xbf16>
    %c6_893 = arith.constant 6 : index
    %c0_894 = arith.constant 0 : index
    %c0_895 = arith.constant 0 : index
    %854 = vector.load %arg5[%c6_893, %c0_894, %c0_895] : memref<9x8x4xbf16, #tpu.memory_space<vmem>>, vector<1x8x4xbf16>
    %855 = vector.shape_cast %854 : vector<1x8x4xbf16> to vector<8x4xbf16>
    %cst_896 = arith.constant dense<0.000000e+00> : vector<8x32xf32>
    %856 = tpu.matmul %855, %853, %cst_896 {dimension_numbers = #tpu.dot_dimension_numbers<[1], [0], [0], [1], [0, 0, 1, 1], [], []>} : vector<8x4xbf16>, vector<4x32xbf16>, vector<8x32xf32> -> vector<8x32xf32>
    %857 = arith.addf %851, %856 : vector<8x32xf32>
    %c0_897 = arith.constant 0 : index
    %c14_898 = arith.constant 14 : index
    %c1_899 = arith.constant 1 : index
    %858 = vector.load %arg9[%c0_897, %c14_898, %c1_899] : memref<4x18x34xbf16, #tpu.memory_space<vmem>>, vector<4x1x32xbf16>
    %859 = vector.shape_cast %858 : vector<4x1x32xbf16> to vector<4x32xbf16>
    %c7_900 = arith.constant 7 : index
    %c0_901 = arith.constant 0 : index
    %c0_902 = arith.constant 0 : index
    %860 = vector.load %arg5[%c7_900, %c0_901, %c0_902] : memref<9x8x4xbf16, #tpu.memory_space<vmem>>, vector<1x8x4xbf16>
    %861 = vector.shape_cast %860 : vector<1x8x4xbf16> to vector<8x4xbf16>
    %cst_903 = arith.constant dense<0.000000e+00> : vector<8x32xf32>
    %862 = tpu.matmul %861, %859, %cst_903 {dimension_numbers = #tpu.dot_dimension_numbers<[1], [0], [0], [1], [0, 0, 1, 1], [], []>} : vector<8x4xbf16>, vector<4x32xbf16>, vector<8x32xf32> -> vector<8x32xf32>
    %863 = arith.addf %857, %862 : vector<8x32xf32>
    %c0_904 = arith.constant 0 : index
    %c14_905 = arith.constant 14 : index
    %c2_906 = arith.constant 2 : index
    %864 = vector.load %arg9[%c0_904, %c14_905, %c2_906] : memref<4x18x34xbf16, #tpu.memory_space<vmem>>, vector<4x1x32xbf16>
    %865 = vector.shape_cast %864 : vector<4x1x32xbf16> to vector<4x32xbf16>
    %c8_907 = arith.constant 8 : index
    %c0_908 = arith.constant 0 : index
    %c0_909 = arith.constant 0 : index
    %866 = vector.load %arg5[%c8_907, %c0_908, %c0_909] : memref<9x8x4xbf16, #tpu.memory_space<vmem>>, vector<1x8x4xbf16>
    %867 = vector.shape_cast %866 : vector<1x8x4xbf16> to vector<8x4xbf16>
    %cst_910 = arith.constant dense<0.000000e+00> : vector<8x32xf32>
    %868 = tpu.matmul %867, %865, %cst_910 {dimension_numbers = #tpu.dot_dimension_numbers<[1], [0], [0], [1], [0, 0, 1, 1], [], []>} : vector<8x4xbf16>, vector<4x32xbf16>, vector<8x32xf32> -> vector<8x32xf32>
    %869 = arith.addf %863, %868 : vector<8x32xf32>
    %870 = vector.broadcast %45 : vector<8x1xf32> to vector<8x32xf32>
    %871 = arith.mulf %869, %870 : vector<8x32xf32>
    %872 = vector.broadcast %46 : vector<8x1xf32> to vector<8x32xf32>
    %873 = arith.addf %871, %872 : vector<8x32xf32>
    %cst_911 = arith.constant 0.000000e+00 : f32
    %874 = vector.broadcast %cst_911 : f32 to vector<8x32xf32>
    %875 = arith.maximumf %873, %874 : vector<8x32xf32>
    %c0_912 = arith.constant 0 : index
    %c0_913 = arith.constant 0 : index
    %c12_914 = arith.constant 12 : index
    %c0_915 = arith.constant 0 : index
    %876 = vector.load %arg8[%c0_912, %c0_913, %c12_914, %c0_915] : memref<1x8x16x32xf32, #tpu.memory_space<vmem>>, vector<1x8x1x32xf32>
    %877 = vector.shape_cast %876 : vector<1x8x1x32xf32> to vector<8x32xf32>
    %878 = vector.shape_cast %875 : vector<8x32xf32> to vector<1x8x1x32xf32>
    tpu.vector_store %arg8[%c0_912, %c0_913, %c12_914, %c0_915], %878 {strides = array<i32>} : memref<1x8x16x32xf32, #tpu.memory_space<vmem>>, vector<1x8x1x32xf32>,
    %cst_916 = arith.constant 0.000000e+00 : f32
    %879 = vector.broadcast %cst_916 : f32 to vector<8x32xf32>
    %c0_917 = arith.constant 0 : index
    %c13_918 = arith.constant 13 : index
    %c0_919 = arith.constant 0 : index
    %880 = vector.load %arg9[%c0_917, %c13_918, %c0_919] : memref<4x18x34xbf16, #tpu.memory_space<vmem>>, vector<4x1x32xbf16>
    %881 = vector.shape_cast %880 : vector<4x1x32xbf16> to vector<4x32xbf16>
    %c0_920 = arith.constant 0 : index
    %c0_921 = arith.constant 0 : index
    %c0_922 = arith.constant 0 : index
    %882 = vector.load %arg5[%c0_920, %c0_921, %c0_922] : memref<9x8x4xbf16, #tpu.memory_space<vmem>>, vector<1x8x4xbf16>
    %883 = vector.shape_cast %882 : vector<1x8x4xbf16> to vector<8x4xbf16>
    %cst_923 = arith.constant dense<0.000000e+00> : vector<8x32xf32>
    %884 = tpu.matmul %883, %881, %cst_923 {dimension_numbers = #tpu.dot_dimension_numbers<[1], [0], [0], [1], [0, 0, 1, 1], [], []>} : vector<8x4xbf16>, vector<4x32xbf16>, vector<8x32xf32> -> vector<8x32xf32>
    %885 = arith.addf %879, %884 : vector<8x32xf32>
    %c0_924 = arith.constant 0 : index
    %c13_925 = arith.constant 13 : index
    %c1_926 = arith.constant 1 : index
    %886 = vector.load %arg9[%c0_924, %c13_925, %c1_926] : memref<4x18x34xbf16, #tpu.memory_space<vmem>>, vector<4x1x32xbf16>
    %887 = vector.shape_cast %886 : vector<4x1x32xbf16> to vector<4x32xbf16>
    %c1_927 = arith.constant 1 : index
    %c0_928 = arith.constant 0 : index
    %c0_929 = arith.constant 0 : index
    %888 = vector.load %arg5[%c1_927, %c0_928, %c0_929] : memref<9x8x4xbf16, #tpu.memory_space<vmem>>, vector<1x8x4xbf16>
    %889 = vector.shape_cast %888 : vector<1x8x4xbf16> to vector<8x4xbf16>
    %cst_930 = arith.constant dense<0.000000e+00> : vector<8x32xf32>
    %890 = tpu.matmul %889, %887, %cst_930 {dimension_numbers = #tpu.dot_dimension_numbers<[1], [0], [0], [1], [0, 0, 1, 1], [], []>} : vector<8x4xbf16>, vector<4x32xbf16>, vector<8x32xf32> -> vector<8x32xf32>
    %891 = arith.addf %885, %890 : vector<8x32xf32>
    %c0_931 = arith.constant 0 : index
    %c13_932 = arith.constant 13 : index
    %c2_933 = arith.constant 2 : index
    %892 = vector.load %arg9[%c0_931, %c13_932, %c2_933] : memref<4x18x34xbf16, #tpu.memory_space<vmem>>, vector<4x1x32xbf16>
    %893 = vector.shape_cast %892 : vector<4x1x32xbf16> to vector<4x32xbf16>
    %c2_934 = arith.constant 2 : index
    %c0_935 = arith.constant 0 : index
    %c0_936 = arith.constant 0 : index
    %894 = vector.load %arg5[%c2_934, %c0_935, %c0_936] : memref<9x8x4xbf16, #tpu.memory_space<vmem>>, vector<1x8x4xbf16>
    %895 = vector.shape_cast %894 : vector<1x8x4xbf16> to vector<8x4xbf16>
    %cst_937 = arith.constant dense<0.000000e+00> : vector<8x32xf32>
    %896 = tpu.matmul %895, %893, %cst_937 {dimension_numbers = #tpu.dot_dimension_numbers<[1], [0], [0], [1], [0, 0, 1, 1], [], []>} : vector<8x4xbf16>, vector<4x32xbf16>, vector<8x32xf32> -> vector<8x32xf32>
    %897 = arith.addf %891, %896 : vector<8x32xf32>
    %c0_938 = arith.constant 0 : index
    %c14_939 = arith.constant 14 : index
    %c0_940 = arith.constant 0 : index
    %898 = vector.load %arg9[%c0_938, %c14_939, %c0_940] : memref<4x18x34xbf16, #tpu.memory_space<vmem>>, vector<4x1x32xbf16>
    %899 = vector.shape_cast %898 : vector<4x1x32xbf16> to vector<4x32xbf16>
    %c3_941 = arith.constant 3 : index
    %c0_942 = arith.constant 0 : index
    %c0_943 = arith.constant 0 : index
    %900 = vector.load %arg5[%c3_941, %c0_942, %c0_943] : memref<9x8x4xbf16, #tpu.memory_space<vmem>>, vector<1x8x4xbf16>
    %901 = vector.shape_cast %900 : vector<1x8x4xbf16> to vector<8x4xbf16>
    %cst_944 = arith.constant dense<0.000000e+00> : vector<8x32xf32>
    %902 = tpu.matmul %901, %899, %cst_944 {dimension_numbers = #tpu.dot_dimension_numbers<[1], [0], [0], [1], [0, 0, 1, 1], [], []>} : vector<8x4xbf16>, vector<4x32xbf16>, vector<8x32xf32> -> vector<8x32xf32>
    %903 = arith.addf %897, %902 : vector<8x32xf32>
    %c0_945 = arith.constant 0 : index
    %c14_946 = arith.constant 14 : index
    %c1_947 = arith.constant 1 : index
    %904 = vector.load %arg9[%c0_945, %c14_946, %c1_947] : memref<4x18x34xbf16, #tpu.memory_space<vmem>>, vector<4x1x32xbf16>
    %905 = vector.shape_cast %904 : vector<4x1x32xbf16> to vector<4x32xbf16>
    %c4_948 = arith.constant 4 : index
    %c0_949 = arith.constant 0 : index
    %c0_950 = arith.constant 0 : index
    %906 = vector.load %arg5[%c4_948, %c0_949, %c0_950] : memref<9x8x4xbf16, #tpu.memory_space<vmem>>, vector<1x8x4xbf16>
    %907 = vector.shape_cast %906 : vector<1x8x4xbf16> to vector<8x4xbf16>
    %cst_951 = arith.constant dense<0.000000e+00> : vector<8x32xf32>
    %908 = tpu.matmul %907, %905, %cst_951 {dimension_numbers = #tpu.dot_dimension_numbers<[1], [0], [0], [1], [0, 0, 1, 1], [], []>} : vector<8x4xbf16>, vector<4x32xbf16>, vector<8x32xf32> -> vector<8x32xf32>
    %909 = arith.addf %903, %908 : vector<8x32xf32>
    %c0_952 = arith.constant 0 : index
    %c14_953 = arith.constant 14 : index
    %c2_954 = arith.constant 2 : index
    %910 = vector.load %arg9[%c0_952, %c14_953, %c2_954] : memref<4x18x34xbf16, #tpu.memory_space<vmem>>, vector<4x1x32xbf16>
    %911 = vector.shape_cast %910 : vector<4x1x32xbf16> to vector<4x32xbf16>
    %c5_955 = arith.constant 5 : index
    %c0_956 = arith.constant 0 : index
    %c0_957 = arith.constant 0 : index
    %912 = vector.load %arg5[%c5_955, %c0_956, %c0_957] : memref<9x8x4xbf16, #tpu.memory_space<vmem>>, vector<1x8x4xbf16>
    %913 = vector.shape_cast %912 : vector<1x8x4xbf16> to vector<8x4xbf16>
    %cst_958 = arith.constant dense<0.000000e+00> : vector<8x32xf32>
    %914 = tpu.matmul %913, %911, %cst_958 {dimension_numbers = #tpu.dot_dimension_numbers<[1], [0], [0], [1], [0, 0, 1, 1], [], []>} : vector<8x4xbf16>, vector<4x32xbf16>, vector<8x32xf32> -> vector<8x32xf32>
    %915 = arith.addf %909, %914 : vector<8x32xf32>
    %c0_959 = arith.constant 0 : index
    %c15 = arith.constant 15 : index
    %c0_960 = arith.constant 0 : index
    %916 = vector.load %arg9[%c0_959, %c15, %c0_960] : memref<4x18x34xbf16, #tpu.memory_space<vmem>>, vector<4x1x32xbf16>
    %917 = vector.shape_cast %916 : vector<4x1x32xbf16> to vector<4x32xbf16>
    %c6_961 = arith.constant 6 : index
    %c0_962 = arith.constant 0 : index
    %c0_963 = arith.constant 0 : index
    %918 = vector.load %arg5[%c6_961, %c0_962, %c0_963] : memref<9x8x4xbf16, #tpu.memory_space<vmem>>, vector<1x8x4xbf16>
    %919 = vector.shape_cast %918 : vector<1x8x4xbf16> to vector<8x4xbf16>
    %cst_964 = arith.constant dense<0.000000e+00> : vector<8x32xf32>
    %920 = tpu.matmul %919, %917, %cst_964 {dimension_numbers = #tpu.dot_dimension_numbers<[1], [0], [0], [1], [0, 0, 1, 1], [], []>} : vector<8x4xbf16>, vector<4x32xbf16>, vector<8x32xf32> -> vector<8x32xf32>
    %921 = arith.addf %915, %920 : vector<8x32xf32>
    %c0_965 = arith.constant 0 : index
    %c15_966 = arith.constant 15 : index
    %c1_967 = arith.constant 1 : index
    %922 = vector.load %arg9[%c0_965, %c15_966, %c1_967] : memref<4x18x34xbf16, #tpu.memory_space<vmem>>, vector<4x1x32xbf16>
    %923 = vector.shape_cast %922 : vector<4x1x32xbf16> to vector<4x32xbf16>
    %c7_968 = arith.constant 7 : index
    %c0_969 = arith.constant 0 : index
    %c0_970 = arith.constant 0 : index
    %924 = vector.load %arg5[%c7_968, %c0_969, %c0_970] : memref<9x8x4xbf16, #tpu.memory_space<vmem>>, vector<1x8x4xbf16>
    %925 = vector.shape_cast %924 : vector<1x8x4xbf16> to vector<8x4xbf16>
    %cst_971 = arith.constant dense<0.000000e+00> : vector<8x32xf32>
    %926 = tpu.matmul %925, %923, %cst_971 {dimension_numbers = #tpu.dot_dimension_numbers<[1], [0], [0], [1], [0, 0, 1, 1], [], []>} : vector<8x4xbf16>, vector<4x32xbf16>, vector<8x32xf32> -> vector<8x32xf32>
    %927 = arith.addf %921, %926 : vector<8x32xf32>
    %c0_972 = arith.constant 0 : index
    %c15_973 = arith.constant 15 : index
    %c2_974 = arith.constant 2 : index
    %928 = vector.load %arg9[%c0_972, %c15_973, %c2_974] : memref<4x18x34xbf16, #tpu.memory_space<vmem>>, vector<4x1x32xbf16>
    %929 = vector.shape_cast %928 : vector<4x1x32xbf16> to vector<4x32xbf16>
    %c8_975 = arith.constant 8 : index
    %c0_976 = arith.constant 0 : index
    %c0_977 = arith.constant 0 : index
    %930 = vector.load %arg5[%c8_975, %c0_976, %c0_977] : memref<9x8x4xbf16, #tpu.memory_space<vmem>>, vector<1x8x4xbf16>
    %931 = vector.shape_cast %930 : vector<1x8x4xbf16> to vector<8x4xbf16>
    %cst_978 = arith.constant dense<0.000000e+00> : vector<8x32xf32>
    %932 = tpu.matmul %931, %929, %cst_978 {dimension_numbers = #tpu.dot_dimension_numbers<[1], [0], [0], [1], [0, 0, 1, 1], [], []>} : vector<8x4xbf16>, vector<4x32xbf16>, vector<8x32xf32> -> vector<8x32xf32>
    %933 = arith.addf %927, %932 : vector<8x32xf32>
    %934 = vector.broadcast %45 : vector<8x1xf32> to vector<8x32xf32>
    %935 = arith.mulf %933, %934 : vector<8x32xf32>
    %936 = vector.broadcast %46 : vector<8x1xf32> to vector<8x32xf32>
    %937 = arith.addf %935, %936 : vector<8x32xf32>
    %cst_979 = arith.constant 0.000000e+00 : f32
    %938 = vector.broadcast %cst_979 : f32 to vector<8x32xf32>
    %939 = arith.maximumf %937, %938 : vector<8x32xf32>
    %c0_980 = arith.constant 0 : index
    %c0_981 = arith.constant 0 : index
    %c13_982 = arith.constant 13 : index
    %c0_983 = arith.constant 0 : index
    %940 = vector.load %arg8[%c0_980, %c0_981, %c13_982, %c0_983] : memref<1x8x16x32xf32, #tpu.memory_space<vmem>>, vector<1x8x1x32xf32>
    %941 = vector.shape_cast %940 : vector<1x8x1x32xf32> to vector<8x32xf32>
    %942 = vector.shape_cast %939 : vector<8x32xf32> to vector<1x8x1x32xf32>
    tpu.vector_store %arg8[%c0_980, %c0_981, %c13_982, %c0_983], %942 {strides = array<i32>} : memref<1x8x16x32xf32, #tpu.memory_space<vmem>>, vector<1x8x1x32xf32>,
    %cst_984 = arith.constant 0.000000e+00 : f32
    %943 = vector.broadcast %cst_984 : f32 to vector<8x32xf32>
    %c0_985 = arith.constant 0 : index
    %c14_986 = arith.constant 14 : index
    %c0_987 = arith.constant 0 : index
    %944 = vector.load %arg9[%c0_985, %c14_986, %c0_987] : memref<4x18x34xbf16, #tpu.memory_space<vmem>>, vector<4x1x32xbf16>
    %945 = vector.shape_cast %944 : vector<4x1x32xbf16> to vector<4x32xbf16>
    %c0_988 = arith.constant 0 : index
    %c0_989 = arith.constant 0 : index
    %c0_990 = arith.constant 0 : index
    %946 = vector.load %arg5[%c0_988, %c0_989, %c0_990] : memref<9x8x4xbf16, #tpu.memory_space<vmem>>, vector<1x8x4xbf16>
    %947 = vector.shape_cast %946 : vector<1x8x4xbf16> to vector<8x4xbf16>
    %cst_991 = arith.constant dense<0.000000e+00> : vector<8x32xf32>
    %948 = tpu.matmul %947, %945, %cst_991 {dimension_numbers = #tpu.dot_dimension_numbers<[1], [0], [0], [1], [0, 0, 1, 1], [], []>} : vector<8x4xbf16>, vector<4x32xbf16>, vector<8x32xf32> -> vector<8x32xf32>
    %949 = arith.addf %943, %948 : vector<8x32xf32>
    %c0_992 = arith.constant 0 : index
    %c14_993 = arith.constant 14 : index
    %c1_994 = arith.constant 1 : index
    %950 = vector.load %arg9[%c0_992, %c14_993, %c1_994] : memref<4x18x34xbf16, #tpu.memory_space<vmem>>, vector<4x1x32xbf16>
    %951 = vector.shape_cast %950 : vector<4x1x32xbf16> to vector<4x32xbf16>
    %c1_995 = arith.constant 1 : index
    %c0_996 = arith.constant 0 : index
    %c0_997 = arith.constant 0 : index
    %952 = vector.load %arg5[%c1_995, %c0_996, %c0_997] : memref<9x8x4xbf16, #tpu.memory_space<vmem>>, vector<1x8x4xbf16>
    %953 = vector.shape_cast %952 : vector<1x8x4xbf16> to vector<8x4xbf16>
    %cst_998 = arith.constant dense<0.000000e+00> : vector<8x32xf32>
    %954 = tpu.matmul %953, %951, %cst_998 {dimension_numbers = #tpu.dot_dimension_numbers<[1], [0], [0], [1], [0, 0, 1, 1], [], []>} : vector<8x4xbf16>, vector<4x32xbf16>, vector<8x32xf32> -> vector<8x32xf32>
    %955 = arith.addf %949, %954 : vector<8x32xf32>
    %c0_999 = arith.constant 0 : index
    %c14_1000 = arith.constant 14 : index
    %c2_1001 = arith.constant 2 : index
    %956 = vector.load %arg9[%c0_999, %c14_1000, %c2_1001] : memref<4x18x34xbf16, #tpu.memory_space<vmem>>, vector<4x1x32xbf16>
    %957 = vector.shape_cast %956 : vector<4x1x32xbf16> to vector<4x32xbf16>
    %c2_1002 = arith.constant 2 : index
    %c0_1003 = arith.constant 0 : index
    %c0_1004 = arith.constant 0 : index
    %958 = vector.load %arg5[%c2_1002, %c0_1003, %c0_1004] : memref<9x8x4xbf16, #tpu.memory_space<vmem>>, vector<1x8x4xbf16>
    %959 = vector.shape_cast %958 : vector<1x8x4xbf16> to vector<8x4xbf16>
    %cst_1005 = arith.constant dense<0.000000e+00> : vector<8x32xf32>
    %960 = tpu.matmul %959, %957, %cst_1005 {dimension_numbers = #tpu.dot_dimension_numbers<[1], [0], [0], [1], [0, 0, 1, 1], [], []>} : vector<8x4xbf16>, vector<4x32xbf16>, vector<8x32xf32> -> vector<8x32xf32>
    %961 = arith.addf %955, %960 : vector<8x32xf32>
    %c0_1006 = arith.constant 0 : index
    %c15_1007 = arith.constant 15 : index
    %c0_1008 = arith.constant 0 : index
    %962 = vector.load %arg9[%c0_1006, %c15_1007, %c0_1008] : memref<4x18x34xbf16, #tpu.memory_space<vmem>>, vector<4x1x32xbf16>
    %963 = vector.shape_cast %962 : vector<4x1x32xbf16> to vector<4x32xbf16>
    %c3_1009 = arith.constant 3 : index
    %c0_1010 = arith.constant 0 : index
    %c0_1011 = arith.constant 0 : index
    %964 = vector.load %arg5[%c3_1009, %c0_1010, %c0_1011] : memref<9x8x4xbf16, #tpu.memory_space<vmem>>, vector<1x8x4xbf16>
    %965 = vector.shape_cast %964 : vector<1x8x4xbf16> to vector<8x4xbf16>
    %cst_1012 = arith.constant dense<0.000000e+00> : vector<8x32xf32>
    %966 = tpu.matmul %965, %963, %cst_1012 {dimension_numbers = #tpu.dot_dimension_numbers<[1], [0], [0], [1], [0, 0, 1, 1], [], []>} : vector<8x4xbf16>, vector<4x32xbf16>, vector<8x32xf32> -> vector<8x32xf32>
    %967 = arith.addf %961, %966 : vector<8x32xf32>
    %c0_1013 = arith.constant 0 : index
    %c15_1014 = arith.constant 15 : index
    %c1_1015 = arith.constant 1 : index
    %968 = vector.load %arg9[%c0_1013, %c15_1014, %c1_1015] : memref<4x18x34xbf16, #tpu.memory_space<vmem>>, vector<4x1x32xbf16>
    %969 = vector.shape_cast %968 : vector<4x1x32xbf16> to vector<4x32xbf16>
    %c4_1016 = arith.constant 4 : index
    %c0_1017 = arith.constant 0 : index
    %c0_1018 = arith.constant 0 : index
    %970 = vector.load %arg5[%c4_1016, %c0_1017, %c0_1018] : memref<9x8x4xbf16, #tpu.memory_space<vmem>>, vector<1x8x4xbf16>
    %971 = vector.shape_cast %970 : vector<1x8x4xbf16> to vector<8x4xbf16>
    %cst_1019 = arith.constant dense<0.000000e+00> : vector<8x32xf32>
    %972 = tpu.matmul %971, %969, %cst_1019 {dimension_numbers = #tpu.dot_dimension_numbers<[1], [0], [0], [1], [0, 0, 1, 1], [], []>} : vector<8x4xbf16>, vector<4x32xbf16>, vector<8x32xf32> -> vector<8x32xf32>
    %973 = arith.addf %967, %972 : vector<8x32xf32>
    %c0_1020 = arith.constant 0 : index
    %c15_1021 = arith.constant 15 : index
    %c2_1022 = arith.constant 2 : index
    %974 = vector.load %arg9[%c0_1020, %c15_1021, %c2_1022] : memref<4x18x34xbf16, #tpu.memory_space<vmem>>, vector<4x1x32xbf16>
    %975 = vector.shape_cast %974 : vector<4x1x32xbf16> to vector<4x32xbf16>
    %c5_1023 = arith.constant 5 : index
    %c0_1024 = arith.constant 0 : index
    %c0_1025 = arith.constant 0 : index
    %976 = vector.load %arg5[%c5_1023, %c0_1024, %c0_1025] : memref<9x8x4xbf16, #tpu.memory_space<vmem>>, vector<1x8x4xbf16>
    %977 = vector.shape_cast %976 : vector<1x8x4xbf16> to vector<8x4xbf16>
    %cst_1026 = arith.constant dense<0.000000e+00> : vector<8x32xf32>
    %978 = tpu.matmul %977, %975, %cst_1026 {dimension_numbers = #tpu.dot_dimension_numbers<[1], [0], [0], [1], [0, 0, 1, 1], [], []>} : vector<8x4xbf16>, vector<4x32xbf16>, vector<8x32xf32> -> vector<8x32xf32>
    %979 = arith.addf %973, %978 : vector<8x32xf32>
    %c0_1027 = arith.constant 0 : index
    %c16 = arith.constant 16 : index
    %c0_1028 = arith.constant 0 : index
    %980 = vector.load %arg9[%c0_1027, %c16, %c0_1028] : memref<4x18x34xbf16, #tpu.memory_space<vmem>>, vector<4x1x32xbf16>
    %981 = vector.shape_cast %980 : vector<4x1x32xbf16> to vector<4x32xbf16>
    %c6_1029 = arith.constant 6 : index
    %c0_1030 = arith.constant 0 : index
    %c0_1031 = arith.constant 0 : index
    %982 = vector.load %arg5[%c6_1029, %c0_1030, %c0_1031] : memref<9x8x4xbf16, #tpu.memory_space<vmem>>, vector<1x8x4xbf16>
    %983 = vector.shape_cast %982 : vector<1x8x4xbf16> to vector<8x4xbf16>
    %cst_1032 = arith.constant dense<0.000000e+00> : vector<8x32xf32>
    %984 = tpu.matmul %983, %981, %cst_1032 {dimension_numbers = #tpu.dot_dimension_numbers<[1], [0], [0], [1], [0, 0, 1, 1], [], []>} : vector<8x4xbf16>, vector<4x32xbf16>, vector<8x32xf32> -> vector<8x32xf32>
    %985 = arith.addf %979, %984 : vector<8x32xf32>
    %c0_1033 = arith.constant 0 : index
    %c16_1034 = arith.constant 16 : index
    %c1_1035 = arith.constant 1 : index
    %986 = vector.load %arg9[%c0_1033, %c16_1034, %c1_1035] : memref<4x18x34xbf16, #tpu.memory_space<vmem>>, vector<4x1x32xbf16>
    %987 = vector.shape_cast %986 : vector<4x1x32xbf16> to vector<4x32xbf16>
    %c7_1036 = arith.constant 7 : index
    %c0_1037 = arith.constant 0 : index
    %c0_1038 = arith.constant 0 : index
    %988 = vector.load %arg5[%c7_1036, %c0_1037, %c0_1038] : memref<9x8x4xbf16, #tpu.memory_space<vmem>>, vector<1x8x4xbf16>
    %989 = vector.shape_cast %988 : vector<1x8x4xbf16> to vector<8x4xbf16>
    %cst_1039 = arith.constant dense<0.000000e+00> : vector<8x32xf32>
    %990 = tpu.matmul %989, %987, %cst_1039 {dimension_numbers = #tpu.dot_dimension_numbers<[1], [0], [0], [1], [0, 0, 1, 1], [], []>} : vector<8x4xbf16>, vector<4x32xbf16>, vector<8x32xf32> -> vector<8x32xf32>
    %991 = arith.addf %985, %990 : vector<8x32xf32>
    %c0_1040 = arith.constant 0 : index
    %c16_1041 = arith.constant 16 : index
    %c2_1042 = arith.constant 2 : index
    %992 = vector.load %arg9[%c0_1040, %c16_1041, %c2_1042] : memref<4x18x34xbf16, #tpu.memory_space<vmem>>, vector<4x1x32xbf16>
    %993 = vector.shape_cast %992 : vector<4x1x32xbf16> to vector<4x32xbf16>
    %c8_1043 = arith.constant 8 : index
    %c0_1044 = arith.constant 0 : index
    %c0_1045 = arith.constant 0 : index
    %994 = vector.load %arg5[%c8_1043, %c0_1044, %c0_1045] : memref<9x8x4xbf16, #tpu.memory_space<vmem>>, vector<1x8x4xbf16>
    %995 = vector.shape_cast %994 : vector<1x8x4xbf16> to vector<8x4xbf16>
    %cst_1046 = arith.constant dense<0.000000e+00> : vector<8x32xf32>
    %996 = tpu.matmul %995, %993, %cst_1046 {dimension_numbers = #tpu.dot_dimension_numbers<[1], [0], [0], [1], [0, 0, 1, 1], [], []>} : vector<8x4xbf16>, vector<4x32xbf16>, vector<8x32xf32> -> vector<8x32xf32>
    %997 = arith.addf %991, %996 : vector<8x32xf32>
    %998 = vector.broadcast %45 : vector<8x1xf32> to vector<8x32xf32>
    %999 = arith.mulf %997, %998 : vector<8x32xf32>
    %1000 = vector.broadcast %46 : vector<8x1xf32> to vector<8x32xf32>
    %1001 = arith.addf %999, %1000 : vector<8x32xf32>
    %cst_1047 = arith.constant 0.000000e+00 : f32
    %1002 = vector.broadcast %cst_1047 : f32 to vector<8x32xf32>
    %1003 = arith.maximumf %1001, %1002 : vector<8x32xf32>
    %c0_1048 = arith.constant 0 : index
    %c0_1049 = arith.constant 0 : index
    %c14_1050 = arith.constant 14 : index
    %c0_1051 = arith.constant 0 : index
    %1004 = vector.load %arg8[%c0_1048, %c0_1049, %c14_1050, %c0_1051] : memref<1x8x16x32xf32, #tpu.memory_space<vmem>>, vector<1x8x1x32xf32>
    %1005 = vector.shape_cast %1004 : vector<1x8x1x32xf32> to vector<8x32xf32>
    %1006 = vector.shape_cast %1003 : vector<8x32xf32> to vector<1x8x1x32xf32>
    tpu.vector_store %arg8[%c0_1048, %c0_1049, %c14_1050, %c0_1051], %1006 {strides = array<i32>} : memref<1x8x16x32xf32, #tpu.memory_space<vmem>>, vector<1x8x1x32xf32>,
    %cst_1052 = arith.constant 0.000000e+00 : f32
    %1007 = vector.broadcast %cst_1052 : f32 to vector<8x32xf32>
    %c0_1053 = arith.constant 0 : index
    %c15_1054 = arith.constant 15 : index
    %c0_1055 = arith.constant 0 : index
    %1008 = vector.load %arg9[%c0_1053, %c15_1054, %c0_1055] : memref<4x18x34xbf16, #tpu.memory_space<vmem>>, vector<4x1x32xbf16>
    %1009 = vector.shape_cast %1008 : vector<4x1x32xbf16> to vector<4x32xbf16>
    %c0_1056 = arith.constant 0 : index
    %c0_1057 = arith.constant 0 : index
    %c0_1058 = arith.constant 0 : index
    %1010 = vector.load %arg5[%c0_1056, %c0_1057, %c0_1058] : memref<9x8x4xbf16, #tpu.memory_space<vmem>>, vector<1x8x4xbf16>
    %1011 = vector.shape_cast %1010 : vector<1x8x4xbf16> to vector<8x4xbf16>
    %cst_1059 = arith.constant dense<0.000000e+00> : vector<8x32xf32>
    %1012 = tpu.matmul %1011, %1009, %cst_1059 {dimension_numbers = #tpu.dot_dimension_numbers<[1], [0], [0], [1], [0, 0, 1, 1], [], []>} : vector<8x4xbf16>, vector<4x32xbf16>, vector<8x32xf32> -> vector<8x32xf32>
    %1013 = arith.addf %1007, %1012 : vector<8x32xf32>
    %c0_1060 = arith.constant 0 : index
    %c15_1061 = arith.constant 15 : index
    %c1_1062 = arith.constant 1 : index
    %1014 = vector.load %arg9[%c0_1060, %c15_1061, %c1_1062] : memref<4x18x34xbf16, #tpu.memory_space<vmem>>, vector<4x1x32xbf16>
    %1015 = vector.shape_cast %1014 : vector<4x1x32xbf16> to vector<4x32xbf16>
    %c1_1063 = arith.constant 1 : index
    %c0_1064 = arith.constant 0 : index
    %c0_1065 = arith.constant 0 : index
    %1016 = vector.load %arg5[%c1_1063, %c0_1064, %c0_1065] : memref<9x8x4xbf16, #tpu.memory_space<vmem>>, vector<1x8x4xbf16>
    %1017 = vector.shape_cast %1016 : vector<1x8x4xbf16> to vector<8x4xbf16>
    %cst_1066 = arith.constant dense<0.000000e+00> : vector<8x32xf32>
    %1018 = tpu.matmul %1017, %1015, %cst_1066 {dimension_numbers = #tpu.dot_dimension_numbers<[1], [0], [0], [1], [0, 0, 1, 1], [], []>} : vector<8x4xbf16>, vector<4x32xbf16>, vector<8x32xf32> -> vector<8x32xf32>
    %1019 = arith.addf %1013, %1018 : vector<8x32xf32>
    %c0_1067 = arith.constant 0 : index
    %c15_1068 = arith.constant 15 : index
    %c2_1069 = arith.constant 2 : index
    %1020 = vector.load %arg9[%c0_1067, %c15_1068, %c2_1069] : memref<4x18x34xbf16, #tpu.memory_space<vmem>>, vector<4x1x32xbf16>
    %1021 = vector.shape_cast %1020 : vector<4x1x32xbf16> to vector<4x32xbf16>
    %c2_1070 = arith.constant 2 : index
    %c0_1071 = arith.constant 0 : index
    %c0_1072 = arith.constant 0 : index
    %1022 = vector.load %arg5[%c2_1070, %c0_1071, %c0_1072] : memref<9x8x4xbf16, #tpu.memory_space<vmem>>, vector<1x8x4xbf16>
    %1023 = vector.shape_cast %1022 : vector<1x8x4xbf16> to vector<8x4xbf16>
    %cst_1073 = arith.constant dense<0.000000e+00> : vector<8x32xf32>
    %1024 = tpu.matmul %1023, %1021, %cst_1073 {dimension_numbers = #tpu.dot_dimension_numbers<[1], [0], [0], [1], [0, 0, 1, 1], [], []>} : vector<8x4xbf16>, vector<4x32xbf16>, vector<8x32xf32> -> vector<8x32xf32>
    %1025 = arith.addf %1019, %1024 : vector<8x32xf32>
    %c0_1074 = arith.constant 0 : index
    %c16_1075 = arith.constant 16 : index
    %c0_1076 = arith.constant 0 : index
    %1026 = vector.load %arg9[%c0_1074, %c16_1075, %c0_1076] : memref<4x18x34xbf16, #tpu.memory_space<vmem>>, vector<4x1x32xbf16>
    %1027 = vector.shape_cast %1026 : vector<4x1x32xbf16> to vector<4x32xbf16>
    %c3_1077 = arith.constant 3 : index
    %c0_1078 = arith.constant 0 : index
    %c0_1079 = arith.constant 0 : index
    %1028 = vector.load %arg5[%c3_1077, %c0_1078, %c0_1079] : memref<9x8x4xbf16, #tpu.memory_space<vmem>>, vector<1x8x4xbf16>
    %1029 = vector.shape_cast %1028 : vector<1x8x4xbf16> to vector<8x4xbf16>
    %cst_1080 = arith.constant dense<0.000000e+00> : vector<8x32xf32>
    %1030 = tpu.matmul %1029, %1027, %cst_1080 {dimension_numbers = #tpu.dot_dimension_numbers<[1], [0], [0], [1], [0, 0, 1, 1], [], []>} : vector<8x4xbf16>, vector<4x32xbf16>, vector<8x32xf32> -> vector<8x32xf32>
    %1031 = arith.addf %1025, %1030 : vector<8x32xf32>
    %c0_1081 = arith.constant 0 : index
    %c16_1082 = arith.constant 16 : index
    %c1_1083 = arith.constant 1 : index
    %1032 = vector.load %arg9[%c0_1081, %c16_1082, %c1_1083] : memref<4x18x34xbf16, #tpu.memory_space<vmem>>, vector<4x1x32xbf16>
    %1033 = vector.shape_cast %1032 : vector<4x1x32xbf16> to vector<4x32xbf16>
    %c4_1084 = arith.constant 4 : index
    %c0_1085 = arith.constant 0 : index
    %c0_1086 = arith.constant 0 : index
    %1034 = vector.load %arg5[%c4_1084, %c0_1085, %c0_1086] : memref<9x8x4xbf16, #tpu.memory_space<vmem>>, vector<1x8x4xbf16>
    %1035 = vector.shape_cast %1034 : vector<1x8x4xbf16> to vector<8x4xbf16>
    %cst_1087 = arith.constant dense<0.000000e+00> : vector<8x32xf32>
    %1036 = tpu.matmul %1035, %1033, %cst_1087 {dimension_numbers = #tpu.dot_dimension_numbers<[1], [0], [0], [1], [0, 0, 1, 1], [], []>} : vector<8x4xbf16>, vector<4x32xbf16>, vector<8x32xf32> -> vector<8x32xf32>
    %1037 = arith.addf %1031, %1036 : vector<8x32xf32>
    %c0_1088 = arith.constant 0 : index
    %c16_1089 = arith.constant 16 : index
    %c2_1090 = arith.constant 2 : index
    %1038 = vector.load %arg9[%c0_1088, %c16_1089, %c2_1090] : memref<4x18x34xbf16, #tpu.memory_space<vmem>>, vector<4x1x32xbf16>
    %1039 = vector.shape_cast %1038 : vector<4x1x32xbf16> to vector<4x32xbf16>
    %c5_1091 = arith.constant 5 : index
    %c0_1092 = arith.constant 0 : index
    %c0_1093 = arith.constant 0 : index
    %1040 = vector.load %arg5[%c5_1091, %c0_1092, %c0_1093] : memref<9x8x4xbf16, #tpu.memory_space<vmem>>, vector<1x8x4xbf16>
    %1041 = vector.shape_cast %1040 : vector<1x8x4xbf16> to vector<8x4xbf16>
    %cst_1094 = arith.constant dense<0.000000e+00> : vector<8x32xf32>
    %1042 = tpu.matmul %1041, %1039, %cst_1094 {dimension_numbers = #tpu.dot_dimension_numbers<[1], [0], [0], [1], [0, 0, 1, 1], [], []>} : vector<8x4xbf16>, vector<4x32xbf16>, vector<8x32xf32> -> vector<8x32xf32>
    %1043 = arith.addf %1037, %1042 : vector<8x32xf32>
    %c0_1095 = arith.constant 0 : index
    %c17 = arith.constant 17 : index
    %c0_1096 = arith.constant 0 : index
    %1044 = vector.load %arg9[%c0_1095, %c17, %c0_1096] : memref<4x18x34xbf16, #tpu.memory_space<vmem>>, vector<4x1x32xbf16>
    %1045 = vector.shape_cast %1044 : vector<4x1x32xbf16> to vector<4x32xbf16>
    %c6_1097 = arith.constant 6 : index
    %c0_1098 = arith.constant 0 : index
    %c0_1099 = arith.constant 0 : index
    %1046 = vector.load %arg5[%c6_1097, %c0_1098, %c0_1099] : memref<9x8x4xbf16, #tpu.memory_space<vmem>>, vector<1x8x4xbf16>
    %1047 = vector.shape_cast %1046 : vector<1x8x4xbf16> to vector<8x4xbf16>
    %cst_1100 = arith.constant dense<0.000000e+00> : vector<8x32xf32>
    %1048 = tpu.matmul %1047, %1045, %cst_1100 {dimension_numbers = #tpu.dot_dimension_numbers<[1], [0], [0], [1], [0, 0, 1, 1], [], []>} : vector<8x4xbf16>, vector<4x32xbf16>, vector<8x32xf32> -> vector<8x32xf32>
    %1049 = arith.addf %1043, %1048 : vector<8x32xf32>
    %c0_1101 = arith.constant 0 : index
    %c17_1102 = arith.constant 17 : index
    %c1_1103 = arith.constant 1 : index
    %1050 = vector.load %arg9[%c0_1101, %c17_1102, %c1_1103] : memref<4x18x34xbf16, #tpu.memory_space<vmem>>, vector<4x1x32xbf16>
    %1051 = vector.shape_cast %1050 : vector<4x1x32xbf16> to vector<4x32xbf16>
    %c7_1104 = arith.constant 7 : index
    %c0_1105 = arith.constant 0 : index
    %c0_1106 = arith.constant 0 : index
    %1052 = vector.load %arg5[%c7_1104, %c0_1105, %c0_1106] : memref<9x8x4xbf16, #tpu.memory_space<vmem>>, vector<1x8x4xbf16>
    %1053 = vector.shape_cast %1052 : vector<1x8x4xbf16> to vector<8x4xbf16>
    %cst_1107 = arith.constant dense<0.000000e+00> : vector<8x32xf32>
    %1054 = tpu.matmul %1053, %1051, %cst_1107 {dimension_numbers = #tpu.dot_dimension_numbers<[1], [0], [0], [1], [0, 0, 1, 1], [], []>} : vector<8x4xbf16>, vector<4x32xbf16>, vector<8x32xf32> -> vector<8x32xf32>
    %1055 = arith.addf %1049, %1054 : vector<8x32xf32>
    %c0_1108 = arith.constant 0 : index
    %c17_1109 = arith.constant 17 : index
    %c2_1110 = arith.constant 2 : index
    %1056 = vector.load %arg9[%c0_1108, %c17_1109, %c2_1110] : memref<4x18x34xbf16, #tpu.memory_space<vmem>>, vector<4x1x32xbf16>
    %1057 = vector.shape_cast %1056 : vector<4x1x32xbf16> to vector<4x32xbf16>
    %c8_1111 = arith.constant 8 : index
    %c0_1112 = arith.constant 0 : index
    %c0_1113 = arith.constant 0 : index
    %1058 = vector.load %arg5[%c8_1111, %c0_1112, %c0_1113] : memref<9x8x4xbf16, #tpu.memory_space<vmem>>, vector<1x8x4xbf16>
    %1059 = vector.shape_cast %1058 : vector<1x8x4xbf16> to vector<8x4xbf16>
    %cst_1114 = arith.constant dense<0.000000e+00> : vector<8x32xf32>
    %1060 = tpu.matmul %1059, %1057, %cst_1114 {dimension_numbers = #tpu.dot_dimension_numbers<[1], [0], [0], [1], [0, 0, 1, 1], [], []>} : vector<8x4xbf16>, vector<4x32xbf16>, vector<8x32xf32> -> vector<8x32xf32>
    %1061 = arith.addf %1055, %1060 : vector<8x32xf32>
    %1062 = vector.broadcast %45 : vector<8x1xf32> to vector<8x32xf32>
    %1063 = arith.mulf %1061, %1062 : vector<8x32xf32>
    %1064 = vector.broadcast %46 : vector<8x1xf32> to vector<8x32xf32>
    %1065 = arith.addf %1063, %1064 : vector<8x32xf32>
    %cst_1115 = arith.constant 0.000000e+00 : f32
    %1066 = vector.broadcast %cst_1115 : f32 to vector<8x32xf32>
    %1067 = arith.maximumf %1065, %1066 : vector<8x32xf32>
    %c0_1116 = arith.constant 0 : index
    %c0_1117 = arith.constant 0 : index
    %c15_1118 = arith.constant 15 : index
    %c0_1119 = arith.constant 0 : index
    %1068 = vector.load %arg8[%c0_1116, %c0_1117, %c15_1118, %c0_1119] : memref<1x8x16x32xf32, #tpu.memory_space<vmem>>, vector<1x8x1x32xf32>
    %1069 = vector.shape_cast %1068 : vector<1x8x1x32xf32> to vector<8x32xf32>
    %1070 = vector.shape_cast %1067 : vector<8x32xf32> to vector<1x8x1x32xf32>
    tpu.vector_store %arg8[%c0_1116, %c0_1117, %c15_1118, %c0_1119], %1070 {strides = array<i32>} : memref<1x8x16x32xf32, #tpu.memory_space<vmem>>, vector<1x8x1x32xf32>,
    return
  }
  func.func @transform_0(%arg0: i32, %arg1: i32) -> (i32, i32, i32, i32) {
    %c0_i32 = arith.constant 0 : i32
    %c0_i32_0 = arith.constant 0 : i32
    %c0_i32_1 = arith.constant 0 : i32
    %c0_i32_2 = arith.constant 0 : i32
    return %arg0, %c0_i32, %c0_i32_0, %c0_i32_1 : i32, i32, i32, i32
  }
  func.func @transform_1(%arg0: i32, %arg1: i32) -> (i32, i32) {
    %c0_i32 = arith.constant 0 : i32
    %c0_i32_0 = arith.constant 0 : i32
    %c0_i32_1 = arith.constant 0 : i32
    return %c0_i32, %c0_i32_0 : i32, i32
  }
  func.func @transform_2(%arg0: i32, %arg1: i32) -> (i32, i32) {
    %c0_i32 = arith.constant 0 : i32
    %c0_i32_0 = arith.constant 0 : i32
    %c0_i32_1 = arith.constant 0 : i32
    return %c0_i32, %c0_i32_0 : i32, i32
  }
  func.func @transform_3(%arg0: i32, %arg1: i32) -> (i32, i32, i32) {
    %c0_i32 = arith.constant 0 : i32
    %c0_i32_0 = arith.constant 0 : i32
    %c0_i32_1 = arith.constant 0 : i32
    %c0_i32_2 = arith.constant 0 : i32
    return %c0_i32, %c0_i32_0, %c0_i32_1 : i32, i32, i32
  }
  func.func @transform_4(%arg0: i32, %arg1: i32) -> (i32, i32) {
    %c0_i32 = arith.constant 0 : i32
    %c0_i32_0 = arith.constant 0 : i32
    %c0_i32_1 = arith.constant 0 : i32
    return %c0_i32, %c0_i32_0 : i32, i32
  }
  func.func @transform_5(%arg0: i32, %arg1: i32) -> (i32, i32) {
    %c0_i32 = arith.constant 0 : i32
    %c0_i32_0 = arith.constant 0 : i32
    %c0_i32_1 = arith.constant 0 : i32
    return %c0_i32, %c0_i32_0 : i32, i32
  }
  func.func @transform_6(%arg0: i32, %arg1: i32) -> (i32, i32, i32, i32) {
    %c0_i32 = arith.constant 0 : i32
    %c0_i32_0 = arith.constant 0 : i32
    %c0_i32_1 = arith.constant 0 : i32
    return %arg0, %c0_i32, %arg1, %c0_i32_0 : i32, i32, i32, i32
  }
}

</mosaic_0001>

<bundles_post_ra>
// kernel: upsample_interpolate_forward.1
= control target key start
LH: loop header
LB: loop body
LE: loop exit
PB: predicated region body
PF: predicated region fallthrough
CT: control target
= control target key end

     0   :  { %s21519_s0 = inlined_call_operand.vmem [shape: f32[2,4,16,16], index: 0, kind: input, shape index: {}]   ;;  %s21520_s1 = inlined_call_operand.hbm [shape: f32[34,16], index: 1, kind: input, shape index: {}]   ;;  %s21521_s2 = inlined_call_operand.vmem [shape: f32[16,34], index: 2, kind: input, shape index: {}]   ;;  %s21522_s3 = inlined_call_operand.vmem [shape: bf16[9,8,4], index: 3, kind: input, shape index: {}]   ;;  %s21523_s4 = inlined_call_operand.vmem [shape: f32[8,1], index: 4, kind: input, shape index: {}]   ;;  %s21524_s5 = inlined_call_operand.vmem [shape: f32[8,1], index: 5, kind: input, shape index: {}]   ;;  %s21525_s6 = inlined_call_operand.hbm [shape: f32[2,8,32,32], index: 6, kind: output, shape index: {}]  }
   0x1   :  { %21564 = sst [smem:[#allocation52_spill]] %s21519_s0 }
   0x2   :  { %11 = vsyncpa [#allocation4], 0 }
   0x3   :  { %12 = vsyncpa [#allocation5], 0 }
   0x4   :  { %14 = vsyncpa [#allocation5 + $0x1], 0  ;;  %s17857_s21 = smov 0   ;;  %s17859_s22 = smov 0  }
   0x5   :  { %s17861_s23 = smov 0   ;;  %s17863_s24 = smov 0  }
   0x6   :  { %s17865_s25 = smov 0   ;;  %s17867_s26 = smov 0  }
   0x7   :  { %s17869_s27 = smov 0   ;;  %s17871_s28 = smov 0  }
   0x8 LB: > { %s14111_s29 = sadd.s32 4294967295, %s17803_s28   ;;  %s14112_s30 = sadd.s32 4294967294, %s17803_s28   ;;  %s17803_s28 = sphi %s17871_s28, %s20_s28   ;;  %s17799_s27 = sphi %s17869_s27, %s21726_s27   ;;  %s17795_s26 = sphi %s17867_s26, %s21725_s26   ;;  %s17791_s25 = sphi %s17865_s25, %s21724_s25   ;;  %s17787_s24 = sphi %s17863_s24, %s21723_s24   ;;  %s17783_s23 = sphi %s17861_s23, %s21722_s23   ;;  %s17779_s22 = sphi %s17859_s22, %s21721_s22   ;;  %s17775_s21 = sphi %s17857_s21, %s21720_s21  }
   0x9   : > { %s29_s7 = sadd.s32 1, %s17795_s26  ;;  %s32_s8 = sadd.s32 1, %s17799_s27 }
   0xa   : > { %p30_p0 = scmp.ge.s32.totalorder %s29_s7, 2  ;;  %s172_s9 = sadd.s32 1, %s17783_s23 }
   0xb   : > { %p182_p1 = scmp.ne.s32.totalorder %s17783_s23, %s17779_s22  ;;  %p183_p2 = scmp.eq.s32.totalorder %s14111_s29, 3 }
   0xc   : > { %s21728_s7 = smov (%p30_p0, %s29_s7), 0  ;;  %s21730_s8 = smov (!%p30_p0, %s32_s8), %s17799_s27 }
   0xd   : > { %s168_s10 = ssub.s32 %s17795_s26, %s21728_s7  ;;  %p17909_p3 = por %p183_p2, %p182_p1 }
   0xe   : > { %p34_p4 = scmp.ge.s32.totalorder %s21730_s8, 2  ;;  %p188_p5 = scmp.ne.s32.totalorder %s17779_s22, %s17775_s21 }
   0xf   : > { %s21565_s11 = scalar_select %p17909_p3, 1, 0 }
  0x10   : > { %p189_p6 = scmp.eq.s32.totalorder %s14112_s30, 3  ;;  %p14113_p7 = scmp.ge.s32.totalorder %s17803_s28, 1 }
  0x11   : > { %s21732_s8 = smov (%p34_p4, %s21730_s8), 0  ;;  %p196_p9 = scmp.lt.s32.totalorder %s17803_s28, 5 }
  0x12   : > { %21566 = sst [smem:[#allocation11_spill]] %s21732_s8  ;;  %p17918_p8 = por %p189_p6, %p188_p5 }
  0x13   : > { %s167_s13 = ssub.s32 %s17799_s27, %s21732_s8  ;;  %p17925_p10 = pnand %p14113_p7, %p196_p9 }
  0x14   : > { %s21567_s12 = scalar_select %p17918_p8, 1, 0 }
  0x15   : > { %s169_s14 = sor.u32 %s168_s10, %s167_s13  ;;  %p17929_p12 = scmp.eq.s32.totalorder %s14111_s29, 0 }
  0x16   : > { %s21568_s15 = scalar_select %p17925_p10, 1, 0 }
  0x17   : > { %p170_p11 = scmp.eq.s32.totalorder %s169_s14, 0  ;;  %p17483_p13 = pneg %p17925_p10 }
  0x18   : > { %s21569_s16 = scalar_select %p17929_p12, 1, 0 }
  0x19   : > { %s17936_s17 = scalar_select %p170_p11, %s17783_s23, %s172_s9  }
  0x1a   : > { %s17805_s18 = smov [#allocation3]   ;;  %p17940_p0 = pnand %p17929_p12, %p17483_p13 }
  0x1b   : > { %s208_s19 = sshll.u32 %s17805_s18, 4  ;;  %s17705_s29 = scalar_lea.hbm %s21520_s1, 640  ;;  %s209_s19 = int_to_ptr.vmem [resolvable:$true] %s208_s19 }
  0x1c   : > { %p17706_p1 = scmp.ne.s32.totalorder %s21520_s1, %s17705_s29  ;;  %p17707_p2 = pneg %p17940_p0 }
  0x1d   : > { %p17712_p6 = scmp.lt.u32.totalorder %s17705_s29, %s21520_s1 }
  0x1e   : > { %p17708_p4 = pnand %p17707_p2, %p17706_p1 }
  0x20   : > { %p17709_p5 = pneg %p17708_p4 }
  0x22   : > { %p17714_p7 = pnand %p17712_p6, %p17709_p5 }
  0x24   : > { %17717 = shalt.err (!%p17714_p7)
}
  0x25   : > { %s17718_s8 = scalar_lea.vmem %s209_s19, 640  ;;  %p17726_p8 = scmp.lt.s32.totalorder %s209_s19, %s209_s19 }
  0x26   : > { %p17719_p9 = scmp.ne.s32.totalorder %s209_s19, %s17718_s8  ;;  %p17727_p3 = scmp.lt.s32.totalorder %s17718_s8, %s17718_s8 }
  0x28   : > { %p17721_p11 = pnand %p17719_p9, %p17707_p2  ;;  %p17728_p12 = por %p17727_p3, %p17726_p8 }
  0x2a   : > { %p17722_p13 = pneg %p17721_p11 }
  0x2c   : > { %p17729_p10 = pnand %p17728_p12, %p17722_p13 }
  0x2e   : > { %17732 = shalt.err (!%p17729_p10)
}
  0x2f   : > { %s17806_s30 = smov 128   ;;  %s17807_s10 = smov 8  }
  0x30   : > { %17486 = dma.hbm_to_vmem [thread:$0]  (!%p17940_p0), %s21520_s1, 640, %s209_s19, [#allocation4], %s17806_s30, %s17806_s30, %s17807_s10  }
  0x31   : > { %p21571_p1 = scmp.ne.s32.totalorder %s21568_s15, 0 }
  0x33   : > { %244 = sbr.rel (%p21571_p1) target bundleno = 2054 (0x806), region = 44 }
  0x3a   : > { %p21572_p4 = scmp.ne.s32.totalorder %s21569_s16, 0 }
  0x3c   : > { %17766 = dma.done.wait (%p21572_p4), [#allocation4], 640  }
  0x3d   : > { %17768 = vsyncadd (%p21572_p4), [#allocation4], 4294966656  ;;  %p274_p3 = scmp.lt.s32.totalorder %s17791_s25, 1  ;;  %v17808_v0 = vmov 0.0|0.0   ;;  %vm17809_vm0 = vmmov 0   ;;  %v21531_v1 = vmov 0.0  }
  0x3e   : > { %16575 = vmatprep.subr.bf16.mxu0 %v17808_v0  ;;  %15091 = vmatprep.mubr.msk.f32.mxu0 %vm17809_vm0, %v21531_v1  ;;  %s14121_s8 = sshll.u32 %s17787_s24, 4  ;;  %s21573_s0 = sld [smem:[#allocation52_spill]]  ;;  %vm290_vm1 = vcmask 130048   ;;  %vm1412_vm2 = vcmask 273408   ;;  %vm1415_vm3 = vcmask 270336   ;;  %vm4800_vm4 = vcmask 1041409  }
  0x3f   : > { %s275_s15 = scalar_select %p274_p3, %s17791_s25, 1  ;;  %16593 = vmatprep.subr.bf16.mxu1 %v17808_v0  ;;  %15169 = vmatprep.mubr.msk.f32.mxu1 %vm17809_vm0, %v21531_v1  ;;  %vm4803_vm5 = vcmask 1042434   ;;  %vm4806_vm6 = vcmask 1043459   ;;  %vm4815_vm7 = vcmask 1041408   ;;  %vm4811_vm8 = vcmask 31744  }
  0x40   : > { %s282_s9 = scalar_lea.vmem [#allocation3], %s14121_s8  ;;  %s17811_s14 = smov 126   ;;  %vm5363_vm9 = vcmask 253952  }
  0x41   : > { %s14546_s16 = sshll.u32 %s275_s15, 6  ;;  %v283_v4 = vld [vmem:[%s282_s9] sm:$0xff]  ;;  %v284_v8 = vld [vmem:[%s282_s9 + $0x8] sm:$0xff]  ;;  %v285_v9 = vld [vmem:[%s282_s9 + $0x10] sm:$0x3]  ;;  %s17812_s8 = smov 127  }
  0x42   : > { %v292_v7 = vsel %vm290_vm1, %v283_v4, 0  ;;  %v295_v11 = vsel %vm290_vm1, %v284_v8, 0  ;;  %v298_v12 = vsel %vm290_vm1, %v285_v9, 0  ;;  %v287_v8 = vld [vmem:[%s21521_s2 + $0x8] sm:$0xff]  ;;  %s271_s18 = sand.u32 1, %s17779_s22  }
  0x43   : > { %v17983_v10 = vand.u32 4294901760, %v292_v7  ;;  %v17989_v16 = vand.u32 4294901760, %v295_v11  ;;  %v17994_v18 = vand.u32 4294901760, %v298_v12  ;;  %s14118_s19 = sshll.u32 %s271_s18, 7 }
  0x44   : > { %s17978_s29 = scalar_lea.vmem %s21573_s0, %s14546_s16  ;;  %s20311_s9 = scalar_lea.vmem [#allocation6], %s14118_s19 }
  0x45   : > { %v288_v2 = vld [vmem:[%s17978_s29] sm:$0xff]  ;;  %v289_v3 = vld [vmem:[%s17978_s29 + $0x8] sm:$0xff]  ;;  %v17992_v17 = vsub.f32 %v292_v7, %v17983_v10  ;;  %v17998_v19 = vsub.f32 %v295_v11, %v17989_v16  ;;  %v18004_v23 = vsub.f32 %v298_v12, %v17994_v18  ;;  %v14125_v39 = vld [vmem:[%s17978_s29 + $0x10] sm:$0xff]  ;;  %v858_v11 = vand.u32 4294901760, %v287_v8  ;;  %s13977_s16 = scalar_lea.sflag [#allocation5], %s271_s18 }
  0x46   : > { %v301_v5 = vand.u32 4294901760, %v288_v2  ;;  %v304_v6 = vand.u32 4294901760, %v289_v3  ;;  %v14126_v40 = vld [vmem:[%s17978_s29 + $0x18] sm:$0xff]  ;;  %v1421_v41 = vand.u32 4294901760, %v14125_v39  ;;  %v14130_v55 = vld [vmem:[%s17978_s29 + $0x20] sm:$0xff]  ;;  %v14131_v56 = vld [vmem:[%s17978_s29 + $0x28] sm:$0xff] }
  0x47   : > { %v18001_v22 = vand.u32 4294901760, %v17992_v17  ;;  %v18008_v24 = vand.u32 4294901760, %v17998_v19  ;;  %v18013_v28 = vand.u32 4294901760, %v18004_v23  ;;  %v1424_v42 = vand.u32 4294901760, %v14126_v40  ;;  %v286_v7 = vld [vmem:[%s21521_s2] sm:$0xff] }
  0x48   : > { %v17987_v13 = vpack.c.bf16 %v304_v6, %v301_v5  ;;  %v399_v14 = vsub.f32 %v288_v2, %v301_v5  ;;  %v406_v15 = vsub.f32 %v289_v3, %v304_v6  ;;  %v1519_v43 = vsub.f32 %v14125_v39, %v1421_v41 }
  0x49   : > { %v370_v27 = vsub.f32 %v17992_v17, %v18001_v22  ;;  %v380_v29 = vsub.f32 %v17998_v19, %v18008_v24  ;;  %v390_v35 = vsub.f32 %v18004_v23, %v18013_v28  ;;  %v1526_v44 = vsub.f32 %v14126_v40, %v1424_v42 }
  0x4a   : > { %16577 = vmatpush3.bf16.msra.mxu0 %v17987_v13  ;;  %v400_v20 = vand.u32 4294901760, %v399_v14  ;;  %v407_v21 = vand.u32 4294901760, %v406_v15  ;;  %v16582_v37 = vpack.c.bf16 %v406_v15, %v399_v14  ;;  %v16612_v45 = vpack.c.bf16 %v1424_v42, %v1421_v41 }
  0x4b   : > { %16578 = vmatprep.subr.bf16.mxu0 %v17808_v0  ;;  %v18017_v32 = vand.u32 4294901760, %v370_v27  ;;  %v18020_v34 = vand.u32 4294901760, %v380_v29  ;;  %v18028_v36 = vand.u32 4294901760, %v390_v35  ;;  %v1520_v46 = vand.u32 4294901760, %v1519_v43  ;;  %v14135_v35 = vld [vmem:[%s17978_s29 + $0x30] sm:$0xff] }
  0x4c   : > { %v401_v25 = vsub.f32 %v399_v14, %v400_v20  ;;  %v408_v26 = vsub.f32 %v406_v15, %v407_v21  ;;  %v16588_v38 = vpack.c.bf16 %v407_v21, %v400_v20  ;;  %v1527_v47 = vand.u32 4294901760, %v1526_v44 }
  0x4d   : > { %15092 = vmatmul.mubr.f32.vlgmr.msra.gmra.mrb[0].mxu0 %v18017_v32  ;;  %v1521_v48 = vsub.f32 %v1519_v43, %v1520_v46  ;;  %v16618_v53 = vpack.c.bf16 %v1526_v44, %v1519_v43  ;;  %v2540_v57 = vand.u32 4294901760, %v14130_v55  ;;  %v2543_v58 = vand.u32 4294901760, %v14131_v56 }
  0x4e   : > { %v402_v30 = vand.u32 4294901760, %v401_v25  ;;  %v409_v31 = vand.u32 4294901760, %v408_v26  ;;  %15094 = vmatprep.mubr.msk.f32.mxu0 %vm17809_vm0, %v21531_v1  ;;  %v1528_v49 = vsub.f32 %v1526_v44, %v1527_v47  ;;  %v16624_v54 = vpack.c.bf16 %v1527_v47, %v1520_v46 }
  0x4f   : > { %v1522_v50 = vand.u32 4294901760, %v1521_v48  ;;  %v18138_v59 = vsub.f32 %v14130_v55, %v2540_v57  ;;  %v2645_v60 = vsub.f32 %v14131_v56, %v2543_v58  ;;  %v18143_v61 = vpack.c.bf16 %v2543_v58, %v2540_v57 }
  0x50   : > { %v16579_v33 = vpack.c.bf16 %v409_v31, %v402_v30  ;;  %v1529_v51 = vand.u32 4294901760, %v1528_v49  ;;  %v855_v9 = vand.u32 4294901760, %v286_v7  ;;  %v960_v15 = vsub.f32 %v287_v8, %v858_v11 }
  0x51   : > { %15095 = vmatmul.mubr.f32.gmra.mrb[2].mxu0 %v18020_v34  ;;  %v2639_v62 = vand.u32 4294901760, %v18138_v59  ;;  %v2646_v63 = vand.u32 4294901760, %v2645_v60 }
  0x52   : > { %16580 = vmatpush3.bf16.msra.mxu0 %v16579_v33  ;;  %15097 = vmatprep.mubr.msk.f32.mxu0 %vm17809_vm0, %v21531_v1  ;;  %v16615_v52 = vpack.c.bf16 %v1529_v51, %v1522_v50  ;;  %v18171_v12 = vpack.c.bf16 %v858_v11, %v855_v9  ;;  %v953_v14 = vsub.f32 %v286_v7, %v855_v9  ;;  %v961_v21 = vand.u32 4294901760, %v960_v15 }
  0x53   : > { %16581 = vmatprep.subr.bf16.mxu0 %v17808_v0  ;;  %v2640_v2 = vsub.f32 %v18138_v59, %v2639_v62  ;;  %v2647_v3 = vsub.f32 %v2645_v60, %v2646_v63  ;;  %v16660_v33 = vpack.c.bf16 %v2646_v63, %v2639_v62 }
  0x54   : > { %16595 = vmatpush3.bf16.msra.mxu1 %v18171_v12  ;;  %v954_v20 = vand.u32 4294901760, %v953_v14  ;;  %v962_v26 = vsub.f32 %v960_v15, %v961_v21  ;;  %v18199_v31 = vpack.c.bf16 %v960_v15, %v953_v14 }
  0x55   : > { %15098 = vmatmul.mubr.f32.gmra.mrb[4].mxu0 %v18028_v36  ;;  %v2641_v4 = vand.u32 4294901760, %v2640_v2  ;;  %v2648_v5 = vand.u32 4294901760, %v2647_v3  ;;  %16596 = vmatprep.subr.bf16.mxu1 %v17808_v0 }
  0x56   : > { %15104 = vmatprep.mubr.msk.f32.mxu0 %vm17809_vm0, %v21531_v1  ;;  %v955_v25 = vsub.f32 %v953_v14, %v954_v20  ;;  %v963_v29 = vand.u32 4294901760, %v962_v26  ;;  %v18224_v42 = vpack.c.bf16 %v961_v21, %v954_v20 }
  0x57   : > { %v16651_v6 = vpack.c.bf16 %v2648_v5, %v2641_v4 }
  0x58   : > { %v956_v27 = vand.u32 4294901760, %v955_v25 }
  0x59   : > { %15105 = vmatmul.mubr.f32.vlgmr.msra.gmra.mrb[0].mxu0 %v17983_v10 }
  0x5a   : > { %15107 = vmatprep.mubr.msk.f32.mxu0 %vm17809_vm0, %v21531_v1  ;;  %16583 = vmatpush3.bf16.msra.mxu0 %v16582_v37  ;;  %v18186_v30 = vpack.c.bf16 %v963_v29, %v956_v27  ;;  %v14136_v37 = vld [vmem:[%s17978_s29 + $0x38] sm:$0xff] }
  0x5b   : > { %16584 = vmatprep.subr.bf16.mxu0 %v17808_v0  ;;  %v3662_v39 = vand.u32 4294901760, %v14136_v37 }
  0x5d   : > { %15108 = vmatmul.mubr.f32.gmra.mrb[2].mxu0 %v17989_v16  ;;  %v3764_v41 = vsub.f32 %v14136_v37, %v3662_v39 }
  0x5e   : > { %15110 = vmatprep.mubr.msk.f32.mxu0 %vm17809_vm0, %v21531_v1 }
  0x61   : > { %15111 = vmatmul.mubr.f32.gmra.mrb[4].mxu0 %v17994_v18 }
  0x62   : > { %15117 = vmatprep.mubr.msk.f32.mxu0 %vm17809_vm0, %v21531_v1 }
  0x65   : > { %15118 = vmatmul.mubr.f32.vlgmr.msra.gmra.mrb[0].mxu0 %v17992_v17 }
  0x66   : > { %15120 = vmatprep.mubr.msk.f32.mxu0 %vm17809_vm0, %v21531_v1  ;;  %16586 = vmatpush3.bf16.msra.mxu0 %v17987_v13 }
  0x67   : > { %16587 = vmatprep.subr.bf16.mxu0 %v17808_v0 }
  0x69   : > { %15121 = vmatmul.mubr.f32.gmra.mrb[2].mxu0 %v17998_v19 }
  0x6a   : > { %15123 = vmatprep.mubr.msk.f32.mxu0 %vm17809_vm0, %v21531_v1 }
  0x6d   : > { %15124 = vmatmul.mubr.f32.gmra.mrb[4].mxu0 %v18004_v23 }
  0x6e   : > { %15130 = vmatprep.mubr.msk.f32.mxu0 %vm17809_vm0, %v21531_v1 }
  0x71   : > { %15131 = vmatmul.mubr.f32.vlgmr.msra.gmra.mrb[0].mxu0 %v18001_v22 }
  0x72   : > { %15133 = vmatprep.mubr.msk.f32.mxu0 %vm17809_vm0, %v21531_v1  ;;  %16589 = vmatpush3.bf16.msra.mxu0 %v16588_v38  ;;  %v3659_v38 = vand.u32 4294901760, %v14135_v35 }
  0x73   : > { %16590 = vmatprep.subr.bf16.mxu0 %v17808_v0 }
  0x74   : > { %v3757_v40 = vsub.f32 %v14135_v35, %v3659_v38  ;;  %v16684_v43 = vpack.c.bf16 %v3662_v39, %v3659_v38 }
  0x75   : > { %15134 = vmatmul.mubr.f32.gmra.mrb[2].mxu0 %v18008_v24 }
  0x76   : > { %15136 = vmatprep.mubr.msk.f32.mxu0 %vm17809_vm0, %v21531_v1  ;;  %v3758_v44 = vand.u32 4294901760, %v3757_v40  ;;  %v16690_v51 = vpack.c.bf16 %v3764_v41, %v3757_v40 }
  0x78   : > { %v3759_v46 = vsub.f32 %v3757_v40, %v3758_v44 }
  0x79   : > { %15137 = vmatmul.mubr.f32.gmra.mrb[4].mxu0 %v18013_v28 }
  0x7a   : > { %15143 = vmatprep.mubr.msk.f32.mxu0 %vm17809_vm0, %v21531_v1  ;;  %v3760_v48 = vand.u32 4294901760, %v3759_v46 }
  0x7d   : > { %15144 = vmatmul.mubr.f32.vlgmr.msra.gmra.mrb[0].mxu0 %v17983_v10 }
  0x7e   : > { %15146 = vmatprep.mubr.msk.f32.mxu0 %vm17809_vm0, %v21531_v1  ;;  %16592 = vmatpush3.bf16.msra.mxu0 %v17987_v13  ;;  %v16654_v13 = vpack.c.bf16 %v2645_v60, %v18138_v59 }
  0x7f   : > { %16611 = vmatprep.subr.bf16.mxu0 %v17808_v0 }
  0x81   : > { %15147 = vmatmul.mubr.f32.gmra.mrb[2].mxu0 %v17989_v16 }
  0x82   : > { %15149 = vmatprep.mubr.msk.f32.mxu0 %vm17809_vm0, %v21531_v1 }
  0x85   : > { %15150 = vmatmul.mubr.f32.gmra.mrb[4].mxu0 %v17994_v18 }
  0x86   : > { %15156 = vmatprep.mubr.msk.f32.mxu0 %vm17809_vm0, %v21531_v1 }
  0x89   : > { %15157 = vmatmul.mubr.f32.vlgmr.msra.gmra.mrb[0].mxu0 %v17983_v10 }
  0x8a   : > { %15159 = vmatprep.mubr.msk.f32.mxu0 %vm17809_vm0, %v21531_v1  ;;  %16613 = vmatpush3.bf16.msra.mxu0 %v16612_v45 }
  0x8b   : > { %16614 = vmatprep.subr.bf16.mxu0 %v17808_v0 }
  0x8d   : > { %15160 = vmatmul.mubr.f32.gmra.mrb[2].mxu0 %v17989_v16 }
  0x8e   : > { %15162 = vmatprep.mubr.msk.f32.mxu0 %vm17809_vm0, %v21531_v1 }
  0x91   : > { %15163 = vmatmul.mubr.f32.gmra.mrb[4].mxu0 %v17994_v18 }
  0x92   : > { %15247 = vmatprep.mubr.msk.f32.mxu0 %vm17809_vm0, %v21531_v1 }
  0x95   : > { %15248 = vmatmul.mubr.f32.vlgmr.msra.gmra.mrb[6].mxu0 %v18017_v32 }
  0x96   : > { %15250 = vmatprep.mubr.msk.f32.mxu0 %vm17809_vm0, %v21531_v1  ;;  %16616 = vmatpush3.bf16.msra.mxu0 %v16615_v52 }
  0x97   : > { %16617 = vmatprep.subr.bf16.mxu0 %v17808_v0 }
  0x99   : > { %15251 = vmatmul.mubr.f32.gmra.mrb[8].mxu0 %v18020_v34 }
  0x9a   : > { %15253 = vmatprep.mubr.msk.f32.mxu0 %vm17809_vm0, %v21531_v1 }
  0x9d   : > { %15254 = vmatmul.mubr.f32.gmra.mrb[10].mxu0 %v18028_v36 }
  0x9e   : > { %15260 = vmatprep.mubr.msk.f32.mxu0 %vm17809_vm0, %v21531_v1 }
  0xa1   : > { %15261 = vmatmul.mubr.f32.vlgmr.msra.gmra.mrb[6].mxu0 %v17983_v10 }
  0xa2   : > { %15263 = vmatprep.mubr.msk.f32.mxu0 %vm17809_vm0, %v21531_v1  ;;  %16619 = vmatpush3.bf16.msra.mxu0 %v16618_v53 }
  0xa3   : > { %16620 = vmatprep.subr.bf16.mxu0 %v17808_v0 }
  0xa5   : > { %15264 = vmatmul.mubr.f32.gmra.mrb[8].mxu0 %v17989_v16 }
  0xa6   : > { %15266 = vmatprep.mubr.msk.f32.mxu0 %vm17809_vm0, %v21531_v1 }
  0xa9   : > { %15267 = vmatmul.mubr.f32.gmra.mrb[10].mxu0 %v17994_v18 }
  0xaa   : > { %15273 = vmatprep.mubr.msk.f32.mxu0 %vm17809_vm0, %v21531_v1 }
  0xad   : > { %15274 = vmatmul.mubr.f32.vlgmr.msra.gmra.mrb[6].mxu0 %v17992_v17 }
  0xae   : > { %15276 = vmatprep.mubr.msk.f32.mxu0 %vm17809_vm0, %v21531_v1  ;;  %16622 = vmatpush3.bf16.msra.mxu0 %v16612_v45 }
  0xaf   : > { %16623 = vmatprep.subr.bf16.mxu0 %v17808_v0 }
  0xb1   : > { %15277 = vmatmul.mubr.f32.gmra.mrb[8].mxu0 %v17998_v19 }
  0xb2   : > { %15279 = vmatprep.mubr.msk.f32.mxu0 %vm17809_vm0, %v21531_v1 }
  0xb5   : > { %15280 = vmatmul.mubr.f32.gmra.mrb[10].mxu0 %v18004_v23 }
  0xb6   : > { %15286 = vmatprep.mubr.msk.f32.mxu0 %vm17809_vm0, %v21531_v1 }
  0xb9   : > { %15287 = vmatmul.mubr.f32.vlgmr.msra.gmra.mrb[6].mxu0 %v18001_v22 }
  0xba   : > { %15289 = vmatprep.mubr.msk.f32.mxu0 %vm17809_vm0, %v21531_v1  ;;  %16625 = vmatpush3.bf16.msra.mxu0 %v16624_v54 }
  0xbb   : > { %16626 = vmatprep.subr.bf16.mxu0 %v17808_v0 }
  0xbd   : > { %15290 = vmatmul.mubr.f32.gmra.mrb[8].mxu0 %v18008_v24 }
  0xbe   : > { %15292 = vmatprep.mubr.msk.f32.mxu0 %vm17809_vm0, %v21531_v1 }
  0xc1   : > { %15293 = vmatmul.mubr.f32.gmra.mrb[10].mxu0 %v18013_v28 }
  0xc2   : > { %15299 = vmatprep.mubr.msk.f32.mxu0 %vm17809_vm0, %v21531_v1 }
  0xc5   : > { %15300 = vmatmul.mubr.f32.vlgmr.msra.gmra.mrb[6].mxu0 %v17983_v10 }
  0xc6   : > { %15302 = vmatprep.mubr.msk.f32.mxu0 %vm17809_vm0, %v21531_v1  ;;  %16628 = vmatpush3.bf16.msra.mxu0 %v16612_v45  ;;  %v3765_v45 = vand.u32 4294901760, %v3764_v41 }
  0xc7   : > { %16647 = vmatprep.subr.bf16.mxu0 %v17808_v0 }
  0xc8   : > { %v3766_v47 = vsub.f32 %v3764_v41, %v3765_v45 }
  0xc9   : > { %15303 = vmatmul.mubr.f32.gmra.mrb[8].mxu0 %v17989_v16 }
  0xca   : > { %15305 = vmatprep.mubr.msk.f32.mxu0 %vm17809_vm0, %v21531_v1  ;;  %v3767_v49 = vand.u32 4294901760, %v3766_v47 }
  0xcc   : > { %v16687_v50 = vpack.c.bf16 %v3767_v49, %v3760_v48 }
  0xcd   : > { %15306 = vmatmul.mubr.f32.gmra.mrb[10].mxu0 %v17994_v18 }
  0xce   : > { %15312 = vmatprep.mubr.msk.f32.mxu0 %vm17809_vm0, %v21531_v1 }
  0xd1   : > { %15313 = vmatmul.mubr.f32.vlgmr.msra.gmra.mrb[6].mxu0 %v17983_v10 }
  0xd2   : > { %15315 = vmatprep.mubr.msk.f32.mxu0 %vm17809_vm0, %v21531_v1  ;;  %16649 = vmatpush3.bf16.msra.mxu0 %v18143_v61 }
  0xd3   : > { %16650 = vmatprep.subr.bf16.mxu0 %v17808_v0 }
  0xd5   : > { %15316 = vmatmul.mubr.f32.gmra.mrb[8].mxu0 %v17989_v16 }
  0xd6   : > { %15318 = vmatprep.mubr.msk.f32.mxu0 %vm17809_vm0, %v21531_v1 }
  0xd9   : > { %15319 = vmatmul.mubr.f32.gmra.mrb[10].mxu0 %v17994_v18 }
  0xda   : > { %15403 = vmatprep.mubr.msk.f32.mxu0 %vm17809_vm0, %v21531_v1 }
  0xdd   : > { %15404 = vmatmul.mubr.f32.vlgmr.msra.gmra.mrb[12].mxu0 %v18017_v32 }
  0xde   : > { %15406 = vmatprep.mubr.msk.f32.mxu0 %vm17809_vm0, %v21531_v1  ;;  %16652 = vmatpush3.bf16.msra.mxu0 %v16651_v6 }
  0xdf   : > { %16653 = vmatprep.subr.bf16.mxu0 %v17808_v0 }
  0xe1   : > { %15407 = vmatmul.mubr.f32.gmra.mrb[14].mxu0 %v18020_v34 }
  0xe2   : > { %15409 = vmatprep.mubr.msk.f32.mxu0 %vm17809_vm0, %v21531_v1 }
  0xe5   : > { %15410 = vmatmul.mubr.f32.gmra.mrb[16].mxu0 %v18028_v36 }
  0xe6   : > { %15416 = vmatprep.mubr.msk.f32.mxu0 %vm17809_vm0, %v21531_v1 }
  0xe9   : > { %15417 = vmatmul.mubr.f32.vlgmr.msra.gmra.mrb[12].mxu0 %v17983_v10 }
  0xea   : > { %15419 = vmatprep.mubr.msk.f32.mxu0 %vm17809_vm0, %v21531_v1  ;;  %16655 = vmatpush3.bf16.msra.mxu0 %v16654_v13 }
  0xeb   : > { %16656 = vmatprep.subr.bf16.mxu0 %v17808_v0 }
  0xed   : > { %15420 = vmatmul.mubr.f32.gmra.mrb[14].mxu0 %v17989_v16 }
  0xee   : > { %15422 = vmatprep.mubr.msk.f32.mxu0 %vm17809_vm0, %v21531_v1 }
  0xf1   : > { %15423 = vmatmul.mubr.f32.gmra.mrb[16].mxu0 %v17994_v18 }
  0xf2   : > { %15429 = vmatprep.mubr.msk.f32.mxu0 %vm17809_vm0, %v21531_v1 }
  0xf5   : > { %15430 = vmatmul.mubr.f32.vlgmr.msra.gmra.mrb[12].mxu0 %v17992_v17 }
  0xf6   : > { %15432 = vmatprep.mubr.msk.f32.mxu0 %vm17809_vm0, %v21531_v1  ;;  %16658 = vmatpush3.bf16.msra.mxu0 %v18143_v61 }
  0xf7   : > { %16659 = vmatprep.subr.bf16.mxu0 %v17808_v0 }
  0xf9   : > { %15433 = vmatmul.mubr.f32.gmra.mrb[14].mxu0 %v17998_v19 }
  0xfa   : > { %15435 = vmatprep.mubr.msk.f32.mxu0 %vm17809_vm0, %v21531_v1 }
  0xfd   : > { %15436 = vmatmul.mubr.f32.gmra.mrb[16].mxu0 %v18004_v23 }
  0xfe   : > { %15442 = vmatprep.mubr.msk.f32.mxu0 %vm17809_vm0, %v21531_v1 }
 0x101   : > { %15443 = vmatmul.mubr.f32.vlgmr.msra.gmra.mrb[12].mxu0 %v18001_v22 }
 0x102   : > { %15445 = vmatprep.mubr.msk.f32.mxu0 %vm17809_vm0, %v21531_v1  ;;  %16661 = vmatpush3.bf16.msra.mxu0 %v16660_v33 }
 0x103   : > { %16662 = vmatprep.subr.bf16.mxu0 %v17808_v0 }
 0x105   : > { %15446 = vmatmul.mubr.f32.gmra.mrb[14].mxu0 %v18008_v24 }
 0x106   : > { %15448 = vmatprep.mubr.msk.f32.mxu0 %vm17809_vm0, %v21531_v1 }
 0x109   : > { %15449 = vmatmul.mubr.f32.gmra.mrb[16].mxu0 %v18013_v28 }
 0x10a   : > { %15455 = vmatprep.mubr.msk.f32.mxu0 %vm17809_vm0, %v21531_v1 }
 0x10d   : > { %15456 = vmatmul.mubr.f32.vlgmr.msra.gmra.mrb[12].mxu0 %v17983_v10 }
 0x10e   : > { %15458 = vmatprep.mubr.msk.f32.mxu0 %vm17809_vm0, %v21531_v1  ;;  %16664 = vmatpush3.bf16.msra.mxu0 %v18143_v61 }
 0x10f   : > { %16683 = vmatprep.subr.bf16.mxu0 %v17808_v0 }
 0x111   : > { %15459 = vmatmul.mubr.f32.gmra.mrb[14].mxu0 %v17989_v16 }
 0x112   : > { %15461 = vmatprep.mubr.msk.f32.mxu0 %vm17809_vm0, %v21531_v1 }
 0x115   : > { %15462 = vmatmul.mubr.f32.gmra.mrb[16].mxu0 %v17994_v18 }
 0x116   : > { %15468 = vmatprep.mubr.msk.f32.mxu0 %vm17809_vm0, %v21531_v1 }
 0x119   : > { %15469 = vmatmul.mubr.f32.vlgmr.msra.gmra.mrb[12].mxu0 %v17983_v10 }
 0x11a   : > { %15471 = vmatprep.mubr.msk.f32.mxu0 %vm17809_vm0, %v21531_v1  ;;  %16685 = vmatpush3.bf16.msra.mxu0 %v16684_v43 }
 0x11b   : > { %16686 = vmatprep.subr.bf16.mxu0 %v17808_v0 }
 0x11d   : > { %15472 = vmatmul.mubr.f32.gmra.mrb[14].mxu0 %v17989_v16 }
 0x11e   : > { %15474 = vmatprep.mubr.msk.f32.mxu0 %vm17809_vm0, %v21531_v1 }
 0x121   : > { %15475 = vmatmul.mubr.f32.gmra.mrb[16].mxu0 %v17994_v18 }
 0x122   : > { %15559 = vmatprep.mubr.msk.f32.mxu0 %vm17809_vm0, %v21531_v1 }
 0x125   : > { %15560 = vmatmul.mubr.f32.vlgmr.msra.gmra.mrb[18].mxu0 %v18017_v32  ;;  %v16696_v32 = vpack.c.bf16 %v3765_v45, %v3758_v44 }
 0x126   : > { %15562 = vmatprep.mubr.msk.f32.mxu0 %vm17809_vm0, %v21531_v1  ;;  %16688 = vmatpush3.bf16.msra.mxu0 %v16687_v50 }
 0x127   : > { %16689 = vmatprep.subr.bf16.mxu0 %v17808_v0 }
 0x129   : > { %15563 = vmatmul.mubr.f32.gmra.mrb[20].mxu0 %v18020_v34 }
 0x12a   : > { %15565 = vmatprep.mubr.msk.f32.mxu0 %vm17809_vm0, %v21531_v1 }
 0x12d   : > { %15566 = vmatmul.mubr.f32.gmra.mrb[22].mxu0 %v18028_v36 }
 0x12e   : > { %15572 = vmatprep.mubr.msk.f32.mxu0 %vm17809_vm0, %v21531_v1 }
 0x131   : > { %15573 = vmatmul.mubr.f32.vlgmr.msra.gmra.mrb[18].mxu0 %v17983_v10 }
 0x132   : > { %15575 = vmatprep.mubr.msk.f32.mxu0 %vm17809_vm0, %v21531_v1  ;;  %16691 = vmatpush3.bf16.msra.mxu0 %v16690_v51 }
 0x133   : > { %16692 = vmatprep.subr.bf16.mxu0 %v17808_v0 }
 0x135   : > { %15576 = vmatmul.mubr.f32.gmra.mrb[20].mxu0 %v17989_v16 }
 0x136   : > { %15578 = vmatprep.mubr.msk.f32.mxu0 %vm17809_vm0, %v21531_v1 }
 0x139   : > { %15579 = vmatmul.mubr.f32.gmra.mrb[22].mxu0 %v17994_v18 }
 0x13a   : > { %15585 = vmatprep.mubr.msk.f32.mxu0 %vm17809_vm0, %v21531_v1 }
 0x13d   : > { %15586 = vmatmul.mubr.f32.vlgmr.msra.gmra.mrb[18].mxu0 %v17992_v17 }
 0x13e   : > { %15588 = vmatprep.mubr.msk.f32.mxu0 %vm17809_vm0, %v21531_v1  ;;  %16694 = vmatpush3.bf16.msra.mxu0 %v16684_v43 }
 0x13f   : > { %16695 = vmatprep.subr.bf16.mxu0 %v17808_v0 }
 0x141   : > { %15589 = vmatmul.mubr.f32.gmra.mrb[20].mxu0 %v17998_v19 }
 0x142   : > { %15591 = vmatprep.mubr.msk.f32.mxu0 %vm17809_vm0, %v21531_v1 }
 0x145   : > { %15592 = vmatmul.mubr.f32.gmra.mrb[22].mxu0 %v18004_v23 }
 0x146   : > { %15598 = vmatprep.mubr.msk.f32.mxu0 %vm17809_vm0, %v21531_v1 }
 0x149   : > { %15599 = vmatmul.mubr.f32.vlgmr.msra.gmra.mrb[18].mxu0 %v18001_v22 }
 0x14a   : > { %15601 = vmatprep.mubr.msk.f32.mxu0 %vm17809_vm0, %v21531_v1  ;;  %16697 = vmatpush3.bf16.msra.mxu0 %v16696_v32 }
 0x14b   : > { %16698 = vmatprep.subr.bf16.mxu0 %v17808_v0 }
 0x14d   : > { %15602 = vmatmul.mubr.f32.gmra.mrb[20].mxu0 %v18008_v24 }
 0x14e   : > { %15604 = vmatprep.mubr.msk.f32.mxu0 %vm17809_vm0, %v21531_v1 }
 0x151   : > { %15605 = vmatmul.mubr.f32.gmra.mrb[22].mxu0 %v18013_v28 }
 0x152   : > { %15611 = vmatprep.mubr.msk.f32.mxu0 %vm17809_vm0, %v21531_v1 }
 0x155   : > { %15612 = vmatmul.mubr.f32.vlgmr.msra.gmra.mrb[18].mxu0 %v17983_v10 }
 0x156   : > { %15614 = vmatprep.mubr.msk.f32.mxu0 %vm17809_vm0, %v21531_v1  ;;  %16700 = vmatpush3.bf16.msra.mxu0 %v16684_v43 }
 0x157   : > { %15711 = vmatprep.subr.bf16.mxu0 %v21531_v1 }
 0x159   : > { %15615 = vmatmul.mubr.f32.gmra.mrb[20].mxu0 %v17989_v16 }
 0x15a   : > { %15617 = vmatprep.mubr.msk.f32.mxu0 %vm17809_vm0, %v21531_v1 }
 0x15c   : > { %v829_v17 = vpop.f32.mrb[0].mxu0 }
 0x15d   : > { %v846_v19 = vsel %vm290_vm1, %v829_v17, 0  ;;  %v15158_v22 = vpop.f32.mrb[1].mxu0  ;;  %15618 = vmatmul.mubr.f32.gmra.mrb[22].mxu0 %v17994_v18 }
 0x15e   : > { %v18288_v23 = vand.u32 4294901760, %v846_v19  ;;  %15624 = vmatprep.mubr.msk.f32.mxu0 %vm17809_vm0, %v21531_v1 }
 0x160   : > { %v922_v24 = vsub.f32 %v846_v19, %v18288_v23  ;;  %v835_v28 = vpop.f32.mrb[2].mxu0 }
 0x161   : > { %v849_v34 = vsel %vm290_vm1, %v835_v28, 0  ;;  %v15161_v36 = vpop.f32.mrb[3].mxu0  ;;  %15625 = vmatmul.mubr.f32.vlgmr.msra.gmra.mrb[18].mxu0 %v17983_v10 }
 0x162   : > { %v923_v52 = vand.u32 4294901760, %v922_v24  ;;  %v18295_v53 = vand.u32 4294901760, %v849_v34  ;;  %15627 = vmatprep.mubr.msk.f32.mxu0 %vm17809_vm0, %v21531_v1 }
 0x164   : > { %v932_v54 = vsub.f32 %v849_v34, %v18295_v53  ;;  %v841_v55 = vpop.f32.mrb[4].mxu0  ;;  %v924_v56 = vsub.f32 %v922_v24, %v923_v52 }
 0x165   : > { %v852_v57 = vsel %vm290_vm1, %v841_v55, 0  ;;  %v15164_v58 = vpop.f32.mrb[5].mxu0  ;;  %15628 = vmatmul.mubr.f32.gmra.mrb[20].mxu0 %v17989_v16 }
 0x166   : > { %v933_v59 = vand.u32 4294901760, %v932_v54  ;;  %v18302_v60 = vand.u32 4294901760, %v852_v57  ;;  %v925_v61 = vand.u32 4294901760, %v924_v56  ;;  %15630 = vmatprep.mubr.msk.f32.mxu0 %vm17809_vm0, %v21531_v1 }
 0x168   : > { %v942_v10 = vsub.f32 %v852_v57, %v18302_v60  ;;  %15170 = vmatmul.mubr.f32.vlgmr.msra.gmra.mrb[0].mxu1 %v925_v61  ;;  %v934_v62 = vsub.f32 %v932_v54, %v933_v59 }
 0x169   : > { %15631 = vmatmul.mubr.f32.gmra.mrb[22].mxu0 %v17994_v18  ;;  %15172 = vmatprep.mubr.msk.f32.mxu1 %vm17809_vm0, %v21531_v1 }
 0x16a   : > { %v943_v63 = vand.u32 4294901760, %v942_v10  ;;  %v935_v2 = vand.u32 4294901760, %v934_v62  ;;  %16598 = vmatpush3.bf16.msra.mxu1 %v18186_v30  ;;  %15713 = vmatprep.mubr.msk.bf16.mxu0 %vm17809_vm0, %v21531_v1 }
 0x16b   : > { %16599 = vmatprep.subr.bf16.mxu1 %v17808_v0 }
 0x16c   : > { %15173 = vmatmul.mubr.f32.gmra.mrb[2].mxu1 %v935_v2  ;;  %v944_v16 = vsub.f32 %v942_v10, %v943_v63 }
 0x16d   : > { %15175 = vmatprep.mubr.msk.f32.mxu1 %vm17809_vm0, %v21531_v1 }
 0x16e   : > { %v945_v3 = vand.u32 4294901760, %v944_v16 }
 0x170   : > { %15176 = vmatmul.mubr.f32.gmra.mrb[4].mxu1 %v945_v3 }
 0x171   : > { %15182 = vmatprep.mubr.msk.f32.mxu1 %vm17809_vm0, %v21531_v1 }
 0x174   : > { %15183 = vmatmul.mubr.f32.vlgmr.msra.gmra.mrb[0].mxu1 %v18288_v23 }
 0x175   : > { %15185 = vmatprep.mubr.msk.f32.mxu1 %vm17809_vm0, %v21531_v1  ;;  %16601 = vmatpush3.bf16.msra.mxu1 %v18199_v31 }
 0x176   : > { %16602 = vmatprep.subr.bf16.mxu1 %v17808_v0 }
 0x178   : > { %15186 = vmatmul.mubr.f32.gmra.mrb[2].mxu1 %v18295_v53 }
 0x179   : > { %15188 = vmatprep.mubr.msk.f32.mxu1 %vm17809_vm0, %v21531_v1 }
 0x17c   : > { %15189 = vmatmul.mubr.f32.gmra.mrb[4].mxu1 %v18302_v60 }
 0x17d   : > { %15195 = vmatprep.mubr.msk.f32.mxu1 %vm17809_vm0, %v21531_v1 }
 0x180   : > { %15196 = vmatmul.mubr.f32.vlgmr.msra.gmra.mrb[0].mxu1 %v922_v24 }
 0x181   : > { %15198 = vmatprep.mubr.msk.f32.mxu1 %vm17809_vm0, %v21531_v1  ;;  %16604 = vmatpush3.bf16.msra.mxu1 %v18171_v12 }
 0x182   : > { %16605 = vmatprep.subr.bf16.mxu1 %v17808_v0 }
 0x184   : > { %15199 = vmatmul.mubr.f32.gmra.mrb[2].mxu1 %v932_v54 }
 0x185   : > { %15201 = vmatprep.mubr.msk.f32.mxu1 %vm17809_vm0, %v21531_v1 }
 0x188   : > { %15202 = vmatmul.mubr.f32.gmra.mrb[4].mxu1 %v942_v10 }
 0x189   : > { %15208 = vmatprep.mubr.msk.f32.mxu1 %vm17809_vm0, %v21531_v1 }
 0x18c   : > { %15209 = vmatmul.mubr.f32.vlgmr.msra.gmra.mrb[0].mxu1 %v923_v52 }
 0x18d   : > { %15211 = vmatprep.mubr.msk.f32.mxu1 %vm17809_vm0, %v21531_v1  ;;  %16607 = vmatpush3.bf16.msra.mxu1 %v18224_v42 }
 0x18e   : > { %16608 = vmatprep.subr.bf16.mxu1 %v17808_v0 }
 0x190   : > { %15212 = vmatmul.mubr.f32.gmra.mrb[2].mxu1 %v933_v59 }
 0x191   : > { %15214 = vmatprep.mubr.msk.f32.mxu1 %vm17809_vm0, %v21531_v1 }
 0x194   : > { %15215 = vmatmul.mubr.f32.gmra.mrb[4].mxu1 %v943_v63 }
 0x195   : > { %15221 = vmatprep.mubr.msk.f32.mxu1 %vm17809_vm0, %v21531_v1 }
 0x198   : > { %15222 = vmatmul.mubr.f32.vlgmr.msra.gmra.mrb[0].mxu1 %v18288_v23 }
 0x199   : > { %15224 = vmatprep.mubr.msk.f32.mxu1 %vm17809_vm0, %v21531_v1  ;;  %16610 = vmatpush3.bf16.msra.mxu1 %v18171_v12 }
 0x19a   : > { %16629 = vmatprep.subr.bf16.mxu1 %v17808_v0 }
 0x19c   : > { %15225 = vmatmul.mubr.f32.gmra.mrb[2].mxu1 %v18295_v53 }
 0x19d   : > { %15227 = vmatprep.mubr.msk.f32.mxu1 %vm17809_vm0, %v21531_v1 }
 0x1a0   : > { %15228 = vmatmul.mubr.f32.gmra.mrb[4].mxu1 %v18302_v60 }
 0x1a1   : > { %15234 = vmatprep.mubr.msk.f32.mxu1 %vm17809_vm0, %v21531_v1 }
 0x1a4   : > { %15235 = vmatmul.mubr.f32.vlgmr.msra.gmra.mrb[0].mxu1 %v18288_v23  ;;  %v1949_v18 = vpop.f32.mrb[6].mxu0 }
 0x1a5   : > { %v1966_v4 = vsel %vm290_vm1, %v1949_v18, 0  ;;  %v15314_v5 = vpop.f32.mrb[7].mxu0  ;;  %15237 = vmatprep.mubr.msk.f32.mxu1 %vm17809_vm0, %v21531_v1  ;;  %16631 = vmatpush3.bf16.msra.mxu1 %v18171_v12 }
 0x1a6   : > { %v18361_v6 = vand.u32 4294901760, %v1966_v4  ;;  %16632 = vmatprep.subr.bf16.mxu1 %v17808_v0 }
 0x1a8   : > { %v2042_v7 = vsub.f32 %v1966_v4, %v18361_v6  ;;  %15238 = vmatmul.mubr.f32.gmra.mrb[2].mxu1 %v18295_v53  ;;  %v1955_v8 = vpop.f32.mrb[8].mxu0 }
 0x1a9   : > { %v1969_v9 = vsel %vm290_vm1, %v1955_v8, 0  ;;  %v15317_v11 = vpop.f32.mrb[9].mxu0  ;;  %15240 = vmatprep.mubr.msk.f32.mxu1 %vm17809_vm0, %v21531_v1 }
 0x1aa   : > { %v2043_v13 = vand.u32 4294901760, %v2042_v7  ;;  %v18369_v14 = vand.u32 4294901760, %v1969_v9 }
 0x1ac   : > { %v2044_v15 = vsub.f32 %v2042_v7, %v2043_v13  ;;  %v2052_v20 = vsub.f32 %v1969_v9, %v18369_v14  ;;  %15241 = vmatmul.mubr.f32.gmra.mrb[4].mxu1 %v18302_v60  ;;  %v1961_v21 = vpop.f32.mrb[10].mxu0 }
 0x1ad   : > { %v1972_v25 = vsel %vm290_vm1, %v1961_v21, 0  ;;  %v15320_v26 = vpop.f32.mrb[11].mxu0  ;;  %15325 = vmatprep.mubr.msk.f32.mxu1 %vm17809_vm0, %v21531_v1 }
 0x1ae   : > { %v2045_v27 = vand.u32 4294901760, %v2044_v15  ;;  %v2053_v29 = vand.u32 4294901760, %v2052_v20  ;;  %v18376_v33 = vand.u32 4294901760, %v1972_v25 }
 0x1b0   : > { %v2062_v35 = vsub.f32 %v1972_v25, %v18376_v33  ;;  %15326 = vmatmul.mubr.f32.vlgmr.msra.gmra.mrb[6].mxu1 %v2045_v27  ;;  %v2054_v37 = vsub.f32 %v2052_v20, %v2053_v29 }
 0x1b1   : > { %15328 = vmatprep.mubr.msk.f32.mxu1 %vm17809_vm0, %v21531_v1  ;;  %16634 = vmatpush3.bf16.msra.mxu1 %v18186_v30 }
 0x1b2   : > { %v2063_v38 = vand.u32 4294901760, %v2062_v35  ;;  %v2055_v39 = vand.u32 4294901760, %v2054_v37  ;;  %16635 = vmatprep.subr.bf16.mxu1 %v17808_v0 }
 0x1b4   : > { %15329 = vmatmul.mubr.f32.gmra.mrb[8].mxu1 %v2055_v39  ;;  %v2064_v40 = vsub.f32 %v2062_v35, %v2063_v38 }
 0x1b5   : > { %15331 = vmatprep.mubr.msk.f32.mxu1 %vm17809_vm0, %v21531_v1 }
 0x1b6   : > { %v2065_v41 = vand.u32 4294901760, %v2064_v40 }
 0x1b8   : > { %15332 = vmatmul.mubr.f32.gmra.mrb[10].mxu1 %v2065_v41 }
 0x1b9   : > { %15338 = vmatprep.mubr.msk.f32.mxu1 %vm17809_vm0, %v21531_v1 }
 0x1bc   : > { %15339 = vmatmul.mubr.f32.vlgmr.msra.gmra.mrb[6].mxu1 %v18361_v6 }
 0x1bd   : > { %15341 = vmatprep.mubr.msk.f32.mxu1 %vm17809_vm0, %v21531_v1  ;;  %16637 = vmatpush3.bf16.msra.mxu1 %v18199_v31 }
 0x1be   : > { %16638 = vmatprep.subr.bf16.mxu1 %v17808_v0 }
 0x1c0   : > { %15342 = vmatmul.mubr.f32.gmra.mrb[8].mxu1 %v18369_v14 }
 0x1c1   : > { %15344 = vmatprep.mubr.msk.f32.mxu1 %vm17809_vm0, %v21531_v1 }
 0x1c4   : > { %15345 = vmatmul.mubr.f32.gmra.mrb[10].mxu1 %v18376_v33 }
 0x1c5   : > { %15351 = vmatprep.mubr.msk.f32.mxu1 %vm17809_vm0, %v21531_v1 }
 0x1c8   : > { %15352 = vmatmul.mubr.f32.vlgmr.msra.gmra.mrb[6].mxu1 %v2042_v7 }
 0x1c9   : > { %15354 = vmatprep.mubr.msk.f32.mxu1 %vm17809_vm0, %v21531_v1  ;;  %16640 = vmatpush3.bf16.msra.mxu1 %v18171_v12 }
 0x1ca   : > { %16641 = vmatprep.subr.bf16.mxu1 %v17808_v0 }
 0x1cc   : > { %15355 = vmatmul.mubr.f32.gmra.mrb[8].mxu1 %v2052_v20 }
 0x1cd   : > { %15357 = vmatprep.mubr.msk.f32.mxu1 %vm17809_vm0, %v21531_v1 }
 0x1d0   : > { %15358 = vmatmul.mubr.f32.gmra.mrb[10].mxu1 %v2062_v35 }
 0x1d1   : > { %15364 = vmatprep.mubr.msk.f32.mxu1 %vm17809_vm0, %v21531_v1 }
 0x1d4   : > { %15365 = vmatmul.mubr.f32.vlgmr.msra.gmra.mrb[6].mxu1 %v2043_v13 }
 0x1d5   : > { %15367 = vmatprep.mubr.msk.f32.mxu1 %vm17809_vm0, %v21531_v1  ;;  %16643 = vmatpush3.bf16.msra.mxu1 %v18224_v42 }
 0x1d6   : > { %16644 = vmatprep.subr.bf16.mxu1 %v17808_v0 }
 0x1d8   : > { %15368 = vmatmul.mubr.f32.gmra.mrb[8].mxu1 %v2053_v29 }
 0x1d9   : > { %15370 = vmatprep.mubr.msk.f32.mxu1 %vm17809_vm0, %v21531_v1 }
 0x1dc   : > { %15371 = vmatmul.mubr.f32.gmra.mrb[10].mxu1 %v2063_v38 }
 0x1dd   : > { %15377 = vmatprep.mubr.msk.f32.mxu1 %vm17809_vm0, %v21531_v1 }
 0x1e0   : > { %15378 = vmatmul.mubr.f32.vlgmr.msra.gmra.mrb[6].mxu1 %v18361_v6 }
 0x1e1   : > { %15380 = vmatprep.mubr.msk.f32.mxu1 %vm17809_vm0, %v21531_v1  ;;  %16646 = vmatpush3.bf16.msra.mxu1 %v18171_v12 }
 0x1e2   : > { %16665 = vmatprep.subr.bf16.mxu1 %v17808_v0 }
 0x1e4   : > { %15381 = vmatmul.mubr.f32.gmra.mrb[8].mxu1 %v18369_v14 }
 0x1e5   : > { %15383 = vmatprep.mubr.msk.f32.mxu1 %vm17809_vm0, %v21531_v1 }
 0x1e8   : > { %15384 = vmatmul.mubr.f32.gmra.mrb[10].mxu1 %v18376_v33 }
 0x1e9   : > { %15390 = vmatprep.mubr.msk.f32.mxu1 %vm17809_vm0, %v21531_v1 }
 0x1ec   : > { %15391 = vmatmul.mubr.f32.vlgmr.msra.gmra.mrb[6].mxu1 %v18361_v6  ;;  %v3068_v43 = vpop.f32.mrb[12].mxu0 }
 0x1ed   : > { %v3085_v44 = vsel %vm290_vm1, %v3068_v43, 0  ;;  %v15470_v45 = vpop.f32.mrb[13].mxu0  ;;  %15393 = vmatprep.mubr.msk.f32.mxu1 %vm17809_vm0, %v21531_v1  ;;  %16667 = vmatpush3.bf16.msra.mxu1 %v18171_v12 }
 0x1ee   : > { %v18430_v46 = vand.u32 4294901760, %v3085_v44  ;;  %16668 = vmatprep.subr.bf16.mxu1 %v17808_v0 }
 0x1f0   : > { %v3161_v47 = vsub.f32 %v3085_v44, %v18430_v46  ;;  %15394 = vmatmul.mubr.f32.gmra.mrb[8].mxu1 %v18369_v14  ;;  %v3074_v48 = vpop.f32.mrb[14].mxu0 }
 0x1f1   : > { %v3088_v49 = vsel %vm290_vm1, %v3074_v48, 0  ;;  %v15473_v50 = vpop.f32.mrb[15].mxu0  ;;  %15396 = vmatprep.mubr.msk.f32.mxu1 %vm17809_vm0, %v21531_v1 }
 0x1f2   : > { %v3162_v51 = vand.u32 4294901760, %v3161_v47  ;;  %v18438_v32 = vand.u32 4294901760, %v3088_v49 }
 0x1f4   : > { %v3163_v17 = vsub.f32 %v3161_v47, %v3162_v51  ;;  %v3171_v19 = vsub.f32 %v3088_v49, %v18438_v32  ;;  %15397 = vmatmul.mubr.f32.gmra.mrb[10].mxu1 %v18376_v33  ;;  %v3080_v22 = vpop.f32.mrb[16].mxu0 }
 0x1f5   : > { %v3091_v23 = vsel %vm290_vm1, %v3080_v22, 0  ;;  %v15476_v24 = vpop.f32.mrb[17].mxu0  ;;  %15481 = vmatprep.mubr.msk.f32.mxu1 %vm17809_vm0, %v21531_v1 }
 0x1f6   : > { %v3164_v28 = vand.u32 4294901760, %v3163_v17  ;;  %v3172_v34 = vand.u32 4294901760, %v3171_v19  ;;  %v18445_v36 = vand.u32 4294901760, %v3091_v23 }
 0x1f8   : > { %v3181_v52 = vsub.f32 %v3091_v23, %v18445_v36  ;;  %15482 = vmatmul.mubr.f32.vlgmr.msra.gmra.mrb[12].mxu1 %v3164_v28  ;;  %v3173_v53 = vsub.f32 %v3171_v19, %v3172_v34 }
 0x1f9   : > { %15484 = vmatprep.mubr.msk.f32.mxu1 %vm17809_vm0, %v21531_v1  ;;  %16670 = vmatpush3.bf16.msra.mxu1 %v18186_v30 }
 0x1fa   : > { %v3182_v54 = vand.u32 4294901760, %v3181_v52  ;;  %v3174_v55 = vand.u32 4294901760, %v3173_v53  ;;  %16671 = vmatprep.subr.bf16.mxu1 %v17808_v0 }
 0x1fc   : > { %15485 = vmatmul.mubr.f32.gmra.mrb[14].mxu1 %v3174_v55  ;;  %v3183_v56 = vsub.f32 %v3181_v52, %v3182_v54 }
 0x1fd   : > { %15487 = vmatprep.mubr.msk.f32.mxu1 %vm17809_vm0, %v21531_v1 }
 0x1fe   : > { %v3184_v57 = vand.u32 4294901760, %v3183_v56 }
 0x200   : > { %15488 = vmatmul.mubr.f32.gmra.mrb[16].mxu1 %v3184_v57 }
 0x201   : > { %15494 = vmatprep.mubr.msk.f32.mxu1 %vm17809_vm0, %v21531_v1 }
 0x204   : > { %15495 = vmatmul.mubr.f32.vlgmr.msra.gmra.mrb[12].mxu1 %v18430_v46 }
 0x205   : > { %15497 = vmatprep.mubr.msk.f32.mxu1 %vm17809_vm0, %v21531_v1  ;;  %16673 = vmatpush3.bf16.msra.mxu1 %v18199_v31 }
 0x206   : > { %16674 = vmatprep.subr.bf16.mxu1 %v17808_v0 }
 0x208   : > { %15498 = vmatmul.mubr.f32.gmra.mrb[14].mxu1 %v18438_v32 }
 0x209   : > { %15500 = vmatprep.mubr.msk.f32.mxu1 %vm17809_vm0, %v21531_v1 }
 0x20c   : > { %15501 = vmatmul.mubr.f32.gmra.mrb[16].mxu1 %v18445_v36 }
 0x20d   : > { %15507 = vmatprep.mubr.msk.f32.mxu1 %vm17809_vm0, %v21531_v1 }
 0x210   : > { %15508 = vmatmul.mubr.f32.vlgmr.msra.gmra.mrb[12].mxu1 %v3161_v47 }
 0x211   : > { %15510 = vmatprep.mubr.msk.f32.mxu1 %vm17809_vm0, %v21531_v1  ;;  %16676 = vmatpush3.bf16.msra.mxu1 %v18171_v12 }
 0x212   : > { %16677 = vmatprep.subr.bf16.mxu1 %v17808_v0 }
 0x214   : > { %15511 = vmatmul.mubr.f32.gmra.mrb[14].mxu1 %v3171_v19 }
 0x215   : > { %15513 = vmatprep.mubr.msk.f32.mxu1 %vm17809_vm0, %v21531_v1 }
 0x218   : > { %15514 = vmatmul.mubr.f32.gmra.mrb[16].mxu1 %v3181_v52 }
 0x219   : > { %15520 = vmatprep.mubr.msk.f32.mxu1 %vm17809_vm0, %v21531_v1 }
 0x21c   : > { %15521 = vmatmul.mubr.f32.vlgmr.msra.gmra.mrb[12].mxu1 %v3162_v51 }
 0x21d   : > { %15523 = vmatprep.mubr.msk.f32.mxu1 %vm17809_vm0, %v21531_v1  ;;  %16679 = vmatpush3.bf16.msra.mxu1 %v18224_v42 }
 0x21e   : > { %16680 = vmatprep.subr.bf16.mxu1 %v17808_v0 }
 0x220   : > { %15524 = vmatmul.mubr.f32.gmra.mrb[14].mxu1 %v3172_v34 }
 0x221   : > { %15526 = vmatprep.mubr.msk.f32.mxu1 %vm17809_vm0, %v21531_v1 }
 0x224   : > { %15527 = vmatmul.mubr.f32.gmra.mrb[16].mxu1 %v3182_v54 }
 0x225   : > { %15533 = vmatprep.mubr.msk.f32.mxu1 %vm17809_vm0, %v21531_v1 }
 0x228   : > { %15534 = vmatmul.mubr.f32.vlgmr.msra.gmra.mrb[12].mxu1 %v18430_v46 }
 0x229   : > { %15536 = vmatprep.mubr.msk.f32.mxu1 %vm17809_vm0, %v21531_v1  ;;  %16682 = vmatpush3.bf16.msra.mxu1 %v18171_v12 }
 0x22a   : > { %16701 = vmatprep.subr.bf16.mxu1 %v17808_v0 }
 0x22c   : > { %15537 = vmatmul.mubr.f32.gmra.mrb[14].mxu1 %v18438_v32 }
 0x22d   : > { %15539 = vmatprep.mubr.msk.f32.mxu1 %vm17809_vm0, %v21531_v1 }
 0x230   : > { %15540 = vmatmul.mubr.f32.gmra.mrb[16].mxu1 %v18445_v36 }
 0x231   : > { %15546 = vmatprep.mubr.msk.f32.mxu1 %vm17809_vm0, %v21531_v1 }
 0x234   : > { %15547 = vmatmul.mubr.f32.vlgmr.msra.gmra.mrb[12].mxu1 %v18430_v46  ;;  %v4187_v58 = vpop.f32.mrb[18].mxu0 }
 0x235   : > { %v4204_v59 = vsel %vm290_vm1, %v4187_v58, 0  ;;  %v15626_v60 = vpop.f32.mrb[19].mxu0  ;;  %15549 = vmatprep.mubr.msk.f32.mxu1 %vm17809_vm0, %v21531_v1  ;;  %16703 = vmatpush3.bf16.msra.mxu1 %v18171_v12 }
 0x236   : > { %v18499_v61 = vand.u32 4294901760, %v4204_v59  ;;  %16704 = vmatprep.subr.bf16.mxu1 %v17808_v0 }
 0x238   : > { %v4280_v10 = vsub.f32 %v4204_v59, %v18499_v61  ;;  %15550 = vmatmul.mubr.f32.gmra.mrb[14].mxu1 %v18438_v32  ;;  %v4193_v62 = vpop.f32.mrb[20].mxu0 }
 0x239   : > { %v4207_v63 = vsel %vm290_vm1, %v4193_v62, 0  ;;  %v15629_v2 = vpop.f32.mrb[21].mxu0  ;;  %15552 = vmatprep.mubr.msk.f32.mxu1 %vm17809_vm0, %v21531_v1 }
 0x23a   : > { %v4281_v16 = vand.u32 4294901760, %v4280_v10  ;;  %v18507_v3 = vand.u32 4294901760, %v4207_v63 }
 0x23c   : > { %v4282_v18 = vsub.f32 %v4280_v10, %v4281_v16  ;;  %v4290_v4 = vsub.f32 %v4207_v63, %v18507_v3  ;;  %15553 = vmatmul.mubr.f32.gmra.mrb[16].mxu1 %v18445_v36  ;;  %v4199_v5 = vpop.f32.mrb[22].mxu0 }
 0x23d   : > { %v4210_v6 = vsel %vm290_vm1, %v4199_v5, 0  ;;  %v15632_v7 = vpop.f32.mrb[23].mxu0  ;;  %15637 = vmatprep.mubr.msk.f32.mxu1 %vm17809_vm0, %v21531_v1 }
 0x23e   : > { %v4283_v8 = vand.u32 4294901760, %v4282_v18  ;;  %v4291_v9 = vand.u32 4294901760, %v4290_v4  ;;  %v18514_v11 = vand.u32 4294901760, %v4210_v6 }
 0x240   : > { %v4300_v13 = vsub.f32 %v4210_v6, %v18514_v11  ;;  %15638 = vmatmul.mubr.f32.vlgmr.msra.gmra.mrb[18].mxu1 %v4283_v8  ;;  %v4292_v14 = vsub.f32 %v4290_v4, %v4291_v9 }
 0x241   : > { %15640 = vmatprep.mubr.msk.f32.mxu1 %vm17809_vm0, %v21531_v1  ;;  %16706 = vmatpush3.bf16.msra.mxu1 %v18186_v30 }
 0x242   : > { %v4301_v15 = vand.u32 4294901760, %v4300_v13  ;;  %v4293_v20 = vand.u32 4294901760, %v4292_v14  ;;  %16707 = vmatprep.subr.bf16.mxu1 %v17808_v0 }
 0x244   : > { %15641 = vmatmul.mubr.f32.gmra.mrb[20].mxu1 %v4293_v20  ;;  %v4302_v21 = vsub.f32 %v4300_v13, %v4301_v15 }
 0x245   : > { %15643 = vmatprep.mubr.msk.f32.mxu1 %vm17809_vm0, %v21531_v1 }
 0x246   : > { %v4303_v25 = vand.u32 4294901760, %v4302_v21 }
 0x248   : > { %15644 = vmatmul.mubr.f32.gmra.mrb[22].mxu1 %v4303_v25 }
 0x249   : > { %15650 = vmatprep.mubr.msk.f32.mxu1 %vm17809_vm0, %v21531_v1 }
 0x24c   : > { %15651 = vmatmul.mubr.f32.vlgmr.msra.gmra.mrb[18].mxu1 %v18499_v61 }
 0x24d   : > { %15653 = vmatprep.mubr.msk.f32.mxu1 %vm17809_vm0, %v21531_v1  ;;  %16709 = vmatpush3.bf16.msra.mxu1 %v18199_v31 }
 0x24e   : > { %16710 = vmatprep.subr.bf16.mxu1 %v17808_v0 }
 0x250   : > { %15654 = vmatmul.mubr.f32.gmra.mrb[20].mxu1 %v18507_v3 }
 0x251   : > { %15656 = vmatprep.mubr.msk.f32.mxu1 %vm17809_vm0, %v21531_v1 }
 0x254   : > { %15657 = vmatmul.mubr.f32.gmra.mrb[22].mxu1 %v18514_v11 }
 0x255   : > { %15663 = vmatprep.mubr.msk.f32.mxu1 %vm17809_vm0, %v21531_v1 }
 0x258   : > { %15664 = vmatmul.mubr.f32.vlgmr.msra.gmra.mrb[18].mxu1 %v4280_v10 }
 0x259   : > { %15666 = vmatprep.mubr.msk.f32.mxu1 %vm17809_vm0, %v21531_v1  ;;  %16712 = vmatpush3.bf16.msra.mxu1 %v18171_v12 }
 0x25a   : > { %16713 = vmatprep.subr.bf16.mxu1 %v17808_v0 }
 0x25c   : > { %15667 = vmatmul.mubr.f32.gmra.mrb[20].mxu1 %v4290_v4 }
 0x25d   : > { %15669 = vmatprep.mubr.msk.f32.mxu1 %vm17809_vm0, %v21531_v1 }
 0x260   : > { %15670 = vmatmul.mubr.f32.gmra.mrb[22].mxu1 %v4300_v13 }
 0x261   : > { %15676 = vmatprep.mubr.msk.f32.mxu1 %vm17809_vm0, %v21531_v1 }
 0x264   : > { %15677 = vmatmul.mubr.f32.vlgmr.msra.gmra.mrb[18].mxu1 %v4281_v16 }
 0x265   : > { %15679 = vmatprep.mubr.msk.f32.mxu1 %vm17809_vm0, %v21531_v1  ;;  %16715 = vmatpush3.bf16.msra.mxu1 %v18224_v42 }
 0x266   : > { %16716 = vmatprep.subr.bf16.mxu1 %v17808_v0 }
 0x268   : > { %15680 = vmatmul.mubr.f32.gmra.mrb[20].mxu1 %v4291_v9 }
 0x269   : > { %15682 = vmatprep.mubr.msk.f32.mxu1 %vm17809_vm0, %v21531_v1 }
 0x26c   : > { %15683 = vmatmul.mubr.f32.gmra.mrb[22].mxu1 %v4301_v15 }
 0x26d   : > { %15689 = vmatprep.mubr.msk.f32.mxu1 %vm17809_vm0, %v21531_v1 }
 0x270   : > { %15690 = vmatmul.mubr.f32.vlgmr.msra.gmra.mrb[18].mxu1 %v18499_v61 }
 0x271   : > { %15692 = vmatprep.mubr.msk.f32.mxu1 %vm17809_vm0, %v21531_v1  ;;  %16718 = vmatpush3.bf16.msra.mxu1 %v18171_v12 }
 0x272   : > { %15765 = vmatprep.subr.bf16.mxu1 %v21531_v1 }
 0x274   : > { %15693 = vmatmul.mubr.f32.gmra.mrb[20].mxu1 %v18507_v3 }
 0x275   : > { %15695 = vmatprep.mubr.msk.f32.mxu1 %vm17809_vm0, %v21531_v1 }
 0x277   : > { %v1383_v0 = vpop.f32.mrb[0].mxu1 }
 0x278   : > { %v14547_v30 = vpack.c.bf16 %v1383_v0, %v1383_v0  ;;  %v15236_v31 = vpop.f32.mrb[1].mxu1  ;;  %15696 = vmatmul.mubr.f32.gmra.mrb[22].mxu1 %v18514_v11 }
 0x279   : > { %15702 = vmatprep.mubr.msk.f32.mxu1 %vm17809_vm0, %v21531_v1 }
 0x27a   : > { %1413 = vst.msk [vmem:[#allocation2] sm:$0xf] %vm1412_vm2, %v14547_v30 }
 0x27b   : > { %v1389_v42 = vpop.f32.mrb[2].mxu1 }
 0x27c   : > { %v14548_v12 = vpack.c.bf16 %v1389_v42, %v1389_v42  ;;  %v15239_v26 = vpop.f32.mrb[3].mxu1  ;;  %15703 = vmatmul.mubr.f32.vlgmr.msra.gmra.mrb[18].mxu1 %v18499_v61 }
 0x27d   : > { %15705 = vmatprep.mubr.msk.f32.mxu1 %vm17809_vm0, %v21531_v1 }
 0x27e   : > { %1414 = vst.msk [vmem:[#allocation2 + $0x4] sm:$0xf] %vm1412_vm2, %v14548_v12 }
 0x27f   : > { %v1395_v27 = vpop.f32.mrb[4].mxu1 }
 0x280   : > { %v14549_v29 = vpack.c.bf16 %v1395_v27, %v1395_v27  ;;  %v15242_v33 = vpop.f32.mrb[5].mxu1  ;;  %15706 = vmatmul.mubr.f32.gmra.mrb[20].mxu1 %v18507_v3 }
 0x281   : > { %15708 = vmatprep.mubr.msk.f32.mxu1 %vm17809_vm0, %v21531_v1  ;;  %v18578_v46 = vld [vmem:[#allocation2] ss:$0 sps:$4 sm:$0x88]  }
 0x282   : > { %1416 = vst.msk [vmem:[#allocation2 + $0x8] sm:$0x1] %vm1415_vm3, %v14549_v29  ;;  %21574 = vst [vmem:[#allocation12_spill] sm:$0xff] %v18578_v46  ;;  %v17621_v47 = vld [vmem:[#allocation2] ss:$0 sps:$4 sm:$0x88]   ;;  %v21533_v50 = vunpack.c.l.b16 %v18578_v46 }
 0x283   : > { %v17625_v48 = vld [vmem:[#allocation2] ss:$0 sps:$4 sm:$0x88]   ;;  %v7438_v32 = vunpack.c.l.b16 %v17621_v47 }
 0x284   : > { %15709 = vmatmul.mubr.f32.gmra.mrb[22].mxu1 %v18514_v11  ;;  %v17629_v49 = vld [vmem:[#allocation2] ss:$0 sps:$4 sm:$0x88]   ;;  %v8833_v22 = vunpack.c.l.b16 %v17625_v48  ;;  %v18587_v24 = vrot.slane %v21533_v50, 7 }
 0x285   : > { %15767 = vmatprep.mubr.msk.bf16.mxu1 %vm17809_vm0, %v21531_v1  ;;  %v18581_v51 = vld [vmem:[#allocation2 + $0x4] ss:$0 sps:$4 sm:$0x11]   ;;  %v8259_v23 = vunpack.c.l.b16 %v17629_v49  ;;  %v18589_v52 = vrot.slane %v7438_v32, 6 }
 0x286   : > { %v17641_v17 = vld [vmem:[#allocation2 + $0x4] ss:$0 sps:$4 sm:$0x11]   ;;  %v9006_v53 = vunpack.c.l.b16 %v18581_v51  ;;  %v18593_v57 = vrot.slane %v8833_v22, 7 }
 0x287   : > { %v18583_v19 = vld [vmem:[#allocation2 + $0x4] ss:$0 sps:$4 sm:$0x11]   ;;  %v9978_v54 = vunpack.c.l.b16 %v17641_v17  ;;  %v18595_v58 = vrot.slane %v8259_v23, 6  ;;  %v18597_v59 = vrot.slane %v8259_v23, 7 }
 0x288   : > { %v17649_v28 = vld [vmem:[#allocation2 + $0x4] ss:$0 sps:$4 sm:$0x22]   ;;  %v21536_v55 = vunpack.c.l.b16 %v18583_v19  ;;  %v18601_v18 = vrot.slane %v9006_v53, 1 }
 0x289   : > { %v17653_v34 = vld [vmem:[#allocation2 + $0x4] ss:$0 sps:$4 sm:$0x22]   ;;  %v10150_v61 = vunpack.c.l.b16 %v17649_v28  ;;  %v18603_v4 = vrot.slane %v9978_v54, 1 }
 0x28a   : > { %v17657_v36 = vld [vmem:[#allocation2 + $0x4] ss:$0 sps:$4 sm:$0x22]   ;;  %v9733_v63 = vunpack.c.l.b16 %v17653_v34  ;;  %v18607_v5 = vrot.slane %v21536_v55, 1 }
 0x28b   : > { %v17661_v56 = vld [vmem:[#allocation2 + $0x4] ss:$0 sps:$4 sm:$0x22]   ;;  %v11123_v2 = vunpack.c.l.b16 %v17657_v36  ;;  %v18609_v13 = vrot.slane %v10150_v61, 2  ;;  %v18611_v14 = vrot.slane %v10150_v61, 3 }
 0x28c   : > { %v17665_v60 = vld [vmem:[#allocation2 + $0x4] ss:$0 sps:$4 sm:$0x44]   ;;  %v10550_v6 = vunpack.c.l.b16 %v17661_v56  ;;  %v18615_v25 = vrot.slane %v9733_v63, 2 }
 0x28d   : > { %v17669_v10 = vld [vmem:[#allocation2 + $0x4] ss:$0 sps:$4 sm:$0x44]   ;;  %v11295_v8 = vunpack.c.l.b16 %v17665_v60  ;;  %v18617_v0 = vrot.slane %v11123_v2, 3 }
 0x28e   : > { %v17673_v62 = vld [vmem:[#allocation2 + $0x4] ss:$0 sps:$4 sm:$0x44]   ;;  %v10877_v15 = vunpack.c.l.b16 %v17669_v10  ;;  %v18619_v26 = vrot.slane %v10550_v6, 2  ;;  %v18621_v27 = vrot.slane %v10550_v6, 3 }
 0x28f   : > { %v17677_v16 = vld [vmem:[#allocation2 + $0x4] ss:$0 sps:$4 sm:$0x44]   ;;  %v12272_v20 = vunpack.c.l.b16 %v17673_v62  ;;  %v18651_v2 = vld [vmem:[#allocation2 + $0x8] ss:$0 sps:$4 sm:$0x11]  }
 0x290   : > { %v17681_v3 = vld [vmem:[#allocation2 + $0x4] ss:$0 sps:$4 sm:$0x88]   ;;  %v11697_v30 = vunpack.c.l.b16 %v17677_v16 }
 0x291   : > { %v17685_v7 = vld [vmem:[#allocation2 + $0x4] ss:$0 sps:$4 sm:$0x88]   ;;  %v12445_v31 = vunpack.c.l.b16 %v17681_v3 }
 0x292   : > { %v17689_v9 = vld [vmem:[#allocation2 + $0x4] ss:$0 sps:$4 sm:$0x88]   ;;  %v12026_v29 = vunpack.c.l.b16 %v17685_v7  ;;  %v18634_v48 = vrot.slane %v11697_v30, 4  ;;  %v18638_v32 = vrot.slane %v11697_v30, 5 }
 0x293   : > { %v17693_v11 = vld [vmem:[#allocation2 + $0x4] ss:$0 sps:$4 sm:$0x88]   ;;  %v18636_v49 = vrot.slane %v12445_v31, 6  ;;  %v18643_v36 = vrot.slane %v12445_v31, 7 }
 0x294   : > { %v18641_v34 = vld [vmem:[#allocation2 + $0x4] ss:$0 sps:$4 sm:$0x11]   ;;  %v18645_v54 = vrot.slane %v12026_v29, 6 }
 0x2bf   : > { %v2503_v35 = vpop.f32.mrb[6].mxu1 }
 0x2c0   : > { %v14550_v37 = vpack.c.bf16 %v2503_v35, %v2503_v35  ;;  %v15392_v38 = vpop.f32.mrb[7].mxu1 }
 0x2c1   : > { %v18623_v38 = vrot.slane %v11295_v8, 4 }
 0x2c2   : > { %2533 = vst.msk [vmem:[#allocation2 + $0xc] sm:$0xf] %vm1412_vm2, %v14550_v37 }
 0x2c3   : > { %v2509_v39 = vpop.f32.mrb[8].mxu1 }
 0x2c4   : > { %v14551_v40 = vpack.c.bf16 %v2509_v39, %v2509_v39  ;;  %v15395_v41 = vpop.f32.mrb[9].mxu1  ;;  %v13421_v39 = vunpack.c.l.b16 %v17689_v9 }
 0x2c5   : > { %v18625_v41 = vrot.slane %v11295_v8, 5 }
 0x2c6   : > { %2534 = vst.msk [vmem:[#allocation2 + $0x10] sm:$0xf] %vm1412_vm2, %v14551_v40  ;;  %v12847_v40 = vunpack.c.l.b16 %v17693_v11  ;;  %v18647_v62 = vrot.slane %v13421_v39, 7  ;;  %v8588_v39 = vunpack.c.l.b16 %v18641_v34 }
 0x2c7   : > { %v2515_v43 = vpop.f32.mrb[10].mxu1 }
 0x2c8   : > { %v14552_v44 = vpack.c.bf16 %v2515_v43, %v2515_v43  ;;  %v15398_v45 = vpop.f32.mrb[11].mxu1  ;;  %v18627_v43 = vrot.slane %v10877_v15, 4  ;;  %v18649_v63 = vrot.slane %v12847_v40, 6 }
 0x2c9   : > { %v18613_v21 = vld [vmem:[#allocation2 + $0xc] ss:$0 sps:$4 sm:$0x88]   ;;  %v18631_v45 = vld [vmem:[#allocation2 + $0x8] ss:$0 sps:$4 sm:$0x11]  }
 0x2ca   : > { %2535 = vst.msk [vmem:[#allocation2 + $0x14] sm:$0x1] %vm1415_vm3, %v14552_v44  ;;  %21575 = vst [vmem:[#allocation13_spill] sm:$0xff] %v18613_v21  ;;  %v17622_v12 = vld [vmem:[#allocation2 + $0xc] ss:$0 sps:$4 sm:$0x88]   ;;  %v21534_v22 = vunpack.c.l.b16 %v18613_v21  ;;  %v21535_v6 = vunpack.c.l.b16 %v18631_v45 }
 0x2cb   : > { %v17626_v37 = vld [vmem:[#allocation2 + $0xc] ss:$0 sps:$4 sm:$0x88]   ;;  %v18629_v44 = vrot.slane %v12272_v20, 5  ;;  %v7439_v23 = vunpack.c.l.b16 %v17622_v12 }
 0x2cc   : > { %v17630_v47 = vld [vmem:[#allocation2 + $0xc] ss:$0 sps:$4 sm:$0x88]   ;;  %v8834_v61 = vunpack.c.l.b16 %v17626_v37  ;;  %v8018_v15 = vrot.slane %v21534_v22, 6  ;;  %v18659_v37 = vrot.slane %v12847_v40, 7 }
 0x2cd   : > { %v17634_v28 = vld [vmem:[#allocation2 + $0x10] ss:$0 sps:$4 sm:$0x11]   ;;  %v8260_v7 = vunpack.c.l.b16 %v17630_v47  ;;  %v7443_v20 = vrot.slane %v7439_v23, 5 }
 0x2ce   : > { %v17638_v10 = vld [vmem:[#allocation2 + $0x10] ss:$0 sps:$4 sm:$0x11]   ;;  %v8838_v29 = vrot.slane %v8834_v61, 6  ;;  %v18671_v40 = vsel %vm4800_vm4, %v8018_v15, %v18587_v24 }
 0x2cf   : > { %v18653_v16 = vld [vmem:[#allocation2 + $0x10] ss:$0 sps:$4 sm:$0x11]   ;;  %v8264_v23 = vrot.slane %v8260_v7, 5  ;;  %v18675_v34 = vsel %vm4800_vm4, %v7443_v20, %v18589_v52 }
 0x2d0   : > { %v17650_v3 = vld [vmem:[#allocation2 + $0x10] ss:$0 sps:$4 sm:$0x22]   ;;  %v9407_v47 = vunpack.c.l.b16 %v18653_v16 }
 0x2d1   : > { %v17654_v8 = vld [vmem:[#allocation2 + $0x10] ss:$0 sps:$4 sm:$0x22]   ;;  %v18687_v55 = vsel %vm4800_vm4, %v8264_v23, %v18595_v58 }
 0x2d2   : > { %v17658_v9 = vld [vmem:[#allocation2 + $0x10] ss:$0 sps:$4 sm:$0x22]   ;;  %v18712_v51 = vsel %vm4800_vm4, %v9407_v47, %v18607_v5 }
 0x2d3   : > { %v17642_v30 = vld [vmem:[#allocation2 + $0x10] ss:$0 sps:$4 sm:$0x11]   ;;  %v11124_v16 = vunpack.c.l.b16 %v17658_v9 }
 0x2d4   : > { %v17662_v31 = vld [vmem:[#allocation2 + $0x10] ss:$0 sps:$4 sm:$0x22]   ;;  %v9979_v15 = vunpack.c.l.b16 %v17642_v30 }
 0x2d5   : > { %v17674_v61 = vld [vmem:[#allocation2 + $0x10] ss:$0 sps:$4 sm:$0x44]  }
 0x2d6   : > { %v17678_v1 = vld [vmem:[#allocation2 + $0x10] ss:$0 sps:$4 sm:$0x44]   ;;  %v18700_v58 = vsel %vm4800_vm4, %v9979_v15, %v18603_v4 }
 0x2d7   : > { %v17682_v22 = vld [vmem:[#allocation2 + $0x10] ss:$0 sps:$4 sm:$0x88]   ;;  %v11698_v30 = vunpack.c.l.b16 %v17678_v1 }
 0x307   : > { %v3622_v42 = vpop.f32.mrb[12].mxu1 }
 0x308   : > { %v14553_v33 = vpack.c.bf16 %v3622_v42, %v3622_v42  ;;  %v15548_v35 = vpop.f32.mrb[13].mxu1 }
 0x309   : > { %v17666_v35 = vld [vmem:[#allocation2 + $0x10] ss:$0 sps:$4 sm:$0x44]  }
 0x30a   : > { %3652 = vst.msk [vmem:[#allocation2 + $0x18] sm:$0xf] %vm1412_vm2, %v14553_v33  ;;  %v9007_v33 = vunpack.c.l.b16 %v17634_v28  ;;  %v11296_v50 = vunpack.c.l.b16 %v17666_v35  ;;  %v17686_v35 = vld [vmem:[#allocation2 + $0x10] ss:$0 sps:$4 sm:$0x88]  }
 0x30b   : > { %v3628_v17 = vpop.f32.mrb[14].mxu1 }
 0x30c   : > { %v14554_v56 = vpack.c.bf16 %v3628_v17, %v3628_v17  ;;  %v15551_v60 = vpop.f32.mrb[15].mxu1  ;;  %v8589_v17 = vunpack.c.l.b16 %v17638_v10  ;;  %v8417_v10 = vrot.slane %v8260_v7, 6  ;;  %v18683_v28 = vsel %vm4800_vm4, %v9007_v33, %v18601_v18 }
 0x30d   : > { %v18665_v60 = vrot.slane %v21535_v6, 1  ;;  %v9410_v6 = vrot.slane %v9407_v47, 7  ;;  %v11456_v23 = vrot.slane %v11296_v50, 4  ;;  %v11855_v47 = vrot.slane %v11698_v30, 4 }
 0x30e   : > { %3653 = vst.msk [vmem:[#allocation2 + $0x1c] sm:$0xf] %vm1412_vm2, %v14554_v56  ;;  %v17670_v56 = vld [vmem:[#allocation2 + $0x10] ss:$0 sps:$4 sm:$0x44]   ;;  %v8592_v24 = vrot.slane %v8589_v17, 7 }
 0x30f   : > { %v3634_v11 = vpop.f32.mrb[16].mxu1  ;;  %v10878_v9 = vunpack.c.l.b16 %v17670_v56 }
 0x310   : > { %v14555_v42 = vpack.c.bf16 %v3634_v11, %v3634_v11  ;;  %v15554_v12 = vpop.f32.mrb[17].mxu1  ;;  %v10151_v11 = vunpack.c.l.b16 %v17650_v3  ;;  %v9010_v3 = vrot.slane %v9007_v33, 7  ;;  %v11300_v33 = vrot.slane %v11296_v50, 3 }
 0x311   : > { %v9734_v12 = vunpack.c.l.b16 %v17654_v8  ;;  %v10551_v8 = vunpack.c.l.b16 %v17662_v31  ;;  %v11128_v31 = vrot.slane %v11124_v16, 2  ;;  %v18714_v16 = vld [vmem:[#allocation2 + $0x18] ss:$0 sps:$4 sm:$0x88]  }
 0x312   : > { %3654 = vst.msk [vmem:[#allocation2 + $0x20] sm:$0x1] %vm1415_vm3, %v14555_v42  ;;  %v18679_v42 = vsel %vm4800_vm4, %v8838_v29, %v18593_v57  ;;  %v10155_v52 = vrot.slane %v10151_v11, 1  ;;  %v10310_v20 = vrot.slane %v10151_v11, 2  ;;  %v18691_v57 = vsel %vm4800_vm4, %v8417_v10, %v18597_v59  ;;  %21577 = vst [vmem:[#allocation14_spill] sm:$0xff] %v18714_v16 }
 0x313   : > { %v9738_v7 = vrot.slane %v9734_v12, 1  ;;  %v12273_v29 = vunpack.c.l.b16 %v17674_v61  ;;  %v10555_v18 = vrot.slane %v10551_v8, 1  ;;  %v10707_v17 = vrot.slane %v10551_v8, 2  ;;  %v17690_v11 = vld [vmem:[#allocation2 + $0x10] ss:$0 sps:$4 sm:$0x88]  }
 0x314   : > { %v18696_v56 = vsel %vm4800_vm4, %v9010_v3, %v9006_v53  ;;  %v12446_v59 = vunpack.c.l.b16 %v17682_v22  ;;  %v18703_v12 = vsel %vm4800_vm4, %v8592_v24, %v8588_v39  ;;  %v21576_v61 = vunpack.c.l.b16 %v18583_v19  ;;  %v17694_v10 = vld [vmem:[#allocation2 + $0x10] ss:$0 sps:$4 sm:$0x88]   ;;  %v17627_v15 = vld [vmem:[#allocation2 + $0x18] ss:$0 sps:$4 sm:$0x88]  }
 0x315   : > { %v10882_v53 = vrot.slane %v10878_v9, 3  ;;  %v18718_v50 = vsel %vm4800_vm4, %v10155_v52, %v18609_v13  ;;  %v18722_v4 = vsel %vm4800_vm4, %v10310_v20, %v18611_v14  ;;  %v12277_v19 = vrot.slane %v12273_v29, 4  ;;  %v17623_v13 = vld [vmem:[#allocation2 + $0x18] ss:$0 sps:$4 sm:$0x88]  }
 0x316   : > { %v18708_v1 = vsel %vm4800_vm4, %v9410_v6, %v21576_v61  ;;  %v12027_v22 = vunpack.c.l.b16 %v17686_v35  ;;  %v18726_v6 = vsel %vm4800_vm4, %v9738_v7, %v18615_v25  ;;  %v18730_v5 = vsel %vm4800_vm4, %v11128_v31, %v18617_v0 }
 0x317   : > { %v11702_v39 = vrot.slane %v11698_v30, 3  ;;  %v21537_v3 = vunpack.c.l.b16 %v18714_v16  ;;  %v18735_v8 = vsel %vm4800_vm4, %v10555_v18, %v18619_v26  ;;  %v12450_v14 = vrot.slane %v12446_v59, 5  ;;  %v17631_v26 = vld [vmem:[#allocation2 + $0x18] ss:$0 sps:$4 sm:$0x88]  }
 0x318   : > { %v13422_v24 = vunpack.c.l.b16 %v17690_v11  ;;  %v18739_v25 = vsel %vm4800_vm4, %v11300_v33, %v18623_v38  ;;  %v18743_v0 = vsel %vm4800_vm4, %v10707_v17, %v18621_v27  ;;  %v18747_v52 = vsel %vm4800_vm4, %v11456_v23, %v18625_v41  ;;  %v17635_v18 = vld [vmem:[#allocation2 + $0x1c] ss:$0 sps:$4 sm:$0x11]   ;;  %v18953_v16 = vld [vmem:[#allocation2] ss:$0 sps:$4 sm:$0x44]  }
 0x319   : > { %v18751_v20 = vsel %vm4800_vm4, %v10882_v53, %v18627_v43  ;;  %v18755_v7 = vsel %vm4800_vm4, %v12277_v19, %v18629_v44  ;;  %v12606_v9 = vrot.slane %v12446_v59, 6  ;;  %v12031_v38 = vrot.slane %v12027_v22, 5  ;;  %v17639_v33 = vld [vmem:[#allocation2 + $0x1c] ss:$0 sps:$4 sm:$0x11]  }
 0x31a   : > { %v12848_v31 = vunpack.c.l.b16 %v17694_v10  ;;  %v8020_v27 = vrot.slane %v21537_v3, 5  ;;  %v7440_v29 = vunpack.c.l.b16 %v17623_v13  ;;  %v8835_v35 = vunpack.c.l.b16 %v17627_v15  ;;  %v17643_v22 = vld [vmem:[#allocation2 + $0x1c] ss:$0 sps:$4 sm:$0x11]  }
 0x31b   : > { %v18761_v41 = vsel %vm4800_vm4, %v11702_v39, %v18634_v48  ;;  %v8261_v43 = vunpack.c.l.b16 %v17631_v26  ;;  %v18765_v17 = vsel %vm4800_vm4, %v12450_v14, %v18636_v49  ;;  %v18769_v44 = vsel %vm4800_vm4, %v11855_v47, %v18638_v32  ;;  %v18775_v48 = vld [vmem:[#allocation2 + $0x14] ss:$0 sps:$4 sm:$0x11]   ;;  %v17647_v13 = vld [vmem:[#allocation2 + $0x1c] ss:$0 sps:$4 sm:$0x11]  }
 0x31c   : > { %v13426_v30 = vrot.slane %v13422_v24, 6  ;;  %v18773_v23 = vsel %vm4803_vm5, %v8020_v27, %v18671_v40  ;;  %v7445_v59 = vrot.slane %v7440_v29, 4  ;;  %v8840_v11 = vrot.slane %v8835_v35, 5  ;;  %v17651_v27 = vld [vmem:[#allocation2 + $0x1c] ss:$0 sps:$4 sm:$0x22]  }
 0x31d   : > { %v9008_v61 = vunpack.c.l.b16 %v17635_v18  ;;  %v8266_v53 = vrot.slane %v8261_v43, 4  ;;  %v8419_v10 = vrot.slane %v8261_v43, 5  ;;  %v8590_v19 = vunpack.c.l.b16 %v17639_v33  ;;  %v17655_v35 = vld [vmem:[#allocation2 + $0x1c] ss:$0 sps:$4 sm:$0x22]  }
 0x31e   : > { %v18777_v49 = vrot.slane %v12848_v31, 5  ;;  %v18781_v32 = vsel %vm4803_vm5, %v7445_v59, %v18675_v34  ;;  %v18785_v39 = vsel %vm4803_vm5, %v8840_v11, %v18679_v42  ;;  %v9980_v26 = vunpack.c.l.b16 %v17643_v22  ;;  %v17659_v59 = vld [vmem:[#allocation2 + $0x1c] ss:$0 sps:$4 sm:$0x22]  }
 0x31f   : > { %v9012_v40 = vrot.slane %v9008_v61, 6  ;;  %v9167_v47 = vrot.slane %v9008_v61, 7  ;;  %v18789_v14 = vsel %vm4803_vm5, %v8266_v53, %v18687_v55  ;;  %v18793_v24 = vsel %vm4803_vm5, %v8419_v10, %v18691_v57  ;;  %v17702_v55 = vld [vmem:[#allocation2 + $0x14] ss:$0 sps:$4 sm:$0x11]  }
 0x320   : > { %v8594_v15 = vrot.slane %v8590_v19, 6  ;;  %v9408_v29 = vunpack.c.l.b16 %v17647_v13  ;;  %v18803_v18 = vrot.slane %v12848_v31, 6  ;;  %v9984_v43 = vrot.slane %v9980_v26, 7  ;;  %v17663_v22 = vld [vmem:[#allocation2 + $0x1c] ss:$0 sps:$4 sm:$0x22]  }
 0x321   : > { %v18797_v34 = vsel %vm4803_vm5, %v9012_v40, %v18696_v56  ;;  %v18801_v42 = vsel %vm4803_vm5, %v9167_v47, %v18683_v28  ;;  %v10152_v33 = vunpack.c.l.b16 %v17651_v27  ;;  %v12607_v56 = vsel %vm4800_vm4, %v12606_v9, %v18643_v36  ;;  %v17583_v3 = vld [vmem:[#allocation2 + $0x18] ss:$0 sps:$4 sm:$0x11]  }
 0x322   : > { %v18807_v57 = vsel %vm4803_vm5, %v8594_v15, %v18703_v12  ;;  %v9412_v11 = vrot.slane %v9408_v29, 6  ;;  %v9564_v61 = vrot.slane %v9408_v29, 7  ;;  %v9735_v53 = vunpack.c.l.b16 %v17655_v35  ;;  %v17675_v15 = vld [vmem:[#allocation2 + $0x1c] ss:$0 sps:$4 sm:$0x44]  }
 0x323   : > { %v13595_v28 = vunpack.c.l.b16 %v18775_v48  ;;  %v18814_v31 = vsel %vm4803_vm5, %v9984_v43, %v18700_v58  ;;  %v18818_v10 = vsel %vm4803_vm5, %v10152_v33, %v18718_v50  ;;  %v10312_v12 = vrot.slane %v10152_v33, 1  ;;  %v17667_v58 = vld [vmem:[#allocation2 + $0x1c] ss:$0 sps:$4 sm:$0x44]  }
 0x324   : > { %v11125_v19 = vunpack.c.l.b16 %v17659_v59  ;;  %v18822_v40 = vsel %vm4803_vm5, %v9412_v11, %v18708_v1  ;;  %v18826_v36 = vsel %vm4803_vm5, %v9564_v61, %v18712_v51  ;;  %v18830_v9 = vsel %vm4803_vm5, %v9735_v53, %v18726_v6  ;;  %v17671_v48 = vld [vmem:[#allocation2 + $0x1c] ss:$0 sps:$4 sm:$0x44]  }
 0x325   : > { %v12032_v50 = vsel %vm4800_vm4, %v12031_v38, %v18645_v54  ;;  %v18836_v47 = vsel %vm4803_vm5, %v10312_v12, %v18722_v4  ;;  %v10552_v1 = vunpack.c.l.b16 %v17663_v22  ;;  %v13427_v51 = vsel %vm4800_vm4, %v13426_v30, %v18647_v62  ;;  %v17679_v29 = vld [vmem:[#allocation2 + $0x1c] ss:$0 sps:$4 sm:$0x44]  }
 0x326   : > { %v11130_v13 = vrot.slane %v11125_v19, 1  ;;  %v11297_v26 = vunpack.c.l.b16 %v17667_v58  ;;  %v10879_v27 = vunpack.c.l.b16 %v17671_v48  ;;  %v13598_v6 = vrot.slane %v13595_v28, 7  ;;  %v17683_v33 = vld [vmem:[#allocation2 + $0x1c] ss:$0 sps:$4 sm:$0x88]  }
 0x327   : > { %v13177_v35 = vunpack.c.l.b16 %v17702_v55  ;;  %v18846_v54 = vsel %vm4803_vm5, %v10552_v1, %v18735_v8  ;;  %v10709_v4 = vrot.slane %v10552_v1, 1  ;;  %v12274_v38 = vunpack.c.l.b16 %v17675_v15  ;;  %v17687_v12 = vld [vmem:[#allocation2 + $0x1c] ss:$0 sps:$4 sm:$0x88]  }
 0x328   : > { %v18842_v43 = vsel %vm4803_vm5, %v11130_v13, %v18730_v5  ;;  %v11302_v59 = vrot.slane %v11297_v26, 2  ;;  %v11458_v11 = vrot.slane %v11297_v26, 3  ;;  %v10884_v61 = vrot.slane %v10879_v27, 2  ;;  %v17691_v58 = vld [vmem:[#allocation2 + $0x1c] ss:$0 sps:$4 sm:$0x88]  }
 0x329   : > { %v11699_v62 = vunpack.c.l.b16 %v17679_v29  ;;  %v18850_v30 = vsel %vm4803_vm5, %v10709_v4, %v18743_v0  ;;  %v12279_v55 = vrot.slane %v12274_v38, 3  ;;  %v12447_v53 = vunpack.c.l.b16 %v17683_v33  ;;  %v17695_v1 = vld [vmem:[#allocation2 + $0x1c] ss:$0 sps:$4 sm:$0x88]  }
 0x32a   : > { %v13754_v5 = vsel %vm4800_vm4, %v13595_v28, %v18665_v60  ;;  %v18856_v8 = vsel %vm4803_vm5, %v11302_v59, %v18739_v25  ;;  %v18860_v19 = vsel %vm4803_vm5, %v11458_v11, %v18747_v52  ;;  %v18864_v22 = vsel %vm4803_vm5, %v10884_v61, %v18751_v20  ;;  %v17699_v26 = vld [vmem:[#allocation2 + $0x20] ss:$0 sps:$4 sm:$0x11]  }
 0x32b   : > { %21578 = vst [vmem:[#allocation15_spill] sm:$0xff] %v18860_v19  ;;  %21579 = vst [vmem:[#allocation16_spill] sm:$0xff] %v18864_v22  ;;  %v11704_v0 = vrot.slane %v11699_v62, 2  ;;  %v18868_v48 = vsel %vm4803_vm5, %v12279_v55, %v18755_v7  ;;  %v12452_v13 = vrot.slane %v12447_v53, 4  ;;  %v11857_v60 = vrot.slane %v11699_v62, 3 }
 0x32c   : > { %21580 = vst [vmem:[#allocation17_spill] sm:$0xff] %v18868_v48  ;;  %v12608_v28 = vrot.slane %v12447_v53, 5  ;;  %v12028_v52 = vunpack.c.l.b16 %v17687_v12  ;;  %v13423_v15 = vunpack.c.l.b16 %v17691_v58  ;;  %v13180_v27 = vrot.slane %v13177_v35, 7  ;;  %v17703_v38 = vld [vmem:[#allocation2 + $0x20] ss:$0 sps:$4 sm:$0x11]  }
 0x32d   : > { %v18872_v25 = vsel %vm4803_vm5, %v11704_v0, %v18761_v41  ;;  %v18876_v20 = vsel %vm4803_vm5, %v12452_v13, %v18765_v17  ;;  %v18880_v7 = vsel %vm4803_vm5, %v11857_v60, %v18769_v44  ;;  %v12849_v4 = vunpack.c.l.b16 %v17695_v1  ;;  %v18918_v60 = vld [vmem:[#allocation2] ss:$0 sps:$4 sm:$0x11]   ;;  %v17595_v19 = vld [vmem:[#allocation2 + $0x18] ss:$0 sps:$4 sm:$0x22]  }
 0x32e   : > { %21581 = vst [vmem:[#allocation18_spill] sm:$0xff] %v18872_v25  ;;  %21582 = vst [vmem:[#allocation19_spill] sm:$0xff] %v18876_v20  ;;  %v18883_v29 = vsel %vm4803_vm5, %v12608_v28, %v12607_v56  ;;  %v12033_v33 = vrot.slane %v12028_v52, 4  ;;  %v13428_v41 = vrot.slane %v13423_v15, 5  ;;  %v12853_v59 = vsel %vm4800_vm4, %v18777_v49, %v18649_v63 }
 0x32f   : > { %21583 = vst [vmem:[#allocation20_spill] sm:$0xff] %v18880_v7  ;;  %21584 = vst [vmem:[#allocation21_spill] sm:$0xff] %v18883_v29  ;;  %v13596_v35 = vunpack.c.l.b16 %v17699_v26  ;;  %v12854_v11 = vrot.slane %v12849_v4, 4  ;;  %v13006_v17 = vsel %vm4800_vm4, %v18803_v18, %v18659_v37  ;;  %v13007_v61 = vrot.slane %v12849_v4, 5 }
 0x330   : > { %v13178_v44 = vunpack.c.l.b16 %v17703_v38  ;;  %v18892_v62 = vsel %vm4803_vm5, %v12033_v33, %v12032_v50  ;;  %v18895_v56 = vsel %vm4803_vm5, %v13428_v41, %v13427_v51  ;;  %v21589_v49 = vunpack.c.l.b16 %v18631_v45  ;;  %v17581_v28 = vld [vmem:[#allocation2] ss:$0 sps:$4 sm:$0x11]   ;;  %v18921_v4 = vld [vmem:[#allocation2 + $0xc] ss:$0 sps:$4 sm:$0x11]  }
 0x331   : > { %21585 = vst [vmem:[#allocation22_spill] sm:$0xff] %v18892_v62  ;;  %21586 = vst [vmem:[#allocation23_spill] sm:$0xff] %v18895_v56  ;;  %v13600_v55 = vrot.slane %v13596_v35, 6  ;;  %v13755_v53 = vrot.slane %v13596_v35, 7  ;;  %v18898_v12 = vsel %vm4803_vm5, %v12854_v11, %v12853_v59  ;;  %v18901_v63 = vsel %vm4803_vm5, %v13007_v61, %v13006_v17 }
 0x332   : > { %21587 = vst [vmem:[#allocation24_spill] sm:$0xff] %v18898_v12  ;;  %21588 = vst [vmem:[#allocation25_spill] sm:$0xff] %v18901_v63  ;;  %v13599_v37 = vsel %vm4800_vm4, %v13598_v6, %v21589_v49  ;;  %v13182_v18 = vrot.slane %v13178_v44, 6  ;;  %v21592_v51 = vunpack.c.l.b16 %v18651_v2  ;;  %v17585_v45 = vld [vmem:[#allocation2] ss:$0 sps:$4 sm:$0x22]   ;;  %v21538_v52 = vunpack.c.l.b16 %v18918_v60 }
 0x333   : > { %v18907_v0 = vsel %vm4803_vm5, %v13600_v55, %v13599_v37  ;;  %v18910_v50 = vsel %vm4803_vm5, %v13755_v53, %v13754_v5  ;;  %v17589_v1 = vld [vmem:[#allocation2] ss:$0 sps:$4 sm:$0x22]   ;;  %v5390_v2 = vunpack.c.l.b16 %v17581_v28  ;;  %v17586_v33 = vld [vmem:[#allocation2 + $0xc] ss:$0 sps:$4 sm:$0x22]   ;;  %v21594_v29 = vunpack.c.l.b16 %v18918_v60 }
 0x334   : > { %21590 = vst [vmem:[#allocation26_spill] sm:$0xff] %v18907_v0  ;;  %21591 = vst [vmem:[#allocation27_spill] sm:$0xff] %v18910_v50  ;;  %v13181_v58 = vsel %vm4800_vm4, %v13180_v27, %v21592_v51  ;;  %v17593_v6 = vld [vmem:[#allocation2] ss:$0 sps:$4 sm:$0x22]   ;;  %v5562_v27 = vunpack.c.l.b16 %v17585_v45  ;;  %v5132_v35 = vunpack.c.l.b16 %v17589_v1  ;;  %v18925_v11 = vrot.slane %v21538_v52, 1 }
 0x335   : > { %v18916_v13 = vsel %vm4803_vm5, %v13182_v18, %v13181_v58  ;;  %v17597_v15 = vld [vmem:[#allocation2] ss:$0 sps:$4 sm:$0x22]   ;;  %v17590_v17 = vld [vmem:[#allocation2 + $0xc] ss:$0 sps:$4 sm:$0x22]   ;;  %v6535_v61 = vunpack.c.l.b16 %v17593_v6  ;;  %v21542_v51 = vunpack.c.l.b16 %v18921_v4  ;;  %v5563_v28 = vunpack.c.l.b16 %v17586_v33 }
 0x336   : > { %21593 = vst [vmem:[#allocation28_spill] sm:$0xff] %v18916_v13  ;;  %v17601_v26 = vld [vmem:[#allocation2] ss:$0 sps:$4 sm:$0x44]   ;;  %v5962_v44 = vunpack.c.l.b16 %v17597_v15  ;;  %v5394_v58 = vrot.slane %v5390_v2, 1  ;;  %v5566_v45 = vrot.slane %v5562_v27, 2 }
 0x337   : > { %v17605_v5 = vld [vmem:[#allocation2] ss:$0 sps:$4 sm:$0x44]   ;;  %v18928_v55 = vld [vmem:[#allocation2 + $0x18] ss:$0 sps:$4 sm:$0x11]   ;;  %v6707_v49 = vunpack.c.l.b16 %v17601_v26 }
 0x338   : > { %v17594_v53 = vld [vmem:[#allocation2 + $0xc] ss:$0 sps:$4 sm:$0x22]   ;;  %v6289_v37 = vunpack.c.l.b16 %v17605_v5  ;;  %v18933_v6 = vrot.slane %v5562_v27, 3  ;;  %v18935_v15 = vrot.slane %v5132_v35, 2  ;;  %v18937_v52 = vrot.slane %v6535_v61, 3 }
 0x339   : > { %v18931_v1 = vld [vmem:[#allocation2 + $0xc] ss:$0 sps:$4 sm:$0x22]   ;;  %v18939_v26 = vrot.slane %v5962_v44, 2  ;;  %v18941_v5 = vrot.slane %v5962_v44, 3  ;;  %v4797_v2 = vunpack.c.l.b16 %v18928_v55  ;;  %v18945_v33 = vrot.slane %v6707_v49, 4 }
 0x33a   : > { %v4799_v35 = vrot.slane %v21542_v51, 7  ;;  %v5567_v61 = vrot.slane %v5563_v28, 1  ;;  %v6536_v46 = vunpack.c.l.b16 %v17594_v53  ;;  %v5722_v13 = vrot.slane %v5563_v28, 2  ;;  %v17602_v50 = vld [vmem:[#allocation2 + $0xc] ss:$0 sps:$4 sm:$0x44]  }
 0x33b   : > { %v5963_v55 = vunpack.c.l.b16 %v18931_v1  ;;  %v17587_v0 = vld [vmem:[#allocation2 + $0x18] ss:$0 sps:$4 sm:$0x22]   ;;  %v4802_v51 = vrot.slane %v4797_v2, 6  ;;  %v6708_v48 = vunpack.c.l.b16 %v17602_v50  ;;  %v4960_v60 = vrot.slane %v4797_v2, 7 }
 0x33c   : > { %v17606_v1 = vld [vmem:[#allocation2 + $0xc] ss:$0 sps:$4 sm:$0x44]   ;;  %v4801_v7 = vsel %vm4800_vm4, %v4799_v35, %v21594_v29  ;;  %v17591_v25 = vld [vmem:[#allocation2 + $0x18] ss:$0 sps:$4 sm:$0x22]   ;;  %v5564_v22 = vunpack.c.l.b16 %v17587_v0 }
 0x33d   : > { %v5967_v28 = vrot.slane %v5963_v55, 1 }
 0x34f   : > { %v4741_v38 = vpop.f32.mrb[18].mxu1 }
 0x350   : > { %v14556_v41 = vpack.c.bf16 %v4741_v38, %v4741_v38  ;;  %v15704_v59 = vpop.f32.mrb[19].mxu1 }
 0x352   : > { %4771 = vst.msk [vmem:[#allocation2 + $0x24] sm:$0xf] %vm1412_vm2, %v14556_v41  ;;  %v5133_v41 = vunpack.c.l.b16 %v17590_v17  ;;  %v17582_v17 = vld [vmem:[#allocation2 + $0xc] ss:$0 sps:$4 sm:$0x11]  }
 0x353   : > { %v4747_v18 = vpop.f32.mrb[20].mxu1  ;;  %v5391_v53 = vunpack.c.l.b16 %v17582_v17 }
 0x354   : > { %v14557_v38 = vpack.c.bf16 %v4747_v18, %v4747_v18  ;;  %v15707_v59 = vpop.f32.mrb[21].mxu1  ;;  %v18947_v18 = vrot.slane %v6707_v49, 5  ;;  %v18956_v49 = vld [vmem:[#allocation2] ss:$0 sps:$4 sm:$0x44]   ;;  %v5137_v63 = vrot.slane %v5133_v41, 1 }
 0x355   : > { %v18949_v59 = vrot.slane %v6289_v37, 4 }
 0x356   : > { %4772 = vst.msk [vmem:[#allocation2 + $0x28] sm:$0xf] %vm1412_vm2, %v14557_v38  ;;  %v5392_v38 = vunpack.c.l.b16 %v17583_v3 }
 0x357   : > { %v4753_v27 = vpop.f32.mrb[22].mxu1 }
 0x358   : > { %v14558_v44 = vpack.c.bf16 %v4753_v27, %v4753_v27  ;;  %v15710_v21 = vpop.f32.mrb[23].mxu1  ;;  %v6540_v27 = vrot.slane %v6536_v46, 2  ;;  %v5396_v3 = vrot.slane %v5392_v38, 7  ;;  %v5395_v38 = vsel %vm4800_vm4, %v5391_v53, %v5394_v58 }
 0x359   : > { %v17580_v37 = vld [vmem:[#allocation2 + $0x24] ss:$0 sps:$4 sm:$0x11]   ;;  %v6119_v53 = vrot.slane %v5963_v55, 2 }
 0x35a   : > { %4773 = vst.msk [vmem:[#allocation2 + $0x2c] sm:$0x1] %vm1415_vm3, %v14558_v44  ;;  %v17584_v12 = vld [vmem:[#allocation2 + $0x24] ss:$0 sps:$4 sm:$0x11]   ;;  %v4798_v56 = vunpack.c.l.b16 %v17580_v37  ;;  %v4804_v37 = vsel %vm4803_vm5, %v4802_v51, %v4801_v7  ;;  %v5397_v35 = vsel %vm4803_vm5, %v5396_v3, %v5395_v38  ;;  %v5568_v44 = vsel %vm4800_vm4, %v5567_v61, %v5566_v45 }
 0x35b   : > { %v18959_v62 = vld [vmem:[#allocation2 + $0x24] ss:$0 sps:$4 sm:$0x22]   ;;  %v5393_v21 = vunpack.c.l.b16 %v17584_v12  ;;  %v21595_v7 = vunpack.c.l.b16 %v18921_v4  ;;  %v18985_v3 = vld [vmem:[#allocation2 + $0xc] ss:$0 sps:$4 sm:$0x44]   ;;  %v5723_v4 = vsel %vm4800_vm4, %v5722_v13, %v18933_v6  ;;  %v6290_v61 = vunpack.c.l.b16 %v17606_v1 }
 0x35c   : > { %v4805_v20 = vrot.slane %v4798_v56, 5  ;;  %v5565_v41 = vunpack.c.l.b16 %v18959_v62  ;;  %v17592_v51 = vld [vmem:[#allocation2 + $0x24] ss:$0 sps:$4 sm:$0x22]   ;;  %v4962_v2 = vrot.slane %v4798_v56, 6  ;;  %v6712_v56 = vrot.slane %v6708_v48, 3 }
 0x35d   : > { %v5398_v17 = vrot.slane %v5393_v21, 6  ;;  %v4959_v50 = vsel %vm4800_vm4, %v21595_v7, %v18925_v11  ;;  %v18978_v21 = vld [vmem:[#allocation2 + $0x18] ss:$0 sps:$4 sm:$0x22]   ;;  %v5138_v11 = vsel %vm4800_vm4, %v5137_v63, %v18935_v15  ;;  %v5569_v55 = vsel %vm4803_vm5, %v5564_v22, %v5568_v44 }
 0x35e   : > { %v4807_v12 = vsel %vm4806_vm6, %v4805_v20, %v4804_v37  ;;  %v18980_v20 = vld [vmem:[#allocation2 + $0xc] ss:$0 sps:$4 sm:$0x44]   ;;  %v5570_v58 = vrot.slane %v5565_v41, 7  ;;  %v5134_v37 = vunpack.c.l.b16 %v17591_v25  ;;  %v4961_v13 = vsel %vm4803_vm5, %v4960_v60, %v4959_v50 }
 0x35f   : > { %v18970_v29 = vpack.c.b16 %v4807_v12, %v4807_v12  ;;  %v5399_v0 = vsel %vm4806_vm6, %v5398_v17, %v5397_v35  ;;  %v18995_v45 = vld [vmem:[#allocation2 + $0x18] ss:$0 sps:$4 sm:$0x44]   ;;  %v19000_v17 = vsel %vm4800_vm4, %v6540_v27, %v18937_v52  ;;  %v19002_v12 = vrot.slane %v6708_v48, 4 }
 0x360   : > { %v19004_v38 = vld [vmem:[#allocation2 + $0x18] ss:$0 sps:$4 sm:$0x44]   ;;  %v19006_v35 = vpack.c.b16 %v5399_v0, %v5399_v0  ;;  %v5724_v63 = vrot.slane %v5564_v22, 1  ;;  %v6537_v6 = vunpack.c.l.b16 %v17595_v19  ;;  %v5571_v15 = vsel %vm4806_vm6, %v5570_v58, %v5569_v55 }
 0x361   : > { %4907 = vrot.lane.b32.xlu1 %v18970_v29, %s17811_s14  ;;  %4809 = vrot.lane.b32.xlu0 %v18970_v29, %s17812_s8  ;;  %v4963_v1 = vsel %vm4806_vm6, %v4962_v2, %v4961_v13  ;;  %v5135_v44 = vunpack.c.l.b16 %v17592_v51  ;;  %v5968_v25 = vsel %vm4800_vm4, %v5967_v28, %v18939_v26  ;;  %v19013_v52 = vld [vmem:[#allocation2 + $0x24] ss:$0 sps:$4 sm:$0x88]   ;;  %v5964_v19 = vunpack.c.l.b16 %v18978_v21  ;;  %v17640_v46 = vld [vmem:[#allocation2 + $0x28] ss:$0 sps:$4 sm:$0x11]  }
 0x362   : > { %21596 = vst [vmem:[#allocation29_spill] sm:$0xff] %v19006_v35  ;;  %v17624_v48 = vld [vmem:[#allocation2 + $0x24] ss:$0 sps:$4 sm:$0x88]   ;;  %v19024_v22 = vsel %vm4800_vm4, %v6119_v53, %v18941_v5  ;;  %v19026_v60 = vrot.slane %v6290_v61, 3  ;;  %v5139_v7 = vsel %vm4803_vm5, %v5134_v37, %v5138_v11  ;;  %v6709_v50 = vunpack.c.l.b16 %v18995_v45 }
 0x363   : > { %v19019_v27 = vld [vmem:[#allocation2 + $0x24] ss:$0 sps:$4 sm:$0x22]   ;;  %v19033_v51 = vsel %vm4800_vm4, %v6712_v56, %v18945_v33  ;;  %v19036_v58 = vpack.c.b16 %v5571_v15, %v5571_v15  ;;  %v19038_v5 = vpack.c.b16 %v4963_v1, %v4963_v1  ;;  %v5725_v2 = vsel %vm4803_vm5, %v5724_v63, %v5723_v4  ;;  %v17636_v61 = vld [vmem:[#allocation2 + $0x28] ss:$0 sps:$4 sm:$0x11]  }
 0x364   : > { %v17628_v28 = vld [vmem:[#allocation2 + $0x24] ss:$0 sps:$4 sm:$0x88]   ;;  %v6542_v53 = vrot.slane %v6537_v6, 1  ;;  %v5140_v55 = vrot.slane %v5135_v44, 7  ;;  %v21543_v45 = vunpack.c.l.b16 %v19013_v52  ;;  %v7441_v37 = vunpack.c.l.b16 %v17624_v48 }
 0x365   : > { %5496 = vrot.lane.b32.xlu1 %v19006_v35, %s17811_s14  ;;  %5401 = vrot.lane.b32.xlu0 %v19006_v35, %s17812_s8  ;;  %v17632_v21 = vld [vmem:[#allocation2 + $0x24] ss:$0 sps:$4 sm:$0x88]   ;;  %21597 = vst [vmem:[#allocation30_spill] sm:$0xff] %v19036_v58  ;;  %21598 = vst [vmem:[#allocation31_spill] sm:$0xff] %v19038_v5  ;;  %v5969_v33 = vsel %vm4803_vm5, %v5964_v19, %v5968_v25  ;;  %v8836_v4 = vunpack.c.l.b16 %v17628_v28  ;;  %v9009_v6 = vunpack.c.l.b16 %v17636_v61  ;;  %v19053_v1 = vrot.slane %v6709_v50, 2 }
 0x366   : > { %v17596_v13 = vld [vmem:[#allocation2 + $0x24] ss:$0 sps:$4 sm:$0x22]   ;;  %v8262_v63 = vunpack.c.l.b16 %v17632_v21  ;;  %v5726_v15 = vsel %vm4806_vm6, %v5565_v41, %v5725_v2  ;;  %v19055_v44 = vrot.slane %v5964_v19, 1  ;;  %v8022_v48 = vrot.slane %v21543_v45, 4 }
 0x367   : > { %v19048_v56 = vld [vmem:[#allocation2 + $0x24] ss:$0 sps:$4 sm:$0x44]   ;;  %v17644_v0 = vld [vmem:[#allocation2 + $0x28] ss:$0 sps:$4 sm:$0x11]   ;;  %v21544_v25 = vunpack.c.l.b16 %v19019_v27  ;;  %v5141_v61 = vsel %vm4806_vm6, %v5140_v55, %v5139_v7  ;;  %v6538_v45 = vunpack.c.l.b16 %v17596_v13 }
 0x368   : > { %v7447_v26 = vrot.slane %v7441_v37, 3  ;;  %v8842_v11 = vrot.slane %v8836_v4, 4  ;;  %v8268_v28 = vrot.slane %v8262_v63, 3  ;;  %v17648_v21 = vld [vmem:[#allocation2 + $0x28] ss:$0 sps:$4 sm:$0x11]   ;;  %v19063_v62 = vsel %vm4806_vm6, %v8022_v48, %v18773_v23 }
 0x369   : > { %5621 = vrot.lane.b32.xlu1 %v19036_v58, %s17812_s8  ;;  %5014 = vrot.lane.b32.xlu0 %v19038_v5, %s17812_s8  ;;  %v8421_v41 = vrot.slane %v8262_v63, 4  ;;  %v9014_v19 = vrot.slane %v9009_v6, 5  ;;  %v17652_v2 = vld [vmem:[#allocation2 + $0x28] ss:$0 sps:$4 sm:$0x22]   ;;  %v6543_v37 = vsel %vm4803_vm5, %v6542_v53, %v19000_v17  ;;  %v9169_v55 = vrot.slane %v9009_v6, 6 }
 0x36a   : > { %v19073_v7 = vsel %vm4806_vm6, %v7447_v26, %v18781_v32  ;;  %v17656_v23 = vld [vmem:[#allocation2 + $0x28] ss:$0 sps:$4 sm:$0x22]   ;;  %v19075_v4 = vrot.slane %v6709_v50, 3  ;;  %v19079_v63 = vsel %vm4806_vm6, %v8842_v11, %v18785_v39  ;;  %v19083_v48 = vsel %vm4806_vm6, %v8268_v28, %v18789_v14 }
 0x36b   : > { %v19087_v13 = vsel %vm4806_vm6, %v8421_v41, %v18793_v24  ;;  %v19089_v17 = vpack.c.b16 %v5726_v15, %v5726_v15  ;;  %v19091_v32 = vpack.c.b16 %v5141_v61, %v5141_v61  ;;  %v19096_v50 = vsel %vm4806_vm6, %v9014_v19, %v18797_v34  ;;  %v17660_v39 = vld [vmem:[#allocation2 + $0x28] ss:$0 sps:$4 sm:$0x22]   ;;  %v19109_v15 = vld [vmem:[#allocation2 + $0x18] ss:$0 sps:$4 sm:$0x44]  }
 0x36c   : > { %v17664_v53 = vld [vmem:[#allocation2 + $0x28] ss:$0 sps:$4 sm:$0x22]   ;;  %v5970_v14 = vrot.slane %v21544_v25, 7  ;;  %v19102_v11 = vsel %vm4806_vm6, %v9169_v55, %v18801_v42  ;;  %v8591_v24 = vunpack.c.l.b16 %v17640_v46  ;;  %v9981_v6 = vunpack.c.l.b16 %v17644_v0 }
 0x36d   : > { %5671 = vrot.lane.b32.xlu1 %v19036_v58, %s17811_s14  ;;  %5065 = vrot.lane.b32.xlu0 %v19038_v5, %s17811_s14  ;;  %v6544_v34 = vsel %vm4806_vm6, %v6538_v45, %v6543_v37  ;;  %v9409_v28 = vunpack.c.l.b16 %v17648_v21  ;;  %v10153_v61 = vunpack.c.l.b16 %v17652_v2  ;;  %v9736_v41 = vunpack.c.l.b16 %v17656_v23  ;;  %v19111_v55 = vld [vmem:[#allocation2 + $0x24] ss:$0 sps:$4 sm:$0x44]   ;;  %v17668_v35 = vld [vmem:[#allocation2 + $0x28] ss:$0 sps:$4 sm:$0x44]  }
 0x36e   : > { %v8596_v19 = vrot.slane %v8591_v24, 5  ;;  %v9986_v25 = vrot.slane %v9981_v6, 6  ;;  %v11126_v26 = vunpack.c.l.b16 %v17660_v39  ;;  %v10553_v42 = vunpack.c.l.b16 %v17664_v53  ;;  %v17672_v23 = vld [vmem:[#allocation2 + $0x28] ss:$0 sps:$4 sm:$0x44]  }
 0x36f   : > { %v9414_v46 = vrot.slane %v9409_v28, 5  ;;  %v10158_v0 = vrot.slane %v10153_v61, 7  ;;  %v9566_v58 = vrot.slane %v9409_v28, 6  ;;  %v19115_v5 = vsel %vm4806_vm6, %v10153_v61, %v18836_v47  ;;  %v17684_v6 = vld [vmem:[#allocation2 + $0x28] ss:$0 sps:$4 sm:$0x88]  }
 0x370   : > { %v5971_v45 = vsel %vm4806_vm6, %v5970_v14, %v5969_v33  ;;  %v19120_v21 = vsel %vm4806_vm6, %v8596_v19, %v18807_v57  ;;  %v19124_v2 = vsel %vm4806_vm6, %v9986_v25, %v18814_v31  ;;  %v9741_v37 = vrot.slane %v9736_v41, 7  ;;  %v17676_v25 = vld [vmem:[#allocation2 + $0x28] ss:$0 sps:$4 sm:$0x44]  }
 0x371   : > { %5776 = vrot.lane.b32.xlu1 %v19089_v17, %s17812_s8  ;;  %5192 = vrot.lane.b32.xlu0 %v19091_v32, %s17812_s8  ;;  %v19133_v47 = vsel %vm4800_vm4, %v19002_v12, %v18947_v18  ;;  %v19138_v57 = vsel %vm4800_vm4, %v19026_v60, %v18949_v59  ;;  %v19142_v31 = vsel %vm4806_vm6, %v9414_v46, %v18822_v40  ;;  %v10558_v33 = vrot.slane %v10553_v42, 7  ;;  %v17688_v61 = vld [vmem:[#allocation2 + $0x28] ss:$0 sps:$4 sm:$0x88]  }
 0x372   : > { %v21599_v39 = vunpack.c.l.b16 %v19048_v56  ;;  %v19148_v14 = vsel %vm4806_vm6, %v10158_v0, %v18818_v10  ;;  %v19152_v18 = vsel %vm4806_vm6, %v9566_v58, %v18826_v36  ;;  %v19156_v59 = vsel %vm4806_vm6, %v9741_v37, %v18830_v9  ;;  %v17680_v10 = vld [vmem:[#allocation2 + $0x28] ss:$0 sps:$4 sm:$0x44]   ;;  %v19221_v56 = vld [vmem:[#allocation2 + $0x24] ss:$0 sps:$4 sm:$0x44]  }
 0x373   : > { %v19158_v12 = vpack.c.b16 %v6544_v34, %v6544_v34  ;;  %v19160_v40 = vpack.c.b16 %v5971_v45, %v5971_v45  ;;  %v19165_v24 = vsel %vm4806_vm6, %v11126_v26, %v18842_v43  ;;  %v6122_v36 = vsel %vm4803_vm5, %v19055_v44, %v19024_v22 }
 0x374   : > { %v6716_v53 = vrot.slane %v21599_v39, 1  ;;  %v21600_v58 = vunpack.c.l.b16 %v19004_v38  ;;  %v19174_v34 = vsel %vm4806_vm6, %v10558_v33, %v18846_v54  ;;  %v11298_v28 = vunpack.c.l.b16 %v17668_v35  ;;  %v19184_v38 = vld [vmem:[#allocation2 + $0x18] ss:$0 sps:$4 sm:$0x44]  }
 0x375   : > { %5826 = vrot.lane.b32.xlu1 %v19089_v17, %s17811_s14  ;;  %5243 = vrot.lane.b32.xlu0 %v19091_v32, %s17811_s14  ;;  %v6715_v43 = vsel %vm4803_vm5, %v19053_v1, %v19033_v51  ;;  %v6292_v22 = vunpack.c.l.b16 %v19111_v55  ;;  %v19188_v54 = vsel %vm4806_vm6, %v10553_v42, %v18850_v30  ;;  %v10880_v35 = vunpack.c.l.b16 %v17672_v23  ;;  %v17612_v55 = vld [vmem:[#allocation2 + $0x24] ss:$0 sps:$4 sm:$0x44]   ;;  %v21602_v30 = vld [vmem:[#allocation15_spill] sm:$0xff] }
 0x376   : > { %v6296_v9 = vrot.slane %v21600_v58, 2  ;;  %v21601_v44 = vunpack.c.l.b16 %v19019_v27  ;;  %v11304_v41 = vrot.slane %v11298_v28, 1  ;;  %v11460_v19 = vrot.slane %v11298_v28, 2  ;;  %v17692_v33 = vld [vmem:[#allocation2 + $0x28] ss:$0 sps:$4 sm:$0x88]  }
 0x377   : > { %v12275_v46 = vunpack.c.l.b16 %v17676_v25  ;;  %v6717_v0 = vsel %vm4806_vm6, %v6716_v53, %v6715_v43  ;;  %v10886_v45 = vrot.slane %v10880_v35, 1  ;;  %v11700_v51 = vunpack.c.l.b16 %v17680_v10  ;;  %v21605_v28 = vld [vmem:[#allocation17_spill] sm:$0xff] }
 0x378   : > { %v6123_v26 = vsel %vm4806_vm6, %v21601_v44, %v6122_v36  ;;  %v12448_v1 = vunpack.c.l.b16 %v17684_v6  ;;  %v19196_v37 = vsel %vm4806_vm6, %v11304_v41, %v18856_v8  ;;  %v19200_v42 = vsel %vm4806_vm6, %v11460_v19, %v21602_v30  ;;  %v21604_v8 = vld [vmem:[#allocation16_spill] sm:$0xff]  ;;  %v17696_v36 = vld [vmem:[#allocation2 + $0x28] ss:$0 sps:$4 sm:$0x88]  }
 0x379   : > { %6546 = vrot.lane.b32.xlu1 %v19158_v12, %s17812_s8  ;;  %5973 = vrot.lane.b32.xlu0 %v19160_v40, %s17812_s8  ;;  %v12281_v27 = vrot.slane %v12275_v46, 2  ;;  %v12029_v23 = vunpack.c.l.b16 %v17688_v61  ;;  %v21603_v25 = vmov %v21599_v39  ;;  %v19211_v10 = vsel %vm4806_vm6, %v10886_v45, %v21604_v8  ;;  %v17700_v44 = vld [vmem:[#allocation2 + $0x2c] ss:$0 sps:$4 sm:$0x11]  }
 0x37a   : > { %v6872_v39 = vrot.slane %v21603_v25, 2  ;;  %v11706_v6 = vrot.slane %v11700_v51, 1  ;;  %v19213_v58 = vpack.c.b16 %v6123_v26, %v6123_v26  ;;  %v12454_v43 = vrot.slane %v12448_v1, 3  ;;  %v21606_v19 = vld [vmem:[#allocation18_spill] sm:$0xff]  ;;  %v21607_v26 = vld [vmem:[#allocation19_spill] sm:$0xff] }
 0x37b   : > { %v19217_v61 = vsel %vm4806_vm6, %v12281_v27, %v21605_v28  ;;  %v11859_v35 = vrot.slane %v11700_v51, 2  ;;  %v19219_v41 = vpack.c.b16 %v6717_v0, %v6717_v0  ;;  %v12610_v45 = vrot.slane %v12448_v1, 4  ;;  %v21608_v27 = vld [vmem:[#allocation20_spill] sm:$0xff]  ;;  %v21609_v1 = vld [vmem:[#allocation21_spill] sm:$0xff] }
 0x37c   : > { %v19225_v46 = vsel %vm4806_vm6, %v11706_v6, %v21606_v19  ;;  %v12035_v30 = vrot.slane %v12029_v23, 3  ;;  %v6298_v25 = vrot.slane %v6292_v22, 1  ;;  %v19229_v8 = vsel %vm4806_vm6, %v12454_v43, %v21607_v26  ;;  %v17704_v43 = vld [vmem:[#allocation2 + $0x2c] ss:$0 sps:$4 sm:$0x11]  }
 0x37d   : > { %6641 = vrot.lane.b32.xlu1 %v19158_v12, %s17811_s14  ;;  %6068 = vrot.lane.b32.xlu0 %v19160_v40, %s17811_s14  ;;  %v19233_v28 = vsel %vm4806_vm6, %v11859_v35, %v21608_v27  ;;  %v13424_v51 = vunpack.c.l.b16 %v17692_v33  ;;  %v6871_v0 = vsel %vm4803_vm5, %v19075_v4, %v19133_v47  ;;  %v6297_v22 = vsel %vm4803_vm5, %v6296_v9, %v19138_v57  ;;  %v21610_v35 = vld [vmem:[#allocation22_spill] sm:$0xff]  ;;  %v21611_v9 = vld [vmem:[#allocation23_spill] sm:$0xff] }
 0x37e   : > { %v19246_v23 = vsel %vm4806_vm6, %v12610_v45, %v21609_v1  ;;  %v12850_v6 = vunpack.c.l.b16 %v17696_v36  ;;  %v7687_v33 = vunpack.c.l.b16 %v17612_v55  ;;  %v19250_v19 = vsel %vm4806_vm6, %v12035_v30, %v21610_v35 }
 0x37f   : > { %v13430_v26 = vrot.slane %v13424_v51, 4  ;;  %v13597_v27 = vunpack.c.l.b16 %v17700_v44  ;;  %v6873_v53 = vsel %vm4806_vm6, %v6872_v39, %v6871_v0  ;;  %v7112_v4 = vunpack.c.l.b16 %v19221_v56  ;;  %v21613_v56 = vld [vmem:[#allocation24_spill] sm:$0xff] }
 0x380   : > { %v12856_v47 = vrot.slane %v12850_v6, 3  ;;  %v13009_v60 = vrot.slane %v12850_v6, 4  ;;  %v6299_v57 = vsel %vm4806_vm6, %v6298_v25, %v6297_v22  ;;  %v21612_v39 = vunpack.c.l.b16 %v18980_v20  ;;  %v21614_v25 = vld [vmem:[#allocation25_spill] sm:$0xff]  ;;  %v21618_v20 = vld [vmem:[#allocation27_spill] sm:$0xff] }
 0x381   : > { %6767 = vrot.lane.b32.xlu1 %v19219_v41, %s17812_s8  ;;  %6173 = vrot.lane.b32.xlu0 %v19213_v58, %s17812_s8  ;;  %v19257_v45 = vsel %vm4806_vm6, %v13430_v26, %v21611_v9  ;;  %v13602_v36 = vrot.slane %v13597_v27, 5  ;;  %v13757_v55 = vrot.slane %v13597_v27, 6  ;;  %v13179_v0 = vunpack.c.l.b16 %v17704_v43  ;;  %v21617_v26 = vld [vmem:[#allocation26_spill] sm:$0xff] }
 0x382   : > { %v7689_v44 = vrot.slane %v21612_v39, 4  ;;  %v19267_v30 = vsel %vm4806_vm6, %v12856_v47, %v21613_v56  ;;  %v19271_v51 = vsel %vm4806_vm6, %v13009_v60, %v21614_v25  ;;  %v21615_v22 = vunpack.c.l.b16 %v19109_v15 }
 0x383   : > { %v21616_v6 = vunpack.c.l.b16 %v18985_v3  ;;  %v19279_v27 = vsel %vm4806_vm6, %v13602_v36, %v21617_v26  ;;  %v19283_v9 = vsel %vm4806_vm6, %v13757_v55, %v21618_v20  ;;  %v19285_v47 = vpack.c.b16 %v6873_v53, %v6873_v53  ;;  %v21622_v53 = vld [vmem:[#allocation28_spill] sm:$0xff] }
 0x384   : > { %v7691_v1 = vrot.slane %v21615_v22, 3  ;;  %v19287_v39 = vpack.c.b16 %v6299_v57, %v6299_v57  ;;  %v21619_v60 = vunpack.c.l.b16 %v19184_v38  ;;  %v13184_v15 = vrot.slane %v13179_v0, 5 }
 0x385   : > { %6817 = vrot.lane.b32.xlu1 %v19219_v41, %s17811_s14  ;;  %6223 = vrot.lane.b32.xlu0 %v19213_v58, %s17811_s14  ;;  %v7114_v35 = vrot.slane %v21616_v6, 3  ;;  %v21620_v56 = vunpack.c.l.b16 %v18953_v16  ;;  %v7693_v22 = vrot.slane %v7687_v33, 2  ;;  %v21621_v6 = vunpack.c.l.b16 %v18956_v49 }
 0x386   : > { %v7116_v43 = vrot.slane %v21619_v60, 2  ;;  %v7118_v26 = vrot.slane %v7112_v4, 1  ;;  %v19301_v57 = vsel %vm4806_vm6, %v13184_v15, %v21622_v53  ;;  %v21623_v15 = vld [vmem:[#allocation13_spill] sm:$0xff] }
 0x387   : > { %v7688_v25 = vrot.slane %v21620_v56, 5  ;;  %v7113_v36 = vrot.slane %v21621_v6, 4  ;;  %v21624_v56 = vunpack.c.l.b16 %v21623_v15 }
 0x389   : > { %6923 = vrot.lane.b32.xlu1 %v19285_v47, %s17812_s8  ;;  %6349 = vrot.lane.b32.xlu0 %v19287_v39, %s17812_s8  ;;  %v7690_v55 = vsel %vm4800_vm4, %v7689_v44, %v7688_v25  ;;  %v7115_v16 = vsel %vm4800_vm4, %v7114_v35, %v7113_v36  ;;  %v7862_v6 = vrot.slane %v21624_v56, 5  ;;  %v21625_v44 = vunpack.c.l.b16 %v18985_v3 }
 0x38a   : > { %v7692_v33 = vsel %vm4803_vm5, %v7691_v1, %v7690_v55  ;;  %v7117_v0 = vsel %vm4803_vm5, %v7116_v43, %v7115_v16  ;;  %v21626_v43 = vld [vmem:[#allocation14_spill] sm:$0xff]  ;;  %v21629_v55 = vld [vmem:[#allocation12_spill] sm:$0xff]  ;;  %v21632_v56 = vunpack.c.l.b16 %v18956_v49 }
 0x38b   : > { %v7694_v20 = vsel %vm4806_vm6, %v7693_v22, %v7692_v33  ;;  %v7119_v60 = vsel %vm4806_vm6, %v7118_v26, %v7117_v0  ;;  %v7267_v35 = vrot.slane %v21625_v44, 4  ;;  %v21627_v22 = vunpack.c.l.b16 %v21626_v43 }
 0x38c   : > { %v19317_v25 = vpack.c.b16 %v7694_v20, %v7694_v20  ;;  %v19319_v1 = vpack.c.b16 %v7119_v60, %v7119_v60  ;;  %v21628_v26 = vunpack.c.l.b16 %v19184_v38  ;;  %v21630_v16 = vunpack.c.l.b16 %v21629_v55 }
 0x38d   : > { %6973 = vrot.lane.b32.xlu1 %v19285_v47, %s17811_s14  ;;  %6399 = vrot.lane.b32.xlu0 %v19287_v39, %s17811_s14  ;;  %v7864_v36 = vrot.slane %v21627_v22, 4  ;;  %v21631_v0 = vunpack.c.l.b16 %v19013_v52  ;;  %v7266_v3 = vrot.slane %v21632_v56, 5  ;;  %v7271_v44 = vrot.slane %v7112_v4, 2 }
 0x38e   : > { %v7269_v53 = vrot.slane %v21628_v26, 3  ;;  %v7861_v33 = vrot.slane %v21630_v16, 6  ;;  %v4863_v16 = vsel %vm4815_vm7, %v18970_v29, 0  ;;  %v21634_v29 = vld [vmem:[#allocation29_spill] sm:$0xff]  ;;  %v19509_v56 = vpack.c.b16 %v19196_v37, %v19196_v37 }
 0x38f   : > { %v7866_v15 = vrot.slane %v21631_v0, 3  ;;  %v7268_v38 = vsel %vm4800_vm4, %v7267_v35, %v7266_v3  ;;  %v19363_v35 = vpack.c.b16 %v19073_v7, %v19073_v7  ;;  %v19379_v7 = vpack.c.b16 %v19083_v48, %v19083_v48 }
 0x390   : > { %v7863_v20 = vsel %vm4800_vm4, %v7862_v6, %v7861_v33  ;;  %v7270_v43 = vsel %vm4803_vm5, %v7269_v53, %v7268_v38  ;;  %v19359_v6 = vpack.c.b16 %v19063_v62, %v19063_v62  ;;  %v19375_v62 = vpack.c.b16 %v19079_v63, %v19079_v63  ;;  %21635 = vst [vmem:[#allocation15_spill] sm:$0xff] %v19509_v56 }
 0x391   : > { %7696 = vrot.lane.b32.xlu1 %v19317_v25, %s17812_s8  ;;  %7121 = vrot.lane.b32.xlu0 %v19319_v1, %s17812_s8  ;;  %v7865_v60 = vsel %vm4803_vm5, %v7864_v36, %v7863_v20  ;;  %v7272_v49 = vsel %vm4806_vm6, %v7271_v44, %v7270_v43  ;;  %v19391_v63 = vpack.c.b16 %v19087_v13, %v19087_v13  ;;  %v4780_v44 = vld [vmem:[%s21522_s3] sm:$0xf] }
 0x392   : > { %v7867_v52 = vsel %vm4806_vm6, %v7866_v15, %v7865_v60  ;;  %v19347_v22 = vpack.c.b16 %v7272_v49, %v7272_v49  ;;  %v19395_v48 = vpack.c.b16 %v19096_v50, %v19096_v50  ;;  %v19407_v13 = vpack.c.b16 %v19102_v11, %v19102_v11  ;;  %v14165_v15 = vld [vmem:[%s21522_s3 + $0x4] sm:$0xf] }
 0x393   : > { %v19345_v4 = vpack.c.b16 %v7867_v52, %v7867_v52  ;;  %v19411_v50 = vpack.c.b16 %v19120_v21, %v19120_v21  ;;  %v19423_v11 = vpack.c.b16 %v19124_v2, %v19124_v2  ;;  %v19427_v21 = vpack.c.b16 %v19142_v31, %v19142_v31 }
 0x394   : > { %v19439_v2 = vpack.c.b16 %v19148_v14, %v19148_v14  ;;  %v19443_v31 = vpack.c.b16 %v19152_v18, %v19152_v18  ;;  %v19455_v14 = vpack.c.b16 %v19115_v5, %v19115_v5  ;;  %v19459_v18 = vpack.c.b16 %v19156_v59, %v19156_v59  ;;  %v14140_v5 = vld [vmem:[%s21522_s3 + $0x4] sm:$0xf] }
 0x395   : > { %7791 = vrot.lane.b32.xlu1 %v19317_v25, %s17811_s14  ;;  %7216 = vrot.lane.b32.xlu0 %v19319_v1, %s17811_s14  ;;  %v21633_v59 = vmov 0.0   ;;  %v19480_v33 = vpack.c.b16 %v19165_v24, %v19165_v24  ;;  %v19484_v0 = vpack.c.b16 %v19174_v34, %v19174_v34  ;;  %v5453_v24 = vsel %vm4815_vm7, %v21634_v29, 0 }
 0x396   : > { %v19513_v3 = vpack.c.b16 %v19188_v54, %v19188_v54  ;;  %v5376_v54 = vld [vmem:[%s21522_s3] sm:$0xf]  ;;  %v19538_v60 = vpack.c.b16 %v19200_v42, %v19200_v42  ;;  %v19542_v43 = vpack.c.b16 %v19211_v10, %v19211_v10  ;;  %v14147_v42 = vld [vmem:[%s21522_s3 + $0x8] sm:$0xf]  ;;  %v21639_v10 = vld [vmem:[#allocation31_spill] sm:$0xff]  ;;  %v19563_v49 = vpack.c.b16 %v19217_v61, %v19217_v61 }
 0x397   : > { %v4969_v52 = vsel %vm4815_vm7, %v21639_v10, 0  ;;  %v21642_v61 = vld [vmem:[#allocation30_spill] sm:$0xff] }
 0x398   : > { %21636 = vst [vmem:[#allocation16_spill] sm:$0xff] %v19513_v3  ;;  %21637 = vst [vmem:[#allocation17_spill] sm:$0xff] %v19538_v60 }
 0x399   : > { %7917 = vrot.lane.b32.xlu1 %v19345_v4, %s17812_s8  ;;  %7322 = vrot.lane.b32.xlu0 %v19347_v22, %s17812_s8  ;;  %21638 = vst [vmem:[#allocation18_spill] sm:$0xff] %v19542_v43  ;;  %21640 = vst [vmem:[#allocation19_spill] sm:$0xff] %v19563_v49 }
 0x39d   : > { %7967 = vrot.lane.b32.xlu1 %v19345_v4, %s17811_s14  ;;  %7372 = vrot.lane.b32.xlu0 %v19347_v22, %s17811_s14 }
 0x3a1   : > { %8073 = vrot.lane.b32.xlu1 %v19359_v6, %s17812_s8  ;;  %7498 = vrot.lane.b32.xlu0 %v19363_v35, %s17812_s8 }
 0x3a5   : > { %8123 = vrot.lane.b32.xlu1 %v19359_v6, %s17811_s14  ;;  %7548 = vrot.lane.b32.xlu0 %v19363_v35, %s17811_s14 }
 0x3a9   : > { %8845 = vrot.lane.b32.xlu1 %v19375_v62, %s17812_s8  ;;  %8271 = vrot.lane.b32.xlu0 %v19379_v7, %s17812_s8 }
 0x3ad   : > { %8940 = vrot.lane.b32.xlu1 %v19375_v62, %s17811_s14  ;;  %8366 = vrot.lane.b32.xlu0 %v19379_v7, %s17811_s14 }
 0x3b1   : > { %8472 = vrot.lane.b32.xlu0 %v19391_v63, %s17812_s8  ;;  %9065 = vrot.lane.b32.xlu1 %v19395_v48, %s17812_s8 }
 0x3b5   : > { %8522 = vrot.lane.b32.xlu0 %v19391_v63, %s17811_s14  ;;  %9115 = vrot.lane.b32.xlu1 %v19395_v48, %s17811_s14 }
 0x3b9   : > { %9220 = vrot.lane.b32.xlu1 %v19407_v13, %s17812_s8  ;;  %8647 = vrot.lane.b32.xlu0 %v19411_v50, %s17812_s8 }
 0x3bd   : > { %9270 = vrot.lane.b32.xlu1 %v19407_v13, %s17811_s14  ;;  %8697 = vrot.lane.b32.xlu0 %v19411_v50, %s17811_s14 }
 0x3c1   : > { %9989 = vrot.lane.b32.xlu1 %v19423_v11, %s17812_s8  ;;  %9417 = vrot.lane.b32.xlu0 %v19427_v21, %s17812_s8 }
 0x3c5   : > { %10084 = vrot.lane.b32.xlu1 %v19423_v11, %s17811_s14  ;;  %9512 = vrot.lane.b32.xlu0 %v19427_v21, %s17811_s14 }
 0x3c9   : > { %10209 = vrot.lane.b32.xlu1 %v19439_v2, %s17812_s8  ;;  %9617 = vrot.lane.b32.xlu0 %v19443_v31, %s17812_s8 }
 0x3cd   : > { %10259 = vrot.lane.b32.xlu1 %v19439_v2, %s17811_s14  ;;  %9667 = vrot.lane.b32.xlu0 %v19443_v31, %s17811_s14 }
 0x3d1   : > { %10364 = vrot.lane.b32.xlu1 %v19455_v14, %s17812_s8  ;;  %9792 = vrot.lane.b32.xlu0 %v19459_v18, %s17812_s8 }
 0x3d3   : > { %v4810_v36 = vpop.permute.xlu0 %4809  ;;  %v4908_v34 = vpop.permute.xlu1 %4907 }
 0x3d4   : > { %v4817_v26 = vsel %vm4815_vm7, %v4810_v36, 0  ;;  %v4913_v20 = vsel %vm4815_vm7, %v4908_v34, 0  ;;  %v19567_v36 = vpack.c.b16 %v19225_v46, %v19225_v46  ;;  %v5577_v46 = vsel %vm4815_vm7, %v21642_v61, 0 }
 0x3d5   : > { %15712 = vmatpush3.bf16.msra.mxu0 %v4817_v26  ;;  %10414 = vrot.lane.b32.xlu1 %v19455_v14, %s17811_s14  ;;  %v14172_v26 = vld [vmem:[%s21522_s3 + $0x8] sm:$0xf] }
 0x3d6   : > { %9842 = vrot.lane.b32.xlu0 %v19459_v18, %s17811_s14  ;;  %15717 = vmatprep.subr.bf16.mxu0 %v21633_v59  ;;  %21641 = vst [vmem:[#allocation20_spill] sm:$0xff] %v19567_v36 }
 0x3d7   : > { %v5402_v53 = vpop.permute.xlu0 %5401  ;;  %v5497_v37 = vpop.permute.xlu1 %5496 }
 0x3d8   : > { %v5407_v55 = vsel %vm4815_vm7, %v5402_v53, 0  ;;  %15714 = vmatmul.mubr.msk.bf16.vlgmr.msra.gmra.mrb[24].mxu0 %vm4811_vm8, %v14140_v5  ;;  %v5502_v38 = vsel %vm4815_vm7, %v5497_v37, 0  ;;  %v19591_v53 = vpack.c.b16 %v19229_v8, %v19229_v8 }
 0x3d9   : > { %15718 = vmatpush3.bf16.msra.mxu0 %v4863_v16  ;;  %15766 = vmatpush3.bf16.msra.mxu1 %v5407_v55  ;;  %v19595_v55 = vpack.c.b16 %v19233_v28, %v19233_v28  ;;  %v14174_v28 = vld [vmem:[%s21522_s3 + $0xc] sm:$0xf] }
 0x3da   : > { %11134 = vrot.lane.b32.xlu1 %v19480_v33, %s17812_s8  ;;  %10561 = vrot.lane.b32.xlu0 %v19484_v0, %s17812_s8  ;;  %21643 = vst [vmem:[#allocation21_spill] sm:$0xff] %v19591_v53 }
 0x3db   : > { %15771 = vmatprep.subr.bf16.mxu1 %v21633_v59  ;;  %15719 = vmatprep.mubr.msk.bf16.mxu0 %vm17809_vm0, %v21633_v59  ;;  %v5015_v5 = vpop.permute.xlu0 %5014  ;;  %21644 = vst [vmem:[#allocation22_spill] sm:$0xff] %v19595_v55  ;;  %v5622_v16 = vpop.permute.xlu1 %5621 }
 0x3dc   : > { %15768 = vmatmul.mubr.msk.bf16.vlgmr.msra.gmra.mrb[24].mxu1 %vm4811_vm8, %v14165_v15  ;;  %15723 = vmatprep.subr.bf16.mxu0 %v21633_v59  ;;  %v14149_v15 = vld [vmem:[%s21522_s3 + $0xc] sm:$0xf]  ;;  %v5020_v29 = vsel %vm4815_vm7, %v5015_v5, 0  ;;  %v5627_v34 = vsel %vm4815_vm7, %v5622_v16, 0  ;;  %v19683_v5 = vpack.c.b16 %v19279_v27, %v19279_v27  ;;  %v14182_v27 = vld [vmem:[%s21522_s3 + $0x14] sm:$0xf] }
 0x3dd   : > { %15772 = vmatpush3.bf16.msra.mxu1 %v5453_v24  ;;  %15773 = vmatprep.mubr.msk.bf16.mxu1 %vm17809_vm0, %v21633_v59 }
 0x3de   : > { %11229 = vrot.lane.b32.xlu1 %v19480_v33, %s17811_s14  ;;  %10656 = vrot.lane.b32.xlu0 %v19484_v0, %s17811_s14  ;;  %21650 = vst [vmem:[#allocation28_spill] sm:$0xff] %v19683_v5 }
 0x3df   : > { %15777 = vmatprep.subr.bf16.mxu1 %v21633_v59  ;;  %v5066_v8 = vpop.permute.xlu0 %5065  ;;  %v5672_v24 = vpop.permute.xlu1 %5671 }
 0x3e2   : > { %11355 = vrot.lane.b32.xlu1 %v19509_v56, %s17812_s8  ;;  %10761 = vrot.lane.b32.xlu0 %v19513_v3, %s17812_s8 }
 0x3e3   : > { %v5193_v37 = vpop.permute.xlu0 %5192 }
 0x3e4   : > { %15720 = vmatmul.mubr.msk.bf16.vlgmr.msra.gmra.mrb[24].mxu0 %vm4811_vm8, %v4780_v44  ;;  %v19620_v44 = vpack.c.b16 %v19246_v23, %v19246_v23  ;;  %v14151_v23 = vld [vmem:[%s21522_s3 + $0x10] sm:$0xf] }
 0x3e5   : > { %15724 = vmatpush3.bf16.msra.mxu0 %v4913_v20  ;;  %15725 = vmatprep.mubr.msk.bf16.mxu0 %vm17809_vm0, %v21633_v59  ;;  %v19624_v20 = vpack.c.b16 %v19250_v19, %v19250_v19  ;;  %v5071_v19 = vsel %vm4815_vm7, %v5066_v8, 0 }
 0x3e6   : > { %11405 = vrot.lane.b32.xlu1 %v19509_v56, %s17811_s14  ;;  %10811 = vrot.lane.b32.xlu0 %v19513_v3, %s17811_s14  ;;  %21645 = vst [vmem:[#allocation23_spill] sm:$0xff] %v19620_v44 }
 0x3e7   : > { %15729 = vmatprep.subr.bf16.mxu0 %v21633_v59  ;;  %21646 = vst [vmem:[#allocation24_spill] sm:$0xff] %v19624_v20  ;;  %v19652_v10 = vpop.permute.xlu0 %5243 }
 0x3e8   : > { %15774 = vmatmul.mubr.msk.bf16.vlgmr.msra.gmra.mrb[24].mxu1 %vm4811_vm8, %v5376_v54  ;;  %v19633_v54 = vpop.permute.xlu1 %5776 }
 0x3e9   : > { %15778 = vmatpush3.bf16.msra.mxu1 %v5502_v38  ;;  %15779 = vmatprep.mubr.msk.bf16.mxu1 %vm17809_vm0, %v21633_v59  ;;  %v19646_v38 = vpack.c.b16 %v19257_v45, %v19257_v45 }
 0x3ea   : > { %11511 = vrot.lane.b32.xlu1 %v19538_v60, %s17812_s8  ;;  %10937 = vrot.lane.b32.xlu0 %v19542_v43, %s17812_s8 }
 0x3eb   : > { %15783 = vmatprep.subr.bf16.mxu1 %v21633_v59  ;;  %21647 = vst [vmem:[#allocation25_spill] sm:$0xff] %v19646_v38  ;;  %v19674_v61 = vpop.permute.xlu0 %5973 }
 0x3ec   : > { %v19663_v45 = vpop.permute.xlu1 %5826 }
 0x3ee   : > { %11561 = vrot.lane.b32.xlu1 %v19538_v60, %s17811_s14  ;;  %10987 = vrot.lane.b32.xlu0 %v19542_v43, %s17811_s14 }
 0x3f0   : > { %15726 = vmatmul.mubr.msk.bf16.vlgmr.msra.gmra.mrb[24].mxu0 %vm4811_vm8, %v14147_v42  ;;  %v19650_v42 = vpack.c.b16 %v19267_v30, %v19267_v30  ;;  %v17813_v30 = vmov 0   ;;  %v19685_v16 = vpop.permute.xlu1 %6546 }
 0x3f1   : > { %15730 = vmatpush3.bf16.msra.mxu0 %v4969_v52  ;;  %15731 = vmatprep.mubr.msk.bf16.mxu0 %vm17809_vm0, %v21633_v59  ;;  %v14180_v52 = vld [vmem:[%s21522_s3 + $0x10] sm:$0xf] }
 0x3f2   : > { %12284 = vrot.lane.b32.xlu1 %v19563_v49, %s17812_s8  ;;  %11709 = vrot.lane.b32.xlu0 %v19567_v36, %s17812_s8  ;;  %21648 = vst [vmem:[#allocation26_spill] sm:$0xff] %v19650_v42 }
 0x3f3   : > { %15735 = vmatprep.subr.bf16.mxu0 %v21633_v59  ;;  %17575 = vset.pattern.permute.xlu0 %v17813_v30 }
 0x3f4   : > { %15780 = vmatmul.mubr.msk.bf16.vlgmr.msra.gmra.mrb[24].mxu1 %vm4811_vm8, %v14172_v26  ;;  %v5677_v26 = vsel %vm4815_vm7, %v5672_v24, 0  ;;  %17576 = vset.pattern.permute.xlu1 %v17813_v30  ;;  %v19708_v8 = vpop.permute.xlu1 %6641  ;;  %v19720_v24 = vpack.c.b16 %v19301_v57, %v19301_v57  ;;  %v4774_v57 = vld [vmem:[%s21523_s4] sm:$0xff]  ;;  %v14184_v30 = vld [vmem:[%s21522_s3 + $0x18] sm:$0xf] }
 0x3f5   : > { %15784 = vmatpush3.bf16.msra.mxu1 %v5577_v46  ;;  %15785 = vmatprep.mubr.msk.bf16.mxu1 %vm17809_vm0, %v21633_v59  ;;  %v19679_v46 = vpack.c.b16 %v19271_v51, %v19271_v51  ;;  %v5147_v51 = vsel %vm4815_vm7, %v19091_v32, 0  ;;  %v5732_v32 = vsel %vm4815_vm7, %v19089_v17, 0 }
 0x3f6   : > { %12379 = vrot.lane.b32.xlu1 %v19563_v49, %s17811_s14  ;;  %11804 = vrot.lane.b32.xlu0 %v19567_v36, %s17811_s14  ;;  %21652 = vst [vmem:[#allocation14_spill] sm:$0xff] %v19720_v24 }
 0x3f7   : > { %15789 = vmatprep.subr.bf16.mxu1 %v21633_v59  ;;  %21649 = vst [vmem:[#allocation27_spill] sm:$0xff] %v19679_v46 }
 0x3f8   : > { %v19731_v17 = vpop.permute.xlu1 %6767 }
 0x3fa   : > { %12505 = vrot.lane.b32.xlu1 %v19591_v53, %s17812_s8  ;;  %11910 = vrot.lane.b32.xlu0 %v19595_v55, %s17812_s8 }
 0x3fc   : > { %15732 = vmatmul.mubr.msk.bf16.vlgmr.msra.gmra.mrb[24].mxu0 %vm4811_vm8, %v14149_v15  ;;  %v14153_v15 = vld [vmem:[%s21522_s3 + $0x14] sm:$0xf] }
 0x3fd   : > { %15736 = vmatpush3.bf16.msra.mxu0 %v5020_v29  ;;  %15737 = vmatprep.mubr.msk.bf16.mxu0 %vm17809_vm0, %v21633_v59  ;;  %v19697_v29 = vpop.permute.xlu0 %6068 }
 0x3fe   : > { %12555 = vrot.lane.b32.xlu1 %v19591_v53, %s17811_s14  ;;  %11960 = vrot.lane.b32.xlu0 %v19595_v55, %s17811_s14 }
 0x3ff   : > { %15741 = vmatprep.subr.bf16.mxu0 %v21633_v59 }
 0x400   : > { %15786 = vmatmul.mubr.msk.bf16.vlgmr.msra.gmra.mrb[24].mxu1 %vm4811_vm8, %v14174_v28  ;;  %v19716_v28 = vpack.c.b16 %v19283_v9, %v19283_v9  ;;  %v14155_v9 = vld [vmem:[%s21522_s3 + $0x18] sm:$0xf] }
 0x401   : > { %15790 = vmatpush3.bf16.msra.mxu1 %v5627_v34  ;;  %15791 = vmatprep.mubr.msk.bf16.mxu1 %vm17809_vm0, %v21633_v59  ;;  %v19728_v34 = vpop.permute.xlu0 %6173 }
 0x402   : > { %12661 = vrot.lane.b32.xlu1 %v19620_v44, %s17812_s8  ;;  %12086 = vrot.lane.b32.xlu0 %v19624_v20, %s17812_s8  ;;  %21651 = vst [vmem:[#allocation13_spill] sm:$0xff] %v19716_v28 }
 0x403   : > { %15795 = vmatprep.subr.bf16.mxu1 %v21633_v59 }
 0x406   : > { %12711 = vrot.lane.b32.xlu1 %v19620_v44, %s17811_s14  ;;  %12136 = vrot.lane.b32.xlu0 %v19624_v20, %s17811_s14 }
 0x408   : > { %15738 = vmatmul.mubr.msk.bf16.vlgmr.msra.gmra.mrb[24].mxu0 %vm4811_vm8, %v14151_v23  ;;  %v5198_v23 = vsel %vm4815_vm7, %v5193_v37, 0  ;;  %v19756_v37 = vpop.permute.xlu1 %6817 }
 0x409   : > { %15742 = vmatpush3.bf16.msra.mxu0 %v5071_v19  ;;  %15743 = vmatprep.mubr.msk.bf16.mxu0 %vm17809_vm0, %v21633_v59  ;;  %v4775_v19 = vld [vmem:[%s21524_s5] sm:$0xff]  ;;  %v6823_v44 = vsel %vm4815_vm7, %v19756_v37, 0  ;;  %v6305_v37 = vsel %vm4815_vm7, %v19287_v39, 0 }
 0x40a   : > { %13433 = vrot.lane.b32.xlu1 %v19646_v38, %s17812_s8  ;;  %12859 = vrot.lane.b32.xlu0 %v19650_v42, %s17812_s8 }
 0x40b   : > { %15747 = vmatprep.subr.bf16.mxu0 %v21633_v59 }
 0x40c   : > { %15792 = vmatmul.mubr.msk.bf16.vlgmr.msra.gmra.mrb[24].mxu1 %vm4811_vm8, %v14180_v52  ;;  %v19748_v52 = vpop.permute.xlu0 %6223 }
 0x40d   : > { %15796 = vmatpush3.bf16.msra.mxu1 %v5677_v26  ;;  %15797 = vmatprep.mubr.msk.bf16.mxu1 %vm17809_vm0, %v21633_v59  ;;  %v5782_v26 = vsel %vm4815_vm7, %v19633_v54, 0 }
 0x40e   : > { %13528 = vrot.lane.b32.xlu1 %v19646_v38, %s17811_s14  ;;  %12954 = vrot.lane.b32.xlu0 %v19650_v42, %s17811_s14  ;;  %v6773_v38 = vsel %vm4815_vm7, %v19731_v17, 0  ;;  %v6229_v17 = vsel %vm4815_vm7, %v19748_v52, 0 }
 0x40f   : > { %15801 = vmatprep.subr.bf16.mxu1 %v21633_v59 }
 0x412   : > { %13060 = vrot.lane.b32.xlu0 %v19679_v46, %s17812_s8  ;;  %13653 = vrot.lane.b32.xlu1 %v19683_v5, %s17812_s8 }
 0x414   : > { %15744 = vmatmul.mubr.msk.bf16.vlgmr.msra.gmra.mrb[24].mxu0 %vm4811_vm8, %v14153_v15  ;;  %v19764_v15 = vpop.permute.xlu0 %6349 }
 0x415   : > { %15748 = vmatpush3.bf16.msra.mxu0 %v5147_v51  ;;  %15749 = vmatprep.mubr.msk.bf16.mxu0 %vm17809_vm0, %v21633_v59  ;;  %v19766_v51 = vpop.permute.xlu1 %6923 }
 0x416   : > { %13110 = vrot.lane.b32.xlu0 %v19679_v46, %s17811_s14  ;;  %13703 = vrot.lane.b32.xlu1 %v19683_v5, %s17811_s14  ;;  %v6929_v49 = vsel %vm4815_vm7, %v19766_v51, 0 }
 0x417   : > { %15753 = vmatprep.subr.bf16.mxu0 %v21633_v59 }
 0x418   : > { %15798 = vmatmul.mubr.msk.bf16.vlgmr.msra.gmra.mrb[24].mxu1 %vm4811_vm8, %v14182_v27  ;;  %v14161_v27 = vld [vmem:[%s21522_s3 + $0x1c] sm:$0xf]  ;;  %v19774_v54 = vpop.permute.xlu0 %6399 }
 0x419   : > { %15802 = vmatpush3.bf16.msra.mxu1 %v5732_v32  ;;  %15803 = vmatprep.mubr.msk.bf16.mxu1 %vm17809_vm0, %v21633_v59  ;;  %v5249_v32 = vsel %vm4815_vm7, %v19652_v10, 0  ;;  %v6405_v51 = vsel %vm4815_vm7, %v19774_v54, 0 }
 0x41a   : > { %13808 = vrot.lane.b32.xlu1 %v19716_v28, %s17812_s8  ;;  %13235 = vrot.lane.b32.xlu0 %v19720_v24, %s17812_s8 }
 0x41b   : > { %15807 = vmatprep.subr.bf16.mxu1 %v21633_v59 }
 0x41c   : > { %v19790_v10 = vpop.permute.xlu0 %7121 }
 0x41e   : > { %13858 = vrot.lane.b32.xlu1 %v19716_v28, %s17811_s14  ;;  %13285 = vrot.lane.b32.xlu0 %v19720_v24, %s17811_s14  ;;  %v6647_v28 = vsel %vm4815_vm7, %v19708_v8, 0  ;;  %v6129_v8 = vsel %vm4815_vm7, %v19213_v58, 0 }
 0x420   : > { %15750 = vmatmul.mubr.msk.bf16.vlgmr.msra.gmra.mrb[24].mxu0 %vm4811_vm8, %v14155_v9  ;;  %v14186_v9 = vld [vmem:[%s21522_s3 + $0x1c] sm:$0xf] }
 0x421   : > { %15754 = vmatpush3.bf16.msra.mxu0 %v5198_v23  ;;  %15755 = vmatprep.mubr.msk.bf16.mxu0 %vm17809_vm0, %v21633_v59  ;;  %v5832_v23 = vsel %vm4815_vm7, %v19663_v45, 0  ;;  %v19800_v45 = vpop.permute.xlu0 %7216 }
 0x422   : > { %15759 = vmatprep.subr.bf16.mxu0 %v21633_v59  ;;  %5294 = vperm.xlu0 %17575, %v4774_v57   ;;  %v19782_v57 = vpop.permute.xlu1 %6973 }
 0x423   : > { %5300 = vperm.xlu1 %17576, %v4775_v19   ;;  %v6979_v60 = vsel %vm4815_vm7, %v19782_v57, 0  ;;  %v7127_v57 = vsel %vm4815_vm7, %v19790_v10, 0 }
 0x424   : > { %15804 = vmatmul.mubr.msk.bf16.vlgmr.msra.gmra.mrb[24].mxu1 %vm4811_vm8, %v14184_v30  ;;  %v14163_v30 = vld [vmem:[%s21522_s3 + $0x20] sm:$0xf] }
 0x425   : > { %15808 = vmatpush3.bf16.msra.mxu1 %v5782_v26  ;;  %15809 = vmatprep.mubr.msk.bf16.mxu1 %vm17809_vm0, %v21633_v59  ;;  %v5979_v26 = vsel %vm4815_vm7, %v19674_v61, 0  ;;  %v14190_v61 = vld [vmem:[%s21522_s3 + $0x4] sm:$0xf] }
 0x426   : > { %15813 = vmatprep.subr.bf16.mxu1 %v21633_v59  ;;  %v19792_v19 = vpop.permute.xlu1 %7696 }
 0x427   : > { %v7702_v56 = vsel %vm4815_vm7, %v19792_v19, 0  ;;  %v7173_v19 = vsel %vm4815_vm7, %v19319_v1, 0 }
 0x42c   : > { %15756 = vmatmul.mubr.msk.bf16.vlgmr.msra.gmra.mrb[24].mxu0 %vm4811_vm8, %v14161_v27  ;;  %v14188_v27 = vld [vmem:[%s21522_s3 + $0x20] sm:$0xf] }
 0x42d   : > { %15760 = vmatpush3.bf16.msra.mxu0 %v5249_v32  ;;  %15761 = vmatprep.mubr.msk.bf16.mxu0 %vm17809_vm0, %v21633_v59  ;;  %v19808_v32 = vpop.permute.xlu1 %7791 }
 0x42e   : > { %15819 = vmatprep.subr.bf16.mxu0 %v21633_v59 }
 0x430   : > { %15810 = vmatmul.mubr.msk.bf16.vlgmr.msra.gmra.mrb[24].mxu1 %vm4811_vm8, %v14186_v9  ;;  %v6552_v9 = vsel %vm4815_vm7, %v19685_v16, 0 }
 0x431   : > { %15814 = vmatpush3.bf16.msra.mxu1 %v5832_v23  ;;  %15815 = vmatprep.mubr.msk.bf16.mxu1 %vm17809_vm0, %v21633_v59  ;;  %v19819_v23 = vpop.permute.xlu0 %7322  ;;  %v19824_v16 = vpop.permute.xlu1 %7917 }
 0x432   : > { %15873 = vmatprep.subr.bf16.mxu1 %v21633_v59 }
 0x438   : > { %15762 = vmatmul.mubr.msk.bf16.vlgmr.msra.gmra.mrb[24].mxu0 %vm4811_vm8, %v14163_v30  ;;  %v6025_v30 = vsel %vm4815_vm7, %v19160_v40, 0  ;;  %v19840_v40 = vpop.permute.xlu1 %7967 }
 0x439   : > { %15820 = vmatpush3.bf16.msra.mxu0 %v5979_v26  ;;  %15821 = vmatprep.mubr.msk.bf16.mxu0 %vm17809_vm0, %v21633_v59  ;;  %v14215_v26 = vld [vmem:[%s21522_s3 + $0x4] sm:$0xf] }
 0x43a   : > { %15825 = vmatprep.subr.bf16.mxu0 %v21633_v59 }
 0x43c   : > { %15816 = vmatmul.mubr.msk.bf16.vlgmr.msra.gmra.mrb[24].mxu1 %vm4811_vm8, %v14188_v27  ;;  %v6598_v27 = vsel %vm4815_vm7, %v19158_v12, 0  ;;  %v19850_v12 = vpop.permute.xlu1 %8073 }
 0x43d   : > { %15874 = vmatpush3.bf16.msra.mxu1 %v6552_v9  ;;  %15875 = vmatprep.mubr.msk.bf16.mxu1 %vm17809_vm0, %v21633_v59  ;;  %v19835_v9 = vpop.permute.xlu0 %7372 }
 0x43e   : > { %15879 = vmatprep.subr.bf16.mxu1 %v21633_v59 }
 0x440   : > { %15822 = vmatmul.mubr.msk.bf16.vlgmr.msra.gmra.mrb[28].mxu0 %vm4811_vm8, %v14190_v61  ;;  %v5948_v61 = vld [vmem:[%s21522_s3] sm:$0xf] }
 0x441   : > { %15826 = vmatpush3.bf16.msra.mxu0 %v6025_v30  ;;  %15827 = vmatprep.mubr.msk.bf16.mxu0 %vm17809_vm0, %v21633_v59  ;;  %v19845_v30 = vpop.permute.xlu0 %7498 }
 0x442   : > { %15831 = vmatprep.subr.bf16.mxu0 %v21633_v59 }
 0x444   : > { %15876 = vmatmul.mubr.msk.bf16.vlgmr.msra.gmra.mrb[28].mxu1 %vm4811_vm8, %v14215_v26  ;;  %v6074_v26 = vsel %vm4815_vm7, %v19697_v29, 0 }
 0x445   : > { %15880 = vmatpush3.bf16.msra.mxu1 %v6598_v27  ;;  %15881 = vmatprep.mubr.msk.bf16.mxu1 %vm17809_vm0, %v21633_v59  ;;  %v6521_v27 = vld [vmem:[%s21522_s3] sm:$0xf]  ;;  %v19861_v29 = vpop.permute.xlu0 %7548 }
 0x446   : > { %15885 = vmatprep.subr.bf16.mxu1 %v21633_v59 }
 0x449   : > { %v19871_v24 = vpop.permute.xlu0 %8271 }
 0x44c   : > { %15828 = vmatmul.mubr.msk.bf16.vlgmr.msra.gmra.mrb[28].mxu0 %vm4811_vm8, %v5948_v61  ;;  %v19866_v61 = vpop.permute.xlu1 %8123 }
 0x44d   : > { %15832 = vmatpush3.bf16.msra.mxu0 %v6074_v26  ;;  %15833 = vmatprep.mubr.msk.bf16.mxu0 %vm17809_vm0, %v21633_v59  ;;  %v14197_v26 = vld [vmem:[%s21522_s3 + $0x8] sm:$0xf]  ;;  %v19887_v5 = vpop.permute.xlu0 %8366 }
 0x44e   : > { %15837 = vmatprep.subr.bf16.mxu0 %v21633_v59 }
 0x450   : > { %15882 = vmatmul.mubr.msk.bf16.vlgmr.msra.gmra.mrb[28].mxu1 %vm4811_vm8, %v6521_v27  ;;  %v19876_v27 = vpop.permute.xlu1 %8845 }
 0x451   : > { %15886 = vmatpush3.bf16.msra.mxu1 %v6647_v28  ;;  %15887 = vmatprep.mubr.msk.bf16.mxu1 %vm17809_vm0, %v21633_v59  ;;  %v14222_v28 = vld [vmem:[%s21522_s3 + $0x8] sm:$0xf]  ;;  %v19897_v46 = vpop.permute.xlu0 %8472 }
 0x452   : > { %15891 = vmatprep.subr.bf16.mxu1 %v21633_v59 }
 0x454   : > { %v19892_v58 = vpop.permute.xlu1 %8940 }
 0x458   : > { %15834 = vmatmul.mubr.msk.bf16.vlgmr.msra.gmra.mrb[28].mxu0 %vm4811_vm8, %v14197_v26  ;;  %v6723_v26 = vsel %vm4815_vm7, %v19219_v41, 0  ;;  %v19902_v41 = vpop.permute.xlu1 %9065 }
 0x459   : > { %15838 = vmatpush3.bf16.msra.mxu0 %v6129_v8  ;;  %15839 = vmatprep.mubr.msk.bf16.mxu0 %vm17809_vm0, %v21633_v59  ;;  %v14199_v8 = vld [vmem:[%s21522_s3 + $0xc] sm:$0xf] }
 0x45a   : > { %15843 = vmatprep.subr.bf16.mxu0 %v21633_v59 }
 0x45c   : > { %15888 = vmatmul.mubr.msk.bf16.vlgmr.msra.gmra.mrb[28].mxu1 %vm4811_vm8, %v14222_v28  ;;  %v6179_v28 = vsel %vm4815_vm7, %v19728_v34, 0  ;;  %v19913_v34 = vpop.permute.xlu0 %8522 }
 0x45d   : > { %15892 = vmatpush3.bf16.msra.mxu1 %v6723_v26  ;;  %15893 = vmatprep.mubr.msk.bf16.mxu1 %vm17809_vm0, %v21633_v59  ;;  %v14224_v26 = vld [vmem:[%s21522_s3 + $0xc] sm:$0xf] }
 0x45e   : > { %15897 = vmatprep.subr.bf16.mxu1 %v21633_v59 }
 0x460   : > { %v19923_v42 = vpop.permute.xlu0 %8647 }
 0x464   : > { %15840 = vmatmul.mubr.msk.bf16.vlgmr.msra.gmra.mrb[28].mxu0 %vm4811_vm8, %v14199_v8  ;;  %v19918_v8 = vpop.permute.xlu1 %9115  ;;  %v19939_v52 = vpop.permute.xlu0 %8697 }
 0x465   : > { %15844 = vmatpush3.bf16.msra.mxu0 %v6179_v28  ;;  %15845 = vmatprep.mubr.msk.bf16.mxu0 %vm17809_vm0, %v21633_v59  ;;  %v14201_v28 = vld [vmem:[%s21522_s3 + $0x10] sm:$0xf] }
 0x466   : > { %15849 = vmatprep.subr.bf16.mxu0 %v21633_v59 }
 0x468   : > { %15894 = vmatmul.mubr.msk.bf16.vlgmr.msra.gmra.mrb[28].mxu1 %vm4811_vm8, %v14224_v26  ;;  %v19928_v26 = vpop.permute.xlu1 %9220  ;;  %v19949_v20 = vpop.permute.xlu0 %9417 }
 0x469   : > { %15898 = vmatpush3.bf16.msra.mxu1 %v6773_v38  ;;  %15899 = vmatprep.mubr.msk.bf16.mxu1 %vm17809_vm0, %v21633_v59  ;;  %v14230_v38 = vld [vmem:[%s21522_s3 + $0x10] sm:$0xf] }
 0x46a   : > { %15903 = vmatprep.subr.bf16.mxu1 %v21633_v59 }
 0x46c   : > { %v19965_v53 = vpop.permute.xlu0 %9512 }
 0x470   : > { %15846 = vmatmul.mubr.msk.bf16.vlgmr.msra.gmra.mrb[28].mxu0 %vm4811_vm8, %v14201_v28  ;;  %v19944_v28 = vpop.permute.xlu1 %9270  ;;  %v19975_v55 = vpop.permute.xlu0 %9617 }
 0x471   : > { %15850 = vmatpush3.bf16.msra.mxu0 %v6229_v17  ;;  %15851 = vmatprep.mubr.msk.bf16.mxu0 %vm17809_vm0, %v21633_v59  ;;  %v14203_v17 = vld [vmem:[%s21522_s3 + $0x14] sm:$0xf] }
 0x472   : > { %15855 = vmatprep.subr.bf16.mxu0 %v21633_v59 }
 0x474   : > { %15900 = vmatmul.mubr.msk.bf16.vlgmr.msra.gmra.mrb[28].mxu1 %vm4811_vm8, %v14230_v38  ;;  %v19954_v38 = vpop.permute.xlu1 %9989 }
 0x475   : > { %15904 = vmatpush3.bf16.msra.mxu1 %v6823_v44  ;;  %15905 = vmatprep.mubr.msk.bf16.mxu1 %vm17809_vm0, %v21633_v59  ;;  %v14232_v44 = vld [vmem:[%s21522_s3 + $0x14] sm:$0xf] }
 0x476   : > { %15909 = vmatprep.subr.bf16.mxu1 %v21633_v59 }
 0x478   : > { %v19970_v39 = vpop.permute.xlu1 %10084 }
 0x47c   : > { %15852 = vmatmul.mubr.msk.bf16.vlgmr.msra.gmra.mrb[28].mxu0 %vm4811_vm8, %v14203_v17  ;;  %v6879_v17 = vsel %vm4815_vm7, %v19285_v47, 0  ;;  %v19980_v47 = vpop.permute.xlu1 %10209 }
 0x47d   : > { %15856 = vmatpush3.bf16.msra.mxu0 %v6305_v37  ;;  %15857 = vmatprep.mubr.msk.bf16.mxu0 %vm17809_vm0, %v21633_v59  ;;  %v14205_v37 = vld [vmem:[%s21522_s3 + $0x18] sm:$0xf] }
 0x47e   : > { %15861 = vmatprep.subr.bf16.mxu0 %v21633_v59 }
 0x480   : > { %15906 = vmatmul.mubr.msk.bf16.vlgmr.msra.gmra.mrb[28].mxu1 %vm4811_vm8, %v14232_v44  ;;  %v6355_v44 = vsel %vm4815_vm7, %v19764_v15, 0  ;;  %v19991_v15 = vpop.permute.xlu0 %9667 }
 0x481   : > { %15910 = vmatpush3.bf16.msra.mxu1 %v6879_v17  ;;  %15911 = vmatprep.mubr.msk.bf16.mxu1 %vm17809_vm0, %v21633_v59  ;;  %v14234_v17 = vld [vmem:[%s21522_s3 + $0x18] sm:$0xf] }
 0x482   : > { %15915 = vmatprep.subr.bf16.mxu1 %v21633_v59 }
 0x484   : > { %v20001_v36 = vpop.permute.xlu0 %9792 }
 0x488   : > { %15858 = vmatmul.mubr.msk.bf16.vlgmr.msra.gmra.mrb[28].mxu0 %vm4811_vm8, %v14205_v37  ;;  %v19996_v37 = vpop.permute.xlu1 %10259  ;;  %v20017_v54 = vpop.permute.xlu0 %9842 }
 0x489   : > { %15862 = vmatpush3.bf16.msra.mxu0 %v6355_v44  ;;  %15863 = vmatprep.mubr.msk.bf16.mxu0 %vm17809_vm0, %v21633_v59  ;;  %v14211_v44 = vld [vmem:[%s21522_s3 + $0x1c] sm:$0xf] }
 0x48a   : > { %15867 = vmatprep.subr.bf16.mxu0 %v21633_v59 }
 0x48c   : > { %15912 = vmatmul.mubr.msk.bf16.vlgmr.msra.gmra.mrb[28].mxu1 %vm4811_vm8, %v14234_v17  ;;  %v20006_v17 = vpop.permute.xlu1 %10364  ;;  %v20027_v43 = vpop.permute.xlu0 %10561 }
 0x48d   : > { %15916 = vmatpush3.bf16.msra.mxu1 %v6929_v49  ;;  %15917 = vmatprep.mubr.msk.bf16.mxu1 %vm17809_vm0, %v21633_v59  ;;  %v14236_v49 = vld [vmem:[%s21522_s3 + $0x1c] sm:$0xf] }
 0x48e   : > { %15921 = vmatprep.subr.bf16.mxu1 %v21633_v59 }
 0x490   : > { %v20044_v10 = vpop.permute.xlu0 %10656 }
 0x494   : > { %15864 = vmatmul.mubr.msk.bf16.vlgmr.msra.gmra.mrb[28].mxu0 %vm4811_vm8, %v14211_v44  ;;  %v20022_v44 = vpop.permute.xlu1 %10414 }
 0x495   : > { %15868 = vmatpush3.bf16.msra.mxu0 %v6405_v51  ;;  %15869 = vmatprep.mubr.msk.bf16.mxu0 %vm17809_vm0, %v21633_v59  ;;  %v14213_v51 = vld [vmem:[%s21522_s3 + $0x20] sm:$0xf] }
 0x496   : > { %15927 = vmatprep.subr.bf16.mxu0 %v21633_v59 }
 0x498   : > { %15918 = vmatmul.mubr.msk.bf16.vlgmr.msra.gmra.mrb[28].mxu1 %vm4811_vm8, %v14236_v49  ;;  %v14238_v49 = vld [vmem:[%s21522_s3 + $0x20] sm:$0xf] }
 0x499   : > { %15922 = vmatpush3.bf16.msra.mxu1 %v6979_v60  ;;  %15923 = vmatprep.mubr.msk.bf16.mxu1 %vm17809_vm0, %v21633_v59  ;;  %v20033_v60 = vpop.permute.xlu1 %11134 }
 0x49a   : > { %15981 = vmatprep.subr.bf16.mxu1 %v21633_v59 }
 0x4a0   : > { %15870 = vmatmul.mubr.msk.bf16.vlgmr.msra.gmra.mrb[28].mxu0 %vm4811_vm8, %v14213_v51  ;;  %v14240_v51 = vld [vmem:[%s21522_s3 + $0x4] sm:$0xf] }
 0x4a1   : > { %15928 = vmatpush3.bf16.msra.mxu0 %v7127_v57  ;;  %15929 = vmatprep.mubr.msk.bf16.mxu0 %vm17809_vm0, %v21633_v59  ;;  %v20052_v57 = vpop.permute.xlu1 %11229 }
 0x4a2   : > { %15933 = vmatprep.subr.bf16.mxu0 %v21633_v59 }
 0x4a4   : > { %15924 = vmatmul.mubr.msk.bf16.vlgmr.msra.gmra.mrb[28].mxu1 %vm4811_vm8, %v14238_v49  ;;  %v20063_v49 = vpop.permute.xlu0 %10761 }
 0x4a5   : > { %15982 = vmatpush3.bf16.msra.mxu1 %v7702_v56  ;;  %15983 = vmatprep.mubr.msk.bf16.mxu1 %vm17809_vm0, %v21633_v59  ;;  %v14265_v56 = vld [vmem:[%s21522_s3 + $0x4] sm:$0xf]  ;;  %21653 = vst [vmem:[#allocation12_spill] sm:$0xff] %v20063_v49  ;;  %v20068_v3 = vpop.permute.xlu1 %11355 }
 0x4a6   : > { %15987 = vmatprep.subr.bf16.mxu1 %v21633_v59 }
 0x4a8   : > { %15930 = vmatmul.mubr.msk.bf16.vlgmr.msra.gmra.mrb[32].mxu0 %vm4811_vm8, %v14240_v51  ;;  %v7748_v51 = vsel %vm4815_vm7, %v19317_v25, 0  ;;  %v20073_v1 = vpop.permute.xlu0 %10811  ;;  %v7670_v25 = vld [vmem:[%s21522_s3] sm:$0xf] }
 0x4a9   : > { %15934 = vmatpush3.bf16.msra.mxu0 %v7173_v19  ;;  %15935 = vmatprep.mubr.msk.bf16.mxu0 %vm17809_vm0, %v21633_v59  ;;  %v7095_v19 = vld [vmem:[%s21522_s3] sm:$0xf]  ;;  %v20078_v49 = vpop.permute.xlu1 %11405 }
 0x4aa   : > { %15939 = vmatprep.subr.bf16.mxu0 %v21633_v59  ;;  %21654 = vst [vmem:[#allocation29_spill] sm:$0xff] %v20078_v49  ;;  %v7797_v49 = vsel %vm4815_vm7, %v19808_v32, 0  ;;  %v7278_v32 = vsel %vm4815_vm7, %v19347_v22, 0 }
 0x4ac   : > { %15984 = vmatmul.mubr.msk.bf16.vlgmr.msra.gmra.mrb[32].mxu1 %vm4811_vm8, %v14265_v56  ;;  %v7222_v56 = vsel %vm4815_vm7, %v19800_v45, 0 }
 0x4ad   : > { %15988 = vmatpush3.bf16.msra.mxu1 %v7748_v51  ;;  %15989 = vmatprep.mubr.msk.bf16.mxu1 %vm17809_vm0, %v21633_v59  ;;  %v20089_v51 = vpop.permute.xlu0 %10937  ;;  %v20094_v45 = vpop.permute.xlu1 %11511 }
 0x4ae   : > { %15993 = vmatprep.subr.bf16.mxu1 %v21633_v59  ;;  %21655 = vst [vmem:[#allocation31_spill] sm:$0xff] %v20089_v51 }
 0x4b1   : > { %v20104_v51 = vpop.permute.xlu1 %11561 }
 0x4b2   : > { %21656 = vst [vmem:[#allocation30_spill] sm:$0xff] %v20104_v51 }
 0x4b4   : > { %15936 = vmatmul.mubr.msk.bf16.vlgmr.msra.gmra.mrb[32].mxu0 %vm4811_vm8, %v7095_v19  ;;  %v20099_v19 = vpop.permute.xlu0 %10987 }
 0x4b5   : > { %15940 = vmatpush3.bf16.msra.mxu0 %v7222_v56  ;;  %15941 = vmatprep.mubr.msk.bf16.mxu0 %vm17809_vm0, %v21633_v59  ;;  %v14247_v56 = vld [vmem:[%s21522_s3 + $0x8] sm:$0xf]  ;;  %v20120_v51 = vpop.permute.xlu1 %12284 }
 0x4b6   : > { %15945 = vmatprep.subr.bf16.mxu0 %v21633_v59 }
 0x4b8   : > { %15990 = vmatmul.mubr.msk.bf16.vlgmr.msra.gmra.mrb[32].mxu1 %vm4811_vm8, %v7670_v25  ;;  %v20115_v25 = vpop.permute.xlu0 %11709 }
 0x4b9   : > { %15994 = vmatpush3.bf16.msra.mxu1 %v7797_v49  ;;  %15995 = vmatprep.mubr.msk.bf16.mxu1 %vm17809_vm0, %v21633_v59  ;;  %v14272_v49 = vld [vmem:[%s21522_s3 + $0x8] sm:$0xf]  ;;  %21657 = vst [vmem:[#allocation32_spill] sm:$0xff] %v20115_v25  ;;  %v20130_v25 = vpop.permute.xlu1 %12379 }
 0x4ba   : > { %15999 = vmatprep.subr.bf16.mxu1 %v21633_v59  ;;  %21658 = vst [vmem:[#allocation33_spill] sm:$0xff] %v20130_v25  ;;  %v7923_v25 = vsel %vm4815_vm7, %v19824_v16, 0  ;;  %v7378_v16 = vsel %vm4815_vm7, %v19835_v9, 0 }
 0x4bc   : > { %v20125_v22 = vpop.permute.xlu0 %11804 }
 0x4c0   : > { %15942 = vmatmul.mubr.msk.bf16.vlgmr.msra.gmra.mrb[32].mxu0 %vm4811_vm8, %v14247_v56  ;;  %v7873_v56 = vsel %vm4815_vm7, %v19345_v4, 0  ;;  %v14274_v4 = vld [vmem:[%s21522_s3 + $0xc] sm:$0xf] }
 0x4c1   : > { %15946 = vmatpush3.bf16.msra.mxu0 %v7278_v32  ;;  %15947 = vmatprep.mubr.msk.bf16.mxu0 %vm17809_vm0, %v21633_v59  ;;  %v14249_v32 = vld [vmem:[%s21522_s3 + $0xc] sm:$0xf] }
 0x4c2   : > { %15951 = vmatprep.subr.bf16.mxu0 %v21633_v59 }
 0x4c4   : > { %15996 = vmatmul.mubr.msk.bf16.vlgmr.msra.gmra.mrb[32].mxu1 %vm4811_vm8, %v14272_v49  ;;  %v7328_v49 = vsel %vm4815_vm7, %v19819_v23, 0  ;;  %v20146_v23 = vpop.permute.xlu1 %12505 }
 0x4c5   : > { %16000 = vmatpush3.bf16.msra.mxu1 %v7873_v56  ;;  %16001 = vmatprep.mubr.msk.bf16.mxu1 %vm17809_vm0, %v21633_v59  ;;  %v20141_v56 = vpop.permute.xlu0 %11910 }
 0x4c6   : > { %16005 = vmatprep.subr.bf16.mxu1 %v21633_v59  ;;  %21659 = vst [vmem:[#allocation34_spill] sm:$0xff] %v20141_v56 }
 0x4c8   : > { %v20156_v56 = vpop.permute.xlu1 %12555 }
 0x4c9   : > { %21660 = vst [vmem:[#allocation35_spill] sm:$0xff] %v20156_v56  ;;  %v7973_v56 = vsel %vm4815_vm7, %v19840_v40, 0  ;;  %v7454_v40 = vsel %vm4815_vm7, %v19363_v35, 0 }
 0x4cc   : > { %15948 = vmatmul.mubr.msk.bf16.vlgmr.msra.gmra.mrb[32].mxu0 %vm4811_vm8, %v14249_v32  ;;  %v20151_v32 = vpop.permute.xlu0 %11960  ;;  %v20172_v9 = vpop.permute.xlu1 %12661 }
 0x4cd   : > { %15952 = vmatpush3.bf16.msra.mxu0 %v7328_v49  ;;  %15953 = vmatprep.mubr.msk.bf16.mxu0 %vm17809_vm0, %v21633_v59  ;;  %v14251_v49 = vld [vmem:[%s21522_s3 + $0x10] sm:$0xf]  ;;  %21662 = vst [vmem:[#allocation37_spill] sm:$0xff] %v20172_v9 }
 0x4ce   : > { %15957 = vmatprep.subr.bf16.mxu0 %v21633_v59 }
 0x4d0   : > { %16002 = vmatmul.mubr.msk.bf16.vlgmr.msra.gmra.mrb[32].mxu1 %vm4811_vm8, %v14274_v4  ;;  %v20167_v4 = vpop.permute.xlu0 %12086 }
 0x4d1   : > { %16006 = vmatpush3.bf16.msra.mxu1 %v7923_v25  ;;  %16007 = vmatprep.mubr.msk.bf16.mxu1 %vm17809_vm0, %v21633_v59  ;;  %v14280_v25 = vld [vmem:[%s21522_s3 + $0x10] sm:$0xf]  ;;  %21661 = vst [vmem:[#allocation36_spill] sm:$0xff] %v20167_v4  ;;  %v20182_v4 = vpop.permute.xlu1 %12711 }
 0x4d2   : > { %16011 = vmatprep.subr.bf16.mxu1 %v21633_v59  ;;  %21664 = vst [vmem:[#allocation39_spill] sm:$0xff] %v20182_v4 }
 0x4d5   : > { %v20198_v4 = vpop.permute.xlu1 %13433 }
 0x4d6   : > { %21666 = vst [vmem:[#allocation41_spill] sm:$0xff] %v20198_v4 }
 0x4d8   : > { %15954 = vmatmul.mubr.msk.bf16.vlgmr.msra.gmra.mrb[32].mxu0 %vm4811_vm8, %v14251_v49  ;;  %v20177_v49 = vpop.permute.xlu0 %12136 }
 0x4d9   : > { %15958 = vmatpush3.bf16.msra.mxu0 %v7378_v16  ;;  %15959 = vmatprep.mubr.msk.bf16.mxu0 %vm17809_vm0, %v21633_v59  ;;  %21663 = vst [vmem:[#allocation38_spill] sm:$0xff] %v20177_v49  ;;  %v14253_v16 = vld [vmem:[%s21522_s3 + $0x14] sm:$0xf] }
 0x4da   : > { %15963 = vmatprep.subr.bf16.mxu0 %v21633_v59 }
 0x4dc   : > { %16008 = vmatmul.mubr.msk.bf16.vlgmr.msra.gmra.mrb[32].mxu1 %vm4811_vm8, %v14280_v25  ;;  %v20193_v25 = vpop.permute.xlu0 %12859 }
 0x4dd   : > { %16012 = vmatpush3.bf16.msra.mxu1 %v7973_v56  ;;  %16013 = vmatprep.mubr.msk.bf16.mxu1 %vm17809_vm0, %v21633_v59  ;;  %v14282_v56 = vld [vmem:[%s21522_s3 + $0x14] sm:$0xf]  ;;  %21665 = vst [vmem:[#allocation40_spill] sm:$0xff] %v20193_v25  ;;  %v20208_v25 = vpop.permute.xlu1 %13528 }
 0x4de   : > { %16017 = vmatprep.subr.bf16.mxu1 %v21633_v59  ;;  %21668 = vst [vmem:[#allocation43_spill] sm:$0xff] %v20208_v25  ;;  %v8079_v25 = vsel %vm4815_vm7, %v19850_v12, 0  ;;  %v7554_v12 = vsel %vm4815_vm7, %v19861_v29, 0 }
 0x4e0   : > { %v20203_v35 = vpop.permute.xlu0 %12954 }
 0x4e1   : > { %21667 = vst [vmem:[#allocation42_spill] sm:$0xff] %v20203_v35 }
 0x4e4   : > { %15960 = vmatmul.mubr.msk.bf16.vlgmr.msra.gmra.mrb[32].mxu0 %vm4811_vm8, %v14253_v16  ;;  %v8029_v16 = vsel %vm4815_vm7, %v19359_v6, 0  ;;  %v14284_v6 = vld [vmem:[%s21522_s3 + $0x18] sm:$0xf] }
 0x4e5   : > { %15964 = vmatpush3.bf16.msra.mxu0 %v7454_v40  ;;  %15965 = vmatprep.mubr.msk.bf16.mxu0 %vm17809_vm0, %v21633_v59  ;;  %v14255_v40 = vld [vmem:[%s21522_s3 + $0x18] sm:$0xf] }
 0x4e6   : > { %15969 = vmatprep.subr.bf16.mxu0 %v21633_v59 }
 0x4e8   : > { %16014 = vmatmul.mubr.msk.bf16.vlgmr.msra.gmra.mrb[32].mxu1 %vm4811_vm8, %v14282_v56  ;;  %v7504_v56 = vsel %vm4815_vm7, %v19845_v30, 0  ;;  %v20224_v30 = vpop.permute.xlu1 %13653 }
 0x4e9   : > { %16018 = vmatpush3.bf16.msra.mxu1 %v8029_v16  ;;  %16019 = vmatprep.mubr.msk.bf16.mxu1 %vm17809_vm0, %v21633_v59  ;;  %v20219_v16 = vpop.permute.xlu0 %13060  ;;  %21670 = vst [vmem:[#allocation45_spill] sm:$0xff] %v20224_v30  ;;  %v5310_v30 = vlaneseq }
 0x4ea   : > { %16023 = vmatprep.subr.bf16.mxu1 %v21633_v59  ;;  %21669 = vst [vmem:[#allocation44_spill] sm:$0xff] %v20219_v16 }
 0x4ec   : > { %v20234_v16 = vpop.permute.xlu1 %13703 }
 0x4ed   : > { %21672 = vst [vmem:[#allocation47_spill] sm:$0xff] %v20234_v16  ;;  %v8129_v16 = vsel %vm4815_vm7, %v19866_v61, 0 }
 0x4f0   : > { %15966 = vmatmul.mubr.msk.bf16.vlgmr.msra.gmra.mrb[32].mxu0 %vm4811_vm8, %v14255_v40  ;;  %v20229_v40 = vpop.permute.xlu0 %13110  ;;  %v20250_v29 = vpop.permute.xlu1 %13808 }
 0x4f1   : > { %15970 = vmatpush3.bf16.msra.mxu0 %v7504_v56  ;;  %15971 = vmatprep.mubr.msk.bf16.mxu0 %vm17809_vm0, %v21633_v59  ;;  %21671 = vst [vmem:[#allocation46_spill] sm:$0xff] %v20229_v40  ;;  %v14261_v56 = vld [vmem:[%s21522_s3 + $0x1c] sm:$0xf]  ;;  %21674 = vst [vmem:[#allocation49_spill] sm:$0xff] %v20250_v29 }
 0x4f2   : > { %15975 = vmatprep.subr.bf16.mxu0 %v21633_v59 }
 0x4f4   : > { %16020 = vmatmul.mubr.msk.bf16.vlgmr.msra.gmra.mrb[32].mxu1 %vm4811_vm8, %v14284_v6  ;;  %v20245_v6 = vpop.permute.xlu0 %13235  ;;  %v20260_v61 = vpop.permute.xlu1 %13858 }
 0x4f5   : > { %16024 = vmatpush3.bf16.msra.mxu1 %v8079_v25  ;;  %16025 = vmatprep.mubr.msk.bf16.mxu1 %vm17809_vm0, %v21633_v59  ;;  %v14286_v25 = vld [vmem:[%s21522_s3 + $0x1c] sm:$0xf]  ;;  %21673 = vst [vmem:[#allocation48_spill] sm:$0xff] %v20245_v6  ;;  %v17814_v6 = vmov 1966171168   ;;  %21676 = vst [vmem:[#allocation51_spill] sm:$0xff] %v20260_v61 }
 0x4f6   : > { %16029 = vmatprep.subr.bf16.mxu1 %v21633_v59  ;;  %v5308_v40 = vunpack.c.l.s4 %v17814_v6  ;;  %v5311_v6 = vshrl.u32 %v5310_v30, 7  ;;  %v14290_v30 = vld [vmem:[%s21522_s3 + $0x4] sm:$0xf] }
 0x4f8   : > { %v5309_v29 = vunpack.c.0.s8 %v5308_v40  ;;  %v20273_v35 = vpop.permute.xlu1 %5300 }
 0x4fa   : > { %v20284_v40 = vsub.s32 %v5309_v29, %v5311_v6 }
 0x4fc   : > { %15972 = vmatmul.mubr.msk.bf16.vlgmr.msra.gmra.mrb[32].mxu0 %vm4811_vm8, %v14261_v56  ;;  %v20255_v56 = vpop.permute.xlu0 %13285 }
 0x4fd   : > { %15976 = vmatpush3.bf16.msra.mxu0 %v7554_v12  ;;  %15977 = vmatprep.mubr.msk.bf16.mxu0 %vm17809_vm0, %v21633_v59  ;;  %21675 = vst [vmem:[#allocation50_spill] sm:$0xff] %v20255_v56  ;;  %v14263_v12 = vld [vmem:[%s21522_s3 + $0x20] sm:$0xf] }
 0x4fe   : > { %16035 = vmatprep.subr.bf16.mxu0 %v21633_v59  ;;  %v14288_v56 = vld [vmem:[%s21522_s3 + $0x20] sm:$0xf] }
 0x500   : > { %16026 = vmatmul.mubr.msk.bf16.vlgmr.msra.gmra.mrb[32].mxu1 %vm4811_vm8, %v14286_v25  ;;  %v8277_v25 = vsel %vm4815_vm7, %v19871_v24, 0  ;;  %v8851_v24 = vsel %vm4815_vm7, %v19876_v27, 0 }
 0x501   : > { %16030 = vmatpush3.bf16.msra.mxu1 %v8129_v16  ;;  %16031 = vmatprep.mubr.msk.bf16.mxu1 %vm17809_vm0, %v21633_v59  ;;  %v20265_v16 = vpop.permute.xlu0 %5294 }
 0x502   : > { %16089 = vmatprep.subr.bf16.mxu1 %v21633_v59 }
 0x508   : > { %15978 = vmatmul.mubr.msk.bf16.vlgmr.msra.gmra.mrb[32].mxu0 %vm4811_vm8, %v14263_v12 }
 0x509   : > { %16036 = vmatpush3.bf16.msra.mxu0 %v8277_v25  ;;  %16037 = vmatprep.mubr.msk.bf16.mxu0 %vm17809_vm0, %v21633_v59 }
 0x50a   : > { %16041 = vmatprep.subr.bf16.mxu0 %v21633_v59 }
 0x50b   : > { %v5285_v61 = vpop.f32.mrb[24].mxu0 }
 0x50c   : > { %v5297_v12 = vmul.f32 %v20265_v16, %v5285_v61  ;;  %v15763_v25 = vpop.f32.mrb[25].mxu0  ;;  %16032 = vmatmul.mubr.msk.bf16.vlgmr.msra.gmra.mrb[32].mxu1 %vm4811_vm8, %v14288_v56 }
 0x50d   : > { %16090 = vmatpush3.bf16.msra.mxu1 %v8851_v24  ;;  %v5288_v4 = vpop.f32.mrb[26].mxu0  ;;  %16091 = vmatprep.mubr.msk.bf16.mxu1 %vm17809_vm0, %v21633_v59  ;;  %v8323_v24 = vsel %vm4815_vm7, %v19379_v7, 0  ;;  %v8897_v7 = vsel %vm4815_vm7, %v19375_v62, 0 }
 0x50e   : > { %v5303_v49 = vadd.f32 %v20273_v35, %v5297_v12  ;;  %v15764_v9 = vpop.f32.mrb[27].mxu0  ;;  %16095 = vmatprep.subr.bf16.mxu1 %v21633_v59 }
 0x50f   : > { %v5868_v27 = vpop.f32.mrb[24].mxu1  ;;  %v14315_v9 = vld [vmem:[%s21522_s3 + $0x4] sm:$0xf] }
 0x510   : > { %v5304_v56 = vmax.f32 %v5303_v49, 0.0  ;;  %v5875_v4 = vmul.f32 %v5868_v27, %v20265_v16  ;;  %v15817_v61 = vpop.f32.mrb[25].mxu1  ;;  %16038 = vmatmul.mubr.msk.bf16.vlgmr.msra.gmra.mrb[36].mxu0 %vm4811_vm8, %v14290_v30 }
 0x511   : > { %16042 = vmatpush3.bf16.msra.mxu0 %v8323_v24  ;;  %v5871_v29 = vpop.f32.mrb[26].mxu1  ;;  %16043 = vmatprep.mubr.msk.bf16.mxu0 %vm17809_vm0, %v21633_v59 }
 0x512   : > { %v5306_v6 = vcombine.high %v5304_v56, %v5304_v56  ;;  %v5313_v49 = vrot.slane %v5304_v56, %v20284_v40  ;;  %v5876_v12 = vadd.f32 %v5875_v4, %v20273_v35  ;;  %v15818_v25 = vpop.f32.mrb[27].mxu1  ;;  %16047 = vmatprep.subr.bf16.mxu0 %v21633_v59 }
 0x514   : > { %v5320_v30 = vrot.slane %v5306_v6, %v20284_v40  ;;  %v5321_v27 = vcombine.high %v5313_v49, %v5313_v49  ;;  %v5329_v61 = vrot.slane %v5313_v49, %v20284_v40  ;;  %v5877_v24 = vmax.f32 %v5876_v12, 0.0  ;;  %16092 = vmatmul.mubr.msk.bf16.vlgmr.msra.gmra.mrb[36].mxu1 %vm4811_vm8, %v14315_v9 }
 0x515   : > { %16096 = vmatpush3.bf16.msra.mxu1 %v8897_v7  ;;  %16097 = vmatprep.mubr.msk.bf16.mxu1 %vm17809_vm0, %v21633_v59 }
 0x516   : > { %v5322_v56 = vcombine.high %v5320_v30, %v5320_v30  ;;  %v5336_v4 = vrot.slane %v5320_v30, %v20284_v40  ;;  %v5343_v29 = vrot.slane %v5321_v27, %v20284_v40  ;;  %v5351_v25 = vcombine.high %v5329_v61, %v5329_v61  ;;  %5364 = vst.msk [vmem:[%s20311_s9] sm:$0x1] %vm5363_vm9, %v5329_v61  ;;  %v8245_v61 = vld [vmem:[%s21522_s3] sm:$0xf] }
 0x517   : > { %16101 = vmatprep.subr.bf16.mxu1 %v21633_v59  ;;  %v5879_v62 = vcombine.high %v5877_v24, %v5877_v24  ;;  %v5886_v9 = vrot.slane %v5877_v24, %v20284_v40 }
 0x518   : > { %v5350_v6 = vrot.slane %v5322_v56, %v20284_v40  ;;  %v5352_v49 = vcombine.high %v5336_v4, %v5336_v4  ;;  %v5353_v12 = vcombine.high %v5343_v29, %v5343_v29  ;;  %5365 = vst.msk [vmem:[%s20311_s9 + $0x10] sm:$0x1] %vm5363_vm9, %v5343_v29  ;;  %5366 = vst.msk [vmem:[%s20311_s9 + $0x20] sm:$0x1] %vm5363_vm9, %v5351_v25 }
 0x519   : > { %5368 = vst.msk [vmem:[%s20311_s9 + $0x40] sm:$0x1] %vm5363_vm9, %v5336_v4  ;;  %v5893_v7 = vrot.slane %v5879_v62, %v20284_v40  ;;  %v5894_v30 = vcombine.high %v5886_v9, %v5886_v9  ;;  %v5902_v27 = vrot.slane %v5886_v9, %v20284_v40  ;;  %v8372_v62 = vsel %vm4815_vm7, %v19887_v5, 0  ;;  %v8819_v5 = vld [vmem:[%s21522_s3] sm:$0xf] }
 0x51a   : > { %v5354_v24 = vcombine.high %v5350_v6, %v5350_v6  ;;  %5367 = vst.msk [vmem:[%s20311_s9 + $0x30] sm:$0x1] %vm5363_vm9, %v5353_v12  ;;  %5369 = vst.msk [vmem:[%s20311_s9 + $0x50] sm:$0x1] %vm5363_vm9, %v5350_v6 }
 0x51b   : > { %5370 = vst.msk [vmem:[%s20311_s9 + $0x60] sm:$0x1] %vm5363_vm9, %v5352_v49  ;;  %v5895_v56 = vcombine.high %v5893_v7, %v5893_v7  ;;  %v5909_v4 = vrot.slane %v5893_v7, %v20284_v40  ;;  %v5916_v29 = vrot.slane %v5894_v30, %v20284_v40  ;;  %v5924_v25 = vcombine.high %v5902_v27, %v5902_v27  ;;  %v14297_v30 = vld [vmem:[%s21522_s3 + $0x8] sm:$0xf] }
 0x51c   : > { %5936 = vst.msk [vmem:[%s20311_s9 + $0x1] sm:$0x1] %vm5363_vm9, %v5902_v27  ;;  %5371 = vst.msk [vmem:[%s20311_s9 + $0x70] sm:$0x1] %vm5363_vm9, %v5354_v24  ;;  %16044 = vmatmul.mubr.msk.bf16.vlgmr.msra.gmra.mrb[36].mxu0 %vm4811_vm8, %v8245_v61  ;;  %v8946_v7 = vsel %vm4815_vm7, %v19892_v58, 0  ;;  %v8428_v27 = vsel %vm4815_vm7, %v19391_v63, 0 }
 0x51d   : > { %v5923_v9 = vrot.slane %v5895_v56, %v20284_v40  ;;  %v5925_v6 = vcombine.high %v5909_v4, %v5909_v4  ;;  %v5926_v49 = vcombine.high %v5916_v29, %v5916_v29  ;;  %5937 = vst.msk [vmem:[%s20311_s9 + $0x11] sm:$0x1] %vm5363_vm9, %v5916_v29  ;;  %5938 = vst.msk [vmem:[%s20311_s9 + $0x21] sm:$0x1] %vm5363_vm9, %v5924_v25  ;;  %16048 = vmatpush3.bf16.msra.mxu0 %v8372_v62  ;;  %v14322_v58 = vld [vmem:[%s21522_s3 + $0x8] sm:$0xf] }
 0x51e   : > { %5940 = vst.msk [vmem:[%s20311_s9 + $0x41] sm:$0x1] %vm5363_vm9, %v5909_v4  ;;  %16049 = vmatprep.mubr.msk.bf16.mxu0 %vm17809_vm0, %v21633_v59  ;;  %16053 = vmatprep.subr.bf16.mxu0 %v21633_v59  ;;  %v9021_v61 = vsel %vm4815_vm7, %v19395_v48, 0  ;;  %v14299_v63 = vld [vmem:[%s21522_s3 + $0xc] sm:$0xf]  ;;  %v8478_v24 = vsel %vm4815_vm7, %v19897_v46, 0 }
 0x51f   : > { %v5927_v12 = vcombine.high %v5923_v9, %v5923_v9  ;;  %5939 = vst.msk [vmem:[%s20311_s9 + $0x31] sm:$0x1] %vm5363_vm9, %v5926_v49  ;;  %5941 = vst.msk [vmem:[%s20311_s9 + $0x51] sm:$0x1] %vm5363_vm9, %v5923_v9  ;;  %v14324_v48 = vld [vmem:[%s21522_s3 + $0xc] sm:$0xf] }
 0x520   : > { %5942 = vst.msk [vmem:[%s20311_s9 + $0x61] sm:$0x1] %vm5363_vm9, %v5925_v6  ;;  %16098 = vmatmul.mubr.msk.bf16.vlgmr.msra.gmra.mrb[36].mxu1 %vm4811_vm8, %v8819_v5  ;;  %v9071_v56 = vsel %vm4815_vm7, %v19902_v41, 0  ;;  %v14301_v46 = vld [vmem:[%s21522_s3 + $0x10] sm:$0xf]  ;;  %v8528_v4 = vsel %vm4815_vm7, %v19913_v34, 0 }
 0x521   : > { %5943 = vst.msk [vmem:[%s20311_s9 + $0x71] sm:$0x1] %vm5363_vm9, %v5927_v12  ;;  %16102 = vmatpush3.bf16.msra.mxu1 %v8946_v7  ;;  %16103 = vmatprep.mubr.msk.bf16.mxu1 %vm17809_vm0, %v21633_v59  ;;  %v14330_v41 = vld [vmem:[%s21522_s3 + $0x10] sm:$0xf]  ;;  %v9121_v29 = vsel %vm4815_vm7, %v19918_v8, 0  ;;  %v8603_v25 = vsel %vm4815_vm7, %v19411_v50, 0 }
 0x522   : > { %16107 = vmatprep.subr.bf16.mxu1 %v21633_v59  ;;  %v14303_v34 = vld [vmem:[%s21522_s3 + $0x14] sm:$0xf]  ;;  %v9176_v62 = vsel %vm4815_vm7, %v19407_v13, 0  ;;  %v14305_v50 = vld [vmem:[%s21522_s3 + $0x18] sm:$0xf]  ;;  %v8653_v9 = vsel %vm4815_vm7, %v19923_v42, 0 }
 0x523   : > { %v14332_v8 = vld [vmem:[%s21522_s3 + $0x14] sm:$0xf]  ;;  %v14334_v13 = vld [vmem:[%s21522_s3 + $0x18] sm:$0xf]  ;;  %v9226_v6 = vsel %vm4815_vm7, %v19928_v26, 0  ;;  %v8703_v49 = vsel %vm4815_vm7, %v19939_v52, 0 }
 0x524   : > { %v14311_v42 = vld [vmem:[%s21522_s3 + $0x1c] sm:$0xf]  ;;  %v9276_v5 = vsel %vm4815_vm7, %v19944_v28, 0  ;;  %v14313_v52 = vld [vmem:[%s21522_s3 + $0x20] sm:$0xf]  ;;  %v9423_v12 = vsel %vm4815_vm7, %v19949_v20, 0 }
 0x525   : > { %v14336_v26 = vld [vmem:[%s21522_s3 + $0x1c] sm:$0xf]  ;;  %v14338_v28 = vld [vmem:[%s21522_s3 + $0x20] sm:$0xf] }
 0x528   : > { %16050 = vmatmul.mubr.msk.bf16.vlgmr.msra.gmra.mrb[36].mxu0 %vm4811_vm8, %v14297_v30  ;;  %v9995_v30 = vsel %vm4815_vm7, %v19954_v38, 0 }
 0x529   : > { %16054 = vmatpush3.bf16.msra.mxu0 %v8428_v27  ;;  %16055 = vmatprep.mubr.msk.bf16.mxu0 %vm17809_vm0, %v21633_v59 }
 0x52a   : > { %16059 = vmatprep.subr.bf16.mxu0 %v21633_v59 }
 0x52c   : > { %16104 = vmatmul.mubr.msk.bf16.vlgmr.msra.gmra.mrb[36].mxu1 %vm4811_vm8, %v14322_v58 }
 0x52d   : > { %16108 = vmatpush3.bf16.msra.mxu1 %v9021_v61  ;;  %16109 = vmatprep.mubr.msk.bf16.mxu1 %vm17809_vm0, %v21633_v59  ;;  %v14340_v61 = vld [vmem:[%s21522_s3 + $0x4] sm:$0xf] }
 0x52e   : > { %16113 = vmatprep.subr.bf16.mxu1 %v21633_v59 }
 0x534   : > { %16056 = vmatmul.mubr.msk.bf16.vlgmr.msra.gmra.mrb[36].mxu0 %vm4811_vm8, %v14299_v63 }
 0x535   : > { %16060 = vmatpush3.bf16.msra.mxu0 %v8478_v24  ;;  %16061 = vmatprep.mubr.msk.bf16.mxu0 %vm17809_vm0, %v21633_v59 }
 0x536   : > { %16065 = vmatprep.subr.bf16.mxu0 %v21633_v59 }
 0x538   : > { %16110 = vmatmul.mubr.msk.bf16.vlgmr.msra.gmra.mrb[36].mxu1 %vm4811_vm8, %v14324_v48 }
 0x539   : > { %16114 = vmatpush3.bf16.msra.mxu1 %v9071_v56  ;;  %16115 = vmatprep.mubr.msk.bf16.mxu1 %vm17809_vm0, %v21633_v59 }
 0x53a   : > { %16119 = vmatprep.subr.bf16.mxu1 %v21633_v59 }
 0x540   : > { %16062 = vmatmul.mubr.msk.bf16.vlgmr.msra.gmra.mrb[36].mxu0 %vm4811_vm8, %v14301_v46 }
 0x541   : > { %16066 = vmatpush3.bf16.msra.mxu0 %v8528_v4  ;;  %16067 = vmatprep.mubr.msk.bf16.mxu0 %vm17809_vm0, %v21633_v59  ;;  %v9469_v4 = vsel %vm4815_vm7, %v19427_v21, 0  ;;  %v10041_v21 = vsel %vm4815_vm7, %v19423_v11, 0 }
 0x542   : > { %16071 = vmatprep.subr.bf16.mxu0 %v21633_v59 }
 0x544   : > { %16116 = vmatmul.mubr.msk.bf16.vlgmr.msra.gmra.mrb[36].mxu1 %vm4811_vm8, %v14330_v41 }
 0x545   : > { %16120 = vmatpush3.bf16.msra.mxu1 %v9121_v29  ;;  %16121 = vmatprep.mubr.msk.bf16.mxu1 %vm17809_vm0, %v21633_v59  ;;  %v14365_v29 = vld [vmem:[%s21522_s3 + $0x4] sm:$0xf] }
 0x546   : > { %16125 = vmatprep.subr.bf16.mxu1 %v21633_v59 }
 0x54c   : > { %16068 = vmatmul.mubr.msk.bf16.vlgmr.msra.gmra.mrb[36].mxu0 %vm4811_vm8, %v14303_v34 }
 0x54d   : > { %16072 = vmatpush3.bf16.msra.mxu0 %v8603_v25  ;;  %16073 = vmatprep.mubr.msk.bf16.mxu0 %vm17809_vm0, %v21633_v59 }
 0x54e   : > { %16077 = vmatprep.subr.bf16.mxu0 %v21633_v59 }
 0x550   : > { %16122 = vmatmul.mubr.msk.bf16.vlgmr.msra.gmra.mrb[36].mxu1 %vm4811_vm8, %v14332_v8 }
 0x551   : > { %16126 = vmatpush3.bf16.msra.mxu1 %v9176_v62  ;;  %16127 = vmatprep.mubr.msk.bf16.mxu1 %vm17809_vm0, %v21633_v59 }
 0x552   : > { %16131 = vmatprep.subr.bf16.mxu1 %v21633_v59 }
 0x558   : > { %16074 = vmatmul.mubr.msk.bf16.vlgmr.msra.gmra.mrb[36].mxu0 %vm4811_vm8, %v14305_v50 }
 0x559   : > { %16078 = vmatpush3.bf16.msra.mxu0 %v8653_v9  ;;  %16079 = vmatprep.mubr.msk.bf16.mxu0 %vm17809_vm0, %v21633_v59 }
 0x55a   : > { %16083 = vmatprep.subr.bf16.mxu0 %v21633_v59 }
 0x55c   : > { %16128 = vmatmul.mubr.msk.bf16.vlgmr.msra.gmra.mrb[36].mxu1 %vm4811_vm8, %v14334_v13 }
 0x55d   : > { %16132 = vmatpush3.bf16.msra.mxu1 %v9226_v6  ;;  %16133 = vmatprep.mubr.msk.bf16.mxu1 %vm17809_vm0, %v21633_v59 }
 0x55e   : > { %16137 = vmatprep.subr.bf16.mxu1 %v21633_v59 }
 0x564   : > { %16080 = vmatmul.mubr.msk.bf16.vlgmr.msra.gmra.mrb[36].mxu0 %vm4811_vm8, %v14311_v42 }
 0x565   : > { %16084 = vmatpush3.bf16.msra.mxu0 %v8703_v49  ;;  %16085 = vmatprep.mubr.msk.bf16.mxu0 %vm17809_vm0, %v21633_v59 }
 0x566   : > { %16143 = vmatprep.subr.bf16.mxu0 %v21633_v59 }
 0x568   : > { %16134 = vmatmul.mubr.msk.bf16.vlgmr.msra.gmra.mrb[36].mxu1 %vm4811_vm8, %v14336_v26 }
 0x569   : > { %16138 = vmatpush3.bf16.msra.mxu1 %v9276_v5  ;;  %16139 = vmatprep.mubr.msk.bf16.mxu1 %vm17809_vm0, %v21633_v59 }
 0x56a   : > { %16197 = vmatprep.subr.bf16.mxu1 %v21633_v59 }
 0x570   : > { %16086 = vmatmul.mubr.msk.bf16.vlgmr.msra.gmra.mrb[36].mxu0 %vm4811_vm8, %v14313_v52 }
 0x571   : > { %16144 = vmatpush3.bf16.msra.mxu0 %v9423_v12  ;;  %16145 = vmatprep.mubr.msk.bf16.mxu0 %vm17809_vm0, %v21633_v59 }
 0x572   : > { %16149 = vmatprep.subr.bf16.mxu0 %v21633_v59 }
 0x573   : > { %v6441_v7 = vpop.f32.mrb[28].mxu0 }
 0x574   : > { %v6448_v27 = vmul.f32 %v6441_v7, %v20265_v16  ;;  %v15871_v58 = vpop.f32.mrb[29].mxu0  ;;  %16140 = vmatmul.mubr.msk.bf16.vlgmr.msra.gmra.mrb[36].mxu1 %vm4811_vm8, %v14338_v28 }
 0x575   : > { %16198 = vmatpush3.bf16.msra.mxu1 %v9995_v30  ;;  %v6444_v20 = vpop.f32.mrb[30].mxu0  ;;  %16199 = vmatprep.mubr.msk.bf16.mxu1 %vm17809_vm0, %v21633_v59 }
 0x576   : > { %v6449_v63 = vadd.f32 %v6448_v27, %v20273_v35  ;;  %v15872_v24 = vpop.f32.mrb[31].mxu0  ;;  %16203 = vmatprep.subr.bf16.mxu1 %v21633_v59  ;;  %v9392_v20 = vld [vmem:[%s21522_s3] sm:$0xf] }
 0x577   : > { %v7015_v38 = vpop.f32.mrb[28].mxu1 }
 0x578   : > { %v6450_v48 = vmax.f32 %v6449_v63, 0.0  ;;  %v7022_v56 = vmul.f32 %v7015_v38, %v20265_v16  ;;  %v15925_v46 = vpop.f32.mrb[29].mxu1  ;;  %16146 = vmatmul.mubr.msk.bf16.vlgmr.msra.gmra.mrb[40].mxu0 %vm4811_vm8, %v14340_v61 }
 0x579   : > { %16150 = vmatpush3.bf16.msra.mxu0 %v9469_v4  ;;  %v7018_v41 = vpop.f32.mrb[30].mxu1  ;;  %16151 = vmatprep.mubr.msk.bf16.mxu0 %vm17809_vm0, %v21633_v59 }
 0x57a   : > { %v6452_v34 = vcombine.high %v6450_v48, %v6450_v48  ;;  %v6459_v25 = vrot.slane %v6450_v48, %v20284_v40  ;;  %v7023_v8 = vadd.f32 %v7022_v56, %v20273_v35  ;;  %v15926_v62 = vpop.f32.mrb[31].mxu1  ;;  %16155 = vmatprep.subr.bf16.mxu0 %v21633_v59  ;;  %v9518_v56 = vsel %vm4815_vm7, %v19965_v53, 0  ;;  %v9964_v53 = vld [vmem:[%s21522_s3] sm:$0xf] }
 0x57b   : > { %v10165_v62 = vsel %vm4815_vm7, %v19439_v2, 0  ;;  %v14374_v2 = vld [vmem:[%s21522_s3 + $0xc] sm:$0xf] }
 0x57c   : > { %v6466_v50 = vrot.slane %v6452_v34, %v20284_v40  ;;  %v6467_v9 = vcombine.high %v6459_v25, %v6459_v25  ;;  %v6475_v13 = vrot.slane %v6459_v25, %v20284_v40  ;;  %v7024_v6 = vmax.f32 %v7023_v8, 0.0  ;;  %16200 = vmatmul.mubr.msk.bf16.vlgmr.msra.gmra.mrb[40].mxu1 %vm4811_vm8, %v14365_v29  ;;  %v14347_v25 = vld [vmem:[%s21522_s3 + $0x8] sm:$0xf] }
 0x57d   : > { %16204 = vmatpush3.bf16.msra.mxu1 %v10041_v21  ;;  %16205 = vmatprep.mubr.msk.bf16.mxu1 %vm17809_vm0, %v21633_v59  ;;  %v10090_v34 = vsel %vm4815_vm7, %v19970_v39, 0  ;;  %v9573_v8 = vsel %vm4815_vm7, %v19443_v31, 0  ;;  %v14372_v39 = vld [vmem:[%s21522_s3 + $0x8] sm:$0xf]  ;;  %v14349_v31 = vld [vmem:[%s21522_s3 + $0xc] sm:$0xf] }
 0x57e   : > { %v6468_v42 = vcombine.high %v6466_v50, %v6466_v50  ;;  %v6482_v49 = vrot.slane %v6466_v50, %v20284_v40  ;;  %v6489_v11 = vrot.slane %v6467_v9, %v20284_v40  ;;  %v6497_v26 = vcombine.high %v6475_v13, %v6475_v13  ;;  %6509 = vst.msk [vmem:[%s20311_s9 + $0x2] sm:$0x1] %vm5363_vm9, %v6475_v13 }
 0x57f   : > { %16209 = vmatprep.subr.bf16.mxu1 %v21633_v59  ;;  %v7026_v5 = vcombine.high %v7024_v6, %v7024_v6  ;;  %v7033_v52 = vrot.slane %v7024_v6, %v20284_v40  ;;  %v9623_v21 = vsel %vm4815_vm7, %v19975_v55, 0  ;;  %v10215_v50 = vsel %vm4815_vm7, %v19980_v47, 0  ;;  %v14351_v55 = vld [vmem:[%s21522_s3 + $0x10] sm:$0xf] }
 0x580   : > { %v6496_v12 = vrot.slane %v6468_v42, %v20284_v40  ;;  %v6498_v28 = vcombine.high %v6482_v49, %v6482_v49  ;;  %v6499_v7 = vcombine.high %v6489_v11, %v6489_v11  ;;  %6510 = vst.msk [vmem:[%s20311_s9 + $0x12] sm:$0x1] %vm5363_vm9, %v6489_v11  ;;  %6511 = vst.msk [vmem:[%s20311_s9 + $0x22] sm:$0x1] %vm5363_vm9, %v6497_v26  ;;  %v9673_v9 = vsel %vm4815_vm7, %v19991_v15, 0 }
 0x581   : > { %6513 = vst.msk [vmem:[%s20311_s9 + $0x42] sm:$0x1] %vm5363_vm9, %v6482_v49  ;;  %v7040_v30 = vrot.slane %v7026_v5, %v20284_v40  ;;  %v7041_v27 = vcombine.high %v7033_v52, %v7033_v52  ;;  %v7049_v58 = vrot.slane %v7033_v52, %v20284_v40  ;;  %v14380_v47 = vld [vmem:[%s21522_s3 + $0x10] sm:$0xf]  ;;  %v10265_v13 = vsel %vm4815_vm7, %v19996_v37, 0 }
 0x582   : > { %v6500_v61 = vcombine.high %v6496_v12, %v6496_v12  ;;  %6512 = vst.msk [vmem:[%s20311_s9 + $0x32] sm:$0x1] %vm5363_vm9, %v6499_v7  ;;  %6514 = vst.msk [vmem:[%s20311_s9 + $0x52] sm:$0x1] %vm5363_vm9, %v6496_v12  ;;  %v14353_v15 = vld [vmem:[%s21522_s3 + $0x14] sm:$0xf] }
 0x583   : > { %6515 = vst.msk [vmem:[%s20311_s9 + $0x62] sm:$0x1] %vm5363_vm9, %v6498_v28  ;;  %v7042_v63 = vcombine.high %v7040_v30, %v7040_v30  ;;  %v7056_v24 = vrot.slane %v7040_v30, %v20284_v40  ;;  %v7063_v38 = vrot.slane %v7041_v27, %v20284_v40  ;;  %v7071_v48 = vcombine.high %v7049_v58, %v7049_v58  ;;  %v14382_v37 = vld [vmem:[%s21522_s3 + $0x14] sm:$0xf]  ;;  %v14390_v27 = vld [vmem:[%s21522_s3 + $0x4] sm:$0xf] }
 0x584   : > { %7083 = vst.msk [vmem:[%s20311_s9 + $0x3] sm:$0x1] %vm5363_vm9, %v7049_v58  ;;  %6516 = vst.msk [vmem:[%s20311_s9 + $0x72] sm:$0x1] %vm5363_vm9, %v6500_v61  ;;  %16152 = vmatmul.mubr.msk.bf16.vlgmr.msra.gmra.mrb[40].mxu0 %vm4811_vm8, %v9392_v20  ;;  %v9748_v6 = vsel %vm4815_vm7, %v19459_v18, 0  ;;  %v10320_v42 = vsel %vm4815_vm7, %v19455_v14, 0 }
 0x585   : > { %v7070_v46 = vrot.slane %v7042_v63, %v20284_v40  ;;  %v7072_v4 = vcombine.high %v7056_v24, %v7056_v24  ;;  %v7073_v41 = vcombine.high %v7063_v38, %v7063_v38  ;;  %7084 = vst.msk [vmem:[%s20311_s9 + $0x13] sm:$0x1] %vm5363_vm9, %v7063_v38  ;;  %7085 = vst.msk [vmem:[%s20311_s9 + $0x23] sm:$0x1] %vm5363_vm9, %v7071_v48  ;;  %16156 = vmatpush3.bf16.msra.mxu0 %v9518_v56  ;;  %v14355_v18 = vld [vmem:[%s21522_s3 + $0x18] sm:$0xf] }
 0x586   : > { %7087 = vst.msk [vmem:[%s20311_s9 + $0x43] sm:$0x1] %vm5363_vm9, %v7056_v24  ;;  %16157 = vmatprep.mubr.msk.bf16.mxu0 %vm17809_vm0, %v21633_v59  ;;  %16161 = vmatprep.subr.bf16.mxu0 %v21633_v59  ;;  %v9798_v49 = vsel %vm4815_vm7, %v20001_v36, 0  ;;  %v14384_v14 = vld [vmem:[%s21522_s3 + $0x18] sm:$0xf]  ;;  %v10370_v11 = vsel %vm4815_vm7, %v20006_v17, 0 }
 0x587   : > { %v7074_v29 = vcombine.high %v7070_v46, %v7070_v46  ;;  %7086 = vst.msk [vmem:[%s20311_s9 + $0x33] sm:$0x1] %vm5363_vm9, %v7073_v41  ;;  %7088 = vst.msk [vmem:[%s20311_s9 + $0x53] sm:$0x1] %vm5363_vm9, %v7070_v46  ;;  %v14361_v36 = vld [vmem:[%s21522_s3 + $0x1c] sm:$0xf] }
 0x588   : > { %7089 = vst.msk [vmem:[%s20311_s9 + $0x63] sm:$0x1] %vm5363_vm9, %v7072_v4  ;;  %16206 = vmatmul.mubr.msk.bf16.vlgmr.msra.gmra.mrb[40].mxu1 %vm4811_vm8, %v9964_v53  ;;  %v9848_v26 = vsel %vm4815_vm7, %v20017_v54, 0  ;;  %v14386_v17 = vld [vmem:[%s21522_s3 + $0x1c] sm:$0xf]  ;;  %v10420_v5 = vsel %vm4815_vm7, %v20022_v44, 0 }
 0x589   : > { %7090 = vst.msk [vmem:[%s20311_s9 + $0x73] sm:$0x1] %vm5363_vm9, %v7074_v29  ;;  %16210 = vmatpush3.bf16.msra.mxu1 %v10090_v34  ;;  %16211 = vmatprep.mubr.msk.bf16.mxu1 %vm17809_vm0, %v21633_v59  ;;  %v14363_v54 = vld [vmem:[%s21522_s3 + $0x20] sm:$0xf]  ;;  %v10567_v52 = vsel %vm4815_vm7, %v20027_v43, 0  ;;  %v11140_v28 = vsel %vm4815_vm7, %v20033_v60, 0 }
 0x58a   : > { %16215 = vmatprep.subr.bf16.mxu1 %v21633_v59  ;;  %v14388_v44 = vld [vmem:[%s21522_s3 + $0x20] sm:$0xf]  ;;  %v10613_v38 = vsel %vm4815_vm7, %v19484_v0, 0  ;;  %v14415_v56 = vld [vmem:[%s21522_s3 + $0x4] sm:$0xf]  ;;  %v11186_v0 = vsel %vm4815_vm7, %v19480_v33, 0 }
 0x590   : > { %16158 = vmatmul.mubr.msk.bf16.vlgmr.msra.gmra.mrb[40].mxu0 %vm4811_vm8, %v14347_v25 }
 0x591   : > { %16162 = vmatpush3.bf16.msra.mxu0 %v9573_v8  ;;  %16163 = vmatprep.mubr.msk.bf16.mxu0 %vm17809_vm0, %v21633_v59 }
 0x592   : > { %16167 = vmatprep.subr.bf16.mxu0 %v21633_v59 }
 0x594   : > { %16212 = vmatmul.mubr.msk.bf16.vlgmr.msra.gmra.mrb[40].mxu1 %vm4811_vm8, %v14372_v39 }
 0x595   : > { %16216 = vmatpush3.bf16.msra.mxu1 %v10165_v62  ;;  %16217 = vmatprep.mubr.msk.bf16.mxu1 %vm17809_vm0, %v21633_v59 }
 0x596   : > { %16221 = vmatprep.subr.bf16.mxu1 %v21633_v59 }
 0x59c   : > { %16164 = vmatmul.mubr.msk.bf16.vlgmr.msra.gmra.mrb[40].mxu0 %vm4811_vm8, %v14349_v31 }
 0x59d   : > { %16168 = vmatpush3.bf16.msra.mxu0 %v9623_v21  ;;  %16169 = vmatprep.mubr.msk.bf16.mxu0 %vm17809_vm0, %v21633_v59 }
 0x59e   : > { %16173 = vmatprep.subr.bf16.mxu0 %v21633_v59 }
 0x5a0   : > { %16218 = vmatmul.mubr.msk.bf16.vlgmr.msra.gmra.mrb[40].mxu1 %vm4811_vm8, %v14374_v2 }
 0x5a1   : > { %16222 = vmatpush3.bf16.msra.mxu1 %v10215_v50  ;;  %16223 = vmatprep.mubr.msk.bf16.mxu1 %vm17809_vm0, %v21633_v59 }
 0x5a2   : > { %16227 = vmatprep.subr.bf16.mxu1 %v21633_v59 }
 0x5a8   : > { %16170 = vmatmul.mubr.msk.bf16.vlgmr.msra.gmra.mrb[40].mxu0 %vm4811_vm8, %v14351_v55 }
 0x5a9   : > { %16174 = vmatpush3.bf16.msra.mxu0 %v9673_v9  ;;  %16175 = vmatprep.mubr.msk.bf16.mxu0 %vm17809_vm0, %v21633_v59 }
 0x5aa   : > { %16179 = vmatprep.subr.bf16.mxu0 %v21633_v59 }
 0x5ac   : > { %16224 = vmatmul.mubr.msk.bf16.vlgmr.msra.gmra.mrb[40].mxu1 %vm4811_vm8, %v14380_v47 }
 0x5ad   : > { %16228 = vmatpush3.bf16.msra.mxu1 %v10265_v13  ;;  %16229 = vmatprep.mubr.msk.bf16.mxu1 %vm17809_vm0, %v21633_v59 }
 0x5ae   : > { %16233 = vmatprep.subr.bf16.mxu1 %v21633_v59 }
 0x5b4   : > { %16176 = vmatmul.mubr.msk.bf16.vlgmr.msra.gmra.mrb[40].mxu0 %vm4811_vm8, %v14353_v15 }
 0x5b5   : > { %16180 = vmatpush3.bf16.msra.mxu0 %v9748_v6  ;;  %16181 = vmatprep.mubr.msk.bf16.mxu0 %vm17809_vm0, %v21633_v59  ;;  %v10536_v6 = vld [vmem:[%s21522_s3] sm:$0xf] }
 0x5b6   : > { %16185 = vmatprep.subr.bf16.mxu0 %v21633_v59 }
 0x5b8   : > { %16230 = vmatmul.mubr.msk.bf16.vlgmr.msra.gmra.mrb[40].mxu1 %vm4811_vm8, %v14382_v37 }
 0x5b9   : > { %16234 = vmatpush3.bf16.msra.mxu1 %v10320_v42  ;;  %16235 = vmatprep.mubr.msk.bf16.mxu1 %vm17809_vm0, %v21633_v59 }
 0x5ba   : > { %16239 = vmatprep.subr.bf16.mxu1 %v21633_v59 }
 0x5c0   : > { %16182 = vmatmul.mubr.msk.bf16.vlgmr.msra.gmra.mrb[40].mxu0 %vm4811_vm8, %v14355_v18 }
 0x5c1   : > { %16186 = vmatpush3.bf16.msra.mxu0 %v9798_v49  ;;  %16187 = vmatprep.mubr.msk.bf16.mxu0 %vm17809_vm0, %v21633_v59 }
 0x5c2   : > { %16191 = vmatprep.subr.bf16.mxu0 %v21633_v59 }
 0x5c4   : > { %16236 = vmatmul.mubr.msk.bf16.vlgmr.msra.gmra.mrb[40].mxu1 %vm4811_vm8, %v14384_v14 }
 0x5c5   : > { %16240 = vmatpush3.bf16.msra.mxu1 %v10370_v11  ;;  %16241 = vmatprep.mubr.msk.bf16.mxu1 %vm17809_vm0, %v21633_v59  ;;  %v10662_v11 = vsel %vm4815_vm7, %v20044_v10, 0  ;;  %v11109_v10 = vld [vmem:[%s21522_s3] sm:$0xf] }
 0x5c6   : > { %16245 = vmatprep.subr.bf16.mxu1 %v21633_v59 }
 0x5cc   : > { %16188 = vmatmul.mubr.msk.bf16.vlgmr.msra.gmra.mrb[40].mxu0 %vm4811_vm8, %v14361_v36 }
 0x5cd   : > { %16192 = vmatpush3.bf16.msra.mxu0 %v9848_v26  ;;  %16193 = vmatprep.mubr.msk.bf16.mxu0 %vm17809_vm0, %v21633_v59 }
 0x5ce   : > { %16251 = vmatprep.subr.bf16.mxu0 %v21633_v59 }
 0x5d0   : > { %16242 = vmatmul.mubr.msk.bf16.vlgmr.msra.gmra.mrb[40].mxu1 %vm4811_vm8, %v14386_v17 }
 0x5d1   : > { %16246 = vmatpush3.bf16.msra.mxu1 %v10420_v5  ;;  %16247 = vmatprep.mubr.msk.bf16.mxu1 %vm17809_vm0, %v21633_v59 }
 0x5d2   : > { %16305 = vmatprep.subr.bf16.mxu1 %v21633_v59 }
 0x5d8   : > { %16194 = vmatmul.mubr.msk.bf16.vlgmr.msra.gmra.mrb[40].mxu0 %vm4811_vm8, %v14363_v54  ;;  %v11235_v54 = vsel %vm4815_vm7, %v20052_v57, 0  ;;  %v14422_v57 = vld [vmem:[%s21522_s3 + $0x8] sm:$0xf] }
 0x5d9   : > { %16252 = vmatpush3.bf16.msra.mxu0 %v10567_v52  ;;  %16253 = vmatprep.mubr.msk.bf16.mxu0 %vm17809_vm0, %v21633_v59  ;;  %v14397_v52 = vld [vmem:[%s21522_s3 + $0x8] sm:$0xf] }
 0x5da   : > { %16257 = vmatprep.subr.bf16.mxu0 %v21633_v59 }
 0x5db   : > { %v7590_v12 = vpop.f32.mrb[32].mxu0 }
 0x5dc   : > { %v7597_v7 = vmul.f32 %v7590_v12, %v20265_v16  ;;  %v15979_v30 = vpop.f32.mrb[33].mxu0  ;;  %16248 = vmatmul.mubr.msk.bf16.vlgmr.msra.gmra.mrb[40].mxu1 %vm4811_vm8, %v14388_v44  ;;  %v21677_v44 = vld [vmem:[#allocation16_spill] sm:$0xff] }
 0x5dd   : > { %16306 = vmatpush3.bf16.msra.mxu1 %v11140_v28  ;;  %v7593_v43 = vpop.f32.mrb[34].mxu0  ;;  %16307 = vmatprep.mubr.msk.bf16.mxu1 %vm17809_vm0, %v21633_v59  ;;  %v10717_v12 = vsel %vm4815_vm7, %v21677_v44, 0  ;;  %v21678_v28 = vld [vmem:[#allocation15_spill] sm:$0xff]  ;;  %v14399_v30 = vld [vmem:[%s21522_s3 + $0xc] sm:$0xf] }
 0x5de   : > { %v7598_v58 = vadd.f32 %v7597_v7, %v20273_v35  ;;  %v15980_v20 = vpop.f32.mrb[35].mxu0  ;;  %16311 = vmatprep.subr.bf16.mxu1 %v21633_v59  ;;  %v11311_v7 = vsel %vm4815_vm7, %v21678_v28, 0  ;;  %v21679_v43 = vld [vmem:[#allocation12_spill] sm:$0xff] }
 0x5df   : > { %v8165_v60 = vpop.f32.mrb[32].mxu1  ;;  %v11361_v20 = vsel %vm4815_vm7, %v20068_v3, 0  ;;  %v14430_v3 = vld [vmem:[%s21522_s3 + $0x10] sm:$0xf] }
 0x5e0   : > { %v7599_v61 = vmax.f32 %v7598_v58, 0.0  ;;  %v8172_v63 = vmul.f32 %v8165_v60, %v20265_v16  ;;  %v16033_v24 = vpop.f32.mrb[33].mxu1  ;;  %16254 = vmatmul.mubr.msk.bf16.vlgmr.msra.gmra.mrb[44].mxu0 %vm4811_vm8, %v14390_v27  ;;  %v10767_v27 = vsel %vm4815_vm7, %v21679_v43, 0  ;;  %v14424_v58 = vld [vmem:[%s21522_s3 + $0xc] sm:$0xf] }
 0x5e1   : > { %16258 = vmatpush3.bf16.msra.mxu0 %v10613_v38  ;;  %v8168_v48 = vpop.f32.mrb[34].mxu1  ;;  %16259 = vmatprep.mubr.msk.bf16.mxu0 %vm17809_vm0, %v21633_v59  ;;  %v14401_v60 = vld [vmem:[%s21522_s3 + $0x10] sm:$0xf]  ;;  %v21681_v38 = vld [vmem:[#allocation18_spill] sm:$0xff] }
 0x5e2   : > { %v7601_v46 = vcombine.high %v7599_v61, %v7599_v61  ;;  %v7608_v4 = vrot.slane %v7599_v61, %v20284_v40  ;;  %v8173_v41 = vadd.f32 %v8172_v63, %v20273_v35  ;;  %v16034_v53 = vpop.f32.mrb[35].mxu1  ;;  %16263 = vmatprep.subr.bf16.mxu0 %v21633_v59  ;;  %v10817_v61 = vsel %vm4815_vm7, %v20073_v1, 0  ;;  %v21680_v63 = vld [vmem:[#allocation29_spill] sm:$0xff]  ;;  %v14403_v1 = vld [vmem:[%s21522_s3 + $0x14] sm:$0xf] }
 0x5e3   : > { %v11411_v24 = vsel %vm4815_vm7, %v21680_v63, 0  ;;  %v10893_v48 = vsel %vm4815_vm7, %v21681_v38, 0  ;;  %v21683_v53 = vld [vmem:[#allocation31_spill] sm:$0xff]  ;;  %v11683_v38 = vld [vmem:[%s21522_s3] sm:$0xf] }
 0x5e4   : > { %v7615_v29 = vrot.slane %v7601_v46, %v20284_v40  ;;  %v7616_v34 = vcombine.high %v7608_v4, %v7608_v4  ;;  %v7624_v25 = vrot.slane %v7608_v4, %v20284_v40  ;;  %v8174_v8 = vmax.f32 %v8173_v41, 0.0  ;;  %16308 = vmatmul.mubr.msk.bf16.vlgmr.msra.gmra.mrb[44].mxu1 %vm4811_vm8, %v14415_v56  ;;  %v14432_v56 = vld [vmem:[%s21522_s3 + $0x14] sm:$0xf]  ;;  %v21682_v46 = vld [vmem:[#allocation17_spill] sm:$0xff]  ;;  %v14405_v41 = vld [vmem:[%s21522_s3 + $0x18] sm:$0xf] }
 0x5e5   : > { %16312 = vmatpush3.bf16.msra.mxu1 %v11186_v0  ;;  %16313 = vmatprep.mubr.msk.bf16.mxu1 %vm17809_vm0, %v21633_v59  ;;  %v11467_v4 = vsel %vm4815_vm7, %v21682_v46, 0  ;;  %v10943_v0 = vsel %vm4815_vm7, %v21683_v53, 0  ;;  %v11810_v53 = vsel %vm4815_vm7, %v20125_v22, 0  ;;  %v12258_v22 = vld [vmem:[%s21522_s3] sm:$0xf] }
 0x5e6   : > { %v7617_v39 = vcombine.high %v7615_v29, %v7615_v29  ;;  %v7631_v62 = vrot.slane %v7615_v29, %v20284_v40  ;;  %v7638_v33 = vrot.slane %v7616_v34, %v20284_v40  ;;  %v7646_v31 = vcombine.high %v7624_v25, %v7624_v25  ;;  %7658 = vst.msk [vmem:[%s20311_s9 + $0x4] sm:$0x1] %vm5363_vm9, %v7624_v25  ;;  %v14434_v29 = vld [vmem:[%s21522_s3 + $0x18] sm:$0xf]  ;;  %v14411_v25 = vld [vmem:[%s21522_s3 + $0x1c] sm:$0xf] }
 0x5e7   : > { %16317 = vmatprep.subr.bf16.mxu1 %v21633_v59  ;;  %v8176_v21 = vcombine.high %v8174_v8, %v8174_v8  ;;  %v8183_v2 = vrot.slane %v8174_v8, %v20284_v40  ;;  %v11517_v34 = vsel %vm4815_vm7, %v20094_v45, 0  ;;  %v10993_v8 = vsel %vm4815_vm7, %v20099_v19, 0  ;;  %v14436_v45 = vld [vmem:[%s21522_s3 + $0x1c] sm:$0xf]  ;;  %v14413_v19 = vld [vmem:[%s21522_s3 + $0x20] sm:$0xf] }
 0x5e8   : > { %v7645_v50 = vrot.slane %v7617_v39, %v20284_v40  ;;  %v7647_v55 = vcombine.high %v7631_v62, %v7631_v62  ;;  %v7648_v9 = vcombine.high %v7638_v33, %v7638_v33  ;;  %7659 = vst.msk [vmem:[%s20311_s9 + $0x14] sm:$0x1] %vm5363_vm9, %v7638_v33  ;;  %7660 = vst.msk [vmem:[%s20311_s9 + $0x24] sm:$0x1] %vm5363_vm9, %v7646_v31  ;;  %v21684_v39 = vld [vmem:[#allocation30_spill] sm:$0xff]  ;;  %v21685_v33 = vld [vmem:[#allocation32_spill] sm:$0xff] }
 0x5e9   : > { %7662 = vst.msk [vmem:[%s20311_s9 + $0x44] sm:$0x1] %vm5363_vm9, %v7631_v62  ;;  %v8190_v47 = vrot.slane %v8176_v21, %v20284_v40  ;;  %v8191_v13 = vcombine.high %v8183_v2, %v8183_v2  ;;  %v8199_v15 = vrot.slane %v8183_v2, %v20284_v40  ;;  %v11567_v62 = vsel %vm4815_vm7, %v21684_v39, 0  ;;  %v14438_v21 = vld [vmem:[%s21522_s3 + $0x20] sm:$0xf] }
 0x5ea   : > { %v7649_v37 = vcombine.high %v7645_v50, %v7645_v50  ;;  %7661 = vst.msk [vmem:[%s20311_s9 + $0x34] sm:$0x1] %vm5363_vm9, %v7648_v9  ;;  %7663 = vst.msk [vmem:[%s20311_s9 + $0x54] sm:$0x1] %vm5363_vm9, %v7645_v50  ;;  %v11715_v31 = vsel %vm4815_vm7, %v21685_v33, 0  ;;  %v12290_v50 = vsel %vm4815_vm7, %v20120_v51, 0 }
 0x5eb   : > { %7664 = vst.msk [vmem:[%s20311_s9 + $0x64] sm:$0x1] %vm5363_vm9, %v7647_v55  ;;  %v8192_v42 = vcombine.high %v8190_v47, %v8190_v47  ;;  %v8206_v18 = vrot.slane %v8190_v47, %v20284_v40  ;;  %v8213_v49 = vrot.slane %v8191_v13, %v20284_v40  ;;  %v8221_v14 = vcombine.high %v8199_v15, %v8199_v15  ;;  %v14440_v13 = vld [vmem:[%s21522_s3 + $0x4] sm:$0xf]  ;;  %v14447_v39 = vld [vmem:[%s21522_s3 + $0x8] sm:$0xf] }
 0x5ec   : > { %8233 = vst.msk [vmem:[%s20311_s9 + $0x5] sm:$0x1] %vm5363_vm9, %v8199_v15  ;;  %7665 = vst.msk [vmem:[%s20311_s9 + $0x74] sm:$0x1] %vm5363_vm9, %v7649_v37  ;;  %16260 = vmatmul.mubr.msk.bf16.vlgmr.msra.gmra.mrb[44].mxu0 %vm4811_vm8, %v10536_v6  ;;  %v14472_v33 = vld [vmem:[%s21522_s3 + $0x8] sm:$0xf] }
 0x5ed   : > { %v8220_v36 = vrot.slane %v8192_v42, %v20284_v40  ;;  %v8222_v26 = vcombine.high %v8206_v18, %v8206_v18  ;;  %v8223_v17 = vcombine.high %v8213_v49, %v8213_v49  ;;  %8234 = vst.msk [vmem:[%s20311_s9 + $0x15] sm:$0x1] %vm5363_vm9, %v8213_v49  ;;  %8235 = vst.msk [vmem:[%s20311_s9 + $0x25] sm:$0x1] %vm5363_vm9, %v8221_v14  ;;  %16264 = vmatpush3.bf16.msra.mxu0 %v10662_v11  ;;  %v21686_v49 = vld [vmem:[#allocation20_spill] sm:$0xff] }
 0x5ee   : > { %8237 = vst.msk [vmem:[%s20311_s9 + $0x45] sm:$0x1] %vm5363_vm9, %v8206_v18  ;;  %16265 = vmatprep.mubr.msk.bf16.mxu0 %vm17809_vm0, %v21633_v59  ;;  %16269 = vmatprep.subr.bf16.mxu0 %v21633_v59  ;;  %v11761_v14 = vsel %vm4815_vm7, %v21686_v49, 0  ;;  %v21694_v49 = vld [vmem:[#allocation23_spill] sm:$0xff] }
 0x5ef   : > { %v8224_v5 = vcombine.high %v8220_v36, %v8220_v36  ;;  %8236 = vst.msk [vmem:[%s20311_s9 + $0x35] sm:$0x1] %vm5363_vm9, %v8223_v17  ;;  %8238 = vst.msk [vmem:[%s20311_s9 + $0x55] sm:$0x1] %vm5363_vm9, %v8220_v36  ;;  %v14465_v36 = vld [vmem:[%s21522_s3 + $0x4] sm:$0xf] }
 0x5f0   : > { %8239 = vst.msk [vmem:[%s20311_s9 + $0x65] sm:$0x1] %vm5363_vm9, %v8222_v26  ;;  %16314 = vmatmul.mubr.msk.bf16.vlgmr.msra.gmra.mrb[44].mxu1 %vm4811_vm8, %v11109_v10 }
 0x5f1   : > { %8240 = vst.msk [vmem:[%s20311_s9 + $0x75] sm:$0x1] %vm5363_vm9, %v8224_v5  ;;  %16318 = vmatpush3.bf16.msra.mxu1 %v11235_v54  ;;  %16319 = vmatprep.mubr.msk.bf16.mxu1 %vm17809_vm0, %v21633_v59  ;;  %v21687_v54 = vld [vmem:[#allocation19_spill] sm:$0xff] }
 0x5f2   : > { %16323 = vmatprep.subr.bf16.mxu1 %v21633_v59 }
 0x5f8   : > { %16266 = vmatmul.mubr.msk.bf16.vlgmr.msra.gmra.mrb[44].mxu0 %vm4811_vm8, %v14397_v52  ;;  %v12336_v52 = vsel %vm4815_vm7, %v21687_v54, 0  ;;  %v14461_v54 = vld [vmem:[%s21522_s3 + $0x1c] sm:$0xf] }
 0x5f9   : > { %16270 = vmatpush3.bf16.msra.mxu0 %v10717_v12  ;;  %16271 = vmatprep.mubr.msk.bf16.mxu0 %vm17809_vm0, %v21633_v59 }
 0x5fa   : > { %16275 = vmatprep.subr.bf16.mxu0 %v21633_v59 }
 0x5fc   : > { %16320 = vmatmul.mubr.msk.bf16.vlgmr.msra.gmra.mrb[44].mxu1 %vm4811_vm8, %v14422_v57 }
 0x5fd   : > { %16324 = vmatpush3.bf16.msra.mxu1 %v11311_v7  ;;  %16325 = vmatprep.mubr.msk.bf16.mxu1 %vm17809_vm0, %v21633_v59 }
 0x5fe   : > { %16329 = vmatprep.subr.bf16.mxu1 %v21633_v59 }
 0x604   : > { %16272 = vmatmul.mubr.msk.bf16.vlgmr.msra.gmra.mrb[44].mxu0 %vm4811_vm8, %v14399_v30 }
 0x605   : > { %16276 = vmatpush3.bf16.msra.mxu0 %v10767_v27  ;;  %16277 = vmatprep.mubr.msk.bf16.mxu0 %vm17809_vm0, %v21633_v59 }
 0x606   : > { %16281 = vmatprep.subr.bf16.mxu0 %v21633_v59 }
 0x608   : > { %16326 = vmatmul.mubr.msk.bf16.vlgmr.msra.gmra.mrb[44].mxu1 %vm4811_vm8, %v14424_v58 }
 0x609   : > { %16330 = vmatpush3.bf16.msra.mxu1 %v11361_v20  ;;  %16331 = vmatprep.mubr.msk.bf16.mxu1 %vm17809_vm0, %v21633_v59 }
 0x60a   : > { %16335 = vmatprep.subr.bf16.mxu1 %v21633_v59 }
 0x610   : > { %16278 = vmatmul.mubr.msk.bf16.vlgmr.msra.gmra.mrb[44].mxu0 %vm4811_vm8, %v14401_v60 }
 0x611   : > { %16282 = vmatpush3.bf16.msra.mxu0 %v10817_v61  ;;  %16283 = vmatprep.mubr.msk.bf16.mxu0 %vm17809_vm0, %v21633_v59 }
 0x612   : > { %16287 = vmatprep.subr.bf16.mxu0 %v21633_v59 }
 0x614   : > { %16332 = vmatmul.mubr.msk.bf16.vlgmr.msra.gmra.mrb[44].mxu1 %vm4811_vm8, %v14430_v3 }
 0x615   : > { %16336 = vmatpush3.bf16.msra.mxu1 %v11411_v24  ;;  %16337 = vmatprep.mubr.msk.bf16.mxu1 %vm17809_vm0, %v21633_v59 }
 0x616   : > { %16341 = vmatprep.subr.bf16.mxu1 %v21633_v59 }
 0x61c   : > { %16284 = vmatmul.mubr.msk.bf16.vlgmr.msra.gmra.mrb[44].mxu0 %vm4811_vm8, %v14403_v1 }
 0x61d   : > { %16288 = vmatpush3.bf16.msra.mxu0 %v10893_v48  ;;  %16289 = vmatprep.mubr.msk.bf16.mxu0 %vm17809_vm0, %v21633_v59 }
 0x61e   : > { %16293 = vmatprep.subr.bf16.mxu0 %v21633_v59 }
 0x620   : > { %16338 = vmatmul.mubr.msk.bf16.vlgmr.msra.gmra.mrb[44].mxu1 %vm4811_vm8, %v14432_v56 }
 0x621   : > { %16342 = vmatpush3.bf16.msra.mxu1 %v11467_v4  ;;  %16343 = vmatprep.mubr.msk.bf16.mxu1 %vm17809_vm0, %v21633_v59 }
 0x622   : > { %16347 = vmatprep.subr.bf16.mxu1 %v21633_v59 }
 0x628   : > { %16290 = vmatmul.mubr.msk.bf16.vlgmr.msra.gmra.mrb[44].mxu0 %vm4811_vm8, %v14405_v41 }
 0x629   : > { %16294 = vmatpush3.bf16.msra.mxu0 %v10943_v0  ;;  %16295 = vmatprep.mubr.msk.bf16.mxu0 %vm17809_vm0, %v21633_v59 }
 0x62a   : > { %16299 = vmatprep.subr.bf16.mxu0 %v21633_v59 }
 0x62c   : > { %16344 = vmatmul.mubr.msk.bf16.vlgmr.msra.gmra.mrb[44].mxu1 %vm4811_vm8, %v14434_v29 }
 0x62d   : > { %16348 = vmatpush3.bf16.msra.mxu1 %v11517_v34  ;;  %16349 = vmatprep.mubr.msk.bf16.mxu1 %vm17809_vm0, %v21633_v59 }
 0x62e   : > { %16353 = vmatprep.subr.bf16.mxu1 %v21633_v59 }
 0x634   : > { %16296 = vmatmul.mubr.msk.bf16.vlgmr.msra.gmra.mrb[44].mxu0 %vm4811_vm8, %v14411_v25 }
 0x635   : > { %16300 = vmatpush3.bf16.msra.mxu0 %v10993_v8  ;;  %16301 = vmatprep.mubr.msk.bf16.mxu0 %vm17809_vm0, %v21633_v59  ;;  %v21688_v8 = vld [vmem:[#allocation33_spill] sm:$0xff] }
 0x636   : > { %16359 = vmatprep.subr.bf16.mxu0 %v21633_v59 }
 0x638   : > { %16350 = vmatmul.mubr.msk.bf16.vlgmr.msra.gmra.mrb[44].mxu1 %vm4811_vm8, %v14436_v45  ;;  %v12385_v45 = vsel %vm4815_vm7, %v21688_v8, 0 }
 0x639   : > { %16354 = vmatpush3.bf16.msra.mxu1 %v11567_v62  ;;  %16355 = vmatprep.mubr.msk.bf16.mxu1 %vm17809_vm0, %v21633_v59  ;;  %v21689_v62 = vld [vmem:[#allocation22_spill] sm:$0xff] }
 0x63a   : > { %16413 = vmatprep.subr.bf16.mxu1 %v21633_v59 }
 0x640   : > { %16302 = vmatmul.mubr.msk.bf16.vlgmr.msra.gmra.mrb[44].mxu0 %vm4811_vm8, %v14413_v19  ;;  %v11866_v19 = vsel %vm4815_vm7, %v21689_v62, 0 }
 0x641   : > { %16360 = vmatpush3.bf16.msra.mxu0 %v11715_v31  ;;  %16361 = vmatprep.mubr.msk.bf16.mxu0 %vm17809_vm0, %v21633_v59  ;;  %v21690_v31 = vld [vmem:[#allocation21_spill] sm:$0xff] }
 0x642   : > { %16365 = vmatprep.subr.bf16.mxu0 %v21633_v59 }
 0x643   : > { %v8739_v2 = vpop.f32.mrb[36].mxu0 }
 0x644   : > { %v8746_v55 = vmul.f32 %v8739_v2, %v20265_v16  ;;  %v16087_v9 = vpop.f32.mrb[37].mxu0  ;;  %16356 = vmatmul.mubr.msk.bf16.vlgmr.msra.gmra.mrb[44].mxu1 %vm4811_vm8, %v14438_v21  ;;  %v12461_v21 = vsel %vm4815_vm7, %v21690_v31, 0  ;;  %v14449_v2 = vld [vmem:[%s21522_s3 + $0xc] sm:$0xf] }
 0x645   : > { %16414 = vmatpush3.bf16.msra.mxu1 %v12290_v50  ;;  %v8742_v47 = vpop.f32.mrb[38].mxu0  ;;  %16415 = vmatprep.mubr.msk.bf16.mxu1 %vm17809_vm0, %v21633_v59  ;;  %v21691_v50 = vld [vmem:[#allocation34_spill] sm:$0xff] }
 0x646   : > { %v8747_v15 = vadd.f32 %v8746_v55, %v20273_v35  ;;  %v16088_v6 = vpop.f32.mrb[39].mxu0  ;;  %16419 = vmatprep.subr.bf16.mxu1 %v21633_v59  ;;  %v11916_v55 = vsel %vm4815_vm7, %v21691_v50, 0  ;;  %v14474_v9 = vld [vmem:[%s21522_s3 + $0xc] sm:$0xf]  ;;  %v12511_v47 = vsel %vm4815_vm7, %v20146_v23, 0 }
 0x647   : > { %v9312_v51 = vpop.f32.mrb[36].mxu1  ;;  %v14480_v23 = vld [vmem:[%s21522_s3 + $0x10] sm:$0xf] }
 0x648   : > { %v8748_v37 = vmax.f32 %v8747_v15, 0.0  ;;  %v9319_v42 = vmul.f32 %v9312_v51, %v20265_v16  ;;  %v16141_v18 = vpop.f32.mrb[37].mxu1  ;;  %16362 = vmatmul.mubr.msk.bf16.vlgmr.msra.gmra.mrb[48].mxu0 %vm4811_vm8, %v14440_v13  ;;  %v14451_v13 = vld [vmem:[%s21522_s3 + $0x10] sm:$0xf]  ;;  %v11966_v15 = vsel %vm4815_vm7, %v20151_v32, 0 }
 0x649   : > { %16366 = vmatpush3.bf16.msra.mxu0 %v11761_v14  ;;  %v9315_v11 = vpop.f32.mrb[38].mxu1  ;;  %16367 = vmatprep.mubr.msk.bf16.mxu0 %vm17809_vm0, %v21633_v59  ;;  %v21692_v6 = vld [vmem:[#allocation35_spill] sm:$0xff]  ;;  %v12617_v14 = vsel %vm4815_vm7, %v21694_v49, 0 }
 0x64a   : > { %v8750_v26 = vcombine.high %v8748_v37, %v8748_v37  ;;  %v8757_v17 = vrot.slane %v8748_v37, %v20284_v40  ;;  %v9320_v10 = vadd.f32 %v9319_v42, %v20273_v35  ;;  %v16142_v5 = vpop.f32.mrb[39].mxu1  ;;  %16371 = vmatprep.subr.bf16.mxu0 %v21633_v59  ;;  %v12561_v51 = vsel %vm4815_vm7, %v21692_v6, 0  ;;  %v14453_v32 = vld [vmem:[%s21522_s3 + $0x14] sm:$0xf]  ;;  %v21693_v37 = vld [vmem:[#allocation24_spill] sm:$0xff] }
 0x64b   : > { %v12042_v42 = vsel %vm4815_vm7, %v21693_v37, 0  ;;  %v14482_v18 = vld [vmem:[%s21522_s3 + $0x14] sm:$0xf]  ;;  %v14455_v11 = vld [vmem:[%s21522_s3 + $0x18] sm:$0xf] }
 0x64c   : > { %v8764_v44 = vrot.slane %v8750_v26, %v20284_v40  ;;  %v8765_v12 = vcombine.high %v8757_v17, %v8757_v17  ;;  %v8773_v57 = vrot.slane %v8757_v17, %v20284_v40  ;;  %v9321_v28 = vmax.f32 %v9320_v10, 0.0  ;;  %16416 = vmatmul.mubr.msk.bf16.vlgmr.msra.gmra.mrb[48].mxu1 %vm4811_vm8, %v14465_v36  ;;  %v21695_v36 = vld [vmem:[#allocation36_spill] sm:$0xff]  ;;  %v21696_v10 = vld [vmem:[#allocation37_spill] sm:$0xff] }
 0x64d   : > { %16420 = vmatpush3.bf16.msra.mxu1 %v12336_v52  ;;  %16421 = vmatprep.mubr.msk.bf16.mxu1 %vm17809_vm0, %v21633_v59  ;;  %v12092_v26 = vsel %vm4815_vm7, %v21695_v36, 0  ;;  %v14484_v17 = vld [vmem:[%s21522_s3 + $0x18] sm:$0xf]  ;;  %v12667_v5 = vsel %vm4815_vm7, %v21696_v10, 0  ;;  %v21697_v52 = vld [vmem:[#allocation38_spill] sm:$0xff] }
 0x64e   : > { %v8766_v7 = vcombine.high %v8764_v44, %v8764_v44  ;;  %v8780_v30 = vrot.slane %v8764_v44, %v20284_v40  ;;  %v8787_v43 = vrot.slane %v8765_v12, %v20284_v40  ;;  %v8795_v27 = vcombine.high %v8773_v57, %v8773_v57  ;;  %8807 = vst.msk [vmem:[%s20311_s9 + $0x6] sm:$0x1] %vm5363_vm9, %v8773_v57  ;;  %v14486_v12 = vld [vmem:[%s21522_s3 + $0x1c] sm:$0xf]  ;;  %v21698_v57 = vld [vmem:[#allocation39_spill] sm:$0xff]  ;;  %v21703_v36 = vld [vmem:[#allocation42_spill] sm:$0xff] }
 0x64f   : > { %16425 = vmatprep.subr.bf16.mxu1 %v21633_v59  ;;  %v9323_v58 = vcombine.high %v9321_v28, %v9321_v28  ;;  %v9330_v20 = vrot.slane %v9321_v28, %v20284_v40  ;;  %v12142_v44 = vsel %vm4815_vm7, %v21697_v52, 0  ;;  %v12717_v28 = vsel %vm4815_vm7, %v21698_v57, 0  ;;  %v12833_v37 = vld [vmem:[%s21522_s3] sm:$0xf]  ;;  %v14497_v57 = vld [vmem:[%s21522_s3 + $0x8] sm:$0xf] }
 0x650   : > { %v8794_v60 = vrot.slane %v8766_v7, %v20284_v40  ;;  %v8796_v61 = vcombine.high %v8780_v30, %v8780_v30  ;;  %v8797_v3 = vcombine.high %v8787_v43, %v8787_v43  ;;  %8808 = vst.msk [vmem:[%s20311_s9 + $0x16] sm:$0x1] %vm5363_vm9, %v8787_v43  ;;  %8809 = vst.msk [vmem:[%s20311_s9 + $0x26] sm:$0x1] %vm5363_vm9, %v8795_v27  ;;  %v14463_v7 = vld [vmem:[%s21522_s3 + $0x20] sm:$0xf] }
 0x651   : > { %8811 = vst.msk [vmem:[%s20311_s9 + $0x46] sm:$0x1] %vm5363_vm9, %v8780_v30  ;;  %v9337_v63 = vrot.slane %v9323_v58, %v20284_v40  ;;  %v9338_v24 = vcombine.high %v9330_v20, %v9330_v20  ;;  %v9346_v1 = vrot.slane %v9330_v20, %v20284_v40  ;;  %v21699_v30 = vld [vmem:[#allocation40_spill] sm:$0xff]  ;;  %v14488_v27 = vld [vmem:[%s21522_s3 + $0x20] sm:$0xf] }
 0x652   : > { %v8798_v48 = vcombine.high %v8794_v60, %v8794_v60  ;;  %8810 = vst.msk [vmem:[%s20311_s9 + $0x36] sm:$0x1] %vm5363_vm9, %v8797_v3  ;;  %8812 = vst.msk [vmem:[%s20311_s9 + $0x56] sm:$0x1] %vm5363_vm9, %v8794_v60  ;;  %v12865_v43 = vsel %vm4815_vm7, %v21699_v30, 0  ;;  %v21700_v20 = vld [vmem:[#allocation41_spill] sm:$0xff] }
 0x653   : > { %8813 = vst.msk [vmem:[%s20311_s9 + $0x66] sm:$0x1] %vm5363_vm9, %v8796_v61  ;;  %v9339_v56 = vcombine.high %v9337_v63, %v9337_v63  ;;  %v9353_v46 = vrot.slane %v9337_v63, %v20284_v40  ;;  %v9360_v4 = vrot.slane %v9338_v24, %v20284_v40  ;;  %v9368_v41 = vcombine.high %v9346_v1, %v9346_v1  ;;  %v14490_v24 = vld [vmem:[%s21522_s3 + $0x4] sm:$0xf]  ;;  %v14522_v30 = vld [vmem:[%s21522_s3 + $0x8] sm:$0xf] }
 0x654   : > { %9380 = vst.msk [vmem:[%s20311_s9 + $0x7] sm:$0x1] %vm5363_vm9, %v9346_v1  ;;  %8814 = vst.msk [vmem:[%s20311_s9 + $0x76] sm:$0x1] %vm5363_vm9, %v8798_v48  ;;  %16368 = vmatmul.mubr.msk.bf16.vlgmr.msra.gmra.mrb[48].mxu0 %vm4811_vm8, %v11683_v38  ;;  %v13439_v60 = vsel %vm4815_vm7, %v21700_v20, 0  ;;  %v21707_v20 = vld [vmem:[#allocation44_spill] sm:$0xff] }
 0x655   : > { %v9367_v0 = vrot.slane %v9339_v56, %v20284_v40  ;;  %v9369_v29 = vcombine.high %v9353_v46, %v9353_v46  ;;  %v9370_v34 = vcombine.high %v9360_v4, %v9360_v4  ;;  %9381 = vst.msk [vmem:[%s20311_s9 + $0x17] sm:$0x1] %vm5363_vm9, %v9360_v4  ;;  %9382 = vst.msk [vmem:[%s20311_s9 + $0x27] sm:$0x1] %vm5363_vm9, %v9368_v41  ;;  %16372 = vmatpush3.bf16.msra.mxu0 %v11810_v53  ;;  %v21701_v41 = vld [vmem:[#allocation26_spill] sm:$0xff] }
 0x656   : > { %9384 = vst.msk [vmem:[%s20311_s9 + $0x47] sm:$0x1] %vm5363_vm9, %v9353_v46  ;;  %16373 = vmatprep.mubr.msk.bf16.mxu0 %vm17809_vm0, %v21633_v59  ;;  %16377 = vmatprep.subr.bf16.mxu0 %v21633_v59  ;;  %v12911_v53 = vsel %vm4815_vm7, %v21701_v41, 0  ;;  %v21711_v41 = vld [vmem:[#allocation14_spill] sm:$0xff] }
 0x657   : > { %v9371_v25 = vcombine.high %v9367_v0, %v9367_v0  ;;  %9383 = vst.msk [vmem:[%s20311_s9 + $0x37] sm:$0x1] %vm5363_vm9, %v9370_v34  ;;  %9385 = vst.msk [vmem:[%s20311_s9 + $0x57] sm:$0x1] %vm5363_vm9, %v9367_v0 }
 0x658   : > { %9386 = vst.msk [vmem:[%s20311_s9 + $0x67] sm:$0x1] %vm5363_vm9, %v9369_v29  ;;  %16422 = vmatmul.mubr.msk.bf16.vlgmr.msra.gmra.mrb[48].mxu1 %vm4811_vm8, %v12258_v22  ;;  %v14515_v29 = vld [vmem:[%s21522_s3 + $0x4] sm:$0xf] }
 0x659   : > { %9387 = vst.msk [vmem:[%s20311_s9 + $0x77] sm:$0x1] %vm5363_vm9, %v9371_v25  ;;  %16426 = vmatpush3.bf16.msra.mxu1 %v12385_v45  ;;  %16427 = vmatprep.mubr.msk.bf16.mxu1 %vm17809_vm0, %v21633_v59  ;;  %v21702_v45 = vld [vmem:[#allocation25_spill] sm:$0xff] }
 0x65a   : > { %16431 = vmatprep.subr.bf16.mxu1 %v21633_v59 }
 0x660   : > { %16374 = vmatmul.mubr.msk.bf16.vlgmr.msra.gmra.mrb[48].mxu0 %vm4811_vm8, %v14447_v39  ;;  %v13485_v39 = vsel %vm4815_vm7, %v21702_v45, 0  ;;  %v14534_v45 = vld [vmem:[%s21522_s3 + $0x18] sm:$0xf] }
 0x661   : > { %16378 = vmatpush3.bf16.msra.mxu0 %v11866_v19  ;;  %16379 = vmatprep.mubr.msk.bf16.mxu0 %vm17809_vm0, %v21633_v59 }
 0x662   : > { %16383 = vmatprep.subr.bf16.mxu0 %v21633_v59 }
 0x664   : > { %16428 = vmatmul.mubr.msk.bf16.vlgmr.msra.gmra.mrb[48].mxu1 %vm4811_vm8, %v14472_v33 }
 0x665   : > { %16432 = vmatpush3.bf16.msra.mxu1 %v12461_v21  ;;  %16433 = vmatprep.mubr.msk.bf16.mxu1 %vm17809_vm0, %v21633_v59 }
 0x666   : > { %16437 = vmatprep.subr.bf16.mxu1 %v21633_v59 }
 0x66c   : > { %16380 = vmatmul.mubr.msk.bf16.vlgmr.msra.gmra.mrb[48].mxu0 %vm4811_vm8, %v14449_v2 }
 0x66d   : > { %16384 = vmatpush3.bf16.msra.mxu0 %v11916_v55  ;;  %16385 = vmatprep.mubr.msk.bf16.mxu0 %vm17809_vm0, %v21633_v59 }
 0x66e   : > { %16389 = vmatprep.subr.bf16.mxu0 %v21633_v59 }
 0x670   : > { %16434 = vmatmul.mubr.msk.bf16.vlgmr.msra.gmra.mrb[48].mxu1 %vm4811_vm8, %v14474_v9 }
 0x671   : > { %16438 = vmatpush3.bf16.msra.mxu1 %v12511_v47  ;;  %16439 = vmatprep.mubr.msk.bf16.mxu1 %vm17809_vm0, %v21633_v59 }
 0x672   : > { %16443 = vmatprep.subr.bf16.mxu1 %v21633_v59 }
 0x678   : > { %16386 = vmatmul.mubr.msk.bf16.vlgmr.msra.gmra.mrb[48].mxu0 %vm4811_vm8, %v14451_v13 }
 0x679   : > { %16390 = vmatpush3.bf16.msra.mxu0 %v11966_v15  ;;  %16391 = vmatprep.mubr.msk.bf16.mxu0 %vm17809_vm0, %v21633_v59 }
 0x67a   : > { %16395 = vmatprep.subr.bf16.mxu0 %v21633_v59 }
 0x67c   : > { %16440 = vmatmul.mubr.msk.bf16.vlgmr.msra.gmra.mrb[48].mxu1 %vm4811_vm8, %v14480_v23 }
 0x67d   : > { %16444 = vmatpush3.bf16.msra.mxu1 %v12561_v51  ;;  %16445 = vmatprep.mubr.msk.bf16.mxu1 %vm17809_vm0, %v21633_v59 }
 0x67e   : > { %16449 = vmatprep.subr.bf16.mxu1 %v21633_v59 }
 0x684   : > { %16392 = vmatmul.mubr.msk.bf16.vlgmr.msra.gmra.mrb[48].mxu0 %vm4811_vm8, %v14453_v32 }
 0x685   : > { %16396 = vmatpush3.bf16.msra.mxu0 %v12042_v42  ;;  %16397 = vmatprep.mubr.msk.bf16.mxu0 %vm17809_vm0, %v21633_v59 }
 0x686   : > { %16401 = vmatprep.subr.bf16.mxu0 %v21633_v59 }
 0x688   : > { %16446 = vmatmul.mubr.msk.bf16.vlgmr.msra.gmra.mrb[48].mxu1 %vm4811_vm8, %v14482_v18 }
 0x689   : > { %16450 = vmatpush3.bf16.msra.mxu1 %v12617_v14  ;;  %16451 = vmatprep.mubr.msk.bf16.mxu1 %vm17809_vm0, %v21633_v59 }
 0x68a   : > { %16455 = vmatprep.subr.bf16.mxu1 %v21633_v59 }
 0x690   : > { %16398 = vmatmul.mubr.msk.bf16.vlgmr.msra.gmra.mrb[48].mxu0 %vm4811_vm8, %v14455_v11 }
 0x691   : > { %16402 = vmatpush3.bf16.msra.mxu0 %v12092_v26  ;;  %16403 = vmatprep.mubr.msk.bf16.mxu0 %vm17809_vm0, %v21633_v59  ;;  %v12960_v26 = vsel %vm4815_vm7, %v21703_v36, 0 }
 0x692   : > { %16407 = vmatprep.subr.bf16.mxu0 %v21633_v59 }
 0x694   : > { %16452 = vmatmul.mubr.msk.bf16.vlgmr.msra.gmra.mrb[48].mxu1 %vm4811_vm8, %v14484_v17 }
 0x695   : > { %16456 = vmatpush3.bf16.msra.mxu1 %v12667_v5  ;;  %16457 = vmatprep.mubr.msk.bf16.mxu1 %vm17809_vm0, %v21633_v59 }
 0x696   : > { %16461 = vmatprep.subr.bf16.mxu1 %v21633_v59 }
 0x69c   : > { %16404 = vmatmul.mubr.msk.bf16.vlgmr.msra.gmra.mrb[48].mxu0 %vm4811_vm8, %v14461_v54  ;;  %v13407_v54 = vld [vmem:[%s21522_s3] sm:$0xf] }
 0x69d   : > { %16408 = vmatpush3.bf16.msra.mxu0 %v12142_v44  ;;  %16409 = vmatprep.mubr.msk.bf16.mxu0 %vm17809_vm0, %v21633_v59  ;;  %v21704_v44 = vld [vmem:[#allocation43_spill] sm:$0xff] }
 0x69e   : > { %16467 = vmatprep.subr.bf16.mxu0 %v21633_v59 }
 0x6a0   : > { %16458 = vmatmul.mubr.msk.bf16.vlgmr.msra.gmra.mrb[48].mxu1 %vm4811_vm8, %v14486_v12  ;;  %v13534_v12 = vsel %vm4815_vm7, %v21704_v44, 0 }
 0x6a1   : > { %16462 = vmatpush3.bf16.msra.mxu1 %v12717_v28  ;;  %16463 = vmatprep.mubr.msk.bf16.mxu1 %vm17809_vm0, %v21633_v59  ;;  %v21705_v28 = vld [vmem:[#allocation27_spill] sm:$0xff] }
 0x6a2   : > { %16521 = vmatprep.subr.bf16.mxu1 %v21633_v59 }
 0x6a8   : > { %16410 = vmatmul.mubr.msk.bf16.vlgmr.msra.gmra.mrb[48].mxu0 %vm4811_vm8, %v14463_v7  ;;  %v13016_v7 = vsel %vm4815_vm7, %v21705_v28, 0 }
 0x6a9   : > { %16468 = vmatpush3.bf16.msra.mxu0 %v12865_v43  ;;  %16469 = vmatprep.mubr.msk.bf16.mxu0 %vm17809_vm0, %v21633_v59  ;;  %v21706_v43 = vld [vmem:[#allocation28_spill] sm:$0xff] }
 0x6aa   : > { %16473 = vmatprep.subr.bf16.mxu0 %v21633_v59 }
 0x6ab   : > { %v9884_v58 = vpop.f32.mrb[40].mxu0 }
 0x6ac   : > { %v9891_v61 = vmul.f32 %v9884_v58, %v20265_v16  ;;  %v16195_v3 = vpop.f32.mrb[41].mxu0  ;;  %16464 = vmatmul.mubr.msk.bf16.vlgmr.msra.gmra.mrb[48].mxu1 %vm4811_vm8, %v14488_v27  ;;  %v13609_v27 = vsel %vm4815_vm7, %v21706_v43, 0  ;;  %v14499_v58 = vld [vmem:[%s21522_s3 + $0xc] sm:$0xf] }
 0x6ad   : > { %16522 = vmatpush3.bf16.msra.mxu1 %v13439_v60  ;;  %v9887_v63 = vpop.f32.mrb[42].mxu0  ;;  %16523 = vmatprep.mubr.msk.bf16.mxu1 %vm17809_vm0, %v21633_v59  ;;  %v13066_v60 = vsel %vm4815_vm7, %v21707_v20, 0  ;;  %v21708_v3 = vld [vmem:[#allocation45_spill] sm:$0xff] }
 0x6ae   : > { %v9892_v1 = vadd.f32 %v9891_v61, %v20273_v35  ;;  %v16196_v38 = vpop.f32.mrb[43].mxu0  ;;  %16527 = vmatprep.subr.bf16.mxu1 %v21633_v59  ;;  %v14524_v61 = vld [vmem:[%s21522_s3 + $0xc] sm:$0xf]  ;;  %v13659_v63 = vsel %vm4815_vm7, %v21708_v3, 0 }
 0x6af   : > { %v10456_v48 = vpop.f32.mrb[40].mxu1 }
 0x6b0   : > { %v9893_v56 = vmax.f32 %v9892_v1, 0.0  ;;  %v10463_v46 = vmul.f32 %v10456_v48, %v20265_v16  ;;  %v16249_v4 = vpop.f32.mrb[41].mxu1  ;;  %16470 = vmatmul.mubr.msk.bf16.vlgmr.msra.gmra.mrb[52].mxu0 %vm4811_vm8, %v14490_v24  ;;  %v14501_v24 = vld [vmem:[%s21522_s3 + $0x10] sm:$0xf]  ;;  %v21709_v1 = vld [vmem:[#allocation46_spill] sm:$0xff] }
 0x6b1   : > { %16474 = vmatpush3.bf16.msra.mxu0 %v12911_v53  ;;  %v10459_v0 = vpop.f32.mrb[42].mxu1  ;;  %16475 = vmatprep.mubr.msk.bf16.mxu0 %vm17809_vm0, %v21633_v59  ;;  %v13116_v38 = vsel %vm4815_vm7, %v21709_v1, 0  ;;  %v14530_v48 = vld [vmem:[%s21522_s3 + $0x10] sm:$0xf]  ;;  %v14503_v4 = vld [vmem:[%s21522_s3 + $0x14] sm:$0xf] }
 0x6b2   : > { %v9895_v34 = vcombine.high %v9893_v56, %v9893_v56  ;;  %v9902_v22 = vrot.slane %v9893_v56, %v20284_v40  ;;  %v10464_v25 = vadd.f32 %v10463_v46, %v20273_v35  ;;  %v16250_v8 = vpop.f32.mrb[43].mxu1  ;;  %16479 = vmatprep.subr.bf16.mxu0 %v21633_v59  ;;  %v21710_v56 = vld [vmem:[#allocation47_spill] sm:$0xff]  ;;  %v13191_v53 = vsel %vm4815_vm7, %v21711_v41, 0 }
 0x6b3   : > { %v13709_v46 = vsel %vm4815_vm7, %v21710_v56, 0  ;;  %v14532_v0 = vld [vmem:[%s21522_s3 + $0x14] sm:$0xf] }
 0x6b4   : > { %v9909_v62 = vrot.slane %v9895_v34, %v20284_v40  ;;  %v9910_v19 = vcombine.high %v9902_v22, %v9902_v22  ;;  %v9918_v33 = vrot.slane %v9902_v22, %v20284_v40  ;;  %v10465_v31 = vmax.f32 %v10464_v25, 0.0  ;;  %16524 = vmatmul.mubr.msk.bf16.vlgmr.msra.gmra.mrb[52].mxu1 %vm4811_vm8, %v14515_v29  ;;  %v21712_v29 = vld [vmem:[#allocation13_spill] sm:$0xff]  ;;  %v14505_v22 = vld [vmem:[%s21522_s3 + $0x18] sm:$0xf] }
 0x6b5   : > { %16528 = vmatpush3.bf16.msra.mxu1 %v13485_v39  ;;  %16529 = vmatprep.mubr.msk.bf16.mxu1 %vm17809_vm0, %v21633_v59  ;;  %v13764_v34 = vsel %vm4815_vm7, %v21712_v29, 0  ;;  %v21713_v25 = vld [vmem:[#allocation48_spill] sm:$0xff]  ;;  %v21714_v39 = vld [vmem:[#allocation49_spill] sm:$0xff] }
 0x6b6   : > { %v9911_v21 = vcombine.high %v9909_v62, %v9909_v62  ;;  %v9925_v2 = vrot.slane %v9909_v62, %v20284_v40  ;;  %v9932_v50 = vrot.slane %v9910_v19, %v20284_v40  ;;  %v9940_v55 = vcombine.high %v9918_v33, %v9918_v33  ;;  %9952 = vst.msk [vmem:[%s20311_s9 + $0x8] sm:$0x1] %vm5363_vm9, %v9918_v33  ;;  %v14511_v19 = vld [vmem:[%s21522_s3 + $0x1c] sm:$0xf]  ;;  %v21715_v33 = vld [vmem:[#allocation50_spill] sm:$0xff] }
 0x6b7   : > { %16533 = vmatprep.subr.bf16.mxu1 %v21633_v59  ;;  %v10467_v9 = vcombine.high %v10465_v31, %v10465_v31  ;;  %v10474_v47 = vrot.slane %v10465_v31, %v20284_v40  ;;  %v13241_v8 = vsel %vm4815_vm7, %v21713_v25, 0  ;;  %v13814_v62 = vsel %vm4815_vm7, %v21714_v39, 0 }
 0x6b8   : > { %v9939_v13 = vrot.slane %v9911_v21, %v20284_v40  ;;  %v9941_v15 = vcombine.high %v9925_v2, %v9925_v2  ;;  %v9942_v23 = vcombine.high %v9932_v50, %v9932_v50  ;;  %9953 = vst.msk [vmem:[%s20311_s9 + $0x18] sm:$0x1] %vm5363_vm9, %v9932_v50  ;;  %9954 = vst.msk [vmem:[%s20311_s9 + $0x28] sm:$0x1] %vm5363_vm9, %v9940_v55  ;;  %v13291_v31 = vsel %vm4815_vm7, %v21715_v33, 0 }
 0x6b9   : > { %9956 = vst.msk [vmem:[%s20311_s9 + $0x48] sm:$0x1] %vm5363_vm9, %v9925_v2  ;;  %v10481_v6 = vrot.slane %v10467_v9, %v20284_v40  ;;  %v10482_v51 = vcombine.high %v10474_v47, %v10474_v47  ;;  %v10490_v32 = vrot.slane %v10474_v47, %v20284_v40  ;;  %v14536_v21 = vld [vmem:[%s21522_s3 + $0x1c] sm:$0xf]  ;;  %v21716_v2 = vld [vmem:[#allocation51_spill] sm:$0xff] }
 0x6ba   : > { %v9943_v42 = vcombine.high %v9939_v13, %v9939_v13  ;;  %9955 = vst.msk [vmem:[%s20311_s9 + $0x38] sm:$0x1] %vm5363_vm9, %v9942_v23  ;;  %9957 = vst.msk [vmem:[%s20311_s9 + $0x58] sm:$0x1] %vm5363_vm9, %v9939_v13  ;;  %v13864_v50 = vsel %vm4815_vm7, %v21716_v2, 0 }
 0x6bb   : > { %9958 = vst.msk [vmem:[%s20311_s9 + $0x68] sm:$0x1] %vm5363_vm9, %v9941_v15  ;;  %v10483_v18 = vcombine.high %v10481_v6, %v10481_v6  ;;  %v10497_v49 = vrot.slane %v10481_v6, %v20284_v40  ;;  %v10504_v14 = vrot.slane %v10482_v51, %v20284_v40  ;;  %v10512_v11 = vcombine.high %v10490_v32, %v10490_v32  ;;  %v14513_v55 = vld [vmem:[%s21522_s3 + $0x20] sm:$0xf] }
 0x6bc   : > { %10524 = vst.msk [vmem:[%s20311_s9 + $0x9] sm:$0x1] %vm5363_vm9, %v10490_v32  ;;  %9959 = vst.msk [vmem:[%s20311_s9 + $0x78] sm:$0x1] %vm5363_vm9, %v9943_v42  ;;  %16476 = vmatmul.mubr.msk.bf16.vlgmr.msra.gmra.mrb[52].mxu0 %vm4811_vm8, %v12833_v37  ;;  %v14538_v9 = vld [vmem:[%s21522_s3 + $0x20] sm:$0xf] }
 0x6bd   : > { %v10511_v17 = vrot.slane %v10483_v18, %v20284_v40  ;;  %v10513_v10 = vcombine.high %v10497_v49, %v10497_v49  ;;  %v10514_v5 = vcombine.high %v10504_v14, %v10504_v14  ;;  %10525 = vst.msk [vmem:[%s20311_s9 + $0x19] sm:$0x1] %vm5363_vm9, %v10504_v14  ;;  %10526 = vst.msk [vmem:[%s20311_s9 + $0x29] sm:$0x1] %vm5363_vm9, %v10512_v11  ;;  %16480 = vmatpush3.bf16.msra.mxu0 %v12960_v26 }
 0x6be   : > { %10528 = vst.msk [vmem:[%s20311_s9 + $0x49] sm:$0x1] %vm5363_vm9, %v10497_v49  ;;  %16481 = vmatprep.mubr.msk.bf16.mxu0 %vm17809_vm0, %v21633_v59  ;;  %16485 = vmatprep.subr.bf16.mxu0 %v21633_v59 }
 0x6bf   : > { %v10515_v52 = vcombine.high %v10511_v17, %v10511_v17  ;;  %10527 = vst.msk [vmem:[%s20311_s9 + $0x39] sm:$0x1] %vm5363_vm9, %v10514_v5  ;;  %10529 = vst.msk [vmem:[%s20311_s9 + $0x59] sm:$0x1] %vm5363_vm9, %v10511_v17 }
 0x6c0   : > { %10530 = vst.msk [vmem:[%s20311_s9 + $0x69] sm:$0x1] %vm5363_vm9, %v10513_v10  ;;  %16530 = vmatmul.mubr.msk.bf16.vlgmr.msra.gmra.mrb[52].mxu1 %vm4811_vm8, %v13407_v54 }
 0x6c1   : > { %10531 = vst.msk [vmem:[%s20311_s9 + $0x79] sm:$0x1] %vm5363_vm9, %v10515_v52  ;;  %16534 = vmatpush3.bf16.msra.mxu1 %v13534_v12  ;;  %16535 = vmatprep.mubr.msk.bf16.mxu1 %vm17809_vm0, %v21633_v59 }
 0x6c2   : > { %16539 = vmatprep.subr.bf16.mxu1 %v21633_v59 }
 0x6c8   : > { %16482 = vmatmul.mubr.msk.bf16.vlgmr.msra.gmra.mrb[52].mxu0 %vm4811_vm8, %v14497_v57 }
 0x6c9   : > { %16486 = vmatpush3.bf16.msra.mxu0 %v13016_v7  ;;  %16487 = vmatprep.mubr.msk.bf16.mxu0 %vm17809_vm0, %v21633_v59 }
 0x6ca   : > { %16491 = vmatprep.subr.bf16.mxu0 %v21633_v59 }
 0x6cc   : > { %16536 = vmatmul.mubr.msk.bf16.vlgmr.msra.gmra.mrb[52].mxu1 %vm4811_vm8, %v14522_v30 }
 0x6cd   : > { %16540 = vmatpush3.bf16.msra.mxu1 %v13609_v27  ;;  %16541 = vmatprep.mubr.msk.bf16.mxu1 %vm17809_vm0, %v21633_v59 }
 0x6ce   : > { %16545 = vmatprep.subr.bf16.mxu1 %v21633_v59 }
 0x6d4   : > { %16488 = vmatmul.mubr.msk.bf16.vlgmr.msra.gmra.mrb[52].mxu0 %vm4811_vm8, %v14499_v58 }
 0x6d5   : > { %16492 = vmatpush3.bf16.msra.mxu0 %v13066_v60  ;;  %16493 = vmatprep.mubr.msk.bf16.mxu0 %vm17809_vm0, %v21633_v59 }
 0x6d6   : > { %16497 = vmatprep.subr.bf16.mxu0 %v21633_v59 }
 0x6d8   : > { %16542 = vmatmul.mubr.msk.bf16.vlgmr.msra.gmra.mrb[52].mxu1 %vm4811_vm8, %v14524_v61 }
 0x6d9   : > { %16546 = vmatpush3.bf16.msra.mxu1 %v13659_v63  ;;  %16547 = vmatprep.mubr.msk.bf16.mxu1 %vm17809_vm0, %v21633_v59 }
 0x6da   : > { %16551 = vmatprep.subr.bf16.mxu1 %v21633_v59 }
 0x6e0   : > { %16494 = vmatmul.mubr.msk.bf16.vlgmr.msra.gmra.mrb[52].mxu0 %vm4811_vm8, %v14501_v24 }
 0x6e1   : > { %16498 = vmatpush3.bf16.msra.mxu0 %v13116_v38  ;;  %16499 = vmatprep.mubr.msk.bf16.mxu0 %vm17809_vm0, %v21633_v59 }
 0x6e2   : > { %16503 = vmatprep.subr.bf16.mxu0 %v21633_v59 }
 0x6e4   : > { %16548 = vmatmul.mubr.msk.bf16.vlgmr.msra.gmra.mrb[52].mxu1 %vm4811_vm8, %v14530_v48 }
 0x6e5   : > { %16552 = vmatpush3.bf16.msra.mxu1 %v13709_v46  ;;  %16553 = vmatprep.mubr.msk.bf16.mxu1 %vm17809_vm0, %v21633_v59 }
 0x6e6   : > { %16557 = vmatprep.subr.bf16.mxu1 %v21633_v59 }
 0x6ec   : > { %16500 = vmatmul.mubr.msk.bf16.vlgmr.msra.gmra.mrb[52].mxu0 %vm4811_vm8, %v14503_v4 }
 0x6ed   : > { %16504 = vmatpush3.bf16.msra.mxu0 %v13191_v53  ;;  %16505 = vmatprep.mubr.msk.bf16.mxu0 %vm17809_vm0, %v21633_v59 }
 0x6ee   : > { %16509 = vmatprep.subr.bf16.mxu0 %v21633_v59 }
 0x6f0   : > { %16554 = vmatmul.mubr.msk.bf16.vlgmr.msra.gmra.mrb[52].mxu1 %vm4811_vm8, %v14532_v0 }
 0x6f1   : > { %16558 = vmatpush3.bf16.msra.mxu1 %v13764_v34  ;;  %16559 = vmatprep.mubr.msk.bf16.mxu1 %vm17809_vm0, %v21633_v59 }
 0x6f2   : > { %16563 = vmatprep.subr.bf16.mxu1 %v21633_v59 }
 0x6f8   : > { %16506 = vmatmul.mubr.msk.bf16.vlgmr.msra.gmra.mrb[52].mxu0 %vm4811_vm8, %v14505_v22 }
 0x6f9   : > { %16510 = vmatpush3.bf16.msra.mxu0 %v13241_v8  ;;  %16511 = vmatprep.mubr.msk.bf16.mxu0 %vm17809_vm0, %v21633_v59 }
 0x6fa   : > { %16515 = vmatprep.subr.bf16.mxu0 %v21633_v59 }
 0x6fc   : > { %16560 = vmatmul.mubr.msk.bf16.vlgmr.msra.gmra.mrb[52].mxu1 %vm4811_vm8, %v14534_v45 }
 0x6fd   : > { %16564 = vmatpush3.bf16.msra.mxu1 %v13814_v62  ;;  %16565 = vmatprep.mubr.msk.bf16.mxu1 %vm17809_vm0, %v21633_v59 }
 0x6fe   : > { %16569 = vmatprep.subr.bf16.mxu1 %v21633_v59 }
 0x704   : > { %16512 = vmatmul.mubr.msk.bf16.vlgmr.msra.gmra.mrb[52].mxu0 %vm4811_vm8, %v14511_v19 }
 0x705   : > { %16516 = vmatpush3.bf16.msra.mxu0 %v13291_v31  ;;  %16517 = vmatprep.mubr.msk.bf16.mxu0 %vm17809_vm0, %v21633_v59 }
 0x708   : > { %16566 = vmatmul.mubr.msk.bf16.vlgmr.msra.gmra.mrb[52].mxu1 %vm4811_vm8, %v14536_v21 }
 0x709   : > { %16570 = vmatpush3.bf16.msra.mxu1 %v13864_v50  ;;  %16571 = vmatprep.mubr.msk.bf16.mxu1 %vm17809_vm0, %v21633_v59 }
 0x710   : > { %16518 = vmatmul.mubr.msk.bf16.vlgmr.msra.gmra.mrb[52].mxu0 %vm4811_vm8, %v14513_v55 }
 0x713   : > { %v11029_v47 = vpop.f32.mrb[44].mxu0 }
 0x714   : > { %v11036_v13 = vmul.f32 %v11029_v47, %v20265_v16  ;;  %v16303_v15 = vpop.f32.mrb[45].mxu0  ;;  %16572 = vmatmul.mubr.msk.bf16.vlgmr.msra.gmra.mrb[52].mxu1 %vm4811_vm8, %v14538_v9 }
 0x715   : > { %v11032_v23 = vpop.f32.mrb[46].mxu0 }
 0x716   : > { %v11037_v6 = vadd.f32 %v11036_v13, %v20273_v35  ;;  %v16304_v59 = vpop.f32.mrb[47].mxu0 }
 0x717   : > { %v11603_v51 = vpop.f32.mrb[44].mxu1 }
 0x718   : > { %v11038_v32 = vmax.f32 %v11037_v6, 0.0  ;;  %v11610_v37 = vmul.f32 %v11603_v51, %v20265_v16  ;;  %v16357_v42 = vpop.f32.mrb[45].mxu1 }
 0x719   : > { %v11606_v18 = vpop.f32.mrb[46].mxu1 }
 0x71a   : > { %v11040_v49 = vcombine.high %v11038_v32, %v11038_v32  ;;  %v11047_v14 = vrot.slane %v11038_v32, %v20284_v40  ;;  %v11611_v11 = vadd.f32 %v11610_v37, %v20273_v35  ;;  %v16358_v36 = vpop.f32.mrb[47].mxu1 }
 0x71c   : > { %v11054_v26 = vrot.slane %v11040_v49, %v20284_v40  ;;  %v11055_v17 = vcombine.high %v11047_v14, %v11047_v14  ;;  %v11063_v10 = vrot.slane %v11047_v14, %v20284_v40  ;;  %v11612_v5 = vmax.f32 %v11611_v11, 0.0 }
 0x71e   : > { %v11056_v54 = vcombine.high %v11054_v26, %v11054_v26  ;;  %v11070_v52 = vrot.slane %v11054_v26, %v20284_v40  ;;  %v11077_v44 = vrot.slane %v11055_v17, %v20284_v40  ;;  %v11085_v12 = vcombine.high %v11063_v10, %v11063_v10  ;;  %11097 = vst.msk [vmem:[%s20311_s9 + $0xa] sm:$0x1] %vm5363_vm9, %v11063_v10 }
 0x71f   : > { %v11614_v57 = vcombine.high %v11612_v5, %v11612_v5  ;;  %v11621_v28 = vrot.slane %v11612_v5, %v20284_v40 }
 0x720   : > { %v11084_v7 = vrot.slane %v11056_v54, %v20284_v40  ;;  %v11086_v30 = vcombine.high %v11070_v52, %v11070_v52  ;;  %v11087_v43 = vcombine.high %v11077_v44, %v11077_v44  ;;  %11098 = vst.msk [vmem:[%s20311_s9 + $0x1a] sm:$0x1] %vm5363_vm9, %v11077_v44  ;;  %11099 = vst.msk [vmem:[%s20311_s9 + $0x2a] sm:$0x1] %vm5363_vm9, %v11085_v12 }
 0x721   : > { %11101 = vst.msk [vmem:[%s20311_s9 + $0x4a] sm:$0x1] %vm5363_vm9, %v11070_v52  ;;  %v11628_v27 = vrot.slane %v11614_v57, %v20284_v40  ;;  %v11629_v58 = vcombine.high %v11621_v28, %v11621_v28  ;;  %v11637_v20 = vrot.slane %v11621_v28, %v20284_v40 }
 0x722   : > { %v11088_v60 = vcombine.high %v11084_v7, %v11084_v7  ;;  %11100 = vst.msk [vmem:[%s20311_s9 + $0x3a] sm:$0x1] %vm5363_vm9, %v11087_v43  ;;  %11102 = vst.msk [vmem:[%s20311_s9 + $0x5a] sm:$0x1] %vm5363_vm9, %v11084_v7 }
 0x723   : > { %11103 = vst.msk [vmem:[%s20311_s9 + $0x6a] sm:$0x1] %vm5363_vm9, %v11086_v30  ;;  %v11630_v61 = vcombine.high %v11628_v27, %v11628_v27  ;;  %v11644_v3 = vrot.slane %v11628_v27, %v20284_v40  ;;  %v11651_v63 = vrot.slane %v11629_v58, %v20284_v40  ;;  %v11659_v24 = vcombine.high %v11637_v20, %v11637_v20 }
 0x724   : > { %11671 = vst.msk [vmem:[%s20311_s9 + $0xb] sm:$0x1] %vm5363_vm9, %v11637_v20  ;;  %11104 = vst.msk [vmem:[%s20311_s9 + $0x7a] sm:$0x1] %vm5363_vm9, %v11088_v60 }
 0x725   : > { %v11658_v1 = vrot.slane %v11630_v61, %v20284_v40  ;;  %v11660_v38 = vcombine.high %v11644_v3, %v11644_v3  ;;  %v11661_v48 = vcombine.high %v11651_v63, %v11651_v63  ;;  %11672 = vst.msk [vmem:[%s20311_s9 + $0x1b] sm:$0x1] %vm5363_vm9, %v11651_v63  ;;  %11673 = vst.msk [vmem:[%s20311_s9 + $0x2b] sm:$0x1] %vm5363_vm9, %v11659_v24 }
 0x726   : > { %11675 = vst.msk [vmem:[%s20311_s9 + $0x4b] sm:$0x1] %vm5363_vm9, %v11644_v3 }
 0x727   : > { %v11662_v56 = vcombine.high %v11658_v1, %v11658_v1  ;;  %11674 = vst.msk [vmem:[%s20311_s9 + $0x3b] sm:$0x1] %vm5363_vm9, %v11661_v48  ;;  %11676 = vst.msk [vmem:[%s20311_s9 + $0x5b] sm:$0x1] %vm5363_vm9, %v11658_v1 }
 0x728   : > { %11677 = vst.msk [vmem:[%s20311_s9 + $0x6b] sm:$0x1] %vm5363_vm9, %v11660_v38 }
 0x729   : > { %11678 = vst.msk [vmem:[%s20311_s9 + $0x7b] sm:$0x1] %vm5363_vm9, %v11662_v56 }
 0x77b   : > { %v12178_v46 = vpop.f32.mrb[48].mxu0 }
 0x77c   : > { %v12185_v4 = vmul.f32 %v12178_v46, %v20265_v16  ;;  %v16411_v41 = vpop.f32.mrb[49].mxu0 }
 0x77d   : > { %v12181_v53 = vpop.f32.mrb[50].mxu0 }
 0x77e   : > { %v12186_v0 = vadd.f32 %v12185_v4, %v20273_v35  ;;  %v16412_v29 = vpop.f32.mrb[51].mxu0 }
 0x77f   : > { %v12753_v34 = vpop.f32.mrb[48].mxu1 }
 0x780   : > { %v12187_v22 = vmax.f32 %v12186_v0, 0.0  ;;  %v12760_v25 = vmul.f32 %v12753_v34, %v20265_v16  ;;  %v16465_v8 = vpop.f32.mrb[49].mxu1 }
 0x781   : > { %v12756_v45 = vpop.f32.mrb[50].mxu1 }
 0x782   : > { %v12189_v39 = vcombine.high %v12187_v22, %v12187_v22  ;;  %v12196_v62 = vrot.slane %v12187_v22, %v20284_v40  ;;  %v12761_v19 = vadd.f32 %v12760_v25, %v20273_v35  ;;  %v16466_v33 = vpop.f32.mrb[51].mxu1 }
 0x784   : > { %v12203_v31 = vrot.slane %v12189_v39, %v20284_v40  ;;  %v12204_v21 = vcombine.high %v12196_v62, %v12196_v62  ;;  %v12212_v2 = vrot.slane %v12196_v62, %v20284_v40  ;;  %v12762_v50 = vmax.f32 %v12761_v19, 0.0 }
 0x786   : > { %v12205_v55 = vcombine.high %v12203_v31, %v12203_v31  ;;  %v12219_v9 = vrot.slane %v12203_v31, %v20284_v40  ;;  %v12226_v47 = vrot.slane %v12204_v21, %v20284_v40  ;;  %v12234_v13 = vcombine.high %v12212_v2, %v12212_v2  ;;  %12246 = vst.msk [vmem:[%s20311_s9 + $0xc] sm:$0x1] %vm5363_vm9, %v12212_v2 }
 0x787   : > { %v12764_v15 = vcombine.high %v12762_v50, %v12762_v50  ;;  %v12771_v23 = vrot.slane %v12762_v50, %v20284_v40 }
 0x788   : > { %v12233_v6 = vrot.slane %v12205_v55, %v20284_v40  ;;  %v12235_v59 = vcombine.high %v12219_v9, %v12219_v9  ;;  %v12236_v51 = vcombine.high %v12226_v47, %v12226_v47  ;;  %12247 = vst.msk [vmem:[%s20311_s9 + $0x1c] sm:$0x1] %vm5363_vm9, %v12226_v47  ;;  %12248 = vst.msk [vmem:[%s20311_s9 + $0x2c] sm:$0x1] %vm5363_vm9, %v12234_v13 }
 0x789   : > { %12250 = vst.msk [vmem:[%s20311_s9 + $0x4c] sm:$0x1] %vm5363_vm9, %v12219_v9  ;;  %v12778_v32 = vrot.slane %v12764_v15, %v20284_v40  ;;  %v12779_v37 = vcombine.high %v12771_v23, %v12771_v23  ;;  %v12787_v42 = vrot.slane %v12771_v23, %v20284_v40 }
 0x78a   : > { %v12237_v18 = vcombine.high %v12233_v6, %v12233_v6  ;;  %12249 = vst.msk [vmem:[%s20311_s9 + $0x3c] sm:$0x1] %vm5363_vm9, %v12236_v51  ;;  %12251 = vst.msk [vmem:[%s20311_s9 + $0x5c] sm:$0x1] %vm5363_vm9, %v12233_v6 }
 0x78b   : > { %12252 = vst.msk [vmem:[%s20311_s9 + $0x6c] sm:$0x1] %vm5363_vm9, %v12235_v59  ;;  %v12780_v49 = vcombine.high %v12778_v32, %v12778_v32  ;;  %v12794_v14 = vrot.slane %v12778_v32, %v20284_v40  ;;  %v12801_v11 = vrot.slane %v12779_v37, %v20284_v40  ;;  %v12809_v36 = vcombine.high %v12787_v42, %v12787_v42 }
 0x78c   : > { %12821 = vst.msk [vmem:[%s20311_s9 + $0xd] sm:$0x1] %vm5363_vm9, %v12787_v42  ;;  %12253 = vst.msk [vmem:[%s20311_s9 + $0x7c] sm:$0x1] %vm5363_vm9, %v12237_v18 }
 0x78d   : > { %v12808_v26 = vrot.slane %v12780_v49, %v20284_v40  ;;  %v12810_v17 = vcombine.high %v12794_v14, %v12794_v14  ;;  %v12811_v10 = vcombine.high %v12801_v11, %v12801_v11  ;;  %12822 = vst.msk [vmem:[%s20311_s9 + $0x1d] sm:$0x1] %vm5363_vm9, %v12801_v11  ;;  %12823 = vst.msk [vmem:[%s20311_s9 + $0x2d] sm:$0x1] %vm5363_vm9, %v12809_v36 }
 0x78e   : > { %12825 = vst.msk [vmem:[%s20311_s9 + $0x4d] sm:$0x1] %vm5363_vm9, %v12794_v14 }
 0x78f   : > { %v12812_v5 = vcombine.high %v12808_v26, %v12808_v26  ;;  %12824 = vst.msk [vmem:[%s20311_s9 + $0x3d] sm:$0x1] %vm5363_vm9, %v12811_v10  ;;  %12826 = vst.msk [vmem:[%s20311_s9 + $0x5d] sm:$0x1] %vm5363_vm9, %v12808_v26 }
 0x790   : > { %12827 = vst.msk [vmem:[%s20311_s9 + $0x6d] sm:$0x1] %vm5363_vm9, %v12810_v17 }
 0x791   : > { %12828 = vst.msk [vmem:[%s20311_s9 + $0x7d] sm:$0x1] %vm5363_vm9, %v12812_v5 }
 0x7e3   : > { %v13327_v54 = vpop.f32.mrb[52].mxu0 }
 0x7e4   : > { %v13334_v52 = vmul.f32 %v13327_v54, %v20265_v16  ;;  %v16519_v44 = vpop.f32.mrb[53].mxu0 }
 0x7e5   : > { %v13330_v12 = vpop.f32.mrb[54].mxu0 }
 0x7e6   : > { %v13335_v57 = vadd.f32 %v13334_v52, %v20273_v35  ;;  %v16520_v28 = vpop.f32.mrb[55].mxu0 }
 0x7e7   : > { %v13900_v7 = vpop.f32.mrb[52].mxu1 }
 0x7e8   : > { %v13336_v30 = vmax.f32 %v13335_v57, 0.0  ;;  %v13907_v43 = vmul.f32 %v13900_v7, %v20265_v16  ;;  %v16573_v27 = vpop.f32.mrb[53].mxu1 }
 0x7e9   : > { %v13903_v58 = vpop.f32.mrb[54].mxu1 }
 0x7ea   : > { %v13338_v20 = vcombine.high %v13336_v30, %v13336_v30  ;;  %v13345_v60 = vrot.slane %v13336_v30, %v20284_v40  ;;  %v13908_v61 = vadd.f32 %v13907_v43, %v20273_v35  ;;  %v16574_v3 = vpop.f32.mrb[55].mxu1 }
 0x7ec   : > { %v13352_v63 = vrot.slane %v13338_v20, %v20284_v40  ;;  %v13353_v24 = vcombine.high %v13345_v60, %v13345_v60  ;;  %v13361_v1 = vrot.slane %v13345_v60, %v20284_v40  ;;  %v13909_v38 = vmax.f32 %v13908_v61, 0.0 }
 0x7ee   : > { %v13354_v48 = vcombine.high %v13352_v63, %v13352_v63  ;;  %v13368_v16 = vrot.slane %v13352_v63, %v20284_v40  ;;  %v13375_v56 = vrot.slane %v13353_v24, %v20284_v40  ;;  %v13383_v46 = vcombine.high %v13361_v1, %v13361_v1  ;;  %13395 = vst.msk [vmem:[%s20311_s9 + $0xe] sm:$0x1] %vm5363_vm9, %v13361_v1 }
 0x7ef   : > { %v13911_v35 = vcombine.high %v13909_v38, %v13909_v38  ;;  %v13918_v4 = vrot.slane %v13909_v38, %v20284_v40 }
 0x7f0   : > { %v13382_v41 = vrot.slane %v13354_v48, %v20284_v40  ;;  %v13384_v53 = vcombine.high %v13368_v16, %v13368_v16  ;;  %v13385_v0 = vcombine.high %v13375_v56, %v13375_v56  ;;  %13396 = vst.msk [vmem:[%s20311_s9 + $0x1e] sm:$0x1] %vm5363_vm9, %v13375_v56  ;;  %13397 = vst.msk [vmem:[%s20311_s9 + $0x2e] sm:$0x1] %vm5363_vm9, %v13383_v46 }
 0x7f1   : > { %13399 = vst.msk [vmem:[%s20311_s9 + $0x4e] sm:$0x1] %vm5363_vm9, %v13368_v16  ;;  %v13925_v29 = vrot.slane %v13911_v35, %v20284_v40  ;;  %v13926_v34 = vcombine.high %v13918_v4, %v13918_v4  ;;  %v13934_v22 = vrot.slane %v13918_v4, %v20284_v40 }
 0x7f2   : > { %v13386_v25 = vcombine.high %v13382_v41, %v13382_v41  ;;  %13398 = vst.msk [vmem:[%s20311_s9 + $0x3e] sm:$0x1] %vm5363_vm9, %v13385_v0  ;;  %13400 = vst.msk [vmem:[%s20311_s9 + $0x5e] sm:$0x1] %vm5363_vm9, %v13382_v41 }
 0x7f3   : > { %13401 = vst.msk [vmem:[%s20311_s9 + $0x6e] sm:$0x1] %vm5363_vm9, %v13384_v53  ;;  %v13927_v8 = vcombine.high %v13925_v29, %v13925_v29  ;;  %v13941_v45 = vrot.slane %v13925_v29, %v20284_v40  ;;  %v13948_v39 = vrot.slane %v13926_v34, %v20284_v40  ;;  %v13956_v62 = vcombine.high %v13934_v22, %v13934_v22 }
 0x7f4   : > { %13968 = vst.msk [vmem:[%s20311_s9 + $0xf] sm:$0x1] %vm5363_vm9, %v13934_v22  ;;  %13402 = vst.msk [vmem:[%s20311_s9 + $0x7e] sm:$0x1] %vm5363_vm9, %v13386_v25 }
 0x7f5   : > { %v13955_v19 = vrot.slane %v13927_v8, %v20284_v40  ;;  %v13957_v33 = vcombine.high %v13941_v45, %v13941_v45  ;;  %v13958_v31 = vcombine.high %v13948_v39, %v13948_v39  ;;  %13969 = vst.msk [vmem:[%s20311_s9 + $0x1f] sm:$0x1] %vm5363_vm9, %v13948_v39  ;;  %13970 = vst.msk [vmem:[%s20311_s9 + $0x2f] sm:$0x1] %vm5363_vm9, %v13956_v62 }
 0x7f6   : > { %13972 = vst.msk [vmem:[%s20311_s9 + $0x4f] sm:$0x1] %vm5363_vm9, %v13941_v45 }
 0x7f7   : > { %v13959_v21 = vcombine.high %v13955_v19, %v13955_v19  ;;  %13971 = vst.msk [vmem:[%s20311_s9 + $0x3f] sm:$0x1] %vm5363_vm9, %v13958_v31  ;;  %13973 = vst.msk [vmem:[%s20311_s9 + $0x5f] sm:$0x1] %vm5363_vm9, %v13955_v19 }
 0x7f8   : > { %13974 = vst.msk [vmem:[%s20311_s9 + $0x6f] sm:$0x1] %vm5363_vm9, %v13957_v33 }
 0x7f9   : > { %13975 = vst.msk [vmem:[%s20311_s9 + $0x7f] sm:$0x1] %vm5363_vm9, %v13959_v21 }
 0x7fa   : > { %s14541_s19 = sshll.u32 %s17787_s24, 1  ;;  %s14542_s20 = sshll.u32 %s17791_s25, 5 }
 0x7fb   : > { %s13989_s29 = sadd.s32 %s14542_s20, %s14541_s19  ;;  %s14008_s30 = sshll.u32 %s20311_s9, 4  ;;  %s14009_s30 = int_to_ptr.vmem [resolvable:$true] %s14008_s30 }
 0x7fc   : > { %s14543_s8 = sshll.u32 %s13989_s29, 7  ;;  %s17815_s15 = smov 256  }
 0x7fd   : > { %s13991_s18 = scalar_lea.hbm %s21525_s6, %s14543_s8  ;;  %p21717_p8 = scmp.ne.s32.totalorder %s21565_s11, 0 }
 0x7fe   : > { %s17816_s14 = smov 512   ;;  %s17817_s0 = smov 2  }
 0x7ff   : > { %17475 = sst [smem:[#allocation8]] (%p21717_p8), %s17815_s15  ;;  %s17818_s24 = smov 128  }
 0x800   : > { %17476 = sst [smem:[#allocation8 + $0x1]] (%p21717_p8), %s17816_s14  ;;  %s17819_s25 = smov 8  }
 0x801   : > { %17477 = sst [smem:[#allocation8 + $0x2]] (%p21717_p8), %s17817_s0  ;;  %s17820_s9 = smov [#allocation7]  }
 0x802   : > { %17478 = sst [smem:[#allocation8 + $0x3]] (%p21717_p8), %s17818_s24  ;;  %s17821_s19 = smov 0  }
 0x803   : > { %17479 = sst [smem:[#allocation8 + $0x4]] (%p21717_p8), %s17818_s24 }
 0x804   : > { %17480 = sst [smem:[#allocation8 + $0x5]] (%p21717_p8), %s17819_s25 }
 0x805   : > { %17481 = dma.general (%p21717_p8), %s14009_s30, 2048, %s13991_s18, %s13977_s16, %s17820_s9, [#allocation8], %s17821_s19, 0  }
 0x806 PF: > { %p17493_p10 = scmp.ge.s32.totalorder %s17803_s28, 2  ;;  %s14036_s20 = sand.u32 1, %s17775_s21  }
 0x807   : > { %p21718_p12 = scmp.ne.s32.totalorder %s21567_s12, 0  ;;  %s14037_s0 = scalar_lea.sflag [#allocation5], %s14036_s20 }
 0x809   : > { %p17488_p0 = pnand %p17493_p10, %p21718_p12 }
 0x80b   : > { %17770 = dma.done.wait (!%p17488_p0), %s14037_s0, 2048  }
 0x80c   : > { %17772 = vsyncadd (!%p17488_p0), %s14037_s0, 4294965248  ;;  %s20_s28 = sadd.s32 1, %s17803_s28   ;;  %s21719_s11 = sld [smem:[#allocation11_spill]] }
 0x80d   : > { %p17_p2 = scmp.ge.s32.totalorder %s20_s28, 6   ;;  %s21720_s21 = smov %s17779_s22 }
 0x80e   : > { %s21721_s22 = smov %s17783_s23  ;;  %s21722_s23 = smov %s17936_s17 }
 0x80f   : > { %s21723_s24 = smov %s17795_s26  ;;  %s21724_s25 = smov %s17799_s27 }
 0x810   : > { %s21725_s26 = smov %s21728_s7  ;;  %19 = sbr.rel (!%p17_p2) target bundleno = 8 (0x8), region = 104 }
 0x812   : > { %s21726_s27 = smov %s21719_s11 }
 0x817   :  { %14042 = vsyncpa [#allocation4], 1 }
 0x818   :  { %14044 = vsyncpa [#allocation4 + $0x1], 1 }
 0x819   :  { %14045 = vsyncpa [#allocation5], 1 }
 0x81a   :  { %14047 = vsyncpa [#allocation5 + $0x1], 1 }

</bundles_post_ra>
